<compile_context>
chip_gen: v5e
topology: v5e:2x2
jax: 0.10.0
libtpu: 0.0.40
codegen_flags: <defaults>
</compile_context>

<pallas_src>
import functools
import math

import jax
import jax.numpy as jnp
from jax.experimental import pallas as pl
from jax.experimental.pallas import tpu as pltpu

LN_EPS = 1e-5


def _layer_norm(x, gamma, beta, eps=LN_EPS):
    mu = jnp.mean(x, axis=-1, keepdims=True)
    var = jnp.mean(jnp.square(x - mu), axis=-1, keepdims=True)
    return (x - mu) * jax.lax.rsqrt(var + eps) * gamma + beta


def _gelu_exact(x):
    # matches torch.nn.GELU() (erf-based, non-approximate)
    return 0.5 * x * (1.0 + jax.lax.erf(x * (1.0 / math.sqrt(2.0))))


# ----------------------------------------------------------------------------
# Fused GraphTransformerLayer kernel.  One grid step = one (batch, query-row
# tile):  pre-LN -> multi-head graph attention (node + edge) -> residuals
# -> fused node FFN -> fused edge FFN -> store.
# ----------------------------------------------------------------------------
def graph_transformer_layer_kernel(
        xq_ref, xkv_ref, e_ref,
        lnx_g_ref, lnx_b_ref, lne_g_ref, lne_b_ref,
        wq_ref, bq_ref, wk_ref, bk_ref, wv_ref, bv_ref, wo_ref, bo_ref,
        we_ref, bwe_ref, woe_ref, boe_ref,
        fx_g_ref, fx_b_ref, fx_w1_ref, fx_b1_ref, fx_w2_ref, fx_b2_ref,
        fe_g_ref, fe_b_ref, fe_w1_ref, fe_b1_ref, fe_w2_ref, fe_b2_ref,
        outx_ref, oute_ref, *, n_heads):
    f32 = jnp.float32
    bf16 = jnp.bfloat16

    xq = xq_ref[0].astype(f32)             # [TQ, D]    query-row tile
    xall = xkv_ref[0].astype(f32)          # [N, D]     all nodes (keys / values)
    ef = e_ref[0].astype(f32)              # [TQ*N, De] edge rows of this tile
    TQ, D = xq.shape
    N = xall.shape[0]
    De = ef.shape[-1]
    H = n_heads
    dk = D // H
    scale = 1.0 / math.sqrt(dk)

    # ---------------- attention: pre-LayerNorm ----------------
    xn_q = _layer_norm(xq, lnx_g_ref[...], lnx_b_ref[...])       # [TQ, D]
    xn_kv = _layer_norm(xall, lnx_g_ref[...], lnx_b_ref[...])    # [N, D]
    en = _layer_norm(ef, lne_g_ref[...], lne_b_ref[...])         # [TQ*N, De]

    # Q / K / V projections (separate matmuls -> no misaligned lane slices).
    q = jnp.dot(xn_q.astype(bf16), wq_ref[...],
                preferred_element_type=f32) + bq_ref[...]         # [TQ, D]
    k = jnp.dot(xn_kv.astype(bf16), wk_ref[...],
                preferred_element_type=f32) + bk_ref[...]         # [N, D]
    v = jnp.dot(xn_kv.astype(bf16), wv_ref[...],
                preferred_element_type=f32) + bv_ref[...]         # [N, D]

    # Head-major [H, rows, dk] via a single reshape+transpose (f32, then cast).
    qh = q.reshape(TQ, H, dk).transpose(1, 0, 2).astype(bf16)     # [H, TQ, dk]
    kh = k.reshape(N, H, dk).transpose(1, 0, 2).astype(bf16)      # [H, N, dk]
    vh = v.reshape(N, H, dk).transpose(1, 0, 2).astype(bf16)      # [H, N, dk]

    # All-head Q.K scores — head-major, and they STAY head-major.
    s = jnp.einsum('hqd,hkd->hqk', qh, kh,
                   preferred_element_type=f32) * scale            # [H, TQ, N]

    # Edge bias for all heads: one MXU matmul [TQ*N, De] @ [De, H], then one
    # narrow transpose into head-major (the only relayout of bias-sized data).
    ebias = jnp.dot(en.astype(bf16), we_ref[...],
                    preferred_element_type=f32) + bwe_ref[...]    # [TQ*N, H]
    s = s + ebias.T.reshape(H, TQ, N)                             # pre-softmax scores

    # Edge attention output: contract the leading head axis against W_oe [H, De]
    # (trans_a-style dot_general — no [M, H] score copy).  f32 operands keep the
    # full logit precision; K=H is tiny so the MXU cost is negligible.
    e_attn = jax.lax.dot_general(
        s.reshape(H, TQ * N), woe_ref[...],
        dimension_numbers=(((0,), (0,)), ((), ())),
        preferred_element_type=f32) + boe_ref[...]                # [TQ*N, De]
    e_res = e_attn + ef                                           # edge residual

    # Node attention: softmax over neighbours + PV, all heads batched.
    m = jnp.max(s, axis=-1, keepdims=True)
    p = jnp.exp(s - m)
    p = p * pl.reciprocal(jnp.sum(p, axis=-1, keepdims=True), approx=True)
    o = jnp.einsum('hqk,hkd->hqd', p.astype(bf16), vh,
                   preferred_element_type=f32)                    # [H, TQ, dk]

    # Output projection: one K=D matmul over concatenated heads.
    oc = o.transpose(1, 0, 2).reshape(TQ, D)                      # [TQ, D]
    x_attn = jnp.dot(oc.astype(bf16), wo_ref[...],
                     preferred_element_type=f32) + bo_ref[...]
    x_res = x_attn + xq                                           # node residual

    # ---------------- fused node FeedForward ----------------
    xf = _layer_norm(x_res, fx_g_ref[...], fx_b_ref[...])
    hx = jnp.dot(xf.astype(bf16), fx_w1_ref[...],
                 preferred_element_type=f32) + fx_b1_ref[...]
    hx = _gelu_exact(hx)
    yx = jnp.dot(hx.astype(bf16), fx_w2_ref[...],
                 preferred_element_type=f32) + fx_b2_ref[...]
    outx_ref[0] = (yx + x_res).astype(outx_ref.dtype)

    # ---------------- fused edge FeedForward ----------------
    ee = _layer_norm(e_res, fe_g_ref[...], fe_b_ref[...])
    he = jnp.dot(ee.astype(bf16), fe_w1_ref[...],
                 preferred_element_type=f32) + fe_b1_ref[...]
    he = _gelu_exact(he)
    ye = jnp.dot(he.astype(bf16), fe_w2_ref[...],
                 preferred_element_type=f32) + fe_b2_ref[...]
    oute_ref[0] = (ye + e_res).astype(oute_ref.dtype)


def _choose_row_tile(N, De, d_e_ff, vmem_limit_bytes):
    """Largest query-row tile TQ (divisor of N, respecting the (8,128) sublane
    tiling of the (TQ, D) / (TQ*N, De) blocks) whose f32 edge-path working set
    stays inside a fraction of the VMEM budget."""
    cands = [c for c in range(1, N + 1)
             if N % c == 0 and (c == N or (c % 8 == 0 and (c * N) % 8 == 0))]
    if not cands:
        return N
    # Rough f32 bytes per query row live in the edge path (input, LN copy,
    # attention out, residual, FFN hidden, output) incl. double-buffered blocks.
    per_row_bytes = 4 * N * (6 * De + d_e_ff)
    budget = max(vmem_limit_bytes // 3, 1)    # leave room for weights + node path
    fitting = [c for c in cands if c * per_row_bytes <= budget]
    return max(fitting) if fitting else min(cands)


def graph_transformer_layer(x, e, params, n_heads, *, row_tile=None,
                            vmem_limit_bytes=48 * 1024 * 1024):
    # 48 MiB keeps the kernel safe on v7x (64 MiB VMEM); on v5e/v6e (128 MiB)
    # vmem_limit_bytes can be raised toward ~100 MiB for a larger row tile.
    B, N, D = x.shape
    De = e.shape[-1]
    p = params
    e2 = e.reshape(B, N * N, De)   # flat edge layout: all edge math is 2-D matmuls

    if row_tile is None:
        row_tile = _choose_row_tile(N, De, p["fe_w1"].shape[-1], vmem_limit_bytes)
    TQ = int(row_tile)
    assert N % TQ == 0, "row_tile must divide N"
    NT = N // TQ

    weights = (
        p["ln_x_g"], p["ln_x_b"], p["ln_e_g"], p["ln_e_b"],
        p["wq"], p["bq"], p["wk"], p["bk"], p["wv"], p["bv"],
        p["wo"], p["bo"],
        p["we"], p["bwe"], p["woe"], p["boe"],
        p["fx_g"], p["fx_b"], p["fx_w1"], p["fx_b1"], p["fx_w2"], p["fx_b2"],
        p["fe_g"], p["fe_b"], p["fe_w1"], p["fe_b1"], p["fe_w2"], p["fe_b2"],
    )

    def rep(arr):
        nd = arr.ndim
        # Grid-invariant operand: single-buffer (double-buffering buys nothing
        # and doubles the VMEM footprint of the weights).
        return pl.BlockSpec(arr.shape, lambda b, i, _nd=nd: (0,) * _nd,
                            pipeline_mode=pl.Buffered(1))

    in_specs = [
        pl.BlockSpec((1, TQ, D), lambda b, i: (b, i, 0)),        # query-row tile of x
        pl.BlockSpec((1, N, D), lambda b, i: (b, 0, 0)),         # all nodes (K/V source)
        pl.BlockSpec((1, TQ * N, De), lambda b, i: (b, i, 0)),   # edge rows (flat)
    ] + [rep(w) for w in weights]

    out_specs = [
        pl.BlockSpec((1, TQ, D), lambda b, i: (b, i, 0)),
        pl.BlockSpec((1, TQ * N, De), lambda b, i: (b, i, 0)),
    ]

    kernel = functools.partial(graph_transformer_layer_kernel, n_heads=n_heads)
    out_x, out_e2 = pl.pallas_call(
        kernel,
        out_shape=(jax.ShapeDtypeStruct((B, N, D), x.dtype),
                   jax.ShapeDtypeStruct((B, N * N, De), e.dtype)),
        grid_spec=pltpu.PrefetchScalarGridSpec(
            num_scalar_prefetch=0,
            grid=(B, NT),
            in_specs=in_specs,
            out_specs=out_specs,
        ),
        compiler_params=pltpu.CompilerParams(
            dimension_semantics=("parallel", "parallel"),
            vmem_limit_bytes=vmem_limit_bytes,
        ),
    )(x, x, e2, *weights)
    return out_x, out_e2.reshape(B, N, N, De)


# ----------------------------------------------------------------------------
# Deterministic parameter init (mirrors the module's init_weights).
# Big matmul weights are stored transposed ([in, out]) and in bf16 for the MXU;
# LayerNorm params, biases, and the tiny W_oe stay f32.
# ----------------------------------------------------------------------------
def xavier_uniform(key, shape, gain=1.0):
    fan_in, fan_out = shape
    bound = gain * math.sqrt(6.0 / (fan_in + fan_out))
    return jax.random.uniform(key, shape, jnp.float32, -bound, bound)


def init_params(key, D, De, H, d_ff, d_e_ff):
    ks = jax.random.split(key, 10)
    relu_gain = math.sqrt(2.0)  # torch.nn.init.calculate_gain('relu')
    bf16 = jnp.bfloat16
    f32 = jnp.float32
    return dict(
        ln_x_g=jnp.ones((1, D), f32), ln_x_b=jnp.zeros((1, D), f32),
        ln_e_g=jnp.ones((1, De), f32), ln_e_b=jnp.zeros((1, De), f32),
        wq=xavier_uniform(ks[0], (D, D)).astype(bf16), bq=jnp.zeros((1, D), f32),
        wk=xavier_uniform(ks[1], (D, D)).astype(bf16), bk=jnp.zeros((1, D), f32),
        wv=xavier_uniform(ks[2], (D, D)).astype(bf16), bv=jnp.zeros((1, D), f32),
        wo=xavier_uniform(ks[3], (D, D)).astype(bf16), bo=jnp.zeros((1, D), f32),
        we=xavier_uniform(ks[4], (De, H)).astype(bf16),                 # [De, H]
        bwe=jnp.zeros((1, H), f32),
        woe=xavier_uniform(ks[5], (H, De)),                             # [H, De] f32
        boe=jnp.zeros((1, De), f32),
        # node FFN
        fx_g=jnp.ones((1, D), f32), fx_b=jnp.zeros((1, D), f32),
        fx_w1=xavier_uniform(ks[6], (D, d_ff), relu_gain).astype(bf16),
        fx_b1=jnp.zeros((1, d_ff), f32),
        fx_w2=xavier_uniform(ks[7], (d_ff, D)).astype(bf16),
        fx_b2=jnp.zeros((1, D), f32),
        # edge FFN
        fe_g=jnp.ones((1, De), f32), fe_b=jnp.zeros((1, De), f32),
        fe_w1=xavier_uniform(ks[8], (De, d_e_ff), relu_gain).astype(bf16),
        fe_b1=jnp.zeros((1, d_e_ff), f32),
        fe_w2=xavier_uniform(ks[9], (d_e_ff, De)).astype(bf16),
        fe_b2=jnp.zeros((1, De), f32),
    )


if __name__ == "__main__":
    B, N = 2, 16
    D, De = 32, 16          # config.d_embed, config.d_e_embed
    H = 4                   # n_heads
    d_ff, d_e_ff = 64, 32   # config.d_ff, config.d_e_ff

    key = jax.random.PRNGKey(0)
    kx, ke, kp = jax.random.split(key, 3)
    x = jax.random.normal(kx, (B, N, D), jnp.float32)
    e = jax.random.normal(ke, (B, N, N, De), jnp.float32)
    params = init_params(kp, D, De, H, d_ff, d_e_ff)

    # Auto-selected row tile (fits whole graph at this size -> grid=(B, 1)).
    fwd = jax.jit(functools.partial(graph_transformer_layer, n_heads=H))
    out_x, out_e = fwd(x, e, params)
    jax.block_until_ready((out_x, out_e))

    # Explicitly row-tiled variant (grid=(B, N//8)) must match.
    fwd_tiled = jax.jit(functools.partial(graph_transformer_layer, n_heads=H,
                                          row_tile=8))
    out_x_t, out_e_t = fwd_tiled(x, e, params)
    jax.block_until_ready((out_x_t, out_e_t))

    assert out_x.shape == (B, N, D) and out_e.shape == (B, N, N, De)
    assert jnp.all(jnp.isfinite(out_x)) and jnp.all(jnp.isfinite(out_e))
    assert jnp.allclose(out_x, out_x_t, atol=2e-4, rtol=2e-4)
    assert jnp.allclose(out_e, out_e_t, atol=2e-4, rtol=2e-4)
    print("KERNEL_OK")
</pallas_src>

<mosaic_0001>
module attributes {stable_mosaic.version = 11 : i64} {
  func.func @graph_transformer_layer_kernel(%arg0: i32, %arg1: i32, %arg2: memref<1x16x32xf32, #tpu.memory_space<vmem>>, %arg3: memref<1x16x32xf32, #tpu.memory_space<vmem>>, %arg4: memref<1x256x16xf32, #tpu.memory_space<vmem>>, %arg5: memref<1x32xf32, #tpu.memory_space<vmem>>, %arg6: memref<1x32xf32, #tpu.memory_space<vmem>>, %arg7: memref<1x16xf32, #tpu.memory_space<vmem>>, %arg8: memref<1x16xf32, #tpu.memory_space<vmem>>, %arg9: memref<32x32xbf16, #tpu.memory_space<vmem>>, %arg10: memref<1x32xf32, #tpu.memory_space<vmem>>, %arg11: memref<32x32xbf16, #tpu.memory_space<vmem>>, %arg12: memref<1x32xf32, #tpu.memory_space<vmem>>, %arg13: memref<32x32xbf16, #tpu.memory_space<vmem>>, %arg14: memref<1x32xf32, #tpu.memory_space<vmem>>, %arg15: memref<32x32xbf16, #tpu.memory_space<vmem>>, %arg16: memref<1x32xf32, #tpu.memory_space<vmem>>, %arg17: memref<16x4xbf16, #tpu.memory_space<vmem>>, %arg18: memref<1x4xf32, #tpu.memory_space<vmem>>, %arg19: memref<4x16xf32, #tpu.memory_space<vmem>>, %arg20: memref<1x16xf32, #tpu.memory_space<vmem>>, %arg21: memref<1x32xf32, #tpu.memory_space<vmem>>, %arg22: memref<1x32xf32, #tpu.memory_space<vmem>>, %arg23: memref<32x64xbf16, #tpu.memory_space<vmem>>, %arg24: memref<1x64xf32, #tpu.memory_space<vmem>>, %arg25: memref<64x32xbf16, #tpu.memory_space<vmem>>, %arg26: memref<1x32xf32, #tpu.memory_space<vmem>>, %arg27: memref<1x16xf32, #tpu.memory_space<vmem>>, %arg28: memref<1x16xf32, #tpu.memory_space<vmem>>, %arg29: memref<16x32xbf16, #tpu.memory_space<vmem>>, %arg30: memref<1x32xf32, #tpu.memory_space<vmem>>, %arg31: memref<32x16xbf16, #tpu.memory_space<vmem>>, %arg32: memref<1x16xf32, #tpu.memory_space<vmem>>, %arg33: memref<1x16x32xf32, #tpu.memory_space<vmem>>, %arg34: memref<1x256x16xf32, #tpu.memory_space<vmem>>) attributes {dimension_semantics = [#tpu.dimension_semantics<parallel>, #tpu.dimension_semantics<parallel>], iteration_bounds = array<i64: 2, 1>, scalar_prefetch = 0 : i64, scratch_operands = 0 : i64, tpu.core_type = #tpu.core_type<tc>, window_params = [{transform_indices = @transform_0, window_bounds = array<i64: 1, 16, 32>}, {transform_indices = @transform_1, window_bounds = array<i64: 1, 16, 32>}, {transform_indices = @transform_2, window_bounds = array<i64: 1, 256, 16>}, {pipeline_mode = #tpu.pipeline_mode<synchronous>, transform_indices = @transform_3, window_bounds = array<i64: 1, 32>}, {pipeline_mode = #tpu.pipeline_mode<synchronous>, transform_indices = @transform_4, window_bounds = array<i64: 1, 32>}, {pipeline_mode = #tpu.pipeline_mode<synchronous>, transform_indices = @transform_5, window_bounds = array<i64: 1, 16>}, {pipeline_mode = #tpu.pipeline_mode<synchronous>, transform_indices = @transform_6, window_bounds = array<i64: 1, 16>}, {pipeline_mode = #tpu.pipeline_mode<synchronous>, transform_indices = @transform_7, window_bounds = array<i64: 32, 32>}, {pipeline_mode = #tpu.pipeline_mode<synchronous>, transform_indices = @transform_8, window_bounds = array<i64: 1, 32>}, {pipeline_mode = #tpu.pipeline_mode<synchronous>, transform_indices = @transform_9, window_bounds = array<i64: 32, 32>}, {pipeline_mode = #tpu.pipeline_mode<synchronous>, transform_indices = @transform_10, window_bounds = array<i64: 1, 32>}, {pipeline_mode = #tpu.pipeline_mode<synchronous>, transform_indices = @transform_11, window_bounds = array<i64: 32, 32>}, {pipeline_mode = #tpu.pipeline_mode<synchronous>, transform_indices = @transform_12, window_bounds = array<i64: 1, 32>}, {pipeline_mode = #tpu.pipeline_mode<synchronous>, transform_indices = @transform_13, window_bounds = array<i64: 32, 32>}, {pipeline_mode = #tpu.pipeline_mode<synchronous>, transform_indices = @transform_14, window_bounds = array<i64: 1, 32>}, {pipeline_mode = #tpu.pipeline_mode<synchronous>, transform_indices = @transform_15, window_bounds = array<i64: 16, 4>}, {pipeline_mode = #tpu.pipeline_mode<synchronous>, transform_indices = @transform_16, window_bounds = array<i64: 1, 4>}, {pipeline_mode = #tpu.pipeline_mode<synchronous>, transform_indices = @transform_17, window_bounds = array<i64: 4, 16>}, {pipeline_mode = #tpu.pipeline_mode<synchronous>, transform_indices = @transform_18, window_bounds = array<i64: 1, 16>}, {pipeline_mode = #tpu.pipeline_mode<synchronous>, transform_indices = @transform_19, window_bounds = array<i64: 1, 32>}, {pipeline_mode = #tpu.pipeline_mode<synchronous>, transform_indices = @transform_20, window_bounds = array<i64: 1, 32>}, {pipeline_mode = #tpu.pipeline_mode<synchronous>, transform_indices = @transform_21, window_bounds = array<i64: 32, 64>}, {pipeline_mode = #tpu.pipeline_mode<synchronous>, transform_indices = @transform_22, window_bounds = array<i64: 1, 64>}, {pipeline_mode = #tpu.pipeline_mode<synchronous>, transform_indices = @transform_23, window_bounds = array<i64: 64, 32>}, {pipeline_mode = #tpu.pipeline_mode<synchronous>, transform_indices = @transform_24, window_bounds = array<i64: 1, 32>}, {pipeline_mode = #tpu.pipeline_mode<synchronous>, transform_indices = @transform_25, window_bounds = array<i64: 1, 16>}, {pipeline_mode = #tpu.pipeline_mode<synchronous>, transform_indices = @transform_26, window_bounds = array<i64: 1, 16>}, {pipeline_mode = #tpu.pipeline_mode<synchronous>, transform_indices = @transform_27, window_bounds = array<i64: 16, 32>}, {pipeline_mode = #tpu.pipeline_mode<synchronous>, transform_indices = @transform_28, window_bounds = array<i64: 1, 32>}, {pipeline_mode = #tpu.pipeline_mode<synchronous>, transform_indices = @transform_29, window_bounds = array<i64: 32, 16>}, {pipeline_mode = #tpu.pipeline_mode<synchronous>, transform_indices = @transform_30, window_bounds = array<i64: 1, 16>}, {transform_indices = @transform_31, window_bounds = array<i64: 1, 16, 32>}, {transform_indices = @transform_32, window_bounds = array<i64: 1, 256, 16>}]} {
    %c0 = arith.constant 0 : index
    %c0_0 = arith.constant 0 : index
    %c0_1 = arith.constant 0 : index
    %0 = vector.load %arg2[%c0, %c0_0, %c0_1] : memref<1x16x32xf32, #tpu.memory_space<vmem>>, vector<1x16x32xf32>
    %1 = vector.shape_cast %0 : vector<1x16x32xf32> to vector<16x32xf32>
    %c0_2 = arith.constant 0 : index
    %c0_3 = arith.constant 0 : index
    %c0_4 = arith.constant 0 : index
    %2 = vector.load %arg3[%c0_2, %c0_3, %c0_4] : memref<1x16x32xf32, #tpu.memory_space<vmem>>, vector<1x16x32xf32>
    %3 = vector.shape_cast %2 : vector<1x16x32xf32> to vector<16x32xf32>
    %c0_5 = arith.constant 0 : index
    %c0_6 = arith.constant 0 : index
    %c0_7 = arith.constant 0 : index
    %4 = vector.load %arg4[%c0_5, %c0_6, %c0_7] : memref<1x256x16xf32, #tpu.memory_space<vmem>>, vector<1x256x16xf32>
    %5 = vector.shape_cast %4 : vector<1x256x16xf32> to vector<256x16xf32>
    %c0_8 = arith.constant 0 : index
    %c0_9 = arith.constant 0 : index
    %6 = vector.load %arg5[%c0_8, %c0_9] : memref<1x32xf32, #tpu.memory_space<vmem>>, vector<1x32xf32>
    %c0_10 = arith.constant 0 : index
    %c0_11 = arith.constant 0 : index
    %7 = vector.load %arg6[%c0_10, %c0_11] : memref<1x32xf32, #tpu.memory_space<vmem>>, vector<1x32xf32>
    %cst = arith.constant dense<0.000000e+00> : vector<16xf32>
    %8 = vector.multi_reduction <add>, %1, %cst [1] : vector<16x32xf32> to vector<16xf32>
    %9 = vector.shape_cast %8 : vector<16xf32> to vector<16x1xf32>
    %cst_12 = arith.constant 3.200000e+01 : f32
    %10 = vector.broadcast %cst_12 : f32 to vector<16x1xf32>
    %11 = arith.divf %9, %10 : vector<16x1xf32>
    %12 = vector.broadcast %11 : vector<16x1xf32> to vector<16x32xf32>
    %13 = arith.subf %1, %12 : vector<16x32xf32>
    %14 = arith.mulf %13, %13 : vector<16x32xf32>
    %cst_13 = arith.constant dense<0.000000e+00> : vector<16xf32>
    %15 = vector.multi_reduction <add>, %14, %cst_13 [1] : vector<16x32xf32> to vector<16xf32>
    %16 = vector.shape_cast %15 : vector<16xf32> to vector<16x1xf32>
    %cst_14 = arith.constant 3.200000e+01 : f32
    %17 = vector.broadcast %cst_14 : f32 to vector<16x1xf32>
    %18 = arith.divf %16, %17 : vector<16x1xf32>
    %19 = vector.broadcast %11 : vector<16x1xf32> to vector<16x32xf32>
    %20 = arith.subf %1, %19 : vector<16x32xf32>
    %cst_15 = arith.constant 9.99999974E-6 : f32
    %21 = vector.broadcast %cst_15 : f32 to vector<16x1xf32>
    %22 = arith.addf %18, %21 : vector<16x1xf32>
    %23 = math.rsqrt %22 : vector<16x1xf32>
    %24 = vector.broadcast %23 : vector<16x1xf32> to vector<16x32xf32>
    %25 = arith.mulf %20, %24 : vector<16x32xf32>
    %26 = vector.broadcast %6 : vector<1x32xf32> to vector<16x32xf32>
    %27 = arith.mulf %25, %26 : vector<16x32xf32>
    %28 = vector.broadcast %7 : vector<1x32xf32> to vector<16x32xf32>
    %29 = arith.addf %27, %28 : vector<16x32xf32>
    %c0_16 = arith.constant 0 : index
    %c0_17 = arith.constant 0 : index
    %30 = vector.load %arg5[%c0_16, %c0_17] : memref<1x32xf32, #tpu.memory_space<vmem>>, vector<1x32xf32>
    %c0_18 = arith.constant 0 : index
    %c0_19 = arith.constant 0 : index
    %31 = vector.load %arg6[%c0_18, %c0_19] : memref<1x32xf32, #tpu.memory_space<vmem>>, vector<1x32xf32>
    %cst_20 = arith.constant dense<0.000000e+00> : vector<16xf32>
    %32 = vector.multi_reduction <add>, %3, %cst_20 [1] : vector<16x32xf32> to vector<16xf32>
    %33 = vector.shape_cast %32 : vector<16xf32> to vector<16x1xf32>
    %cst_21 = arith.constant 3.200000e+01 : f32
    %34 = vector.broadcast %cst_21 : f32 to vector<16x1xf32>
    %35 = arith.divf %33, %34 : vector<16x1xf32>
    %36 = vector.broadcast %35 : vector<16x1xf32> to vector<16x32xf32>
    %37 = arith.subf %3, %36 : vector<16x32xf32>
    %38 = arith.mulf %37, %37 : vector<16x32xf32>
    %cst_22 = arith.constant dense<0.000000e+00> : vector<16xf32>
    %39 = vector.multi_reduction <add>, %38, %cst_22 [1] : vector<16x32xf32> to vector<16xf32>
    %40 = vector.shape_cast %39 : vector<16xf32> to vector<16x1xf32>
    %cst_23 = arith.constant 3.200000e+01 : f32
    %41 = vector.broadcast %cst_23 : f32 to vector<16x1xf32>
    %42 = arith.divf %40, %41 : vector<16x1xf32>
    %43 = vector.broadcast %35 : vector<16x1xf32> to vector<16x32xf32>
    %44 = arith.subf %3, %43 : vector<16x32xf32>
    %cst_24 = arith.constant 9.99999974E-6 : f32
    %45 = vector.broadcast %cst_24 : f32 to vector<16x1xf32>
    %46 = arith.addf %42, %45 : vector<16x1xf32>
    %47 = math.rsqrt %46 : vector<16x1xf32>
    %48 = vector.broadcast %47 : vector<16x1xf32> to vector<16x32xf32>
    %49 = arith.mulf %44, %48 : vector<16x32xf32>
    %50 = vector.broadcast %30 : vector<1x32xf32> to vector<16x32xf32>
    %51 = arith.mulf %49, %50 : vector<16x32xf32>
    %52 = vector.broadcast %31 : vector<1x32xf32> to vector<16x32xf32>
    %53 = arith.addf %51, %52 : vector<16x32xf32>
    %c0_25 = arith.constant 0 : index
    %c0_26 = arith.constant 0 : index
    %54 = vector.load %arg7[%c0_25, %c0_26] : memref<1x16xf32, #tpu.memory_space<vmem>>, vector<1x16xf32>
    %c0_27 = arith.constant 0 : index
    %c0_28 = arith.constant 0 : index
    %55 = vector.load %arg8[%c0_27, %c0_28] : memref<1x16xf32, #tpu.memory_space<vmem>>, vector<1x16xf32>
    %cst_29 = arith.constant dense<0.000000e+00> : vector<256xf32>
    %56 = vector.multi_reduction <add>, %5, %cst_29 [1] : vector<256x16xf32> to vector<256xf32>
    %57 = vector.shape_cast %56 : vector<256xf32> to vector<256x1xf32>
    %cst_30 = arith.constant 1.600000e+01 : f32
    %58 = vector.broadcast %cst_30 : f32 to vector<256x1xf32>
    %59 = arith.divf %57, %58 : vector<256x1xf32>
    %60 = vector.broadcast %59 : vector<256x1xf32> to vector<256x16xf32>
    %61 = arith.subf %5, %60 : vector<256x16xf32>
    %62 = arith.mulf %61, %61 : vector<256x16xf32>
    %cst_31 = arith.constant dense<0.000000e+00> : vector<256xf32>
    %63 = vector.multi_reduction <add>, %62, %cst_31 [1] : vector<256x16xf32> to vector<256xf32>
    %64 = vector.shape_cast %63 : vector<256xf32> to vector<256x1xf32>
    %cst_32 = arith.constant 1.600000e+01 : f32
    %65 = vector.broadcast %cst_32 : f32 to vector<256x1xf32>
    %66 = arith.divf %64, %65 : vector<256x1xf32>
    %67 = vector.broadcast %59 : vector<256x1xf32> to vector<256x16xf32>
    %68 = arith.subf %5, %67 : vector<256x16xf32>
    %cst_33 = arith.constant 9.99999974E-6 : f32
    %69 = vector.broadcast %cst_33 : f32 to vector<256x1xf32>
    %70 = arith.addf %66, %69 : vector<256x1xf32>
    %71 = math.rsqrt %70 : vector<256x1xf32>
    %72 = vector.broadcast %71 : vector<256x1xf32> to vector<256x16xf32>
    %73 = arith.mulf %68, %72 : vector<256x16xf32>
    %74 = vector.broadcast %54 : vector<1x16xf32> to vector<256x16xf32>
    %75 = arith.mulf %73, %74 : vector<256x16xf32>
    %76 = vector.broadcast %55 : vector<1x16xf32> to vector<256x16xf32>
    %77 = arith.addf %75, %76 : vector<256x16xf32>
    %78 = arith.truncf %29 : vector<16x32xf32> to vector<16x32xbf16>
    %c0_34 = arith.constant 0 : index
    %c0_35 = arith.constant 0 : index
    %79 = vector.load %arg9[%c0_34, %c0_35] : memref<32x32xbf16, #tpu.memory_space<vmem>>, vector<32x32xbf16>
    %cst_36 = arith.constant dense<0.000000e+00> : vector<16x32xf32>
    %80 = tpu.matmul %78, %79, %cst_36 {dimension_numbers = #tpu.dot_dimension_numbers<[1], [0], [0], [1], [0, 0, 1, 1], [], []>} : vector<16x32xbf16>, vector<32x32xbf16>, vector<16x32xf32> -> vector<16x32xf32>
    %c0_37 = arith.constant 0 : index
    %c0_38 = arith.constant 0 : index
    %81 = vector.load %arg10[%c0_37, %c0_38] : memref<1x32xf32, #tpu.memory_space<vmem>>, vector<1x32xf32>
    %82 = vector.broadcast %81 : vector<1x32xf32> to vector<16x32xf32>
    %83 = arith.addf %80, %82 : vector<16x32xf32>
    %84 = arith.truncf %53 : vector<16x32xf32> to vector<16x32xbf16>
    %c0_39 = arith.constant 0 : index
    %c0_40 = arith.constant 0 : index
    %85 = vector.load %arg11[%c0_39, %c0_40] : memref<32x32xbf16, #tpu.memory_space<vmem>>, vector<32x32xbf16>
    %cst_41 = arith.constant dense<0.000000e+00> : vector<16x32xf32>
    %86 = tpu.matmul %84, %85, %cst_41 {dimension_numbers = #tpu.dot_dimension_numbers<[1], [0], [0], [1], [0, 0, 1, 1], [], []>} : vector<16x32xbf16>, vector<32x32xbf16>, vector<16x32xf32> -> vector<16x32xf32>
    %c0_42 = arith.constant 0 : index
    %c0_43 = arith.constant 0 : index
    %87 = vector.load %arg12[%c0_42, %c0_43] : memref<1x32xf32, #tpu.memory_space<vmem>>, vector<1x32xf32>
    %88 = vector.broadcast %87 : vector<1x32xf32> to vector<16x32xf32>
    %89 = arith.addf %86, %88 : vector<16x32xf32>
    %90 = arith.truncf %53 : vector<16x32xf32> to vector<16x32xbf16>
    %c0_44 = arith.constant 0 : index
    %c0_45 = arith.constant 0 : index
    %91 = vector.load %arg13[%c0_44, %c0_45] : memref<32x32xbf16, #tpu.memory_space<vmem>>, vector<32x32xbf16>
    %cst_46 = arith.constant dense<0.000000e+00> : vector<16x32xf32>
    %92 = tpu.matmul %90, %91, %cst_46 {dimension_numbers = #tpu.dot_dimension_numbers<[1], [0], [0], [1], [0, 0, 1, 1], [], []>} : vector<16x32xbf16>, vector<32x32xbf16>, vector<16x32xf32> -> vector<16x32xf32>
    %c0_47 = arith.constant 0 : index
    %c0_48 = arith.constant 0 : index
    %93 = vector.load %arg14[%c0_47, %c0_48] : memref<1x32xf32, #tpu.memory_space<vmem>>, vector<1x32xf32>
    %94 = vector.broadcast %93 : vector<1x32xf32> to vector<16x32xf32>
    %95 = arith.addf %92, %94 : vector<16x32xf32>
    %96 = vector.shape_cast %83 : vector<16x32xf32> to vector<16x4x8xf32>
    %97 = tpu.transpose %96, [1, 0, 2] : vector<16x4x8xf32> -> vector<4x16x8xf32>
    %98 = arith.truncf %97 : vector<4x16x8xf32> to vector<4x16x8xbf16>
    %99 = vector.shape_cast %89 : vector<16x32xf32> to vector<16x4x8xf32>
    %100 = tpu.transpose %99, [1, 0, 2] : vector<16x4x8xf32> -> vector<4x16x8xf32>
    %101 = arith.truncf %100 : vector<4x16x8xf32> to vector<4x16x8xbf16>
    %102 = vector.shape_cast %95 : vector<16x32xf32> to vector<16x4x8xf32>
    %103 = tpu.transpose %102, [1, 0, 2] : vector<16x4x8xf32> -> vector<4x16x8xf32>
    %104 = arith.truncf %103 : vector<4x16x8xf32> to vector<4x16x8xbf16>
    "tpu.trace_start"() <{level = 10 : i32, message = "hqd,hkd->hqk"}> : () -> ()
    %cst_49 = arith.constant dense<0.000000e+00> : vector<4x16x16xf32>
    %105 = tpu.matmul %98, %101, %cst_49 {dimension_numbers = #tpu.dot_dimension_numbers<[2], [2], [1], [1], [0, 0, 0, 1, 1, 1], [0], [0]>} : vector<4x16x8xbf16>, vector<4x16x8xbf16>, vector<4x16x16xf32> -> vector<4x16x16xf32>
    "tpu.trace_stop"() : () -> ()
    %cst_50 = arith.constant 0.353553385 : f32
    %106 = vector.broadcast %cst_50 : f32 to vector<4x16x16xf32>
    %107 = arith.mulf %105, %106 : vector<4x16x16xf32>
    %108 = arith.truncf %77 : vector<256x16xf32> to vector<256x16xbf16>
    %c0_51 = arith.constant 0 : index
    %c0_52 = arith.constant 0 : index
    %109 = vector.load %arg17[%c0_51, %c0_52] : memref<16x4xbf16, #tpu.memory_space<vmem>>, vector<16x4xbf16>
    %cst_53 = arith.constant dense<0.000000e+00> : vector<256x4xf32>
    %110 = tpu.matmul %108, %109, %cst_53 {dimension_numbers = #tpu.dot_dimension_numbers<[1], [0], [0], [1], [0, 0, 1, 1], [], []>} : vector<256x16xbf16>, vector<16x4xbf16>, vector<256x4xf32> -> vector<256x4xf32>
    %c0_54 = arith.constant 0 : index
    %c0_55 = arith.constant 0 : index
    %111 = vector.load %arg18[%c0_54, %c0_55] : memref<1x4xf32, #tpu.memory_space<vmem>>, vector<1x4xf32>
    %112 = vector.broadcast %111 : vector<1x4xf32> to vector<256x4xf32>
    %113 = arith.addf %110, %112 : vector<256x4xf32>
    %114 = tpu.transpose %113, [1, 0] : vector<256x4xf32> -> vector<4x256xf32>
    %115 = vector.shape_cast %114 : vector<4x256xf32> to vector<4x16x16xf32>
    %116 = arith.addf %107, %115 : vector<4x16x16xf32>
    %117 = vector.shape_cast %116 : vector<4x16x16xf32> to vector<4x256xf32>
    %c0_56 = arith.constant 0 : index
    %c0_57 = arith.constant 0 : index
    %118 = vector.load %arg19[%c0_56, %c0_57] : memref<4x16xf32, #tpu.memory_space<vmem>>, vector<4x16xf32>
    %cst_58 = arith.constant dense<0.000000e+00> : vector<256x16xf32>
    %119 = tpu.matmul %117, %118, %cst_58 {dimension_numbers = #tpu.dot_dimension_numbers<[0], [0], [1], [1], [0, 1, 1, 1], [], []>} : vector<4x256xf32>, vector<4x16xf32>, vector<256x16xf32> -> vector<256x16xf32>
    %c0_59 = arith.constant 0 : index
    %c0_60 = arith.constant 0 : index
    %120 = vector.load %arg20[%c0_59, %c0_60] : memref<1x16xf32, #tpu.memory_space<vmem>>, vector<1x16xf32>
    %121 = vector.broadcast %120 : vector<1x16xf32> to vector<256x16xf32>
    %122 = arith.addf %119, %121 : vector<256x16xf32>
    %123 = arith.addf %122, %5 : vector<256x16xf32>
    %cst_61 = arith.constant dense<0xFF800000> : vector<4x16xf32>
    %124 = vector.multi_reduction <maximumf>, %116, %cst_61 [2] : vector<4x16x16xf32> to vector<4x16xf32>
    %125 = vector.shape_cast %124 : vector<4x16xf32> to vector<4x16x1xf32>
    %126 = vector.broadcast %125 : vector<4x16x1xf32> to vector<4x16x16xf32>
    %127 = arith.subf %116, %126 : vector<4x16x16xf32>
    %128 = math.exp %127 : vector<4x16x16xf32>
    %cst_62 = arith.constant dense<0.000000e+00> : vector<4x16xf32>
    %129 = vector.multi_reduction <add>, %128, %cst_62 [2] : vector<4x16x16xf32> to vector<4x16xf32>
    %130 = vector.shape_cast %129 : vector<4x16xf32> to vector<4x16x1xf32>
    %131 = tpu.reciprocal %130 {approx = true} : vector<4x16x1xf32> -> vector<4x16x1xf32>
    %132 = vector.broadcast %131 : vector<4x16x1xf32> to vector<4x16x16xf32>
    %133 = arith.mulf %128, %132 : vector<4x16x16xf32>
    %134 = arith.truncf %133 : vector<4x16x16xf32> to vector<4x16x16xbf16>
    "tpu.trace_start"() <{level = 10 : i32, message = "hqk,hkd->hqd"}> : () -> ()
    %cst_63 = arith.constant dense<0.000000e+00> : vector<4x16x8xf32>
    %135 = tpu.matmul %134, %104, %cst_63 {dimension_numbers = #tpu.dot_dimension_numbers<[2], [1], [1], [2], [0, 0, 0, 1, 1, 2], [0], [0]>} : vector<4x16x16xbf16>, vector<4x16x8xbf16>, vector<4x16x8xf32> -> vector<4x16x8xf32>
    "tpu.trace_stop"() : () -> ()
    %136 = tpu.transpose %135, [1, 0, 2] : vector<4x16x8xf32> -> vector<16x4x8xf32>
    %137 = vector.shape_cast %136 : vector<16x4x8xf32> to vector<16x32xf32>
    %138 = arith.truncf %137 : vector<16x32xf32> to vector<16x32xbf16>
    %c0_64 = arith.constant 0 : index
    %c0_65 = arith.constant 0 : index
    %139 = vector.load %arg15[%c0_64, %c0_65] : memref<32x32xbf16, #tpu.memory_space<vmem>>, vector<32x32xbf16>
    %cst_66 = arith.constant dense<0.000000e+00> : vector<16x32xf32>
    %140 = tpu.matmul %138, %139, %cst_66 {dimension_numbers = #tpu.dot_dimension_numbers<[1], [0], [0], [1], [0, 0, 1, 1], [], []>} : vector<16x32xbf16>, vector<32x32xbf16>, vector<16x32xf32> -> vector<16x32xf32>
    %c0_67 = arith.constant 0 : index
    %c0_68 = arith.constant 0 : index
    %141 = vector.load %arg16[%c0_67, %c0_68] : memref<1x32xf32, #tpu.memory_space<vmem>>, vector<1x32xf32>
    %142 = vector.broadcast %141 : vector<1x32xf32> to vector<16x32xf32>
    %143 = arith.addf %140, %142 : vector<16x32xf32>
    %144 = arith.addf %143, %1 : vector<16x32xf32>
    %c0_69 = arith.constant 0 : index
    %c0_70 = arith.constant 0 : index
    %145 = vector.load %arg21[%c0_69, %c0_70] : memref<1x32xf32, #tpu.memory_space<vmem>>, vector<1x32xf32>
    %c0_71 = arith.constant 0 : index
    %c0_72 = arith.constant 0 : index
    %146 = vector.load %arg22[%c0_71, %c0_72] : memref<1x32xf32, #tpu.memory_space<vmem>>, vector<1x32xf32>
    %cst_73 = arith.constant dense<0.000000e+00> : vector<16xf32>
    %147 = vector.multi_reduction <add>, %144, %cst_73 [1] : vector<16x32xf32> to vector<16xf32>
    %148 = vector.shape_cast %147 : vector<16xf32> to vector<16x1xf32>
    %cst_74 = arith.constant 3.200000e+01 : f32
    %149 = vector.broadcast %cst_74 : f32 to vector<16x1xf32>
    %150 = arith.divf %148, %149 : vector<16x1xf32>
    %151 = vector.broadcast %150 : vector<16x1xf32> to vector<16x32xf32>
    %152 = arith.subf %144, %151 : vector<16x32xf32>
    %153 = arith.mulf %152, %152 : vector<16x32xf32>
    %cst_75 = arith.constant dense<0.000000e+00> : vector<16xf32>
    %154 = vector.multi_reduction <add>, %153, %cst_75 [1] : vector<16x32xf32> to vector<16xf32>
    %155 = vector.shape_cast %154 : vector<16xf32> to vector<16x1xf32>
    %cst_76 = arith.constant 3.200000e+01 : f32
    %156 = vector.broadcast %cst_76 : f32 to vector<16x1xf32>
    %157 = arith.divf %155, %156 : vector<16x1xf32>
    %158 = vector.broadcast %150 : vector<16x1xf32> to vector<16x32xf32>
    %159 = arith.subf %144, %158 : vector<16x32xf32>
    %cst_77 = arith.constant 9.99999974E-6 : f32
    %160 = vector.broadcast %cst_77 : f32 to vector<16x1xf32>
    %161 = arith.addf %157, %160 : vector<16x1xf32>
    %162 = math.rsqrt %161 : vector<16x1xf32>
    %163 = vector.broadcast %162 : vector<16x1xf32> to vector<16x32xf32>
    %164 = arith.mulf %159, %163 : vector<16x32xf32>
    %165 = vector.broadcast %145 : vector<1x32xf32> to vector<16x32xf32>
    %166 = arith.mulf %164, %165 : vector<16x32xf32>
    %167 = vector.broadcast %146 : vector<1x32xf32> to vector<16x32xf32>
    %168 = arith.addf %166, %167 : vector<16x32xf32>
    %169 = arith.truncf %168 : vector<16x32xf32> to vector<16x32xbf16>
    %c0_78 = arith.constant 0 : index
    %c0_79 = arith.constant 0 : index
    %170 = vector.load %arg23[%c0_78, %c0_79] : memref<32x64xbf16, #tpu.memory_space<vmem>>, vector<32x64xbf16>
    %cst_80 = arith.constant dense<0.000000e+00> : vector<16x64xf32>
    %171 = tpu.matmul %169, %170, %cst_80 {dimension_numbers = #tpu.dot_dimension_numbers<[1], [0], [0], [1], [0, 0, 1, 1], [], []>} : vector<16x32xbf16>, vector<32x64xbf16>, vector<16x64xf32> -> vector<16x64xf32>
    %c0_81 = arith.constant 0 : index
    %c0_82 = arith.constant 0 : index
    %172 = vector.load %arg24[%c0_81, %c0_82] : memref<1x64xf32, #tpu.memory_space<vmem>>, vector<1x64xf32>
    %173 = vector.broadcast %172 : vector<1x64xf32> to vector<16x64xf32>
    %174 = arith.addf %171, %173 : vector<16x64xf32>
    %cst_83 = arith.constant 5.000000e-01 : f32
    %175 = vector.broadcast %cst_83 : f32 to vector<16x64xf32>
    %176 = arith.mulf %175, %174 : vector<16x64xf32>
    %cst_84 = arith.constant 0.707106769 : f32
    %177 = vector.broadcast %cst_84 : f32 to vector<16x64xf32>
    %178 = arith.mulf %174, %177 : vector<16x64xf32>
    %179 = math.erf %178 : vector<16x64xf32>
    %cst_85 = arith.constant 1.000000e+00 : f32
    %180 = vector.broadcast %cst_85 : f32 to vector<16x64xf32>
    %181 = arith.addf %180, %179 : vector<16x64xf32>
    %182 = arith.mulf %176, %181 : vector<16x64xf32>
    %183 = arith.truncf %182 : vector<16x64xf32> to vector<16x64xbf16>
    %c0_86 = arith.constant 0 : index
    %c0_87 = arith.constant 0 : index
    %184 = vector.load %arg25[%c0_86, %c0_87] : memref<64x32xbf16, #tpu.memory_space<vmem>>, vector<64x32xbf16>
    %cst_88 = arith.constant dense<0.000000e+00> : vector<16x32xf32>
    %185 = tpu.matmul %183, %184, %cst_88 {dimension_numbers = #tpu.dot_dimension_numbers<[1], [0], [0], [1], [0, 0, 1, 1], [], []>} : vector<16x64xbf16>, vector<64x32xbf16>, vector<16x32xf32> -> vector<16x32xf32>
    %c0_89 = arith.constant 0 : index
    %c0_90 = arith.constant 0 : index
    %186 = vector.load %arg26[%c0_89, %c0_90] : memref<1x32xf32, #tpu.memory_space<vmem>>, vector<1x32xf32>
    %187 = vector.broadcast %186 : vector<1x32xf32> to vector<16x32xf32>
    %188 = arith.addf %185, %187 : vector<16x32xf32>
    %189 = arith.addf %188, %144 : vector<16x32xf32>
    %c0_91 = arith.constant 0 : index
    %c0_92 = arith.constant 0 : index
    %c0_93 = arith.constant 0 : index
    %190 = vector.load %arg33[%c0_91, %c0_92, %c0_93] : memref<1x16x32xf32, #tpu.memory_space<vmem>>, vector<1x16x32xf32>
    %191 = vector.shape_cast %190 : vector<1x16x32xf32> to vector<16x32xf32>
    %192 = vector.shape_cast %189 : vector<16x32xf32> to vector<1x16x32xf32>
    tpu.vector_store %arg33[%c0_91, %c0_92, %c0_93], %192 {strides = array<i32>} : memref<1x16x32xf32, #tpu.memory_space<vmem>>, vector<1x16x32xf32>,
    %c0_94 = arith.constant 0 : index
    %c0_95 = arith.constant 0 : index
    %193 = vector.load %arg27[%c0_94, %c0_95] : memref<1x16xf32, #tpu.memory_space<vmem>>, vector<1x16xf32>
    %c0_96 = arith.constant 0 : index
    %c0_97 = arith.constant 0 : index
    %194 = vector.load %arg28[%c0_96, %c0_97] : memref<1x16xf32, #tpu.memory_space<vmem>>, vector<1x16xf32>
    %cst_98 = arith.constant dense<0.000000e+00> : vector<256xf32>
    %195 = vector.multi_reduction <add>, %123, %cst_98 [1] : vector<256x16xf32> to vector<256xf32>
    %196 = vector.shape_cast %195 : vector<256xf32> to vector<256x1xf32>
    %cst_99 = arith.constant 1.600000e+01 : f32
    %197 = vector.broadcast %cst_99 : f32 to vector<256x1xf32>
    %198 = arith.divf %196, %197 : vector<256x1xf32>
    %199 = vector.broadcast %198 : vector<256x1xf32> to vector<256x16xf32>
    %200 = arith.subf %123, %199 : vector<256x16xf32>
    %201 = arith.mulf %200, %200 : vector<256x16xf32>
    %cst_100 = arith.constant dense<0.000000e+00> : vector<256xf32>
    %202 = vector.multi_reduction <add>, %201, %cst_100 [1] : vector<256x16xf32> to vector<256xf32>
    %203 = vector.shape_cast %202 : vector<256xf32> to vector<256x1xf32>
    %cst_101 = arith.constant 1.600000e+01 : f32
    %204 = vector.broadcast %cst_101 : f32 to vector<256x1xf32>
    %205 = arith.divf %203, %204 : vector<256x1xf32>
    %206 = vector.broadcast %198 : vector<256x1xf32> to vector<256x16xf32>
    %207 = arith.subf %123, %206 : vector<256x16xf32>
    %cst_102 = arith.constant 9.99999974E-6 : f32
    %208 = vector.broadcast %cst_102 : f32 to vector<256x1xf32>
    %209 = arith.addf %205, %208 : vector<256x1xf32>
    %210 = math.rsqrt %209 : vector<256x1xf32>
    %211 = vector.broadcast %210 : vector<256x1xf32> to vector<256x16xf32>
    %212 = arith.mulf %207, %211 : vector<256x16xf32>
    %213 = vector.broadcast %193 : vector<1x16xf32> to vector<256x16xf32>
    %214 = arith.mulf %212, %213 : vector<256x16xf32>
    %215 = vector.broadcast %194 : vector<1x16xf32> to vector<256x16xf32>
    %216 = arith.addf %214, %215 : vector<256x16xf32>
    %217 = arith.truncf %216 : vector<256x16xf32> to vector<256x16xbf16>
    %c0_103 = arith.constant 0 : index
    %c0_104 = arith.constant 0 : index
    %218 = vector.load %arg29[%c0_103, %c0_104] : memref<16x32xbf16, #tpu.memory_space<vmem>>, vector<16x32xbf16>
    %cst_105 = arith.constant dense<0.000000e+00> : vector<256x32xf32>
    %219 = tpu.matmul %217, %218, %cst_105 {dimension_numbers = #tpu.dot_dimension_numbers<[1], [0], [0], [1], [0, 0, 1, 1], [], []>} : vector<256x16xbf16>, vector<16x32xbf16>, vector<256x32xf32> -> vector<256x32xf32>
    %c0_106 = arith.constant 0 : index
    %c0_107 = arith.constant 0 : index
    %220 = vector.load %arg30[%c0_106, %c0_107] : memref<1x32xf32, #tpu.memory_space<vmem>>, vector<1x32xf32>
    %221 = vector.broadcast %220 : vector<1x32xf32> to vector<256x32xf32>
    %222 = arith.addf %219, %221 : vector<256x32xf32>
    %cst_108 = arith.constant 5.000000e-01 : f32
    %223 = vector.broadcast %cst_108 : f32 to vector<256x32xf32>
    %224 = arith.mulf %223, %222 : vector<256x32xf32>
    %cst_109 = arith.constant 0.707106769 : f32
    %225 = vector.broadcast %cst_109 : f32 to vector<256x32xf32>
    %226 = arith.mulf %222, %225 : vector<256x32xf32>
    %227 = math.erf %226 : vector<256x32xf32>
    %cst_110 = arith.constant 1.000000e+00 : f32
    %228 = vector.broadcast %cst_110 : f32 to vector<256x32xf32>
    %229 = arith.addf %228, %227 : vector<256x32xf32>
    %230 = arith.mulf %224, %229 : vector<256x32xf32>
    %231 = arith.truncf %230 : vector<256x32xf32> to vector<256x32xbf16>
    %c0_111 = arith.constant 0 : index
    %c0_112 = arith.constant 0 : index
    %232 = vector.load %arg31[%c0_111, %c0_112] : memref<32x16xbf16, #tpu.memory_space<vmem>>, vector<32x16xbf16>
    %cst_113 = arith.constant dense<0.000000e+00> : vector<256x16xf32>
    %233 = tpu.matmul %231, %232, %cst_113 {dimension_numbers = #tpu.dot_dimension_numbers<[1], [0], [0], [1], [0, 0, 1, 1], [], []>} : vector<256x32xbf16>, vector<32x16xbf16>, vector<256x16xf32> -> vector<256x16xf32>
    %c0_114 = arith.constant 0 : index
    %c0_115 = arith.constant 0 : index
    %234 = vector.load %arg32[%c0_114, %c0_115] : memref<1x16xf32, #tpu.memory_space<vmem>>, vector<1x16xf32>
    %235 = vector.broadcast %234 : vector<1x16xf32> to vector<256x16xf32>
    %236 = arith.addf %233, %235 : vector<256x16xf32>
    %237 = arith.addf %236, %123 : vector<256x16xf32>
    %c0_116 = arith.constant 0 : index
    %c0_117 = arith.constant 0 : index
    %c0_118 = arith.constant 0 : index
    %238 = vector.load %arg34[%c0_116, %c0_117, %c0_118] : memref<1x256x16xf32, #tpu.memory_space<vmem>>, vector<1x256x16xf32>
    %239 = vector.shape_cast %238 : vector<1x256x16xf32> to vector<256x16xf32>
    %240 = vector.shape_cast %237 : vector<256x16xf32> to vector<1x256x16xf32>
    tpu.vector_store %arg34[%c0_116, %c0_117, %c0_118], %240 {strides = array<i32>} : memref<1x256x16xf32, #tpu.memory_space<vmem>>, vector<1x256x16xf32>,
    return
  }
  func.func @transform_0(%arg0: i32, %arg1: i32) -> (i32, i32, i32) {
    %c0_i32 = arith.constant 0 : i32
    %c0_i32_0 = arith.constant 0 : i32
    return %arg0, %arg1, %c0_i32 : i32, i32, i32
  }
  func.func @transform_1(%arg0: i32, %arg1: i32) -> (i32, i32, i32) {
    %c0_i32 = arith.constant 0 : i32
    %c0_i32_0 = arith.constant 0 : i32
    %c0_i32_1 = arith.constant 0 : i32
    return %arg0, %c0_i32, %c0_i32_0 : i32, i32, i32
  }
  func.func @transform_2(%arg0: i32, %arg1: i32) -> (i32, i32, i32) {
    %c0_i32 = arith.constant 0 : i32
    %c0_i32_0 = arith.constant 0 : i32
    return %arg0, %arg1, %c0_i32 : i32, i32, i32
  }
  func.func @transform_3(%arg0: i32, %arg1: i32) -> (i32, i32) {
    %c0_i32 = arith.constant 0 : i32
    %c0_i32_0 = arith.constant 0 : i32
    %c0_i32_1 = arith.constant 0 : i32
    return %c0_i32, %c0_i32_0 : i32, i32
  }
  func.func @transform_4(%arg0: i32, %arg1: i32) -> (i32, i32) {
    %c0_i32 = arith.constant 0 : i32
    %c0_i32_0 = arith.constant 0 : i32
    %c0_i32_1 = arith.constant 0 : i32
    return %c0_i32, %c0_i32_0 : i32, i32
  }
  func.func @transform_5(%arg0: i32, %arg1: i32) -> (i32, i32) {
    %c0_i32 = arith.constant 0 : i32
    %c0_i32_0 = arith.constant 0 : i32
    %c0_i32_1 = arith.constant 0 : i32
    return %c0_i32, %c0_i32_0 : i32, i32
  }
  func.func @transform_6(%arg0: i32, %arg1: i32) -> (i32, i32) {
    %c0_i32 = arith.constant 0 : i32
    %c0_i32_0 = arith.constant 0 : i32
    %c0_i32_1 = arith.constant 0 : i32
    return %c0_i32, %c0_i32_0 : i32, i32
  }
  func.func @transform_7(%arg0: i32, %arg1: i32) -> (i32, i32) {
    %c0_i32 = arith.constant 0 : i32
    %c0_i32_0 = arith.constant 0 : i32
    %c0_i32_1 = arith.constant 0 : i32
    return %c0_i32, %c0_i32_0 : i32, i32
  }
  func.func @transform_8(%arg0: i32, %arg1: i32) -> (i32, i32) {
    %c0_i32 = arith.constant 0 : i32
    %c0_i32_0 = arith.constant 0 : i32
    %c0_i32_1 = arith.constant 0 : i32
    return %c0_i32, %c0_i32_0 : i32, i32
  }
  func.func @transform_9(%arg0: i32, %arg1: i32) -> (i32, i32) {
    %c0_i32 = arith.constant 0 : i32
    %c0_i32_0 = arith.constant 0 : i32
    %c0_i32_1 = arith.constant 0 : i32
    return %c0_i32, %c0_i32_0 : i32, i32
  }
  func.func @transform_10(%arg0: i32, %arg1: i32) -> (i32, i32) {
    %c0_i32 = arith.constant 0 : i32
    %c0_i32_0 = arith.constant 0 : i32
    %c0_i32_1 = arith.constant 0 : i32
    return %c0_i32, %c0_i32_0 : i32, i32
  }
  func.func @transform_11(%arg0: i32, %arg1: i32) -> (i32, i32) {
    %c0_i32 = arith.constant 0 : i32
    %c0_i32_0 = arith.constant 0 : i32
    %c0_i32_1 = arith.constant 0 : i32
    return %c0_i32, %c0_i32_0 : i32, i32
  }
  func.func @transform_12(%arg0: i32, %arg1: i32) -> (i32, i32) {
    %c0_i32 = arith.constant 0 : i32
    %c0_i32_0 = arith.constant 0 : i32
    %c0_i32_1 = arith.constant 0 : i32
    return %c0_i32, %c0_i32_0 : i32, i32
  }
  func.func @transform_13(%arg0: i32, %arg1: i32) -> (i32, i32) {
    %c0_i32 = arith.constant 0 : i32
    %c0_i32_0 = arith.constant 0 : i32
    %c0_i32_1 = arith.constant 0 : i32
    return %c0_i32, %c0_i32_0 : i32, i32
  }
  func.func @transform_14(%arg0: i32, %arg1: i32) -> (i32, i32) {
    %c0_i32 = arith.constant 0 : i32
    %c0_i32_0 = arith.constant 0 : i32
    %c0_i32_1 = arith.constant 0 : i32
    return %c0_i32, %c0_i32_0 : i32, i32
  }
  func.func @transform_15(%arg0: i32, %arg1: i32) -> (i32, i32) {
    %c0_i32 = arith.constant 0 : i32
    %c0_i32_0 = arith.constant 0 : i32
    %c0_i32_1 = arith.constant 0 : i32
    return %c0_i32, %c0_i32_0 : i32, i32
  }
  func.func @transform_16(%arg0: i32, %arg1: i32) -> (i32, i32) {
    %c0_i32 = arith.constant 0 : i32
    %c0_i32_0 = arith.constant 0 : i32
    %c0_i32_1 = arith.constant 0 : i32
    return %c0_i32, %c0_i32_0 : i32, i32
  }
  func.func @transform_17(%arg0: i32, %arg1: i32) -> (i32, i32) {
    %c0_i32 = arith.constant 0 : i32
    %c0_i32_0 = arith.constant 0 : i32
    %c0_i32_1 = arith.constant 0 : i32
    return %c0_i32, %c0_i32_0 : i32, i32
  }
  func.func @transform_18(%arg0: i32, %arg1: i32) -> (i32, i32) {
    %c0_i32 = arith.constant 0 : i32
    %c0_i32_0 = arith.constant 0 : i32
    %c0_i32_1 = arith.constant 0 : i32
    return %c0_i32, %c0_i32_0 : i32, i32
  }
  func.func @transform_19(%arg0: i32, %arg1: i32) -> (i32, i32) {
    %c0_i32 = arith.constant 0 : i32
    %c0_i32_0 = arith.constant 0 : i32
    %c0_i32_1 = arith.constant 0 : i32
    return %c0_i32, %c0_i32_0 : i32, i32
  }
  func.func @transform_20(%arg0: i32, %arg1: i32) -> (i32, i32) {
    %c0_i32 = arith.constant 0 : i32
    %c0_i32_0 = arith.constant 0 : i32
    %c0_i32_1 = arith.constant 0 : i32
    return %c0_i32, %c0_i32_0 : i32, i32
  }
  func.func @transform_21(%arg0: i32, %arg1: i32) -> (i32, i32) {
    %c0_i32 = arith.constant 0 : i32
    %c0_i32_0 = arith.constant 0 : i32
    %c0_i32_1 = arith.constant 0 : i32
    return %c0_i32, %c0_i32_0 : i32, i32
  }
  func.func @transform_22(%arg0: i32, %arg1: i32) -> (i32, i32) {
    %c0_i32 = arith.constant 0 : i32
    %c0_i32_0 = arith.constant 0 : i32
    %c0_i32_1 = arith.constant 0 : i32
    return %c0_i32, %c0_i32_0 : i32, i32
  }
  func.func @transform_23(%arg0: i32, %arg1: i32) -> (i32, i32) {
    %c0_i32 = arith.constant 0 : i32
    %c0_i32_0 = arith.constant 0 : i32
    %c0_i32_1 = arith.constant 0 : i32
    return %c0_i32, %c0_i32_0 : i32, i32
  }
  func.func @transform_24(%arg0: i32, %arg1: i32) -> (i32, i32) {
    %c0_i32 = arith.constant 0 : i32
    %c0_i32_0 = arith.constant 0 : i32
    %c0_i32_1 = arith.constant 0 : i32
    return %c0_i32, %c0_i32_0 : i32, i32
  }
  func.func @transform_25(%arg0: i32, %arg1: i32) -> (i32, i32) {
    %c0_i32 = arith.constant 0 : i32
    %c0_i32_0 = arith.constant 0 : i32
    %c0_i32_1 = arith.constant 0 : i32
    return %c0_i32, %c0_i32_0 : i32, i32
  }
  func.func @transform_26(%arg0: i32, %arg1: i32) -> (i32, i32) {
    %c0_i32 = arith.constant 0 : i32
    %c0_i32_0 = arith.constant 0 : i32
    %c0_i32_1 = arith.constant 0 : i32
    return %c0_i32, %c0_i32_0 : i32, i32
  }
  func.func @transform_27(%arg0: i32, %arg1: i32) -> (i32, i32) {
    %c0_i32 = arith.constant 0 : i32
    %c0_i32_0 = arith.constant 0 : i32
    %c0_i32_1 = arith.constant 0 : i32
    return %c0_i32, %c0_i32_0 : i32, i32
  }
  func.func @transform_28(%arg0: i32, %arg1: i32) -> (i32, i32) {
    %c0_i32 = arith.constant 0 : i32
    %c0_i32_0 = arith.constant 0 : i32
    %c0_i32_1 = arith.constant 0 : i32
    return %c0_i32, %c0_i32_0 : i32, i32
  }
  func.func @transform_29(%arg0: i32, %arg1: i32) -> (i32, i32) {
    %c0_i32 = arith.constant 0 : i32
    %c0_i32_0 = arith.constant 0 : i32
    %c0_i32_1 = arith.constant 0 : i32
    return %c0_i32, %c0_i32_0 : i32, i32
  }
  func.func @transform_30(%arg0: i32, %arg1: i32) -> (i32, i32) {
    %c0_i32 = arith.constant 0 : i32
    %c0_i32_0 = arith.constant 0 : i32
    %c0_i32_1 = arith.constant 0 : i32
    return %c0_i32, %c0_i32_0 : i32, i32
  }
  func.func @transform_31(%arg0: i32, %arg1: i32) -> (i32, i32, i32) {
    %c0_i32 = arith.constant 0 : i32
    %c0_i32_0 = arith.constant 0 : i32
    return %arg0, %arg1, %c0_i32 : i32, i32, i32
  }
  func.func @transform_32(%arg0: i32, %arg1: i32) -> (i32, i32, i32) {
    %c0_i32 = arith.constant 0 : i32
    %c0_i32_0 = arith.constant 0 : i32
    return %arg0, %arg1, %c0_i32 : i32, i32, i32
  }
}

</mosaic_0001>

<bundles_post_ra>
// kernel: graph_transformer_layer.1
= control target key start
LH: loop header
LB: loop body
LE: loop exit
PB: predicated region body
PF: predicated region fallthrough
CT: control target
= control target key end

     0   :  { %s9578_s6 = smov 1   ;;  %s9579_s10 = smov 2   ;;  %s14007_s0 = inlined_call_operand.smem [shape: u32[33], index: -1, kind: input, shape index: {}] }
   0x1   :  { %s9656_s5 = sld [smem:[%s14007_s0]]   ;;  %s9580_s14 = smov 3  }
   0x2   :  { %s9661_s9 = sld [smem:[%s14007_s0 + %s9578_s6]]   ;;  %s9581_s18 = smov 4  }
   0x3   :  { %s9666_s13 = sld [smem:[%s14007_s0 + %s9579_s10]]   ;;  %s9582_s22 = smov 5  }
   0x4   :  { %s9671_s17 = sld [smem:[%s14007_s0 + %s9580_s14]]   ;;  %s9583_s26 = smov 6  }
   0x5   :  { %s9676_s21 = sld [smem:[%s14007_s0 + %s9581_s18]]   ;;  %s9584_s30 = smov 7  }
   0x6   :  { %s9681_s25 = sld [smem:[%s14007_s0 + %s9582_s22]]   ;;  %s9585_s4 = smov 8  }
   0x7   :  { %14071 = sst [smem:[#allocation47_spill]] %s9656_s5  ;;  %s9586_s10 = smov 9  }
   0x8   :  { %14072 = sst [smem:[#allocation48_spill]] %s9661_s9  ;;  %s9587_s15 = smov 10  }
   0x9   :  { %14073 = sst [smem:[#allocation49_spill]] %s9666_s13  ;;  %s9588_s20 = smov 11  }
   0xa   :  { %14074 = sst [smem:[#allocation50_spill]] %s9671_s17  ;;  %s9590_s1 = smov 13  }
   0xb   :  { %14075 = sst [smem:[#allocation51_spill]] %s9676_s21  ;;  %s9591_s7 = smov 14  }
   0xc   :  { %14076 = sst [smem:[#allocation52_spill]] %s9681_s25  ;;  %s9593_s22 = smov 16  }
   0xd   :  { %s9686_s29 = sld [smem:[%s14007_s0 + %s9583_s26]]   ;;  %s9589_s26 = smov 12  }
   0xe   :  { %s9691_s3 = sld [smem:[%s14007_s0 + %s9584_s30]]   ;;  %s9594_s28 = smov 17  }
   0xf   :  { %s9696_s8 = sld [smem:[%s14007_s0 + %s9585_s4]]  }
  0x10   :  { %s9701_s14 = sld [smem:[%s14007_s0 + %s9586_s10]]  }
  0x11   :  { %s9706_s19 = sld [smem:[%s14007_s0 + %s9587_s15]]   ;;  %s9592_s15 = smov 15  }
  0x12   :  { %s9711_s24 = sld [smem:[%s14007_s0 + %s9588_s20]]  }
  0x13   :  { %s9716_s30 = sld [smem:[%s14007_s0 + %s9589_s26]]  }
  0x14   :  { %14077 = sst [smem:[#allocation53_spill]] %s9691_s3 }
  0x15   :  { %14078 = sst [smem:[#allocation54_spill]] %s9696_s8 }
  0x16   :  { %14079 = sst [smem:[#allocation55_spill]] %s9701_s14 }
  0x17   :  { %14080 = sst [smem:[#allocation56_spill]] %s9706_s19 }
  0x18   :  { %s9721_s6 = sld [smem:[%s14007_s0 + %s9590_s1]]  }
  0x19   :  { %s9726_s12 = sld [smem:[%s14007_s0 + %s9591_s7]]   ;;  %s9595_s7 = smov 18  }
  0x1a   :  { %s9731_s20 = sld [smem:[%s14007_s0 + %s9592_s15]]   ;;  %s9596_s15 = smov 19  }
  0x1b   :  { %s9736_s27 = sld [smem:[%s14007_s0 + %s9593_s22]]   ;;  %s9597_s22 = smov 20  }
  0x1c   :  { %s9741_s4 = sld [smem:[%s14007_s0 + %s9594_s28]]   ;;  %s9598_s28 = smov 21  }
  0x1d   :  { %s9746_s25 = sld [smem:[%s14007_s0 + %s9595_s7]]   ;;  %s9599_s7 = smov 22  }
  0x1e   :  { %14081 = sst [smem:[#allocation57_spill]] %s9721_s6 }
  0x1f   :  { %14082 = sst [smem:[#allocation58_spill]] %s9726_s12 }
  0x20   :  { %14083 = sst [smem:[#allocation59_spill]] %s9731_s20 }
  0x21   :  { %s9751_s20 = sld [smem:[%s14007_s0 + %s9596_s15]]   ;;  %s9600_s15 = smov 23  }
  0x22   :  { %14084 = sst [smem:[#allocation60_spill]] %s9741_s4 }
  0x23   :  { %s9756_s21 = sld [smem:[%s14007_s0 + %s9597_s22]]   ;;  %s9601_s22 = smov 24  }
  0x24   :  { %s9761_s4 = sld [smem:[%s14007_s0 + %s9598_s28]]   ;;  %s9602_s28 = smov 25  }
  0x25   :  { %s9766_s17 = sld [smem:[%s14007_s0 + %s9599_s7]]   ;;  %s9603_s7 = smov 26  }
  0x26   :  { %s9771_s14 = sld [smem:[%s14007_s0 + %s9600_s15]]   ;;  %s9604_s15 = smov 27  }
  0x27   :  { %s9776_s3 = sld [smem:[%s14007_s0 + %s9601_s22]]   ;;  %s9605_s22 = smov 28  }
  0x28   :  { %s9781_s5 = sld [smem:[%s14007_s0 + %s9602_s28]]   ;;  %s9606_s28 = smov 29  }
  0x29   :  { %s9786_s9 = sld [smem:[%s14007_s0 + %s9603_s7]]   ;;  %s9607_s7 = smov 30  }
  0x2a   :  { %14085 = sst [smem:[#allocation61_spill]] %s9761_s4 }
  0x2b   :  { %14086 = sst [smem:[#allocation62_spill]] %s9766_s17 }
  0x2c   :  { %14087 = sst [smem:[#allocation63_spill]] %s9771_s14 }
  0x2d   :  { %14088 = sst [smem:[#allocation64_spill]] %s9776_s3 }
  0x2e   :  { %14089 = sst [smem:[#allocation65_spill]] %s9781_s5 }
  0x2f   :  { %14090 = sst [smem:[#allocation66_spill]] %s9786_s9 }
  0x30   :  { %s9791_s14 = sld [smem:[%s14007_s0 + %s9604_s15]]   ;;  %s9608_s15 = smov 31  }
  0x31   :  { %s9796_s13 = sld [smem:[%s14007_s0 + %s9605_s22]]   ;;  %s9609_s22 = smov 32  }
  0x32   :  { %s9801_s3 = sld [smem:[%s14007_s0 + %s9606_s28]]  }
  0x33   :  { %s9806_s9 = sld [smem:[%s14007_s0 + %s9607_s7]]  }
  0x34   :  { %s9816_s4 = sld [smem:[%s14007_s0 + %s9609_s22]]  }
  0x36   :  { %14091 = sst [smem:[#allocation67_spill]] %s9791_s14 }
  0x37   :  { %14092 = sst [smem:[#allocation68_spill]] %s9796_s13 }
  0x38   :  { %14093 = sst [smem:[#allocation69_spill]] %s9801_s3 }
  0x39   :  { %14094 = sst [smem:[#allocation70_spill]] %s9806_s9 }
  0x3a   :  { %s9811_s14 = sld [smem:[%s14007_s0 + %s9608_s15]]  }
  0x3b   :  { %14096 = sst [smem:[#allocation72_spill]] %s9816_s4 }
  0x40   :  { %14095 = sst [smem:[#allocation71_spill]] %s9811_s14 }
  0x41   :  { %71 = vsyncpa [#allocation3], 0 }
  0x42   :  { %73 = vsyncpa [#allocation3 + $0x1], 0 }
  0x43   :  { %74 = vsyncpa [#allocation6], 0 }
  0x44   :  { %75 = vsyncpa [#allocation9], 0 }
  0x45   :  { %76 = vsyncpa [#allocation12], 0 }
  0x46   :  { %77 = vsyncpa [#allocation15], 0 }
  0x47   :  { %78 = vsyncpa [#allocation18], 0 }
  0x48   :  { %79 = vsyncpa [#allocation21], 0 }
  0x49   :  { %80 = vsyncpa [#allocation24], 0 }
  0x4a   :  { %81 = vsyncpa [#allocation27], 0 }
  0x4b   :  { %82 = vsyncpa [#allocation30], 0 }
  0x4c   :  { %83 = vsyncpa [#allocation4], 0 }
  0x4d   :  { %85 = vsyncpa [#allocation4 + $0x1], 0 }
  0x4e   :  { %86 = vsyncpa [#allocation34], 0 }
  0x4f   :  { %88 = vsyncpa [#allocation34 + $0x1], 0  ;;  %s9818_s28 = smov 0   ;;  %s9820_s1 = smov 0  }
  0x50   :  { %s9822_s0 = smov 0   ;;  %s9824_s2 = smov 0  }
  0x51   :  { %s9826_s7 = smov 0   ;;  %s9828_s10 = smov 0  }
  0x52 LB: > { %s14097_s19 = sld [smem:[#allocation56_spill]]  ;;  %s14016_s11 = sadd.s32 4294967295, %s9576_s10   ;;  %s9560_s1 = sphi %s9820_s1, %s14254_s1   ;;  %s9556_s28 = sphi %s9818_s28, %s14253_s28   ;;  %s9576_s10 = sphi %s9828_s10, %s94_s10   ;;  %s9572_s7 = sphi %s9826_s7, %s14257_s7   ;;  %s9568_s2 = sphi %s9824_s2, %s14256_s2   ;;  %s9564_s0 = sphi %s9822_s0, %s14255_s0  }
  0x53   : > { %s14098_s17 = sld [smem:[#allocation62_spill]]  ;;  %p7901_p0 = scmp.ge.s32.totalorder %s9576_s10, 1 }
  0x54   : > { %s14099_s13 = sld [smem:[#allocation68_spill]]  ;;  %p9852_p1 = scmp.eq.s32.totalorder %s14016_s11, 0 }
  0x55   : > { %s14100_s9 = sld [smem:[#allocation70_spill]]  ;;  %p837_p2 = scmp.lt.s32.totalorder %s9576_s10, 3 }
  0x56   : > { %s14101_s12 = sld [smem:[#allocation58_spill]]  ;;  %s858_s16 = sshll.u32 %s9686_s29, 4  ;;  %s859_s16 = int_to_ptr.hbm [resolvable:$true] %s858_s16 }
  0x57   : > { %s14102_s8 = sld [smem:[#allocation54_spill]]  ;;  %p9858_p3 = pnand %p7901_p0, %p837_p2 }
  0x58   : > { %s14103_s6 = sld [smem:[#allocation57_spill]]  ;;  %s9610_s22 = smov [#allocation5]  }
  0x59   : > { %s14104_s5 = sld [smem:[#allocation65_spill]]  ;;  %p8262_p5 = pneg %p9858_p3 }
  0x5a   : > { %14105 = sst [smem:[#allocation73_spill]] %s9556_s28  ;;  %s860_s23 = sshll.u32 %s9610_s22, 4  ;;  %s861_s23 = int_to_ptr.vmem [resolvable:$true] %s860_s23 }
  0x5b   : > { %14106 = sst [smem:[#allocation74_spill]] %s9568_s2  ;;  %s888_s26 = sshll.u32 %s14097_s19, 4  ;;  %s9872_s26 = int_to_ptr.hbm [resolvable:$true] %s888_s26 }
  0x5c   : > { %s14107_s15 = scalar_select %p9852_p1, 1, 0 }
  0x5d   : > { %s14109_s18 = scalar_select %p9858_p3, 1, 0 }
  0x5e   : > { %14108 = sst [smem:[#allocation75_spill]] %s14107_s15  ;;  %p9868_p6 = pnand %p8262_p5, %p9852_p1 }
  0x5f   : > { %14110 = sst [smem:[#allocation76_spill]] %s14109_s18  ;;  %s914_s4 = sshll.u32 %s9716_s30, 4  ;;  %s9890_s4 = int_to_ptr.hbm [resolvable:$true] %s914_s4 }
  0x60   : > { %s9611_s14 = smov [#allocation8]   ;;  %s8856_s2 = sshra.s32 %s859_s16, 4  ;;  %s8857_s2 = int_to_ptr.hbm [resolvable:$true] %s8856_s2 }
  0x61   : > { %s9875_s3 = sshll.u32 %s9611_s14, 4  ;;  %s8858_s18 = scalar_lea.hbm %s8857_s2, 1  ;;  %s891_s3 = int_to_ptr.vmem [resolvable:$true] %s9875_s3 }
  0x62   : > { %p8859_p7 = scmp.ne.s32.totalorder %s8857_s2, %s8858_s18  ;;  %p9879_p8 = pneg %p9868_p6 }
  0x63   : > { %s8863_s15 = scalar_lea.hbm %s9686_s29, 1  ;;  %p8864_p11 = scmp.lt.s32.totalorder %s8857_s2, %s9686_s29 }
  0x64   : > { %p8861_p9 = pnand %p9879_p8, %p8859_p7  ;;  %p8865_p12 = scmp.lt.s32.totalorder %s8863_s15, %s8858_s18 }
  0x66   : > { %p8862_p10 = pneg %p8861_p9  ;;  %p8866_p13 = por %p8865_p12, %p8864_p11 }
  0x68   : > { %p8867_p0 = pnand %p8866_p13, %p8862_p10 }
  0x6a   : > { %8870 = shalt.err (!%p8867_p0)
}
  0x6b   : > { %8265 = dma.hbm_to_vmem [thread:$0]  (!%p9868_p6), %s859_s16, 16, %s861_s23, [#allocation6]  }
  0x6c   : > { %s8886_s14 = sshra.s32 %s9872_s26, 4  ;;  %s8893_s2 = scalar_lea.hbm %s14097_s19, 1  ;;  %s8887_s14 = int_to_ptr.hbm [resolvable:$true] %s8886_s14 }
  0x6d   : > { %s8888_s28 = scalar_lea.hbm %s8887_s14, 1  ;;  %p8894_p9 = scmp.lt.s32.totalorder %s8887_s14, %s14097_s19 }
  0x6e   : > { %p8889_p2 = scmp.ne.s32.totalorder %s8887_s14, %s8888_s28  ;;  %p8895_p10 = scmp.lt.s32.totalorder %s8893_s2, %s8888_s28 }
  0x70   : > { %p8891_p5 = pnand %p8889_p2, %p9879_p8  ;;  %p8896_p11 = por %p8895_p10, %p8894_p9 }
  0x72   : > { %p8892_p7 = pneg %p8891_p5 }
  0x74   : > { %p8897_p12 = pnand %p8896_p11, %p8892_p7 }
  0x76   : > { %8900 = shalt.err (!%p8897_p12)
}
  0x77   : > { %8271 = dma.hbm_to_vmem [thread:$0]  (!%p9868_p6), %s9872_s26, 16, %s891_s3, [#allocation9]  }
  0x78   : > { %s940_s15 = sshll.u32 %s14101_s12, 4  ;;  %s9612_s16 = smov [#allocation11]   ;;  %s9901_s15 = int_to_ptr.hbm [resolvable:$true] %s940_s15 }
  0x79   : > { %s916_s18 = sshll.u32 %s9612_s16, 4  ;;  %s8916_s23 = sshra.s32 %s9890_s4, 4  ;;  %s917_s18 = int_to_ptr.vmem [resolvable:$true] %s916_s18  ;;  %s8917_s23 = int_to_ptr.hbm [resolvable:$true] %s8916_s23 }
  0x7a   : > { %s8918_s28 = scalar_lea.hbm %s8917_s23, 1  ;;  %s8923_s14 = scalar_lea.hbm %s9716_s30, 1 }
  0x7b   : > { %p8919_p13 = scmp.ne.s32.totalorder %s8917_s23, %s8918_s28  ;;  %p8924_p5 = scmp.lt.s32.totalorder %s8917_s23, %s9716_s30 }
  0x7c   : > { %p8925_p7 = scmp.lt.s32.totalorder %s8923_s14, %s8918_s28 }
  0x7d   : > { %p8921_p0 = pnand %p8919_p13, %p9879_p8 }
  0x7e   : > { %p8926_p9 = por %p8925_p7, %p8924_p5 }
  0x7f   : > { %p8922_p2 = pneg %p8921_p0 }
  0x81   : > { %p8927_p10 = pnand %p8926_p9, %p8922_p2 }
  0x83   : > { %8930 = shalt.err (!%p8927_p10)
}
  0x84   : > { %8277 = dma.hbm_to_vmem [thread:$0]  (!%p9868_p6), %s9890_s4, 16, %s917_s18, [#allocation12]  }
  0x85   : > { %s9613_s3 = smov [#allocation14]   ;;  %s970_s2 = sshll.u32 %s9746_s25, 4  ;;  %s9912_s2 = int_to_ptr.hbm [resolvable:$true] %s970_s2 }
  0x86   : > { %s942_s26 = sshll.u32 %s9613_s3, 4  ;;  %s8946_s16 = sshra.s32 %s9901_s15, 4  ;;  %s943_s26 = int_to_ptr.vmem [resolvable:$true] %s942_s26  ;;  %s8947_s16 = int_to_ptr.hbm [resolvable:$true] %s8946_s16 }
  0x87   : > { %s8948_s23 = scalar_lea.hbm %s8947_s16, 1  ;;  %s8953_s28 = scalar_lea.hbm %s14101_s12, 1 }
  0x88   : > { %p8949_p11 = scmp.ne.s32.totalorder %s8947_s16, %s8948_s23  ;;  %p8954_p0 = scmp.lt.s32.totalorder %s8947_s16, %s14101_s12 }
  0x89   : > { %p8955_p2 = scmp.lt.s32.totalorder %s8953_s28, %s8948_s23 }
  0x8a   : > { %p8951_p12 = pnand %p8949_p11, %p9879_p8 }
  0x8b   : > { %p8956_p5 = por %p8955_p2, %p8954_p0 }
  0x8c   : > { %p8952_p13 = pneg %p8951_p12 }
  0x8e   : > { %p8957_p7 = pnand %p8956_p5, %p8952_p13 }
  0x90   : > { %8960 = shalt.err (!%p8957_p7)
}
  0x91   : > { %8283 = dma.hbm_to_vmem [thread:$0]  (!%p9868_p6), %s9901_s15, 16, %s943_s26, [#allocation15]  }
  0x92   : > { %s994_s4 = sshll.u32 %s9756_s21, 4  ;;  %s9614_s18 = smov [#allocation17]   ;;  %s9923_s4 = int_to_ptr.hbm [resolvable:$true] %s994_s4 }
  0x93   : > { %s972_s14 = sshll.u32 %s9614_s18, 4  ;;  %s8976_s3 = sshra.s32 %s9912_s2, 4  ;;  %s973_s14 = int_to_ptr.vmem [resolvable:$true] %s972_s14  ;;  %s8977_s3 = int_to_ptr.hbm [resolvable:$true] %s8976_s3 }
  0x94   : > { %s8978_s16 = scalar_lea.hbm %s8977_s3, 1  ;;  %s8983_s23 = scalar_lea.hbm %s9746_s25, 1 }
  0x95   : > { %p8979_p9 = scmp.ne.s32.totalorder %s8977_s3, %s8978_s16  ;;  %p8984_p12 = scmp.lt.s32.totalorder %s8977_s3, %s9746_s25 }
  0x96   : > { %p8985_p13 = scmp.lt.s32.totalorder %s8983_s23, %s8978_s16 }
  0x97   : > { %p8981_p10 = pnand %p8979_p9, %p9879_p8 }
  0x98   : > { %p8986_p0 = por %p8985_p13, %p8984_p12 }
  0x99   : > { %p8982_p11 = pneg %p8981_p10 }
  0x9b   : > { %p8987_p2 = pnand %p8986_p0, %p8982_p11 }
  0x9d   : > { %8990 = shalt.err (!%p8987_p2)
}
  0x9e   : > { %8289 = dma.hbm_to_vmem [thread:$0]  (!%p9868_p6), %s9912_s2, 16, %s973_s14, [#allocation18]  }
  0x9f   : > { %s9615_s15 = smov [#allocation20]   ;;  %s1020_s28 = sshll.u32 %s14098_s17, 4  ;;  %s9934_s28 = int_to_ptr.hbm [resolvable:$true] %s1020_s28 }
  0xa0   : > { %s996_s26 = sshll.u32 %s9615_s15, 4  ;;  %s9006_s18 = sshra.s32 %s9923_s4, 4  ;;  %s997_s26 = int_to_ptr.vmem [resolvable:$true] %s996_s26  ;;  %s9007_s18 = int_to_ptr.hbm [resolvable:$true] %s9006_s18 }
  0xa1   : > { %s9008_s3 = scalar_lea.hbm %s9007_s18, 1  ;;  %s9013_s16 = scalar_lea.hbm %s9756_s21, 1 }
  0xa2   : > { %p9009_p5 = scmp.ne.s32.totalorder %s9007_s18, %s9008_s3  ;;  %p9014_p10 = scmp.lt.s32.totalorder %s9007_s18, %s9756_s21 }
  0xa3   : > { %p9015_p11 = scmp.lt.s32.totalorder %s9013_s16, %s9008_s3 }
  0xa4   : > { %p9011_p7 = pnand %p9009_p5, %p9879_p8 }
  0xa5   : > { %p9016_p12 = por %p9015_p11, %p9014_p10 }
  0xa6   : > { %p9012_p9 = pneg %p9011_p7 }
  0xa8   : > { %p9017_p13 = pnand %p9016_p12, %p9012_p9 }
  0xaa   : > { %9020 = shalt.err (!%p9017_p13)
}
  0xab   : > { %8295 = dma.hbm_to_vmem [thread:$0]  (!%p9868_p6), %s9923_s4, 16, %s997_s26, [#allocation21]  }
  0xac   : > { %s1047_s2 = sshll.u32 %s14104_s5, 4  ;;  %s9616_s14 = smov [#allocation23]   ;;  %s9945_s2 = int_to_ptr.hbm [resolvable:$true] %s1047_s2 }
  0xad   : > { %s1022_s23 = sshll.u32 %s9616_s14, 4  ;;  %s9036_s15 = sshra.s32 %s9934_s28, 4  ;;  %s1023_s23 = int_to_ptr.vmem [resolvable:$true] %s1022_s23  ;;  %s9037_s15 = int_to_ptr.hbm [resolvable:$true] %s9036_s15 }
  0xae   : > { %s9038_s18 = scalar_lea.hbm %s9037_s15, 1  ;;  %s9043_s3 = scalar_lea.hbm %s14098_s17, 1 }
  0xaf   : > { %p9039_p0 = scmp.ne.s32.totalorder %s9037_s15, %s9038_s18  ;;  %p9044_p7 = scmp.lt.s32.totalorder %s9037_s15, %s14098_s17 }
  0xb0   : > { %p9045_p9 = scmp.lt.s32.totalorder %s9043_s3, %s9038_s18 }
  0xb1   : > { %p9041_p2 = pnand %p9039_p0, %p9879_p8 }
  0xb2   : > { %p9046_p10 = por %p9045_p9, %p9044_p7 }
  0xb3   : > { %p9042_p5 = pneg %p9041_p2 }
  0xb5   : > { %p9047_p11 = pnand %p9046_p10, %p9042_p5 }
  0xb7   : > { %9050 = shalt.err (!%p9047_p11)
}
  0xb8   : > { %8301 = dma.hbm_to_vmem [thread:$0]  (!%p9868_p6), %s9934_s28, 16, %s1023_s23, [#allocation24]  }
  0xb9   : > { %s9617_s4 = smov [#allocation26]   ;;  %s1074_s16 = sshll.u32 %s14099_s13, 4  ;;  %s9956_s16 = int_to_ptr.hbm [resolvable:$true] %s1074_s16 }
  0xba   : > { %s1049_s26 = sshll.u32 %s9617_s4, 4  ;;  %s9066_s14 = sshra.s32 %s9945_s2, 4  ;;  %s1050_s26 = int_to_ptr.vmem [resolvable:$true] %s1049_s26  ;;  %s9067_s14 = int_to_ptr.hbm [resolvable:$true] %s9066_s14 }
  0xbb   : > { %s9068_s15 = scalar_lea.hbm %s9067_s14, 1  ;;  %s9073_s18 = scalar_lea.hbm %s14104_s5, 1 }
  0xbc   : > { %p9069_p12 = scmp.ne.s32.totalorder %s9067_s14, %s9068_s15  ;;  %p9074_p2 = scmp.lt.s32.totalorder %s9067_s14, %s14104_s5 }
  0xbd   : > { %p9075_p5 = scmp.lt.s32.totalorder %s9073_s18, %s9068_s15 }
  0xbe   : > { %p9071_p13 = pnand %p9069_p12, %p9879_p8 }
  0xbf   : > { %p9076_p7 = por %p9075_p5, %p9074_p2 }
  0xc0   : > { %p9072_p0 = pneg %p9071_p13 }
  0xc2   : > { %p9077_p9 = pnand %p9076_p7, %p9072_p0 }
  0xc4   : > { %9080 = shalt.err (!%p9077_p9)
}
  0xc5   : > { %8307 = dma.hbm_to_vmem [thread:$0]  (!%p9868_p6), %s9945_s2, 16, %s1050_s26, [#allocation27]  }
  0xc6   : > { %s873_s28 = sshll.u32 %s14102_s8, 4  ;;  %s9618_s23 = smov [#allocation29]   ;;  %s9967_s28 = int_to_ptr.hbm [resolvable:$true] %s873_s28 }
  0xc7   : > { %s1076_s3 = sshll.u32 %s9618_s23, 4  ;;  %s9096_s4 = sshra.s32 %s9956_s16, 4  ;;  %s1077_s3 = int_to_ptr.vmem [resolvable:$true] %s1076_s3  ;;  %s9097_s4 = int_to_ptr.hbm [resolvable:$true] %s9096_s4 }
  0xc8   : > { %s9098_s14 = scalar_lea.hbm %s9097_s4, 1  ;;  %s9103_s15 = scalar_lea.hbm %s14099_s13, 1 }
  0xc9   : > { %p9099_p10 = scmp.ne.s32.totalorder %s9097_s4, %s9098_s14  ;;  %p9104_p13 = scmp.lt.s32.totalorder %s9097_s4, %s14099_s13 }
  0xca   : > { %p9105_p0 = scmp.lt.s32.totalorder %s9103_s15, %s9098_s14 }
  0xcb   : > { %p9101_p11 = pnand %p9099_p10, %p9879_p8 }
  0xcc   : > { %p9106_p2 = por %p9105_p0, %p9104_p13 }
  0xcd   : > { %p9102_p12 = pneg %p9101_p11 }
  0xcf   : > { %p9107_p5 = pnand %p9106_p2, %p9102_p12 }
  0xd1   : > { %9110 = shalt.err (!%p9107_p5)
}
  0xd2   : > { %8313 = dma.hbm_to_vmem [thread:$0]  (!%p9868_p6), %s9956_s16, 16, %s1077_s3, [#allocation30]  }
  0xd3   : > { %s9619_s2 = smov [#allocation7]   ;;  %s899_s18 = sshll.u32 %s9711_s24, 4  ;;  %s9978_s18 = int_to_ptr.hbm [resolvable:$true] %s899_s18 }
  0xd4   : > { %s875_s26 = sshll.u32 %s9619_s2, 4  ;;  %s9126_s23 = sshra.s32 %s9967_s28, 4  ;;  %s876_s26 = int_to_ptr.vmem [resolvable:$true] %s875_s26  ;;  %s9127_s23 = int_to_ptr.hbm [resolvable:$true] %s9126_s23 }
  0xd5   : > { %s9128_s4 = scalar_lea.hbm %s9127_s23, 1  ;;  %s9133_s14 = scalar_lea.hbm %s14102_s8, 1 }
  0xd6   : > { %p9129_p7 = scmp.ne.s32.totalorder %s9127_s23, %s9128_s4  ;;  %p9134_p11 = scmp.lt.s32.totalorder %s9127_s23, %s14102_s8 }
  0xd7   : > { %p9135_p12 = scmp.lt.s32.totalorder %s9133_s14, %s9128_s4 }
  0xd8   : > { %p9131_p9 = pnand %p9129_p7, %p9879_p8 }
  0xd9   : > { %p9136_p13 = por %p9135_p12, %p9134_p11 }
  0xda   : > { %p9132_p10 = pneg %p9131_p9 }
  0xdc   : > { %p9137_p0 = pnand %p9136_p13, %p9132_p10 }
  0xde   : > { %9140 = shalt.err (!%p9137_p0)
}
  0xdf   : > { %8268 = dma.hbm_to_vmem [thread:$0]  (!%p9868_p6), %s9967_s28, 16, %s876_s26, [#allocation6]  }
  0xe0   : > { %s9620_s16 = smov [#allocation10]   ;;  %s925_s15 = sshll.u32 %s14103_s6, 4  ;;  %s926_s15 = int_to_ptr.hbm [resolvable:$true] %s925_s15 }
  0xe1   : > { %s901_s3 = sshll.u32 %s9620_s16, 4  ;;  %s9156_s2 = sshra.s32 %s9978_s18, 4  ;;  %s902_s3 = int_to_ptr.vmem [resolvable:$true] %s901_s3  ;;  %s9157_s2 = int_to_ptr.hbm [resolvable:$true] %s9156_s2 }
  0xe2   : > { %s9158_s23 = scalar_lea.hbm %s9157_s2, 16  ;;  %s9163_s4 = scalar_lea.hbm %s9711_s24, 16 }
  0xe3   : > { %p9159_p2 = scmp.ne.s32.totalorder %s9157_s2, %s9158_s23  ;;  %p9164_p9 = scmp.lt.s32.totalorder %s9157_s2, %s9711_s24 }
  0xe4   : > { %p9165_p10 = scmp.lt.s32.totalorder %s9163_s4, %s9158_s23 }
  0xe5   : > { %p9161_p5 = pnand %p9159_p2, %p9879_p8 }
  0xe6   : > { %p9166_p11 = por %p9165_p10, %p9164_p9 }
  0xe7   : > { %p9162_p7 = pneg %p9161_p5 }
  0xe9   : > { %p9167_p12 = pnand %p9166_p11, %p9162_p7 }
  0xeb   : > { %9170 = shalt.err (!%p9167_p12)
}
  0xec   : > { %s14025_s14 = smov 64   ;;  %s14026_s28 = smov 4  }
  0xed   : > { %8274 = dma.hbm_to_vmem [thread:$0]  (!%p9868_p6), %s9978_s18, 256, %s902_s3, [#allocation9], %s14025_s14, %s14025_s14, %s14026_s28  }
  0xee   : > { %s9623_s26 = smov [#allocation13]   ;;  %s955_s2 = sshll.u32 %s9736_s27, 4  ;;  %s10001_s2 = int_to_ptr.hbm [resolvable:$true] %s955_s2 }
  0xef   : > { %s927_s16 = sshll.u32 %s9623_s26, 4  ;;  %s9186_s23 = sshra.s32 %s926_s15, 4  ;;  %s928_s16 = int_to_ptr.vmem [resolvable:$true] %s927_s16  ;;  %s9187_s23 = int_to_ptr.hbm [resolvable:$true] %s9186_s23 }
  0xf0   : > { %s9188_s4 = scalar_lea.hbm %s9187_s23, 16  ;;  %s9193_s5 = scalar_lea.hbm %s14103_s6, 16 }
  0xf1   : > { %p9189_p13 = scmp.ne.s32.totalorder %s9187_s23, %s9188_s4  ;;  %p9194_p5 = scmp.lt.s32.totalorder %s9187_s23, %s14103_s6 }
  0xf2   : > { %p9195_p7 = scmp.lt.s32.totalorder %s9193_s5, %s9188_s4 }
  0xf3   : > { %p9191_p0 = pnand %p9189_p13, %p9879_p8 }
  0xf4   : > { %p9196_p9 = por %p9195_p7, %p9194_p5 }
  0xf5   : > { %p9192_p2 = pneg %p9191_p0 }
  0xf7   : > { %p9197_p10 = pnand %p9196_p9, %p9192_p2 }
  0xf9   : > { %9200 = shalt.err (!%p9197_p10)
}
  0xfa   : > { %8280 = dma.hbm_to_vmem [thread:$0]  (!%p9868_p6), %s926_s15, 256, %s928_s16, [#allocation12], %s14025_s14, %s14025_s14, %s14026_s28  }
  0xfb   : > { %s982_s18 = sshll.u32 %s9751_s20, 4  ;;  %s9624_s3 = smov [#allocation16]   ;;  %s10013_s18 = int_to_ptr.hbm [resolvable:$true] %s982_s18 }
  0xfc   : > { %s957_s26 = sshll.u32 %s9624_s3, 4  ;;  %s9216_s5 = sshra.s32 %s10001_s2, 4  ;;  %s958_s26 = int_to_ptr.vmem [resolvable:$true] %s957_s26  ;;  %s9217_s5 = int_to_ptr.hbm [resolvable:$true] %s9216_s5 }
  0xfd   : > { %s9218_s23 = scalar_lea.hbm %s9217_s5, 1  ;;  %s9223_s4 = scalar_lea.hbm %s9736_s27, 1 }
  0xfe   : > { %p9219_p11 = scmp.ne.s32.totalorder %s9217_s5, %s9218_s23  ;;  %p9224_p0 = scmp.lt.s32.totalorder %s9217_s5, %s9736_s27 }
  0xff   : > { %p9225_p2 = scmp.lt.s32.totalorder %s9223_s4, %s9218_s23 }
 0x100   : > { %p9221_p12 = pnand %p9219_p11, %p9879_p8 }
 0x101   : > { %p9226_p5 = por %p9225_p2, %p9224_p0 }
 0x102   : > { %p9222_p13 = pneg %p9221_p12 }
 0x104   : > { %p9227_p7 = pnand %p9226_p5, %p9222_p13 }
 0x106   : > { %9230 = shalt.err (!%p9227_p7)
}
 0x107   : > { %s14113_s15 = sld [smem:[#allocation61_spill]]  ;;  %s9625_s16 = smov [#allocation19]  }
 0x108   : > { %8286 = dma.hbm_to_vmem [thread:$0]  (!%p9868_p6), %s10001_s2, 16, %s958_s26, [#allocation15]  }
 0x109   : > { %s984_s3 = sshll.u32 %s9625_s16, 4  ;;  %s9246_s5 = sshra.s32 %s10013_s18, 4  ;;  %s985_s3 = int_to_ptr.vmem [resolvable:$true] %s984_s3  ;;  %s9247_s5 = int_to_ptr.hbm [resolvable:$true] %s9246_s5 }
 0x10a   : > { %s9248_s23 = scalar_lea.hbm %s9247_s5, 1  ;;  %s9253_s4 = scalar_lea.hbm %s9751_s20, 1 }
 0x10b   : > { %p9249_p9 = scmp.ne.s32.totalorder %s9247_s5, %s9248_s23  ;;  %p9254_p12 = scmp.lt.s32.totalorder %s9247_s5, %s9751_s20 }
 0x10c   : > { %p9255_p13 = scmp.lt.s32.totalorder %s9253_s4, %s9248_s23 }
 0x10d   : > { %s1005_s14 = sshll.u32 %s14113_s15, 4  ;;  %p9251_p10 = pnand %p9249_p9, %p9879_p8  ;;  %s10024_s14 = int_to_ptr.hbm [resolvable:$true] %s1005_s14 }
 0x10e   : > { %p9256_p0 = por %p9255_p13, %p9254_p12 }
 0x10f   : > { %p9252_p11 = pneg %p9251_p10 }
 0x111   : > { %p9257_p2 = pnand %p9256_p0, %p9252_p11 }
 0x113   : > { %9260 = shalt.err (!%p9257_p2)
}
 0x114   : > { %s14114_s2 = sld [smem:[#allocation64_spill]]  ;;  %s9626_s28 = smov [#allocation22]  }
 0x115   : > { %8292 = dma.hbm_to_vmem [thread:$0]  (!%p9868_p6), %s10013_s18, 16, %s985_s3, [#allocation18]  }
 0x116   : > { %s1007_s6 = sshll.u32 %s9626_s28, 4  ;;  %s9276_s5 = sshra.s32 %s10024_s14, 4  ;;  %s1008_s6 = int_to_ptr.vmem [resolvable:$true] %s1007_s6  ;;  %s9277_s5 = int_to_ptr.hbm [resolvable:$true] %s9276_s5 }
 0x117   : > { %s9278_s23 = scalar_lea.hbm %s9277_s5, 16  ;;  %s9283_s4 = scalar_lea.hbm %s14113_s15, 16 }
 0x118   : > { %p9279_p5 = scmp.ne.s32.totalorder %s9277_s5, %s9278_s23  ;;  %p9284_p10 = scmp.lt.s32.totalorder %s9277_s5, %s14113_s15 }
 0x119   : > { %p9285_p11 = scmp.lt.s32.totalorder %s9283_s4, %s9278_s23 }
 0x11a   : > { %s14115_s26 = smov %s14114_s2  ;;  %s1035_s16 = sshll.u32 %s14114_s2, 4  ;;  %s10035_s16 = int_to_ptr.hbm [resolvable:$true] %s1035_s16 }
 0x11b   : > { %p9281_p7 = pnand %p9279_p5, %p9879_p8  ;;  %p9286_p12 = por %p9285_p11, %p9284_p10 }
 0x11d   : > { %p9282_p9 = pneg %p9281_p7 }
 0x11f   : > { %p9287_p13 = pnand %p9286_p12, %p9282_p9 }
 0x121   : > { %9290 = shalt.err (!%p9287_p13)
}
 0x122   : > { %s14116_s18 = smov 4   ;;  %s14117_s28 = smov 64  }
 0x123   : > { %s14118_s3 = sld [smem:[#allocation66_spill]]  ;;  %s9627_s2 = smov [#allocation25]  }
 0x124   : > { %8298 = dma.hbm_to_vmem [thread:$0]  (!%p9868_p6), %s10024_s14, 256, %s1008_s6, [#allocation21], %s14117_s28, %s14117_s28, %s14116_s18  }
 0x125   : > { %s1037_s8 = sshll.u32 %s9627_s2, 4  ;;  %s9306_s5 = sshra.s32 %s10035_s16, 4  ;;  %s1038_s8 = int_to_ptr.vmem [resolvable:$true] %s1037_s8  ;;  %s9307_s5 = int_to_ptr.hbm [resolvable:$true] %s9306_s5 }
 0x126   : > { %s9308_s23 = scalar_lea.hbm %s9307_s5, 1  ;;  %s9313_s4 = scalar_lea.hbm %s14115_s26, 1 }
 0x127   : > { %p9309_p0 = scmp.ne.s32.totalorder %s9307_s5, %s9308_s23  ;;  %p9314_p7 = scmp.lt.s32.totalorder %s9307_s5, %s14115_s26 }
 0x128   : > { %p9315_p9 = scmp.lt.s32.totalorder %s9313_s4, %s9308_s23 }
 0x129   : > { %s1059_s12 = sshll.u32 %s14118_s3, 4  ;;  %p9311_p2 = pnand %p9309_p0, %p9879_p8  ;;  %s10049_s12 = int_to_ptr.hbm [resolvable:$true] %s1059_s12 }
 0x12a   : > { %p9316_p10 = por %p9315_p9, %p9314_p7 }
 0x12b   : > { %p9312_p5 = pneg %p9311_p2 }
 0x12d   : > { %p9317_p11 = pnand %p9316_p10, %p9312_p5 }
 0x12f   : > { %9320 = shalt.err (!%p9317_p11)
}
 0x130   : > { %8304 = dma.hbm_to_vmem [thread:$0]  (!%p9868_p6), %s10035_s16, 16, %s1038_s8, [#allocation24]  }
 0x131   : > { %s1089_s6 = sshll.u32 %s14100_s9, 4  ;;  %s9628_s14 = smov [#allocation28]   ;;  %s10060_s6 = int_to_ptr.hbm [resolvable:$true] %s1089_s6 }
 0x132   : > { %s1061_s18 = sshll.u32 %s9628_s14, 4  ;;  %s9336_s28 = sshra.s32 %s10049_s12, 4  ;;  %s1062_s18 = int_to_ptr.vmem [resolvable:$true] %s1061_s18  ;;  %s9337_s28 = int_to_ptr.hbm [resolvable:$true] %s9336_s28 }
 0x133   : > { %s9338_s2 = scalar_lea.hbm %s9337_s28, 1  ;;  %s9343_s5 = scalar_lea.hbm %s14118_s3, 1 }
 0x134   : > { %p9339_p12 = scmp.ne.s32.totalorder %s9337_s28, %s9338_s2  ;;  %p9344_p2 = scmp.lt.s32.totalorder %s9337_s28, %s14118_s3 }
 0x135   : > { %p9345_p5 = scmp.lt.s32.totalorder %s9343_s5, %s9338_s2 }
 0x136   : > { %p9341_p13 = pnand %p9339_p12, %p9879_p8 }
 0x137   : > { %p9346_p7 = por %p9345_p5, %p9344_p2 }
 0x138   : > { %p9342_p0 = pneg %p9341_p13 }
 0x13a   : > { %p9347_p9 = pnand %p9346_p7, %p9342_p0 }
 0x13c   : > { %9350 = shalt.err (!%p9347_p9)
}
 0x13d   : > { %8310 = dma.hbm_to_vmem [thread:$0]  (!%p9868_p6), %s10049_s12, 16, %s1062_s18, [#allocation27]  }
 0x13e   : > { %s9629_s8 = smov [#allocation31]   ;;  %s9366_s23 = sshra.s32 %s10060_s6, 4  ;;  %s9367_s23 = int_to_ptr.hbm [resolvable:$true] %s9366_s23 }
 0x13f   : > { %s1091_s16 = sshll.u32 %s9629_s8, 4  ;;  %s9368_s4 = scalar_lea.hbm %s9367_s23, 1  ;;  %s1092_s16 = int_to_ptr.vmem [resolvable:$true] %s1091_s16 }
 0x140   : > { %p9369_p10 = scmp.ne.s32.totalorder %s9367_s23, %s9368_s4  ;;  %s9373_s14 = scalar_lea.hbm %s14100_s9, 1 }
 0x141   : > { %p9374_p13 = scmp.lt.s32.totalorder %s9367_s23, %s14100_s9  ;;  %p9375_p0 = scmp.lt.s32.totalorder %s9373_s14, %s9368_s4 }
 0x142   : > { %p9371_p11 = pnand %p9369_p10, %p9879_p8 }
 0x143   : > { %p9376_p2 = por %p9375_p0, %p9374_p13 }
 0x144   : > { %p9372_p12 = pneg %p9371_p11 }
 0x146   : > { %p9377_p5 = pnand %p9376_p2, %p9372_p12 }
 0x148   : > { %9380 = shalt.err (!%p9377_p5)
}
 0x149   : > { %s14119_s12 = sld [smem:[#allocation73_spill]]  ;;  %s7900_s18 = sadd.s32 4294967294, %s9576_s10  }
 0x14a   : > { %8316 = dma.hbm_to_vmem [thread:$0]  (!%p9868_p6), %s10060_s6, 16, %s1092_s16, [#allocation30]  }
 0x14b   : > { %s106_s28 = sadd.s32 1, %s9572_s7  ;;  %s169_s11 = sadd.s32 1, %s9564_s0 }
 0x14c   : > { %p108_p8 = scmp.ge.s32.totalorder %s106_s28, 2  ;;  %p176_p7 = scmp.ne.s32.totalorder %s9564_s0, %s9560_s1 }
 0x14d   : > { %p177_p9 = scmp.eq.s32.totalorder %s9576_s10, 0  ;;  %s14121_s2 = sld [smem:[#allocation49_spill]] }
 0x14e   : > { %s14259_s28 = smov (%p108_p8, %s106_s28), 0  ;;  %s14124_s16 = sadd.s32 4294967295, %s9576_s10  }
 0x14f   : > { %p10086_p10 = por %p177_p9, %p176_p7  ;;  %p182_p11 = scmp.ne.s32.totalorder %s9560_s1, %s14119_s12 }
 0x150   : > { %s164_s6 = ssub.s32 %s9572_s7, %s14259_s28  ;;  %p796_p6 = scmp.eq.s32.totalorder %s14124_s16, 1 }
 0x151   : > { %p167_p12 = scmp.eq.s32.totalorder %s164_s6, 0  ;;  %p10098_p13 = por %p9852_p1, %p182_p11 }
 0x152   : > { %p10102_p0 = por %p796_p6, %p176_p7  ;;  %p802_p2 = scmp.eq.s32.totalorder %s7900_s18, 1 }
 0x153   : > { %s14122_s5 = smov %s14121_s2  ;;  %p8346_p8 = scmp.lt.s32.totalorder %s9576_s10, 2 }
 0x154   : > { %s14126_s4 = scalar_select %p10102_p0, 1, 0 }
 0x155   : > { %s10107_s14 = scalar_select %p167_p12, %s9564_s0, %s169_s11  }
 0x156   : > { %p10109_p5 = por %p802_p2, %p182_p11  ;;  %s1123_s12 = sand.u32 1, %s9564_s0  }
 0x157   : > { %s8159_s6 = sshll.u32 %s9572_s7, 8  ;;  %s7921_s22 = sshll.u32 %s1123_s12, 8 }
 0x158   : > { %s14127_s3 = scalar_select %p10109_p5, 1, 0 }
 0x159   : > { %s1134_s16 = scalar_lea.hbm %s14121_s2, %s8159_s6  ;;  %s1127_s13 = scalar_lea.vmem [#allocation2], %s7921_s22 }
 0x15a   : > { %s1135_s9 = sshll.u32 %s1134_s16, 4  ;;  %s1137_s15 = sshll.u32 %s1127_s13, 4  ;;  %s1136_s9 = int_to_ptr.hbm [resolvable:$true] %s1135_s9  ;;  %s1138_s15 = int_to_ptr.vmem [resolvable:$true] %s1137_s15 }
 0x15b   : > { %p10119_p7 = pnand %p8346_p8, %p10086_p10  ;;  %s1124_s11 = scalar_lea.sflag [#allocation3], %s1123_s12 }
 0x15c   : > { %s9396_s17 = sshra.s32 %s1136_s9, 4  ;;  %s9403_s2 = scalar_lea.hbm %s14122_s5, 512  ;;  %s9397_s17 = int_to_ptr.hbm [resolvable:$true] %s9396_s17 }
 0x15d   : > { %s9398_s19 = scalar_lea.hbm %s9397_s17, 256  ;;  %p9400_p11 = pneg %p10119_p7 }
 0x15e   : > { %p9399_p9 = scmp.ne.s32.totalorder %s9397_s17, %s9398_s19  ;;  %p9404_p2 = scmp.lt.s32.totalorder %s9397_s17, %s14122_s5 }
 0x15f   : > { %p9405_p4 = scmp.lt.s32.totalorder %s9403_s2, %s9398_s19 }
 0x160   : > { %p9401_p6 = pnand %p9400_p11, %p9399_p9 }
 0x161   : > { %p9406_p5 = por %p9405_p4, %p9404_p2 }
 0x162   : > { %p9402_p12 = pneg %p9401_p6 }
 0x164   : > { %p9407_p0 = pnand %p9406_p5, %p9402_p12 }
 0x166   : > { %9410 = shalt.err (!%p9407_p0)
}
 0x167   : > { %s9630_s13 = smov 128   ;;  %s9631_s8 = smov 8  }
 0x168   : > { %8320 = dma.hbm_to_vmem [thread:$0]  (!%p10119_p7), %s1136_s9, 4096, %s1138_s15, %s1124_s11, %s9630_s13, %s9630_s13, %s9631_s8  }
 0x169   : > { %1149 = sbr.rel (%p9858_p3) target bundleno = 4057 (0xfd9), region = 144 }
 0x16e   : > { %s10132_s6 = sand.u32 1, %s9560_s1  }
 0x16f   : > { %s14037_s17 = sshll.u32 %s10132_s6, 8  ;;  %s1152_s19 = scalar_lea.sflag [#allocation3], %s10132_s6 }
 0x170   : > { %s10138_s22 = scalar_lea.vmem [#allocation2], %s14037_s17 }
 0x171   : > { %9507 = dma.done.wait (%p10098_p13), %s1152_s19, 4096  }
 0x172   : > { %9509 = vsyncadd (%p10098_p13), %s1152_s19, 4294963200 }
 0x173   : > { %9511 = dma.done.wait (%p9852_p1), [#allocation6], 32  }
 0x174   : > { %9513 = vsyncadd (%p9852_p1), [#allocation6], 4294967264 }
 0x175   : > { %9515 = dma.done.wait (%p9852_p1), [#allocation9], 272  }
 0x176   : > { %9517 = vsyncadd (%p9852_p1), [#allocation9], 4294967024 }
 0x177   : > { %9519 = dma.done.wait (%p9852_p1), [#allocation12], 272  }
 0x178   : > { %9521 = vsyncadd (%p9852_p1), [#allocation12], 4294967024 }
 0x179   : > { %9523 = dma.done.wait (%p9852_p1), [#allocation15], 32  }
 0x17a   : > { %9525 = vsyncadd (%p9852_p1), [#allocation15], 4294967264 }
 0x17b   : > { %9527 = dma.done.wait (%p9852_p1), [#allocation18], 32  }
 0x17c   : > { %9529 = vsyncadd (%p9852_p1), [#allocation18], 4294967264 }
 0x17d   : > { %9531 = dma.done.wait (%p9852_p1), [#allocation21], 272  }
 0x17e   : > { %9533 = vsyncadd (%p9852_p1), [#allocation21], 4294967024 }
 0x17f   : > { %9535 = dma.done.wait (%p9852_p1), [#allocation24], 32  }
 0x180   : > { %9537 = vsyncadd (%p9852_p1), [#allocation24], 4294967264 }
 0x181   : > { %9539 = dma.done.wait (%p9852_p1), [#allocation27], 32  }
 0x182   : > { %9541 = vsyncadd (%p9852_p1), [#allocation27], 4294967264 }
 0x183   : > { %9543 = dma.done.wait (%p9852_p1), [#allocation30], 32  }
 0x184   : > { %9545 = vsyncadd (%p9852_p1), [#allocation30], 4294967264  ;;  %s14131_s15 = sld [smem:[#allocation74_spill]]  ;;  %vm1403_vm0 = vcmask 261120   ;;  %v9632_v8 = vmov 32.0   ;;  %v8167_v47 = vld [vmem:[#allocation10 + $0x8] sm:$0xff] }
 0x185   : > { %s14132_s23 = sld [smem:[#allocation48_spill]]  ;;  %8563 = vrcp.f32 %v9632_v8  ;;  %v8166_v50 = vld [vmem:[#allocation10] sm:$0xff]  ;;  %vm1515_vm10 = vcmask 130048   ;;  %s14040_s17 = smov 48  }
 0x186   : > { %s14133_s16 = sld [smem:[#allocation47_spill]]  ;;  %s7502_s5 = scalar_lea.sflag [#allocation4], %s10132_s6 }
 0x187   : > { %s14134_s8 = sld [smem:[#allocation53_spill]]  ;;  %p14246_p4 = scmp.ne.s32.totalorder %s14126_s4, 0 }
 0x188   : > { %s14135_s12 = sld [smem:[#allocation55_spill]] }
 0x189   : > { %s14140_s19 = sld [smem:[#allocation50_spill]] }
 0x18a   : > { %p1347_p3 = scmp.lt.s32.totalorder %s14131_s15, 1  ;;  %s14141_s9 = sld [smem:[#allocation51_spill]] }
 0x18b   : > { %v8564_v9 = vpop.eup %8563 }
 0x18c   : > { %s1348_s18 = scalar_select %p1347_p3, %s14131_s15, 1  ;;  %v1411_v10 = vmul.f32 32.0, %v8564_v9  ;;  %vm1415_vm1 = vweird.f32 %v8564_v9 }
 0x18d   : > { %v8163_v35 = vld [vmem:[%s14134_s8 + $0x8] sm:$0xff]  ;;  %v8162_v41 = vld [vmem:[%s14134_s8] sm:$0xff] }
 0x18e   : > { %s8160_s11 = sshll.u32 %s1348_s18, 4  ;;  %v1412_v11 = vsub.f32 1.0, %v1411_v10  ;;  %v8165_v36 = vld [vmem:[%s14135_s12 + $0x8] sm:$0xff]  ;;  %2327 = vmatpush.bf16.msra.mxu0 %v8163_v35  ;;  %v8164_v42 = vld [vmem:[%s14135_s12] sm:$0xff]  ;;  %s9636_s18 = smov 112  }
 0x18f   : > { %s1360_s2 = scalar_lea.vmem %s14132_s23, %s8160_s11  ;;  %s10184_s13 = scalar_lea.vmem %s14133_s16, %s8160_s11  ;;  %2365 = vmatpush.bf16.msra.mxu1 %v8165_v36 }
 0x190   : > { %v1367_v0 = vld [vmem:[%s1360_s2] sm:$0xff]  ;;  %v1368_v2 = vld [vmem:[%s1360_s2 + $0x8] sm:$0xff]  ;;  %v1413_v12 = vmul.f32 %v8564_v9, %v1412_v11  ;;  %s14039_s23 = smov 104   ;;  %s14038_s16 = smov 120  }
 0x191   : > { %v1365_v1 = vld [vmem:[%s10184_s13] sm:$0xff]  ;;  %v1465_v3 = vsel %vm1403_vm0, %v1367_v0, 0.0  ;;  %v1366_v5 = vld [vmem:[%s10184_s13 + $0x8] sm:$0xff]  ;;  %v1468_v6 = vsel %vm1403_vm0, %v1368_v2, 0.0  ;;  %s14142_s11 = sld [smem:[#allocation59_spill]] }
 0x192   : > { %v1404_v4 = vsel %vm1403_vm0, %v1365_v1, 0.0  ;;  %1466 = vadd.xlane.f32.xlu0 %v1465_v3  ;;  %v1407_v7 = vsel %vm1403_vm0, %v1366_v5, 0.0  ;;  %v1414_v13 = vadd.f32 %v8564_v9, %v1413_v12  ;;  %2328 = vmatpush.bf16.msra.mxu0 %v8162_v41  ;;  %v10237_v11 = vld [vmem:[%s10138_s22 + $0x8] sm:$0xff]  ;;  %v10240_v12 = vld [vmem:[%s10138_s22 + $0x10] sm:$0xff]  ;;  %v8546_v35 = vld [vmem:[%s14141_s9] ss:$0 sm:$0xff] }
 0x193   : > { %1405 = vadd.xlane.f32.xlu1 %v1404_v4  ;;  %2366 = vmatpush.bf16.msra.mxu1 %v8164_v42  ;;  %s14143_s2 = sld [smem:[#allocation52_spill]]  ;;  %s9639_s9 = smov 80  }
 0x194   : > { %v10192_v14 = vsel %vm1415_vm1, %v8564_v9, %v1414_v13  ;;  %v10243_v13 = vld [vmem:[%s10138_s22] sm:$0xff]  ;;  %vm2428_vm1 = vcmask 1047556  }
 0x196   : > { %2399 = vmatpush.bf16.msrb.mxu0 %v8167_v47 }
 0x19a   : > { %1469 = vadd.xlane.f32.xlu0 %v1468_v6  ;;  %2400 = vmatpush.bf16.msrb.mxu0 %v8166_v50  ;;  %v8548_v50 = vld [vmem:[#allocation8] ss:$0 sm:$0xff] }
 0x19b   : > { %1408 = vadd.xlane.f32.xlu1 %v1407_v7 }
 0x205   : > { %v1467_v15 = vpop.xlane.xlu0 %1466 }
 0x206   : > { %v1406_v16 = vpop.xlane.xlu1 %1405  ;;  %v1471_v17 = vmul.f32 %v1467_v15, %v10192_v14 }
 0x207   : > { %v1417_v18 = vmul.f32 %v10192_v14, %v1406_v16 }
 0x208   : > { %v10198_v20 = vsub.f32 %v1367_v0, %v1471_v17  ;;  %v1519_v17 = vsel %vm1515_vm10, %v10237_v11, 0.0 }
 0x209   : > { %v10196_v19 = vsub.f32 %v1365_v1, %v1417_v18  ;;  %v1522_v18 = vsel %vm1515_vm10, %v10240_v12, 0.0 }
 0x20a   : > { %v1475_v21 = vmul.f32 %v10198_v20, %v10198_v20 }
 0x20b   : > { %v1421_v22 = vmul.f32 %v10196_v19, %v10196_v19 }
 0x20c   : > { %v1477_v23 = vsel %vm1403_vm0, %v1475_v21, 0.0 }
 0x20d   : > { %v1423_v24 = vsel %vm1403_vm0, %v1421_v22, 0.0  ;;  %1478 = vadd.xlane.f32.xlu2 %v1477_v23  ;;  %v1470_v25 = vpop.xlane.xlu0 %1469  ;;  %v1516_v22 = vsel %vm1515_vm10, %v10243_v13, 0.0 }
 0x20e   : > { %1424 = vadd.xlane.f32.xlu0 %v1423_v24  ;;  %v1409_v26 = vpop.xlane.xlu1 %1408  ;;  %v1472_v27 = vmul.f32 %v1470_v25, %v10192_v14  ;;  %v8545_v24 = vld [vmem:[%s14140_s19] ss:$0 sm:$0xff]  ;;  %s14144_s19 = smov %s14143_s2 }
 0x20f   : > { %v1418_v28 = vmul.f32 %v10192_v14, %v1409_v26 }
 0x210   : > { %v10208_v29 = vsub.f32 %v1368_v2, %v1472_v27 }
 0x211   : > { %v10210_v30 = vsub.f32 %v1366_v5, %v1418_v28  ;;  %v10259_v28 = vld [vmem:[%s10138_s22 + $0x20] sm:$0xff] }
 0x212   : > { %v1476_v31 = vmul.f32 %v10208_v29, %v10208_v29 }
 0x213   : > { %v1422_v32 = vmul.f32 %v10210_v30, %v10210_v30 }
 0x214   : > { %v1480_v33 = vsel %vm1403_vm0, %v1476_v31, 0.0 }
 0x215   : > { %v1426_v34 = vsel %vm1403_vm0, %v1422_v32, 0.0  ;;  %1481 = vadd.xlane.f32.xlu2 %v1480_v33  ;;  %v10262_v32 = vld [vmem:[%s10138_s22 + $0x18] sm:$0xff] }
 0x216   : > { %1427 = vadd.xlane.f32.xlu1 %v1426_v34  ;;  %1520 = vadd.xlane.f32.xlu0 %v1519_v17 }
 0x21d   : > { %1517 = vadd.xlane.f32.xlu2 %v1516_v22  ;;  %v10319_v22 = vld [vmem:[%s10138_s22 + $0x38] sm:$0xff] }
 0x21e   : > { %1523 = vadd.xlane.f32.xlu1 %v1522_v18 }
 0x280   : > { %v1479_v37 = vpop.xlane.xlu2 %1478 }
 0x281   : > { %v1425_v38 = vpop.xlane.xlu0 %1424  ;;  %v1483_v39 = vmul.f32 %v1479_v37, %v10192_v14  ;;  %v1528_v37 = vsel %vm1515_vm10, %v10259_v28, 0.0 }
 0x282   : > { %v1429_v40 = vmul.f32 %v1425_v38, %v10192_v14  ;;  %1529 = vadd.xlane.f32.xlu0 %v1528_v37 }
 0x283   : > { %v1485_v43 = vadd.f32 1e-05, %v1483_v39 }
 0x284   : > { %v1431_v44 = vadd.f32 1e-05, %v1429_v40 }
 0x285   : > { %8565 = vrsqrt.f32 %v1485_v43  ;;  %vm1493_vm5 = vweird.f32 %v1485_v43 }
 0x286   : > { %8567 = vrsqrt.f32 %v1431_v44  ;;  %vm1439_vm2 = vweird.f32 %v1431_v44 }
 0x288   : > { %v1482_v45 = vpop.xlane.xlu2 %1481 }
 0x289   : > { %v1428_v46 = vpop.xlane.xlu1 %1427  ;;  %v1484_v48 = vmul.f32 %v1482_v45, %v10192_v14 }
 0x28a   : > { %v1430_v49 = vmul.f32 %v1428_v46, %v10192_v14 }
 0x28b   : > { %v8566_v51 = vpop.eup %8565  ;;  %v1486_v52 = vadd.f32 1e-05, %v1484_v48 }
 0x28c   : > { %v1432_v53 = vadd.f32 1e-05, %v1430_v49  ;;  %v8568_v54 = vpop.eup %8567  ;;  %v1488_v55 = vmul.f32 %v8566_v51, %v1485_v43  ;;  %vm1494_vm4 = vweird.f32 %v8566_v51 }
 0x28d   : > { %v1434_v56 = vmul.f32 %v8568_v54, %v1431_v44  ;;  %8569 = vrsqrt.f32 %v1486_v52  ;;  %vm1440_vm3 = vweird.f32 %v8568_v54  ;;  %vm10230_vm7 = vmor %vm1493_vm5, %vm1494_vm4  ;;  %vm1503_vm12 = vweird.f32 %v1486_v52 }
 0x28e   : > { %v1489_v57 = vmul.f32 %v8566_v51, %v1488_v55  ;;  %8571 = vrsqrt.f32 %v1432_v53  ;;  %vm10226_vm6 = vmor %vm1439_vm2, %vm1440_vm3  ;;  %vm1449_vm8 = vweird.f32 %v1432_v53  ;;  %v9633_v55 = vmov 16.0  }
 0x28f   : > { %v1435_v58 = vmul.f32 %v8568_v54, %v1434_v56  ;;  %8573 = vrcp.f32 %v9633_v55  ;;  %v9638_v55 = vmov 1934713408   ;;  %vm3162_vm2 = vcmask 64512  }
 0x290   : > { %v1490_v59 = vmul.f32 0.5, %v1489_v57  ;;  %v8547_v57 = vld [vmem:[#allocation7] ss:$0 sm:$0xff]  ;;  %v1518_v5 = vpop.xlane.xlu2 %1517 }
 0x291   : > { %v1436_v60 = vmul.f32 0.5, %v1435_v58  ;;  %v1524_v7 = vpop.xlane.xlu1 %1523 }
 0x292   : > { %v1491_v61 = vsub.f32 1.5, %v1490_v59 }
 0x293   : > { %v8570_v62 = vpop.eup %8569  ;;  %v1437_v63 = vsub.f32 1.5, %v1436_v60 }
 0x294   : > { %v8572_v0 = vpop.eup %8571  ;;  %v1492_v1 = vmul.f32 %v8566_v51, %v1491_v61  ;;  %v1498_v2 = vmul.f32 %v8570_v62, %v1486_v52  ;;  %vm1504_vm11 = vweird.f32 %v8570_v62 }
 0x295   : > { %v1438_v3 = vmul.f32 %v8568_v54, %v1437_v63  ;;  %v1444_v4 = vmul.f32 %v8572_v0, %v1432_v53  ;;  %vm1450_vm9 = vweird.f32 %v8572_v0  ;;  %vm1505_vm14 = vmor %vm1503_vm12, %vm1504_vm11  ;;  %v8574_v59 = vpop.eup %8573 }
 0x296   : > { %v1499_v6 = vmul.f32 %v8570_v62, %v1498_v2  ;;  %v1496_v9 = vsel %vm10230_vm7, %v8566_v51, %v1492_v1  ;;  %vm1451_vm13 = vmor %vm1449_vm8, %vm1450_vm9  ;;  %vm1617_vm15 = vweird.f32 %v8574_v59 }
 0x297   : > { %v1445_v8 = vmul.f32 %v8572_v0, %v1444_v4  ;;  %v1442_v15 = vsel %vm10226_vm6, %v8568_v54, %v1438_v3  ;;  %v1507_v25 = vmul.f32 %v1496_v9, %v10198_v20  ;;  %v1521_v3 = vpop.xlane.xlu0 %1520  ;;  %v10305_v9 = vld [vmem:[%s10138_s22 + $0x30] sm:$0xff] }
 0x298   : > { %v1500_v10 = vmul.f32 0.5, %v1499_v6  ;;  %v1453_v27 = vmul.f32 %v1442_v15, %v10196_v19  ;;  %v1525_v19 = vsel %vm1515_vm10, %v10262_v32, 0.0  ;;  %v1534_v15 = vsel %vm1515_vm10, %v10305_v9, 0.0 }
 0x299   : > { %v1446_v16 = vmul.f32 0.5, %v1445_v8  ;;  %v1509_v36 = vmul.f32 %v8545_v24, %v1507_v25  ;;  %1526 = vadd.xlane.f32.xlu2 %v1525_v19 }
 0x29a   : > { %v1501_v21 = vsub.f32 1.5, %v1500_v10  ;;  %v1458_v39 = vmul.f32 %v8545_v24, %v1453_v27  ;;  %v10329_v27 = vld [vmem:[%s10138_s22 + $0x40] sm:$0xff] }
 0x29b   : > { %v1447_v23 = vsub.f32 1.5, %v1446_v16  ;;  %v1511_v42 = vadd.f32 %v8546_v35, %v1509_v36 }
 0x29c   : > { %v1502_v26 = vmul.f32 %v8570_v62, %v1501_v21  ;;  %v1463_v44 = vadd.f32 %v8546_v35, %v1458_v39 }
 0x29d   : > { %v1448_v31 = vmul.f32 %v8572_v0, %v1447_v23 }
 0x29e   : > { %v1506_v33 = vsel %vm1505_vm14, %v8570_v62, %v1502_v26  ;;  %v1613_v62 = vmul.f32 16.0, %v8574_v59 }
 0x29f   : > { %v1452_v34 = vsel %vm1451_vm13, %v8572_v0, %v1448_v31  ;;  %v1508_v20 = vmul.f32 %v1506_v33, %v10208_v29  ;;  %v10272_v29 = vld [vmem:[%s10138_s22 + $0x28] sm:$0xff] }
 0x2a0   : > { %v1454_v38 = vmul.f32 %v1452_v34, %v10210_v30  ;;  %v1531_v30 = vsel %vm1515_vm10, %v10272_v29, 0.0  ;;  %v1614_v63 = vsub.f32 1.0, %v1613_v62 }
 0x2a1   : > { %v1510_v40 = vmul.f32 %v8545_v24, %v1508_v20  ;;  %1532 = vadd.xlane.f32.xlu2 %v1531_v30 }
 0x2a2   : > { %v1459_v41 = vmul.f32 %v8545_v24, %v1454_v38  ;;  %v1615_v0 = vmul.f32 %v8574_v59, %v1614_v63 }
 0x2a3   : > { %v1512_v43 = vadd.f32 %v8546_v35, %v1510_v40 }
 0x2a4   : > { %v1464_v45 = vadd.f32 %v8546_v35, %v1459_v41  ;;  %v1616_v1 = vadd.f32 %v8574_v59, %v1615_v0 }
 0x2a5   : > { %v2335_v46 = vpack.c.bf16 %v1512_v43, %v1511_v42  ;;  %v10359_v42 = vld [vmem:[%s10138_s22 + $0x58] sm:$0xff]  ;;  %v10362_v43 = vld [vmem:[%s10138_s22 + $0x50] sm:$0xff] }
 0x2a6   : > { %v2297_v47 = vpack.c.bf16 %v1464_v45, %v1463_v44  ;;  %v10296_v2 = vsel %vm1617_vm15, %v8574_v59, %v1616_v1  ;;  %v1549_v45 = vsel %vm1515_vm10, %v10359_v42, 0.0 }
 0x2a7   : > { %7967 = vmatmul.msk.bf16.vlgmr.msra.gmra.mxu1 %vm1403_vm0, %v2335_v46  ;;  %v1620_v4 = vmul.f32 %v10296_v2, %v1521_v3  ;;  %v1621_v8 = vmul.f32 %v10296_v2, %v1524_v7  ;;  %v1619_v33 = vmul.f32 %v10296_v2, %v1518_v5 }
 0x2a8   : > { %7958 = vmatmul.msk.bf16.vlgmr.msra.gmra.mxu0 %vm1403_vm0, %v2297_v47  ;;  %v10372_v47 = vld [vmem:[%s10138_s22 + $0x60] sm:$0xff] }
 0x2a9   : > { %v10301_v6 = vsub.f32 %v10237_v11, %v1620_v4  ;;  %v10312_v16 = vsub.f32 %v10240_v12, %v1621_v8  ;;  %v1537_v12 = vsel %vm1515_vm10, %v10319_v22, 0.0  ;;  %v10341_v20 = vsub.f32 %v10243_v13, %v1619_v33 }
 0x2aa   : > { %v1552_v30 = vsel %vm1515_vm10, %v10372_v47, 0.0 }
 0x2ab   : > { %v1684_v10 = vmul.f32 %v10301_v6, %v10301_v6  ;;  %v1685_v11 = vmul.f32 %v10312_v16, %v10312_v16  ;;  %v1683_v39 = vmul.f32 %v10341_v20, %v10341_v20 }
 0x2ad   : > { %v1718_v17 = vsel %vm1515_vm10, %v1684_v10, 0.0  ;;  %v1721_v23 = vsel %vm1515_vm10, %v1685_v11, 0.0  ;;  %v1715_v41 = vsel %vm1515_vm10, %v1683_v39, 0.0 }
 0x2b8   : > { %7976 = vmatmul.msk.bf16.vlgmr.msrb.gmra.mxu0 %vm1403_vm0, %v2335_v46  ;;  %v1546_v46 = vsel %vm1515_vm10, %v10362_v43, 0.0 }
 0x2f5   : > { %v1530_v25 = vpop.xlane.xlu0 %1529 }
 0x2f6   : > { %v1623_v26 = vmul.f32 %v10296_v2, %v1530_v25 }
 0x2f8   : > { %v10335_v34 = vsub.f32 %v10259_v28, %v1623_v26  ;;  %v10347_v28 = vld [vmem:[%s10138_s22 + $0x48] sm:$0xff] }
 0x2f9   : > { %v1543_v13 = vsel %vm1515_vm10, %v10347_v28, 0.0 }
 0x2fa   : > { %v1687_v37 = vmul.f32 %v10335_v34, %v10335_v34 }
 0x2fc   : > { %v1727_v19 = vsel %vm1515_vm10, %v1687_v37, 0.0 }
 0x30c   : > { %v1527_v18 = vpop.xlane.xlu2 %1526 }
 0x30d   : > { %v1622_v21 = vmul.f32 %v10296_v2, %v1527_v18 }
 0x30f   : > { %v10323_v24 = vsub.f32 %v10262_v32, %v1622_v21  ;;  %v1540_v32 = vsel %vm1515_vm10, %v10329_v27, 0.0 }
 0x311   : > { %v1686_v31 = vmul.f32 %v10323_v24, %v10323_v24 }
 0x313   : > { %v1724_v35 = vsel %vm1515_vm10, %v1686_v31, 0.0 }
 0x314   : > { %v1533_v36 = vpop.xlane.xlu2 %1532 }
 0x315   : > { %v1624_v38 = vmul.f32 %v10296_v2, %v1533_v36 }
 0x317   : > { %v10355_v40 = vsub.f32 %v10272_v29, %v1624_v38 }
 0x319   : > { %v1688_v44 = vmul.f32 %v10355_v40, %v10355_v40 }
 0x31b   : > { %v1730_v29 = vsel %vm1515_vm10, %v1688_v44, 0.0 }
 0x324   : > { %v2368_v48 = vpop.f32.mrf.mxu1 }
 0x325   : > { %v2330_v49 = vpop.f32.mrf.mxu0  ;;  %v10279_v52 = vadd.f32 %v8548_v50, %v2368_v48 }
 0x326   : > { %v10290_v60 = vadd.f32 %v8547_v57, %v2330_v49  ;;  %v9637_v49 = vmov 1983009808  }
 0x32c   : > { %v2370_v51 = vpop.f32.mrf.mxu1 }
 0x32d   : > { %v10281_v53 = vadd.f32 %v8548_v50, %v2370_v51  ;;  %v2332_v56 = vpop.f32.mrf.mxu0  ;;  %v2433_v50 = vunpack.c.l.s4 %v9637_v49 }
 0x32e   : > { %v10288_v58 = vadd.f32 %v8547_v57, %v2332_v56  ;;  %v2457_v56 = vunpack.c.l.s4 %v9638_v55 }
 0x32f   : > { %v8495_v54 = vpack.i.bf16 %v10281_v53, %v10279_v52  ;;  %v10376_v57 = vunpack.c.0.s8 %v2433_v50  ;;  %v2734_v5 = vrot.slane %v10281_v53, 4 }
 0x330   : > { %v8500_v61 = vpack.i.bf16 %v10288_v58, %v10290_v60  ;;  %v10379_v4 = vunpack.c.0.s8 %v2457_v56 }
 0x331   : > { %8496 = vrot.lane.b32.xlu2 %v8495_v54, %s14039_s23  ;;  %8486 = vrot.lane.b32.xlu0 %v8495_v54, %s14038_s16 }
 0x332   : > { %8491 = vrot.lane.b32.xlu1 %v8495_v54, %s9636_s18 }
 0x33a   : > { %8501 = vrot.lane.b32.xlu1 %v8500_v61, %s14038_s16  ;;  %s9643_s16 = smov 32  }
 0x342   : > { %8506 = vrot.lane.b32.xlu1 %v8500_v61, %s9636_s18 }
 0x34a   : > { %8511 = vrot.lane.b32.xlu1 %v8500_v61, %s14039_s23  ;;  %v2678_v61 = vrot.slane %v10279_v52, 4  ;;  %s9644_s23 = smov 64  }
 0x35a   : > { %1535 = vadd.xlane.f32.xlu2 %v1534_v15 }
 0x35b   : > { %1719 = vadd.xlane.f32.xlu0 %v1718_v17 }
 0x362   : > { %1722 = vadd.xlane.f32.xlu2 %v1721_v23 }
 0x363   : > { %1538 = vadd.xlane.f32.xlu0 %v1537_v12 }
 0x36a   : > { %1541 = vadd.xlane.f32.xlu2 %v1540_v32 }
 0x36b   : > { %1725 = vadd.xlane.f32.xlu0 %v1724_v35 }
 0x372   : > { %1728 = vadd.xlane.f32.xlu2 %v1727_v19 }
 0x373   : > { %1544 = vadd.xlane.f32.xlu0 %v1543_v13 }
 0x374   : > { %1716 = vadd.xlane.f32.xlu1 %v1715_v41 }
 0x37a   : > { %1550 = vadd.xlane.f32.xlu2 %v1549_v45 }
 0x37b   : > { %1547 = vadd.xlane.f32.xlu0 %v1546_v46 }
 0x37c   : > { %1731 = vadd.xlane.f32.xlu1 %v1730_v29 }
 0x382   : > { %1553 = vadd.xlane.f32.xlu2 %v1552_v30 }
 0x38b   : > { %v8497_v48 = vpop.permute.xlu2 %8496 }
 0x38c   : > { %v8499_v51 = vunpack.i.h.bf16 %v8497_v48  ;;  %v8498_v54 = vunpack.i.l.bf16 %v8497_v48 }
 0x38e   : > { %v2744_v62 = vrot.slane %v8499_v51, 4  ;;  %v2688_v63 = vrot.slane %v8498_v54, 4 }
 0x3a3   : > { %v8487_v59 = vpop.permute.xlu0 %8486 }
 0x3a4   : > { %v8489_v0 = vunpack.i.h.bf16 %v8487_v59  ;;  %v8488_v1 = vunpack.i.l.bf16 %v8487_v59  ;;  %v8492_v3 = vpop.permute.xlu1 %8491 }
 0x3a5   : > { %v8494_v7 = vunpack.i.h.bf16 %v8492_v3  ;;  %v8493_v8 = vunpack.i.l.bf16 %v8492_v3 }
 0x3a6   : > { %v2745_v10 = vsel %vm2428_vm1, %v2744_v62, %v8489_v0  ;;  %v2746_v15 = vrot.slane %v8489_v0, 4  ;;  %v2689_v17 = vsel %vm2428_vm1, %v2688_v63, %v8488_v1  ;;  %v2690_v18 = vrot.slane %v8488_v1, 4 }
 0x3a7   : > { %v2751_v11 = vperm.slane %v2745_v10, %v10376_v57  ;;  %v2695_v21 = vperm.slane %v2689_v17, %v10376_v57  ;;  %v2732_v23 = vrot.slane %v8494_v7, 4  ;;  %v2735_v12 = vsel %vm2428_vm1, %v8494_v7, %v2734_v5 }
 0x3a8   : > { %v2747_v25 = vsel %vm2428_vm1, %v8499_v51, %v2746_v15  ;;  %v2691_v26 = vsel %vm2428_vm1, %v8498_v54, %v2690_v18  ;;  %v2743_v31 = vperm.slane %v2735_v12, %v10376_v57  ;;  %v2676_v33 = vrot.slane %v8493_v8, 4 }
 0x3a9   : > { %v2755_v32 = vperm.slane %v2747_v25, %v10376_v57  ;;  %v2756_v35 = vrot.slane %v2751_v11, 4  ;;  %v2699_v36 = vperm.slane %v2691_v26, %v10376_v57  ;;  %v2700_v37 = vrot.slane %v2695_v21, 4 }
 0x3aa   : > { %v2733_v38 = vsel %vm2428_vm1, %v2732_v23, %v10281_v53  ;;  %v2770_v39 = vrot.slane %v2743_v31, 4  ;;  %v2677_v19 = vsel %vm2428_vm1, %v2676_v33, %v10279_v52  ;;  %v2679_v13 = vsel %vm2428_vm1, %v8493_v8, %v2678_v61 }
 0x3ab   : > { %v2768_v41 = vrot.slane %v2755_v32, 4  ;;  %v2712_v44 = vrot.slane %v2699_v36, 4  ;;  %v2739_v45 = vperm.slane %v2733_v38, %v10376_v57  ;;  %v2683_v46 = vperm.slane %v2677_v19, %v10376_v57 }
 0x3ac   : > { %v2771_v29 = vsel %vm2428_vm1, %v2755_v32, %v2770_v39  ;;  %v2687_v30 = vperm.slane %v2679_v13, %v10376_v57  ;;  %v10401_v48 = vpop.permute.xlu1 %8501  ;;  %v2430_v10 = vrot.slane %v10290_v60, 4 }
 0x3ad   : > { %v2757_v53 = vsel %vm2428_vm1, %v2756_v35, %v2739_v45  ;;  %v2758_v49 = vrot.slane %v2739_v45, 4  ;;  %v2769_v50 = vsel %vm2428_vm1, %v2768_v41, %v2743_v31  ;;  %v2779_v52 = vperm.slane %v2771_v29, %v10379_v4 }
 0x3ae   : > { %v10407_v51 = vperm.slane %v2757_v53, %v10379_v4  ;;  %v2775_v54 = vperm.slane %v2769_v50, %v10379_v4  ;;  %v2702_v55 = vrot.slane %v2683_v46, 4  ;;  %v2701_v61 = vsel %vm2428_vm1, %v2700_v37, %v2683_v46 }
 0x3af   : > { %v2759_v56 = vsel %vm2428_vm1, %v2751_v11, %v2758_v49  ;;  %v2786_v59 = vrot.slane %v2779_v52, 4  ;;  %v2713_v62 = vsel %vm2428_vm1, %v2712_v44, %v2687_v30  ;;  %v2714_v3 = vrot.slane %v2687_v30, 4 }
 0x3b0   : > { %v2703_v63 = vsel %vm2428_vm1, %v2695_v21, %v2702_v55  ;;  %v2767_v0 = vperm.slane %v2759_v56, %v10379_v4  ;;  %v2784_v5 = vrot.slane %v2775_v54, 4  ;;  %v2707_v7 = vperm.slane %v2701_v61, %v10379_v4 }
 0x3b1   : > { %v2711_v1 = vperm.slane %v2703_v63, %v10379_v4  ;;  %v2719_v8 = vperm.slane %v2713_v62, %v10379_v4  ;;  %v2780_v15 = vrot.slane %v10407_v51, 4  ;;  %v10421_v17 = vsel %vm2428_vm1, 0.0, %v2786_v59 }
 0x3b2   : > { %v2715_v18 = vsel %vm2428_vm1, %v2699_v36, %v2714_v3  ;;  %v2486_v11 = vrot.slane %v10288_v58, 4  ;;  %v10426_v21 = vsel %vm2428_vm1, %v2786_v59, %v2775_v54  ;;  %v10429_v31 = vrot.slane %v2767_v0, 4 }
 0x3b3   : > { %v2723_v23 = vperm.slane %v2715_v18, %v10379_v4  ;;  %v2726_v12 = vrot.slane %v2711_v1, 4  ;;  %v2728_v25 = vrot.slane %v2719_v8, 4  ;;  %v8504_v33 = vunpack.i.h.bf16 %v10401_v48 }
 0x3b4   : > { %v8507_v26 = vpop.permute.xlu1 %8506  ;;  %v10433_v37 = vsel %vm2428_vm1, 0.0, %v2784_v5  ;;  %v2724_v36 = vrot.slane %v2707_v7, 4  ;;  %v8503_v39 = vunpack.i.l.bf16 %v10401_v48 }
 0x3b5   : > { %v8509_v32 = vunpack.i.h.bf16 %v8507_v26  ;;  %v8508_v35 = vunpack.i.l.bf16 %v8507_v26  ;;  %v2730_v38 = vrot.slane %v2723_v23, 4  ;;  %v2729_v45 = vsel %vm2428_vm1, 0.0, %v2728_v25 }
 0x3b6   : > { %v2727_v30 = vsel %vm2428_vm1, 0.0, %v2726_v12  ;;  %v2498_v49 = vrot.slane %v8504_v33, 4  ;;  %v2442_v52 = vrot.slane %v8503_v39, 4  ;;  %v2725_v56 = vsel %vm2428_vm1, 0.0, %v2724_v36 }
 0x3b7   : > { %v2484_v19 = vrot.slane %v8509_v32, 4  ;;  %v2487_v13 = vsel %vm2428_vm1, %v8509_v32, %v2486_v11  ;;  %v2427_v41 = vrot.slane %v8508_v35, 4  ;;  %v2431_v44 = vsel %vm2428_vm1, %v8508_v35, %v2430_v10 }
 0x3b8   : > { %v2731_v46 = vsel %vm2428_vm1, 0.0, %v2730_v38  ;;  %v2799_v29 = vsel %vm2428_vm1, %v2730_v38, %v2719_v8  ;;  %v2495_v54 = vperm.slane %v2487_v13, %v10376_v57  ;;  %v2439_v55 = vperm.slane %v2431_v44, %v10376_v57 }
 0x3b9   : > { %v2804_v53 = vrot.slane %v2731_v46, 4  ;;  %v2485_v50 = vsel %vm2428_vm1, %v2484_v19, %v10288_v58  ;;  %v2429_v48 = vsel %vm2428_vm1, %v2427_v41, %v10290_v60  ;;  %v2788_v59 = vsel %vm2428_vm1, %v2726_v12, %v2707_v7 }
 0x3ba   : > { %v2793_v61 = vrot.slane %v2727_v30, 4  ;;  %v10451_v62 = vperm.slane %v2799_v29, %v10376_v57  ;;  %v2491_v58 = vperm.slane %v2485_v50, %v10376_v57  ;;  %v2435_v0 = vperm.slane %v2429_v48, %v10376_v57 }
 0x3bb   : > { %v2805_v63 = vsel %vm2428_vm1, %v2804_v53, %v2729_v45  ;;  %v10457_v1 = vperm.slane %v2788_v59, %v10376_v57  ;;  %v2522_v18 = vrot.slane %v2495_v54, 4  ;;  %v2466_v11 = vrot.slane %v2439_v55, 4 }
 0x3bc   : > { %v8512_v60 = vpop.permute.xlu1 %8511  ;;  %v10460_v3 = vperm.slane %v2805_v63, %v10376_v57  ;;  %v2794_v7 = vsel %vm2428_vm1, %v2793_v61, %v2725_v56  ;;  %v2824_v10 = vrot.slane %v10451_v62, 4  ;;  %v2510_v36 = vrot.slane %v2491_v58, 4 }
 0x3bd   : > { %v8514_v5 = vunpack.i.h.bf16 %v8512_v60  ;;  %v8513_v8 = vunpack.i.l.bf16 %v8512_v60  ;;  %v10465_v23 = vperm.slane %v2794_v7, %v10376_v57  ;;  %v2812_v12 = vrot.slane %v10457_v1, 4 }
 0x3be   : > { %v2825_v13 = vsel %vm2428_vm1, %v10460_v3, %v2824_v10  ;;  %v2454_v41 = vrot.slane %v2435_v0, 4 }
 0x3bf   : > { %v2496_v25 = vrot.slane %v8514_v5, 4  ;;  %v2440_v26 = vrot.slane %v8513_v8, 4  ;;  %v2443_v32 = vsel %vm2428_vm1, %v8513_v8, %v2442_v52  ;;  %v2499_v35 = vsel %vm2428_vm1, %v8514_v5, %v2498_v49 }
 0x3c0   : > { %v2451_v38 = vperm.slane %v2443_v32, %v10376_v57  ;;  %v2507_v19 = vperm.slane %v2499_v35, %v10376_v57  ;;  %v2813_v46 = vsel %vm2428_vm1, %v10465_v23, %v2812_v12  ;;  %v10484_v56 = vperm.slane %v2825_v13, %v10379_v4 }
 0x3c1   : > { %v2441_v44 = vsel %vm2428_vm1, %v2440_v26, %v8503_v39  ;;  %v2497_v45 = vsel %vm2428_vm1, %v2496_v25, %v8504_v33  ;;  %v2783_v26 = vsel %vm2428_vm1, 0.0, %v10429_v31 }
 0x3c2   : > { %v2447_v29 = vperm.slane %v2441_v44, %v10376_v57  ;;  %v2464_v30 = vrot.slane %v2451_v38, 4  ;;  %v2467_v53 = vsel %vm2428_vm1, %v2451_v38, %v2466_v11  ;;  %v2503_v49 = vperm.slane %v2497_v45, %v10376_v57 }
 0x3c3   : > { %v2475_v50 = vperm.slane %v2467_v53, %v10379_v4  ;;  %v2520_v48 = vrot.slane %v2507_v19, 4  ;;  %v2523_v52 = vsel %vm2428_vm1, %v2507_v19, %v2522_v18  ;;  %v2838_v19 = vrot.slane %v10484_v56, 4 }
 0x3c4   : > { %v2452_v39 = vrot.slane %v2447_v29, 4  ;;  %v2455_v33 = vsel %vm2428_vm1, %v2447_v29, %v2454_v41  ;;  %v2465_v59 = vsel %vm2428_vm1, %v2464_v30, %v2439_v55  ;;  %v2508_v61 = vrot.slane %v2503_v49, 4 }
 0x3c5   : > { %v2463_v63 = vperm.slane %v2455_v33, %v10379_v4  ;;  %v2471_v60 = vperm.slane %v2465_v59, %v10379_v4  ;;  %v2482_v5 = vrot.slane %v2475_v50, 4  ;;  %v2511_v8 = vsel %vm2428_vm1, %v2503_v49, %v2510_v36 }
 0x3c6   : > { %v2453_v7 = vsel %vm2428_vm1, %v2452_v39, %v2435_v0  ;;  %v2509_v10 = vsel %vm2428_vm1, %v2508_v61, %v2491_v58  ;;  %v2519_v18 = vperm.slane %v2511_v8, %v10379_v4  ;;  %v2521_v11 = vsel %vm2428_vm1, %v2520_v48, %v2495_v54 }
 0x3c7   : > { %v2459_v12 = vperm.slane %v2453_v7, %v10379_v4  ;;  %v2478_v25 = vrot.slane %v2463_v63, 4  ;;  %v2480_v55 = vrot.slane %v2471_v60, 4  ;;  %v10499_v32 = vperm.slane %v2509_v10, %v10379_v4 }
 0x3c8   : > { %v2527_v35 = vperm.slane %v2521_v11, %v10379_v4  ;;  %v2531_v0 = vperm.slane %v2523_v52, %v10379_v4  ;;  %v10503_v36 = vrot.slane %v2519_v18, 4  ;;  %v10506_v38 = vsel %vm2428_vm1, 0.0, %v2482_v5 }
 0x3c9   : > { %v2476_v58 = vrot.slane %v2459_v12, 4  ;;  %v2821_v54 = vperm.slane %v2813_v46, %v10379_v4  ;;  %v10511_v13 = vsel %vm2428_vm1, 0.0, %v2478_v25  ;;  %v2532_v41 = vrot.slane %v10499_v32, 4 }
 0x3ca   : > { %v2536_v44 = vrot.slane %v2527_v35, 4  ;;  %v2538_v45 = vrot.slane %v2531_v0, 4  ;;  %v2858_v29 = vrot.slane %v10421_v17, 4  ;;  %v2781_v30 = vsel %vm2428_vm1, 0.0, %v2780_v15 }
 0x3cb   : > { %v2842_v53 = vsel %vm2428_vm1, %v10429_v31, %v10407_v51  ;;  %v2847_v46 = vrot.slane %v2783_v26, 4  ;;  %v10522_v49 = vsel %vm2428_vm1, 0.0, %v2476_v58  ;;  %v10525_v50 = vsel %vm2428_vm1, 0.0, %v2480_v55 }
 0x3cc   : > { %v10529_v48 = vsel %vm2428_vm1, 0.0, %v10503_v36  ;;  %v10532_v17 = vsel %vm2428_vm1, %v2478_v25, %v2459_v12  ;;  %v10535_v15 = vsel %vm2428_vm1, 0.0, %v2532_v41  ;;  %v2545_v52 = vrot.slane %v10511_v13, 4 }
 0x3cd   : > { %v10539_v51 = vsel %vm2428_vm1, %v2482_v5, %v2471_v60  ;;  %v2556_v31 = vrot.slane %v10506_v38, 4  ;;  %v1536_v39 = vpop.xlane.xlu2 %1535  ;;  %v10543_v33 = vsel %vm2428_vm1, 0.0, %v2536_v44  ;;  %v10546_v59 = vsel %vm2428_vm1, 0.0, %v2538_v45 }
 0x3ce   : > { %v2839_v61 = vsel %vm2428_vm1, %v2838_v19, %v2821_v54  ;;  %v2846_v63 = vperm.slane %v2842_v53, %v10376_v57  ;;  %v2848_v8 = vsel %vm2428_vm1, %v2847_v46, %v2781_v30  ;;  %v2857_v7 = vperm.slane %v10426_v21, %v10376_v57  ;;  %v1720_v58 = vpop.xlane.xlu0 %1719 }
 0x3cf   : > { %v2859_v60 = vsel %vm2428_vm1, %v2858_v29, %v10433_v37  ;;  %v2900_v5 = vpack.c.bf16 %v2839_v61, %v2839_v61  ;;  %v10556_v10 = vsel %vm2428_vm1, %v2538_v45, %v2527_v35  ;;  %v2852_v18 = vperm.slane %v2848_v8, %v10376_v57 }
 0x3d0   : > { %v2863_v11 = vperm.slane %v2859_v60, %v10376_v57  ;;  %v2866_v12 = vrot.slane %v2846_v63, 4  ;;  %v2610_v25 = vrot.slane %v10546_v59, 4  ;;  %v2878_v55 = vrot.slane %v2857_v7, 4 }
 0x3d1   : > { %v3220_v26 = vunpack.c.l.b16 %v2900_v5  ;;  %v2810_v0 = vrot.slane %v10465_v23, 4  ;;  %v2822_v37 = vrot.slane %v10460_v3, 4  ;;  %v2864_v19 = vrot.slane %v2852_v18, 4 }
 0x3d2   : > { %v2867_v21 = vsel %vm2428_vm1, %v2852_v18, %v2866_v12  ;;  %v2876_v41 = vrot.slane %v2863_v11, 4  ;;  %v2879_v44 = vsel %vm2428_vm1, %v2863_v11, %v2878_v55  ;;  %v2840_v29 = vrot.slane %v2821_v54, 4 }
 0x3d3   : > { %v2875_v35 = vperm.slane %v2867_v21, %v10379_v4  ;;  %v2811_v45 = vsel %vm2428_vm1, %v2810_v0, %v10457_v1  ;;  %v2887_v30 = vperm.slane %v2879_v44, %v10379_v4  ;;  %v2823_v23 = vsel %vm2428_vm1, %v2822_v37, %v10451_v62 }
 0x3d4   : > { %v2817_v53 = vperm.slane %v2811_v45, %v10379_v4  ;;  %v2865_v46 = vsel %vm2428_vm1, %v2864_v19, %v2846_v63  ;;  %v2829_v3 = vperm.slane %v2823_v23, %v10379_v4  ;;  %v2877_v8 = vsel %vm2428_vm1, %v2876_v41, %v2857_v7 }
 0x3d5   : > { %v2871_v61 = vperm.slane %v2865_v46, %v10379_v4  ;;  %v2841_v60 = vsel %vm2428_vm1, %v10484_v56, %v2840_v29  ;;  %v10578_v1 = vpop.xlane.xlu2 %1722  ;;  %v2892_v54 = vrot.slane %v2887_v30, 4  ;;  %v2883_v18 = vperm.slane %v2877_v8, %v10379_v4 }
 0x3d6   : > { %v2836_v5 = vrot.slane %v2817_v53, 4  ;;  %v2894_v11 = vrot.slane %v2875_v35, 4  ;;  %v2834_v12 = vrot.slane %v2829_v3, 4  ;;  %v2902_v55 = vpack.c.bf16 %v2841_v60, %v2841_v60 }
 0x3d7   : > { %v2890_v62 = vrot.slane %v2871_v61, 4  ;;  %v1625_v63 = vmul.f32 %v10296_v2, %v1536_v39  ;;  %v2893_v0 = vsel %vm2428_vm1, %v2892_v54, %v2875_v35  ;;  %v2888_v21 = vrot.slane %v2883_v18, 4  ;;  %v10588_v54 = vpop.xlane.xlu0 %1538 }
 0x3d8   : > { %v2895_v7 = vsel %vm2428_vm1, %v2887_v30, %v2894_v11  ;;  %v2837_v37 = vsel %vm2428_vm1, %v2829_v3, %v2836_v5  ;;  %v2901_v56 = vpack.c.bf16 %v2893_v0, %v2893_v0  ;;  %v2835_v19 = vsel %vm2428_vm1, %v2834_v12, %v2817_v53 }
 0x3d9   : > { %v2903_v41 = vpack.c.bf16 %v2895_v7, %v2895_v7  ;;  %v3250_v44 = vunpack.c.l.b16 %v2902_v55  ;;  %v2889_v45 = vsel %vm2428_vm1, %v2888_v21, %v2871_v61  ;;  %v2896_v29 = vpack.c.bf16 %v2835_v19, %v2835_v19 }
 0x3da   : > { %v2891_v23 = vsel %vm2428_vm1, %v2883_v18, %v2890_v62  ;;  %v2898_v46 = vpack.c.bf16 %v2837_v37, %v2837_v37  ;;  %v3221_v8 = vunpack.c.l.b16 %v2901_v56  ;;  %v2897_v39 = vpack.c.bf16 %v2889_v45, %v2889_v45 }
 0x3db   : > { %v3251_v60 = vunpack.c.l.b16 %v2903_v41  ;;  %v2899_v35 = vpack.c.bf16 %v2891_v23, %v2891_v23  ;;  %v3159_v30 = vunpack.c.l.b16 %v2896_v29  ;;  %v10591_v5 = vsub.f32 %v10305_v9, %v1625_v63 }
 0x3dc   : > { %v3190_v3 = vunpack.c.l.b16 %v2898_v46  ;;  %v3222_v53 = vpack.c.b16 %v3221_v8, %v3220_v26  ;;  %v3160_v11 = vunpack.c.l.b16 %v2897_v39  ;;  %v2555_v18 = vperm.slane %v10539_v51, %v10376_v57 }
 0x3dd   : > { %v3252_v12 = vpack.c.b16 %v3251_v60, %v3250_v44  ;;  %v3191_v61 = vunpack.c.l.b16 %v2899_v35  ;;  %v10593_v55 = vpop.xlane.xlu2 %1541  ;;  %v2557_v62 = vsel %vm2428_vm1, %v2556_v31, %v10525_v50  ;;  %v1812_v0 = vmul.f32 %v1720_v58, %v10296_v2 }
 0x3de   : > { %v1689_v9 = vmul.f32 %v10591_v5, %v10591_v5  ;;  %v3227_v26 = vsel %vm3162_vm2, %v3222_v53, 0  ;;  %v3161_v63 = vpack.c.b16 %v3160_v11, %v3159_v30  ;;  %v2594_v51 = vsel %vm2428_vm1, %v10503_v36, %v10499_v32 }
 0x3df   : > { %v3257_v21 = vsel %vm3162_vm2, %v3252_v12, 0  ;;  %v3192_v7 = vpack.c.b16 %v3191_v61, %v3190_v3  ;;  %v2599_v37 = vrot.slane %v10529_v48, 4  ;;  %v10612_v38 = vperm.slane %v10556_v10, %v10376_v57  ;;  %3236 = vmatpush.bf16.xpose.msrb.mxu1 %v3227_v26  ;;  %v10639_v23 = vpop.xlane.xlu0 %1725 }
 0x3e0   : > { %3266 = vmatpush.bf16.xpose.msra.mxu2 %v3257_v21  ;;  %v1733_v50 = vsel %vm1515_vm10, %v1689_v9, 0.0  ;;  %v2611_v31 = vsel %vm2428_vm1, %v2610_v25, %v10543_v33  ;;  %v3167_v58 = vsel %vm3162_vm2, %v3161_v63, 0  ;;  %v2544_v32 = vperm.slane %v10532_v17, %v10376_v57 }
 0x3e1   : > { %v3197_v56 = vsel %vm3162_vm2, %v3192_v7, 0  ;;  %1734 = vadd.xlane.f32.xlu1 %v1733_v50  ;;  %3176 = vmatpush.bf16.xpose.msra.mxu3 %v3167_v58  ;;  %v10623_v36 = vadd.f32 1e-05, %v1812_v0  ;;  %v2546_v48 = vsel %vm2428_vm1, %v2545_v52, %v10522_v49  ;;  %v2561_v59 = vperm.slane %v2557_v62, %v10376_v57 }
 0x3e2   : > { %3206 = vmatpush.bf16.xpose.msra.mxu0 %v3197_v56  ;;  %v2550_v33 = vperm.slane %v2546_v48, %v10376_v57  ;;  %v2564_v10 = vrot.slane %v2544_v32, 4  ;;  %v2576_v25 = vrot.slane %v2555_v18, 4  ;;  %v2598_v19 = vperm.slane %v2594_v51, %v10376_v57 }
 0x3e3   : > { %v2600_v17 = vsel %vm2428_vm1, %v2599_v37, %v10535_v15  ;;  %v2615_v41 = vperm.slane %v2611_v31, %v10376_v57  ;;  %v2630_v44 = vrot.slane %v10612_v38, 4  ;;  %v2574_v45 = vrot.slane %v2561_v59, 4 }
 0x3e4   : > { %v2565_v13 = vsel %vm2428_vm1, %v2550_v33, %v2564_v10  ;;  %v2577_v49 = vsel %vm2428_vm1, %v2561_v59, %v2576_v25  ;;  %v2604_v52 = vperm.slane %v2600_v17, %v10376_v57  ;;  %v2618_v29 = vrot.slane %v2598_v19, 4 }
 0x3e5   : > { %v2573_v46 = vperm.slane %v2565_v13, %v10379_v4  ;;  %v2585_v8 = vperm.slane %v2577_v49, %v10379_v4  ;;  %v2631_v15 = vsel %vm2428_vm1, %v2615_v41, %v2630_v44  ;;  %v2562_v39 = vrot.slane %v2550_v33, 4  ;;  %v10646_v30 = vpop.xlane.xlu2 %1728 }
 0x3e6   : > { %v2619_v60 = vsel %vm2428_vm1, %v2604_v52, %v2618_v29  ;;  %v2639_v35 = vperm.slane %v2631_v15, %v10379_v4  ;;  %v2575_v12 = vsel %vm2428_vm1, %v2574_v45, %v2555_v18  ;;  %8575 = vrsqrt.f32 %v10623_v36 }
 0x3e7   : > { %v2590_v3 = vrot.slane %v2585_v8, 4  ;;  %v2627_v53 = vperm.slane %v2619_v60, %v10379_v4  ;;  %v2563_v11 = vsel %vm2428_vm1, %v2562_v39, %v2544_v32  ;;  %v2581_v9 = vperm.slane %v2575_v12, %v10379_v4  ;;  %v1545_v17 = vpop.xlane.xlu0 %1544 }
 0x3e8   : > { %v2644_v61 = vrot.slane %v2639_v35, 4  ;;  %v2569_v0 = vperm.slane %v2563_v11, %v10379_v4  ;;  %v2616_v26 = vrot.slane %v2604_v52, 4  ;;  %v1813_v7 = vmul.f32 %v10578_v1, %v10296_v2  ;;  %v10675_v52 = vld [vmem:[%s10138_s22 + $0x68] sm:$0xff] }
 0x3e9   : > { %v2591_v62 = vsel %vm2428_vm1, %v2590_v3, %v2573_v46  ;;  %v2586_v37 = vrot.slane %v2581_v9, 4  ;;  %v1626_v50 = vmul.f32 %v10296_v2, %v10588_v54  ;;  %v2628_v59 = vrot.slane %v2615_v41, 4 }
 0x3ea   : > { %v2645_v63 = vsel %vm2428_vm1, %v2644_v61, %v2627_v53  ;;  %v2652_v21 = vpack.c.bf16 %v2591_v62, %v2591_v62  ;;  %v2617_v18 = vsel %vm2428_vm1, %v2616_v26, %v2598_v19  ;;  %v2588_v58 = vrot.slane %v2569_v0, 4 }
 0x3eb   : > { %v2653_v51 = vpack.c.bf16 %v2645_v63, %v2645_v63  ;;  %v2623_v56 = vperm.slane %v2617_v18, %v10379_v4  ;;  %v2587_v48 = vsel %vm2428_vm1, %v2586_v37, %v2569_v0  ;;  %v2592_v33 = vrot.slane %v2573_v46, 4  ;;  %v1717_v0 = vpop.xlane.xlu1 %1716 }
 0x3ec   : > { %v3215_v31 = vunpack.c.l.b16 %v2652_v21  ;;  %v10663_v10 = vpop.eup %8575  ;;  %v2648_v25 = vpack.c.bf16 %v2587_v48, %v2587_v48  ;;  %v2629_v19 = vsel %vm2428_vm1, %v2628_v59, %v10612_v38  ;;  %v2646_v45 = vrot.slane %v2627_v53, 4  ;;  %v8168_v53 = vld [vmem:[%s14142_s11] sm:$0xff]  ;;  %s9640_s11 = smov 96  }
 0x3ed   : > { %v3216_v32 = vunpack.c.l.b16 %v2653_v51  ;;  %v2642_v1 = vrot.slane %v2623_v56, 4  ;;  %v2593_v54 = vsel %vm2428_vm1, %v2585_v8, %v2592_v33  ;;  %v10668_v13 = vadd.f32 1e-05, %v1813_v7  ;;  %v1551_v29 = vpop.xlane.xlu2 %1550  ;;  %3364 = vmatpush.bf16.msrb.mxu3 %v8168_v53 }
 0x3ee   : > { %v10671_v49 = vsub.f32 %v10319_v22, %v1626_v50  ;;  %v2635_v41 = vperm.slane %v2629_v19, %v10379_v4  ;;  %v1886_v46 = vmul.f32 %v10663_v10, %v10623_v36  ;;  %v2647_v38 = vsel %vm2428_vm1, %v2639_v35, %v2646_v45 }
 0x3ef   : > { %v3217_v44 = vpack.c.b16 %v3216_v32, %v3215_v31  ;;  %v2654_v8 = vpack.c.bf16 %v2593_v54, %v2593_v54  ;;  %v2589_v15 = vsel %vm2428_vm1, %v2581_v9, %v2588_v58  ;;  %v3154_v60 = vunpack.c.l.b16 %v2648_v25  ;;  %v10699_v58 = vld [vmem:[%s10138_s22 + $0x70] sm:$0xff] }
 0x3f0   : > { %v2640_v39 = vrot.slane %v2635_v41, 4  ;;  %v2655_v3 = vpack.c.bf16 %v2647_v38, %v2647_v38  ;;  %v2643_v22 = vsel %vm2428_vm1, %v2635_v41, %v2642_v1  ;;  %v2650_v12 = vpack.c.bf16 %v2589_v15, %v2589_v15  ;;  %v1548_v1 = vpop.xlane.xlu0 %1547 }
 0x3f1   : > { %7979 = vmatmul.msk.bf16.vlgmr.msrb.gmra.mxu1 %vm3162_vm2, %v3217_v44  ;;  %v3245_v11 = vunpack.c.l.b16 %v2654_v8  ;;  %v2651_v61 = vpack.c.bf16 %v2643_v22, %v2643_v22  ;;  %v1555_v62 = vsel %vm1515_vm10, %v10675_v52, 0.0  ;;  %v1627_v9 = vmul.f32 %v10296_v2, %v10593_v55 }
 0x3f2   : > { %v2641_v26 = vsel %vm2428_vm1, %v2640_v39, %v2623_v56  ;;  %v3246_v35 = vunpack.c.l.b16 %v2655_v3  ;;  %1556 = vadd.xlane.f32.xlu1 %v1555_v62  ;;  %v1690_v63 = vmul.f32 %v10671_v49, %v10671_v49  ;;  %v3185_v7 = vunpack.c.l.b16 %v2650_v12  ;;  %v10742_v12 = vld [vmem:[%s10138_s22 + $0x78] sm:$0xff] }
 0x3f3   : > { %v2649_v21 = vpack.c.bf16 %v2641_v26, %v2641_v26  ;;  %v3186_v51 = vunpack.c.l.b16 %v2651_v61  ;;  %v1814_v37 = vmul.f32 %v10639_v23, %v10296_v2  ;;  %8577 = vrsqrt.f32 %v10668_v13 }
 0x3f4   : > { %v3247_v18 = vpack.c.b16 %v3246_v35, %v3245_v11  ;;  %v10695_v50 = vsub.f32 %v10329_v27, %v1627_v9  ;;  %v1736_v31 = vsel %vm1515_vm10, %v1690_v63, 0.0  ;;  %v1887_v55 = vmul.f32 %v10663_v10, %v1886_v46 }
 0x3f5   : > { %v3155_v56 = vunpack.c.l.b16 %v2649_v21  ;;  %v3187_v32 = vpack.c.b16 %v3186_v51, %v3185_v7  ;;  %1737 = vadd.xlane.f32.xlu0 %v1736_v31  ;;  %v10702_v48 = vadd.f32 1e-05, %v1814_v37  ;;  %v1628_v23 = vmul.f32 %v10296_v2, %v1545_v17  ;;  %v1554_v45 = vpop.xlane.xlu2 %1553 }
 0x3f6   : > { %7980 = vmatmul.msk.bf16.vlgmr.msra.gmra.mxu2 %vm3162_vm2, %v3247_v18  ;;  %v1691_v59 = vmul.f32 %v10695_v50, %v10695_v50  ;;  %v1811_v27 = vmul.f32 %v1717_v0, %v10296_v2  ;;  %v1630_v33 = vmul.f32 %v10296_v2, %v1551_v29  ;;  %v1558_v44 = vsel %vm1515_vm10, %v10699_v58, 0.0 }
 0x3f7   : > { %v3156_v25 = vpack.c.b16 %v3155_v56, %v3154_v60  ;;  %7978 = vmatmul.msk.bf16.vlgmr.msra.gmra.mxu0 %vm3162_vm2, %v3187_v32  ;;  %8579 = vrsqrt.f32 %v10702_v48  ;;  %v10715_v19 = vsub.f32 %v10347_v28, %v1628_v23  ;;  %v1888_v41 = vmul.f32 0.5, %v1887_v55  ;;  %v10769_v23 = vld [vmem:[%s10138_s22 + $0x80] sm:$0xff] }
 0x3f8   : > { %v1843_v17 = vadd.f32 1e-05, %v1811_v27  ;;  %v10718_v54 = vsub.f32 %v10359_v42, %v1630_v33  ;;  %v1629_v29 = vmul.f32 %v10296_v2, %v1548_v1  ;;  %v1739_v38 = vsel %vm1515_vm10, %v1691_v59, 0.0  ;;  %v1732_v42 = vpop.xlane.xlu1 %1731  ;;  %v10773_v27 = vld [vmem:[%s10138_s22 + $0x88] sm:$0xff] }
 0x3f9   : > { %7977 = vmatmul.msk.bf16.vlgmr.msra.gmra.mxu3 %vm3162_vm2, %v3156_v25  ;;  %v10722_v46 = vpop.eup %8577  ;;  %v1692_v28 = vmul.f32 %v10715_v19, %v10715_v19  ;;  %v1631_v39 = vmul.f32 %v10296_v2, %v1554_v45  ;;  %v1889_v22 = vsub.f32 1.5, %v1888_v41  ;;  %v1816_v53 = vmul.f32 %v1732_v42, %v10296_v2  ;;  %v10789_v42 = vld [vmem:[#allocation5] ss:$0 sm:$0xff] }
 0x3fa   : > { %1559 = vadd.xlane.f32.xlu1 %v1558_v44  ;;  %8581 = vrsqrt.f32 %v1843_v17  ;;  %v10728_v8 = vsub.f32 %v10362_v43, %v1629_v29  ;;  %v1694_v15 = vmul.f32 %v10718_v54, %v10718_v54  ;;  %v1896_v26 = vmul.f32 %v10722_v46, %v10668_v13 }
 0x3fb   : > { %v1742_v60 = vsel %vm1515_vm10, %v1692_v28, 0.0  ;;  %v10746_v62 = vsub.f32 %v10372_v47, %v1631_v39  ;;  %v1815_v35 = vmul.f32 %v10646_v30, %v10296_v2  ;;  %v1890_v9 = vmul.f32 %v10663_v10, %v1889_v22 }
 0x3fc   : > { %1743 = vadd.xlane.f32.xlu2 %v1742_v60  ;;  %v1693_v11 = vmul.f32 %v10728_v8, %v10728_v8  ;;  %v1748_v61 = vsel %vm1515_vm10, %v1694_v15, 0.0  ;;  %vm1892_vm3 = vweird.f32 %v10663_v10  ;;  %v1561_v21 = vsel %vm1515_vm10, %v10742_v12, 0.0 }
 0x3fd   : > { %v10734_v3 = vpop.eup %8579  ;;  %1740 = vadd.xlane.f32.xlu0 %v1739_v38  ;;  %v10756_v7 = vadd.f32 1e-05, %v1816_v53  ;;  %vm1891_vm4 = vweird.f32 %v10623_v36  ;;  %v1695_v30 = vmul.f32 %v10746_v62, %v10746_v62  ;;  %v1897_v18 = vmul.f32 %v10722_v46, %v1896_v26  ;;  %v10786_v38 = vld [vmem:[%s10138_s22 + $0x98] sm:$0xff] }
 0x3fe   : > { %v1906_v43 = vmul.f32 %v10734_v3, %v10702_v48  ;;  %v1745_v47 = vsel %vm1515_vm10, %v1693_v11, 0.0  ;;  %vm1893_vm5 = vmor %vm1891_vm4, %vm1892_vm3  ;;  %v10764_v31 = vadd.f32 1e-05, %v1815_v35  ;;  %vm1881_vm6 = vweird.f32 %v1843_v17  ;;  %v10799_v11 = vld [vmem:[%s10138_s22 + $0x90] sm:$0xff] }
 0x3ff   : > { %v1894_v55 = vsel %vm1893_vm5, %v10663_v10, %v1890_v9  ;;  %8583 = vrsqrt.f32 %v10756_v7  ;;  %v1751_v59 = vsel %vm1515_vm10, %v1695_v30, 0.0  ;;  %v10778_v10 = vld [vmem:[%s14143_s2] ss:$0 sm:$0xff]  ;;  %v1898_v1 = vmul.f32 0.5, %v1897_v18  ;;  %s9641_s2 = smov 16  }
 0x400   : > { %v8582_v0 = vpop.eup %8581  ;;  %v1907_v51 = vmul.f32 %v10734_v3, %v1906_v43  ;;  %v2196_v33 = vmul.f32 %v1894_v55, %v10301_v6  ;;  %8585 = vrsqrt.f32 %v10764_v31  ;;  %v1564_v44 = vsel %vm1515_vm10, %v10769_v23, 0.0 }
 0x401   : > { %v1876_v63 = vmul.f32 %v8582_v0, %v1843_v17  ;;  %vm1882_vm7 = vweird.f32 %v8582_v0  ;;  %v1567_v17 = vsel %vm1515_vm10, %v10773_v27, 0.0  ;;  %v1899_v15 = vsub.f32 1.5, %v1898_v1 }
 0x402   : > { %1749 = vadd.xlane.f32.xlu1 %v1748_v61  ;;  %v1908_v36 = vmul.f32 0.5, %v1907_v51  ;;  %vm1883_vm8 = vmor %vm1881_vm6, %vm1882_vm7  ;;  %v2231_v28 = vmul.f32 %v10778_v10, %v2196_v33  ;;  %vm1911_vm9 = vweird.f32 %v10702_v48  ;;  %vm1912_vm11 = vweird.f32 %v10734_v3 }
 0x403   : > { %v1877_v37 = vmul.f32 %v8582_v0, %v1876_v63  ;;  %v1573_v53 = vsel %vm1515_vm10, %v10786_v38, 0.0  ;;  %vm10801_vm12 = vmor %vm1911_vm9, %vm1912_vm11  ;;  %vm1902_vm13 = vweird.f32 %v10722_v46  ;;  %v1570_v9 = vsel %vm1515_vm10, %v10799_v11, 0.0 }
 0x404   : > { %1746 = vadd.xlane.f32.xlu2 %v1745_v47  ;;  %v1909_v45 = vsub.f32 1.5, %v1908_v36  ;;  %v2266_v61 = vadd.f32 %v10789_v42, %v2231_v28  ;;  %vm1901_vm14 = vweird.f32 %v10668_v13  ;;  %v10818_v47 = vld [vmem:[%s10138_s22 + $0xa0] sm:$0xff]  ;;  %vm1931_vm3 = vweird.f32 %v10756_v7 }
 0x405   : > { %v1878_v56 = vmul.f32 0.5, %v1877_v37  ;;  %1562 = vadd.xlane.f32.xlu0 %v1561_v21  ;;  %v8584_v29 = vpop.eup %8583  ;;  %vm1903_vm15 = vmor %vm1901_vm14, %vm1902_vm13  ;;  %v1576_v13 = vsel %vm1515_vm10, %v10818_v47, 0.0  ;;  %vm1921_vm5 = vweird.f32 %v10764_v31 }
 0x406   : > { %v8586_v39 = vpop.eup %8585  ;;  %v1910_v22 = vmul.f32 %v10734_v3, %v1909_v45  ;;  %vm1932_vm4 = vweird.f32 %v8584_v29 }
 0x407   : > { %v1879_v32 = vsub.f32 1.5, %v1878_v56  ;;  %v1916_v26 = vmul.f32 %v8586_v39, %v10764_v31  ;;  %vm1922_vm6 = vweird.f32 %v8586_v39  ;;  %vm1933_vm7 = vmor %vm1931_vm3, %vm1932_vm4 }
 0x408   : > { %v1914_v63 = vsel %vm10801_vm12, %v10734_v3, %v1910_v22 }
 0x409   : > { %v1880_v25 = vmul.f32 %v8582_v0, %v1879_v32  ;;  %v1917_v37 = vmul.f32 %v8586_v39, %v1916_v26  ;;  %v2198_v30 = vmul.f32 %v1914_v63, %v10323_v24 }
 0x40a   : > { %1752 = vadd.xlane.f32.xlu1 %v1751_v59 }
 0x40b   : > { %v1884_v41 = vsel %vm1883_vm8, %v8582_v0, %v1880_v25  ;;  %v1900_v0 = vmul.f32 %v10722_v46, %v1899_v15  ;;  %v1918_v56 = vmul.f32 0.5, %v1917_v37  ;;  %v2233_v3 = vmul.f32 %v10778_v10, %v2198_v30  ;;  %vm1923_vm8 = vmor %vm1921_vm5, %vm1922_vm6 }
 0x40c   : > { %v2195_v6 = vmul.f32 %v1884_v41, %v10341_v20  ;;  %1568 = vadd.xlane.f32.xlu2 %v1567_v17  ;;  %v1926_v20 = vmul.f32 %v8584_v29, %v10756_v7 }
 0x40d   : > { %1565 = vadd.xlane.f32.xlu0 %v1564_v44  ;;  %v1904_v51 = vsel %vm1903_vm15, %v10722_v46, %v1900_v0  ;;  %v1919_v59 = vsub.f32 1.5, %v1918_v56  ;;  %v2268_v46 = vadd.f32 %v10789_v42, %v2233_v3 }
 0x40e   : > { %v2230_v60 = vmul.f32 %v10778_v10, %v2195_v6  ;;  %v1927_v21 = vmul.f32 %v8584_v29, %v1926_v20  ;;  %v2197_v55 = vmul.f32 %v1904_v51, %v10312_v16 }
 0x40f   : > { %v1920_v33 = vmul.f32 %v8586_v39, %v1919_v59 }
 0x410   : > { %v2265_v48 = vadd.f32 %v10789_v42, %v2230_v60  ;;  %v1928_v18 = vmul.f32 0.5, %v1927_v21  ;;  %v2232_v32 = vmul.f32 %v10778_v10, %v2197_v55 }
 0x411   : > { %v1924_v44 = vsel %vm1923_vm8, %v8586_v39, %v1920_v33 }
 0x412   : > { %1574 = vadd.xlane.f32.xlu1 %v1573_v53  ;;  %v3281_v35 = vpack.c.bf16 %v2266_v61, %v2265_v48  ;;  %v1929_v36 = vsub.f32 1.5, %v1928_v18  ;;  %v2267_v16 = vadd.f32 %v10789_v42, %v2232_v32  ;;  %v2199_v7 = vmul.f32 %v1924_v44, %v10335_v34 }
 0x414   : > { %7985 = vmatmul.msk.bf16.vlgmr.msrb.gmra.mxu3 %vm1515_vm10, %v3281_v35  ;;  %1571 = vadd.xlane.f32.xlu2 %v1570_v9  ;;  %v1930_v24 = vmul.f32 %v8584_v29, %v1929_v36  ;;  %v3282_v1 = vpack.c.bf16 %v2268_v46, %v2267_v16  ;;  %v2234_v31 = vmul.f32 %v10778_v10, %v2199_v7  ;;  %v10865_v16 = vld [vmem:[%s10138_s22 + $0xa8] sm:$0xff] }
 0x416   : > { %v1934_v25 = vsel %vm1933_vm7, %v8584_v29, %v1930_v24  ;;  %v2269_v6 = vadd.f32 %v10789_v42, %v2234_v31 }
 0x417   : > { %v2200_v17 = vmul.f32 %v1934_v25, %v10355_v40 }
 0x419   : > { %v2235_v45 = vmul.f32 %v10778_v10, %v2200_v17 }
 0x41a   : > { %1577 = vadd.xlane.f32.xlu1 %v1576_v13 }
 0x41b   : > { %v2270_v41 = vadd.f32 %v10789_v42, %v2235_v45 }
 0x41d   : > { %v3283_v28 = vpack.c.bf16 %v2270_v41, %v2269_v6  ;;  %v1579_v6 = vsel %vm1515_vm10, %v10865_v16, 0.0 }
 0x424   : > { %7986 = vmatmul.msk.bf16.gmra.mxu3 %vm1515_vm10, %v3282_v1 }
 0x434   : > { %7987 = vmatmul.msk.bf16.gmra.mxu3 %vm1515_vm10, %v3283_v28 }
 0x454   : > { %v1735_v15 = vpop.xlane.xlu1 %1734 }
 0x455   : > { %v1817_v29 = vmul.f32 %v1735_v15, %v10296_v2 }
 0x457   : > { %v1849_v60 = vadd.f32 1e-05, %v1817_v29 }
 0x459   : > { %8587 = vrsqrt.f32 %v1849_v60  ;;  %vm1941_vm11 = vweird.f32 %v1849_v60 }
 0x45f   : > { %v8588_v39 = vpop.eup %8587 }
 0x460   : > { %v1936_v40 = vmul.f32 %v8588_v39, %v1849_v60  ;;  %vm1942_vm9 = vweird.f32 %v8588_v39 }
 0x461   : > { %vm10867_vm12 = vmor %vm1941_vm11, %vm1942_vm9 }
 0x462   : > { %v1937_v43 = vmul.f32 %v8588_v39, %v1936_v40 }
 0x464   : > { %v1938_v35 = vmul.f32 0.5, %v1937_v43 }
 0x465   : > { %v1557_v22 = vpop.xlane.xlu1 %1556 }
 0x466   : > { %v1632_v34 = vmul.f32 %v10296_v2, %v1557_v22  ;;  %v1939_v37 = vsub.f32 1.5, %v1938_v35 }
 0x468   : > { %v10842_v20 = vsub.f32 %v10675_v52, %v1632_v34  ;;  %v1738_v53 = vpop.xlane.xlu0 %1737  ;;  %v1940_v32 = vmul.f32 %v8588_v39, %v1939_v37 }
 0x469   : > { %v1818_v48 = vmul.f32 %v1738_v53, %v10296_v2 }
 0x46a   : > { %v1696_v61 = vmul.f32 %v10842_v20, %v10842_v20  ;;  %v1944_v7 = vsel %vm10867_vm12, %v8588_v39, %v1940_v32 }
 0x46b   : > { %v1850_v0 = vadd.f32 1e-05, %v1818_v48  ;;  %v2201_v39 = vmul.f32 %v1944_v7, %v10591_v5 }
 0x46c   : > { %v1754_v26 = vsel %vm1515_vm10, %v1696_v61, 0.0  ;;  %v10898_v61 = vld [vmem:[%s10138_s22 + $0xb0] sm:$0xff] }
 0x46d   : > { %8589 = vrsqrt.f32 %v1850_v0  ;;  %1755 = vadd.xlane.f32.xlu0 %v1754_v26  ;;  %v1560_v9 = vpop.xlane.xlu1 %1559  ;;  %vm1951_vm14 = vweird.f32 %v1850_v0 }
 0x46e   : > { %v1633_v63 = vmul.f32 %v10296_v2, %v1560_v9 }
 0x46f   : > { %v1744_v51 = vpop.xlane.xlu2 %1743 }
 0x470   : > { %v10850_v21 = vsub.f32 %v10699_v58, %v1633_v63  ;;  %v1741_v52 = vpop.xlane.xlu0 %1740  ;;  %v1820_v18 = vmul.f32 %v1744_v51, %v10296_v2 }
 0x471   : > { %v1819_v30 = vmul.f32 %v1741_v52, %v10296_v2  ;;  %v2236_v52 = vmul.f32 %v10778_v10, %v2201_v39 }
 0x472   : > { %v1697_v13 = vmul.f32 %v10850_v21, %v10850_v21  ;;  %v10858_v3 = vadd.f32 1e-05, %v1820_v18 }
 0x473   : > { %v8590_v55 = vpop.eup %8589  ;;  %v10856_v56 = vadd.f32 1e-05, %v1819_v30 }
 0x474   : > { %v1946_v36 = vmul.f32 %v8590_v55, %v1850_v0  ;;  %v1757_v58 = vsel %vm1515_vm10, %v1697_v13, 0.0  ;;  %vm1952_vm13 = vweird.f32 %v8590_v55  ;;  %vm1971_vm3 = vweird.f32 %v10858_v3 }
 0x475   : > { %8591 = vrsqrt.f32 %v10856_v56  ;;  %1758 = vadd.xlane.f32.xlu0 %v1757_v58  ;;  %v1750_v59 = vpop.xlane.xlu1 %1749  ;;  %vm1953_vm15 = vmor %vm1951_vm14, %vm1952_vm13  ;;  %v1582_v13 = vsel %vm1515_vm10, %v10898_v61, 0.0  ;;  %vm1961_vm7 = vweird.f32 %v10856_v56 }
 0x476   : > { %v1947_v46 = vmul.f32 %v8590_v55, %v1946_v36  ;;  %8593 = vrsqrt.f32 %v10858_v3  ;;  %v1822_v24 = vmul.f32 %v1750_v59, %v10296_v2 }
 0x477   : > { %v1747_v17 = vpop.xlane.xlu2 %1746 }
 0x478   : > { %v1948_v1 = vmul.f32 0.5, %v1947_v46  ;;  %v1563_v25 = vpop.xlane.xlu0 %1562  ;;  %v10871_v44 = vadd.f32 1e-05, %v1822_v24  ;;  %v1821_v31 = vmul.f32 %v1747_v17, %v10296_v2  ;;  %v2271_v24 = vadd.f32 %v10789_v42, %v2236_v52 }
 0x479   : > { %v1634_v45 = vmul.f32 %v10296_v2, %v1563_v25 }
 0x47a   : > { %v1949_v41 = vsub.f32 1.5, %v1948_v1  ;;  %8595 = vrsqrt.f32 %v10871_v44  ;;  %v10885_v29 = vadd.f32 1e-05, %v1821_v31  ;;  %vm1991_vm9 = vweird.f32 %v10871_v44 }
 0x47b   : > { %v10880_v28 = vpop.eup %8591  ;;  %v10883_v15 = vsub.f32 %v10742_v12, %v1634_v45 }
 0x47c   : > { %v8594_v60 = vpop.eup %8593  ;;  %v1950_v40 = vmul.f32 %v8590_v55, %v1949_v41  ;;  %v1956_v22 = vmul.f32 %v10880_v28, %v10856_v56  ;;  %8597 = vrsqrt.f32 %v10885_v29  ;;  %vm1962_vm5 = vweird.f32 %v10880_v28 }
 0x47d   : > { %v1966_v34 = vmul.f32 %v8594_v60, %v10858_v3  ;;  %1580 = vadd.xlane.f32.xlu0 %v1579_v6  ;;  %v10891_v53 = vpop.xlane.xlu1 %1752  ;;  %v1698_v48 = vmul.f32 %v10883_v15, %v10883_v15  ;;  %vm1972_vm4 = vweird.f32 %v8594_v60  ;;  %vm10929_vm8 = vmor %vm1961_vm7, %vm1962_vm5  ;;  %vm1981_vm12 = vweird.f32 %v10885_v29 }
 0x47e   : > { %v1954_v43 = vsel %vm1953_vm15, %v8590_v55, %v1950_v40  ;;  %v1957_v12 = vmul.f32 %v10880_v28, %v1956_v22  ;;  %vm10920_vm6 = vmor %vm1971_vm3, %vm1972_vm4 }
 0x47f   : > { %v1967_v5 = vmul.f32 %v8594_v60, %v1966_v34  ;;  %v2202_v0 = vmul.f32 %v1954_v43, %v10671_v49  ;;  %v1760_v9 = vsel %vm1515_vm10, %v1698_v48, 0.0  ;;  %v1569_v51 = vpop.xlane.xlu2 %1568 }
 0x480   : > { %v10901_v26 = vpop.eup %8595  ;;  %v1958_v35 = vmul.f32 0.5, %v1957_v12  ;;  %v1566_v63 = vpop.xlane.xlu0 %1565  ;;  %1761 = vadd.xlane.f32.xlu2 %v1760_v9  ;;  %v1636_v3 = vmul.f32 %v10296_v2, %v1569_v51 }
 0x481   : > { %v1968_v37 = vmul.f32 0.5, %v1967_v5  ;;  %v1635_v30 = vmul.f32 %v10296_v2, %v1566_v63  ;;  %v1986_v49 = vmul.f32 %v10901_v26, %v10871_v44  ;;  %v2237_v55 = vmul.f32 %v10778_v10, %v2202_v0 }
 0x482   : > { %v1959_v18 = vsub.f32 1.5, %v1958_v35  ;;  %v10917_v32 = vpop.eup %8597  ;;  %v10943_v39 = vsub.f32 %v10773_v27, %v1636_v3  ;;  %v10956_v27 = vld [vmem:[%s10138_s22 + $0xb8] sm:$0xff]  ;;  %vm1992_vm11 = vweird.f32 %v10901_v26 }
 0x483   : > { %v1969_v36 = vsub.f32 1.5, %v1968_v37  ;;  %v10914_v58 = vsub.f32 %v10769_v23, %v1635_v30  ;;  %v2272_v33 = vadd.f32 %v10789_v42, %v2237_v55  ;;  %v1976_v23 = vmul.f32 %v10917_v32, %v10885_v29  ;;  %vm1993_vm14 = vmor %vm1991_vm9, %vm1992_vm11 }
 0x484   : > { %v1960_v59 = vmul.f32 %v10880_v28, %v1959_v18  ;;  %v1987_v7 = vmul.f32 %v10901_v26, %v1986_v49  ;;  %vm1982_vm13 = vweird.f32 %v10917_v32 }
 0x485   : > { %v1970_v1 = vmul.f32 %v8594_v60, %v1969_v36  ;;  %1583 = vadd.xlane.f32.xlu0 %v1582_v13  ;;  %v1575_v25 = vpop.xlane.xlu1 %1574  ;;  %v3284_v45 = vpack.c.bf16 %v2272_v33, %v2271_v24  ;;  %v1699_v31 = vmul.f32 %v10914_v58, %v10914_v58  ;;  %v1977_v6 = vmul.f32 %v10917_v32, %v1976_v23  ;;  %vm1983_vm15 = vmor %vm1981_vm12, %vm1982_vm13  ;;  %v10996_v23 = vld [vmem:[%s10138_s22 + $0xc8] sm:$0xff] }
 0x486   : > { %v1964_v56 = vsel %vm10929_vm8, %v10880_v28, %v1960_v59  ;;  %v1638_v22 = vmul.f32 %v10296_v2, %v1575_v25  ;;  %v1700_v28 = vmul.f32 %v10943_v39, %v10943_v39  ;;  %v1988_v5 = vmul.f32 0.5, %v1987_v7  ;;  %v10988_v59 = vld [vmem:[%s10138_s22 + $0xc0] sm:$0xff]  ;;  %v11000_v25 = vld [vmem:[%s10138_s22 + $0xd8] sm:$0xff] }
 0x487   : > { %v1974_v41 = vsel %vm10920_vm6, %v8594_v60, %v1970_v1  ;;  %7988 = vmatmul.msk.bf16.gmra.mxu3 %vm1515_vm10, %v3284_v45  ;;  %v1763_v40 = vsel %vm1515_vm10, %v1699_v31, 0.0  ;;  %v1572_v34 = vpop.xlane.xlu2 %1571  ;;  %v2203_v48 = vmul.f32 %v1964_v56, %v10695_v50  ;;  %v1978_v0 = vmul.f32 0.5, %v1977_v6  ;;  %v11011_v56 = vld [vmem:[%s10138_s22 + $0xd0] sm:$0xff] }
 0x488   : > { %v2204_v43 = vmul.f32 %v1974_v41, %v10715_v19  ;;  %1764 = vadd.xlane.f32.xlu2 %v1763_v40  ;;  %v1637_v60 = vmul.f32 %v10296_v2, %v1572_v34  ;;  %v10953_v12 = vsub.f32 %v10786_v38, %v1638_v22  ;;  %v1766_v35 = vsel %vm1515_vm10, %v1700_v28, 0.0  ;;  %v11014_v41 = vld [vmem:[%s10138_s22 + $0xe0] sm:$0xff] }
 0x489   : > { %v1585_v38 = vsel %vm1515_vm10, %v10956_v27, 0.0  ;;  %1767 = vadd.xlane.f32.xlu1 %v1766_v35  ;;  %v2238_v37 = vmul.f32 %v10778_v10, %v2203_v48  ;;  %v1989_v30 = vsub.f32 1.5, %v1988_v5  ;;  %v1979_v18 = vsub.f32 1.5, %v1978_v0 }
 0x48a   : > { %v10961_v9 = vsub.f32 %v10799_v11, %v1637_v60  ;;  %v1702_v19 = vmul.f32 %v10953_v12, %v10953_v12  ;;  %v2239_v63 = vmul.f32 %v10778_v10, %v2204_v43  ;;  %v1588_v24 = vsel %vm1515_vm10, %v10988_v59, 0.0 }
 0x48b   : > { %v2273_v55 = vadd.f32 %v10789_v42, %v2238_v37  ;;  %v1990_v3 = vmul.f32 %v10901_v26, %v1989_v30  ;;  %v1591_v7 = vsel %vm1515_vm10, %v10996_v23, 0.0  ;;  %v1600_v40 = vsel %vm1515_vm10, %v11014_v41, 0.0 }
 0x48c   : > { %v1772_v51 = vsel %vm1515_vm10, %v1702_v19, 0.0  ;;  %v1701_v11 = vmul.f32 %v10961_v9, %v10961_v9  ;;  %v2274_v13 = vadd.f32 %v10789_v42, %v2239_v63  ;;  %v1823_v34 = vmul.f32 %v10891_v53, %v10296_v2 }
 0x48d   : > { %v1578_v52 = vpop.xlane.xlu1 %1577  ;;  %1773 = vadd.xlane.f32.xlu0 %v1772_v51  ;;  %v1994_v33 = vsel %vm1993_vm14, %v10901_v26, %v1990_v3  ;;  %v1597_v26 = vsel %vm1515_vm10, %v11000_v25, 0.0 }
 0x48e   : > { %v1639_v50 = vmul.f32 %v10296_v2, %v1578_v52  ;;  %v1769_v36 = vsel %vm1515_vm10, %v1701_v11, 0.0  ;;  %v3285_v29 = vpack.c.bf16 %v2274_v13, %v2273_v55  ;;  %v2206_v17 = vmul.f32 %v1994_v33, %v10718_v54 }
 0x48f   : > { %v1855_v43 = vadd.f32 1e-05, %v1823_v34 }
 0x490   : > { %v10976_v49 = vsub.f32 %v10818_v47, %v1639_v50  ;;  %1586 = vadd.xlane.f32.xlu2 %v1585_v38  ;;  %v1980_v47 = vmul.f32 %v10917_v32, %v1979_v18  ;;  %v2241_v31 = vmul.f32 %v10778_v10, %v2206_v17 }
 0x491   : > { %1770 = vadd.xlane.f32.xlu1 %v1769_v36  ;;  %8599 = vrsqrt.f32 %v1855_v43  ;;  %vm2001_vm3 = vweird.f32 %v1855_v43 }
 0x492   : > { %v1703_v44 = vmul.f32 %v10976_v49, %v10976_v49  ;;  %v1984_v1 = vsel %vm1983_vm15, %v10917_v32, %v1980_v47  ;;  %v2276_v6 = vadd.f32 %v10789_v42, %v2241_v31 }
 0x493   : > { %v2205_v45 = vmul.f32 %v1984_v1, %v10728_v8  ;;  %v1594_v8 = vsel %vm1515_vm10, %v11011_v56, 0.0 }
 0x494   : > { %v1775_v46 = vsel %vm1515_vm10, %v1703_v44, 0.0 }
 0x495   : > { %1776 = vadd.xlane.f32.xlu0 %v1775_v46  ;;  %v2240_v32 = vmul.f32 %v10778_v10, %v2205_v45 }
 0x497   : > { %7989 = vmatmul.msk.bf16.gmra.mxu3 %vm1515_vm10, %v3285_v29  ;;  %v2275_v54 = vadd.f32 %v10789_v42, %v2240_v32  ;;  %v8600_v28 = vpop.eup %8599 }
 0x498   : > { %1589 = vadd.xlane.f32.xlu2 %v1588_v24  ;;  %v1996_v60 = vmul.f32 %v8600_v28, %v1855_v43  ;;  %vm2002_vm4 = vweird.f32 %v8600_v28 }
 0x499   : > { %1592 = vadd.xlane.f32.xlu1 %v1591_v7  ;;  %v3286_v22 = vpack.c.bf16 %v2276_v6, %v2275_v54  ;;  %vm2003_vm5 = vmor %vm2001_vm3, %vm2002_vm4 }
 0x49a   : > { %v1997_v48 = vmul.f32 %v8600_v28, %v1996_v60  ;;  %v11052_v60 = vpop.f32.mrf.mxu3 }
 0x49c   : > { %v1998_v19 = vmul.f32 0.5, %v1997_v48 }
 0x49d   : > { %1598 = vadd.xlane.f32.xlu0 %v1597_v26 }
 0x49e   : > { %v1999_v63 = vsub.f32 1.5, %v1998_v19 }
 0x4a0   : > { %v2000_v53 = vmul.f32 %v8600_v28, %v1999_v63 }
 0x4a1   : > { %1595 = vadd.xlane.f32.xlu1 %v1594_v8 }
 0x4a2   : > { %v2004_v30 = vsel %vm2003_vm5, %v8600_v28, %v2000_v53 }
 0x4a3   : > { %v2207_v3 = vmul.f32 %v2004_v30, %v10746_v62 }
 0x4a5   : > { %1601 = vadd.xlane.f32.xlu0 %v1600_v40  ;;  %v2242_v26 = vmul.f32 %v10778_v10, %v2207_v3 }
 0x4a7   : > { %7990 = vmatmul.msk.bf16.gmra.mxu3 %vm1515_vm10, %v3286_v22  ;;  %v2277_v40 = vadd.f32 %v10789_v42, %v2242_v26 }
 0x4e0   : > { %v1756_v5 = vpop.xlane.xlu0 %1755 }
 0x4e1   : > { %v1824_v0 = vmul.f32 %v1756_v5, %v10296_v2 }
 0x4e3   : > { %v1856_v35 = vadd.f32 1e-05, %v1824_v0 }
 0x4e5   : > { %8601 = vrsqrt.f32 %v1856_v35  ;;  %vm2011_vm7 = vweird.f32 %v1856_v35 }
 0x4e8   : > { %v1759_v38 = vpop.xlane.xlu0 %1758 }
 0x4e9   : > { %v1825_v52 = vmul.f32 %v1759_v38, %v10296_v2 }
 0x4eb   : > { %v8602_v51 = vpop.eup %8601  ;;  %v1857_v50 = vadd.f32 1e-05, %v1825_v52 }
 0x4ec   : > { %v2006_v37 = vmul.f32 %v8602_v51, %v1856_v35  ;;  %vm2012_vm6 = vweird.f32 %v8602_v51 }
 0x4ed   : > { %8603 = vrsqrt.f32 %v1857_v50  ;;  %vm2013_vm8 = vmor %vm2011_vm7, %vm2012_vm6  ;;  %vm2021_vm11 = vweird.f32 %v1857_v50 }
 0x4ee   : > { %v2007_v11 = vmul.f32 %v8602_v51, %v2006_v37 }
 0x4f0   : > { %v2008_v18 = vmul.f32 0.5, %v2007_v11  ;;  %v1581_v13 = vpop.xlane.xlu0 %1580 }
 0x4f1   : > { %v1640_v55 = vmul.f32 %v10296_v2, %v1581_v13 }
 0x4f2   : > { %v2009_v36 = vsub.f32 1.5, %v2008_v18 }
 0x4f3   : > { %v11028_v44 = vpop.eup %8603  ;;  %v11032_v47 = vsub.f32 %v10865_v16, %v1640_v55  ;;  %v1762_v24 = vpop.xlane.xlu2 %1761 }
 0x4f4   : > { %v2010_v29 = vmul.f32 %v8602_v51, %v2009_v36  ;;  %v2016_v46 = vmul.f32 %v11028_v44, %v1857_v50  ;;  %v1826_v33 = vmul.f32 %v1762_v24, %v10296_v2  ;;  %vm2022_vm9 = vweird.f32 %v11028_v44 }
 0x4f5   : > { %v1704_v1 = vmul.f32 %v11032_v47, %v11032_v47  ;;  %vm11068_vm12 = vmor %vm2021_vm11, %vm2022_vm9 }
 0x4f6   : > { %v2014_v17 = vsel %vm2013_vm8, %v8602_v51, %v2010_v29  ;;  %v2017_v7 = vmul.f32 %v11028_v44, %v2016_v46  ;;  %v1858_v45 = vadd.f32 1e-05, %v1826_v33  ;;  %v11063_v51 = vld [vmem:[%s10138_s22 + $0xe8] sm:$0xff]  ;;  %v11087_v33 = vpop.f32.mrf.mxu3 }
 0x4f7   : > { %v1778_v62 = vsel %vm1515_vm10, %v1704_v1, 0.0  ;;  %v2208_v16 = vmul.f32 %v2014_v17, %v10842_v20  ;;  %v1603_v36 = vsel %vm1515_vm10, %v11063_v51, 0.0 }
 0x4f8   : > { %1779 = vadd.xlane.f32.xlu2 %v1778_v62  ;;  %v1584_v32 = vpop.xlane.xlu0 %1583  ;;  %8605 = vrsqrt.f32 %v1858_v45  ;;  %v2018_v6 = vmul.f32 0.5, %v2017_v7  ;;  %vm2031_vm14 = vweird.f32 %v1858_v45 }
 0x4f9   : > { %v1641_v31 = vmul.f32 %v10296_v2, %v1584_v32  ;;  %v2243_v54 = vmul.f32 %v10778_v10, %v2208_v16  ;;  %v11097_v32 = vld [vmem:[%s10138_s22 + $0xf0] sm:$0xff] }
 0x4fa   : > { %v2019_v48 = vsub.f32 1.5, %v2018_v6 }
 0x4fb   : > { %v11045_v8 = vsub.f32 %v10898_v61, %v1641_v31  ;;  %v2278_v22 = vadd.f32 %v10789_v42, %v2243_v54  ;;  %v1765_v34 = vpop.xlane.xlu2 %1764 }
 0x4fc   : > { %v1827_v20 = vmul.f32 %v1765_v34, %v10296_v2  ;;  %v1768_v19 = vpop.xlane.xlu1 %1767  ;;  %v2020_v38 = vmul.f32 %v11028_v44, %v2019_v48 }
 0x4fd   : > { %v3287_v43 = vpack.c.bf16 %v2278_v22, %v2277_v40  ;;  %v1705_v28 = vmul.f32 %v11045_v8, %v11045_v8  ;;  %v1828_v63 = vmul.f32 %v1768_v19, %v10296_v2 }
 0x4fe   : > { %v8606_v5 = vpop.eup %8605  ;;  %v11054_v0 = vadd.f32 1e-05, %v1827_v20  ;;  %v2024_v29 = vsel %vm11068_vm12, %v11028_v44, %v2020_v38  ;;  %v11120_v19 = vpop.f32.mrf.mxu3 }
 0x4ff   : > { %7991 = vmatmul.msk.bf16.gmra.mxu3 %vm1515_vm10, %v3287_v43  ;;  %v1781_v61 = vsel %vm1515_vm10, %v1705_v28, 0.0  ;;  %v2026_v35 = vmul.f32 %v8606_v5, %v1858_v45  ;;  %v11065_v37 = vadd.f32 1e-05, %v1828_v63  ;;  %vm2032_vm13 = vweird.f32 %v8606_v5 }
 0x500   : > { %1782 = vadd.xlane.f32.xlu2 %v1781_v61  ;;  %8607 = vrsqrt.f32 %v11054_v0  ;;  %v1774_v53 = vpop.xlane.xlu0 %1773  ;;  %vm2033_vm15 = vmor %vm2031_vm14, %vm2032_vm13  ;;  %v1606_v28 = vsel %vm1515_vm10, %v11097_v32, 0.0  ;;  %vm2041_vm3 = vweird.f32 %v11054_v0 }
 0x501   : > { %v2027_v52 = vmul.f32 %v8606_v5, %v2026_v35  ;;  %v1830_v11 = vmul.f32 %v1774_v53, %v10296_v2  ;;  %8609 = vrsqrt.f32 %v11065_v37  ;;  %vm2051_vm5 = vweird.f32 %v11065_v37 }
 0x503   : > { %v2028_v30 = vmul.f32 0.5, %v2027_v52  ;;  %v1587_v18 = vpop.xlane.xlu2 %1586  ;;  %v11076_v3 = vadd.f32 1e-05, %v1830_v11 }
 0x504   : > { %v1642_v55 = vmul.f32 %v10296_v2, %v1587_v18  ;;  %v1771_v7 = vpop.xlane.xlu1 %1770 }
 0x505   : > { %v2029_v50 = vsub.f32 1.5, %v2028_v30  ;;  %8611 = vrsqrt.f32 %v11076_v3  ;;  %v1829_v62 = vmul.f32 %v1771_v7, %v10296_v2  ;;  %vm2071_vm9 = vweird.f32 %v11076_v3 }
 0x506   : > { %v11081_v46 = vpop.eup %8607  ;;  %v11084_v24 = vsub.f32 %v10956_v27, %v1642_v55  ;;  %v2209_v27 = vmul.f32 %v2024_v29, %v10850_v21 }
 0x507   : > { %v2030_v1 = vmul.f32 %v8606_v5, %v2029_v50  ;;  %v2036_v17 = vmul.f32 %v11081_v46, %v11054_v0  ;;  %v8610_v45 = vpop.eup %8609  ;;  %v11102_v6 = vadd.f32 1e-05, %v1829_v62  ;;  %vm2042_vm4 = vweird.f32 %v11081_v46 }
 0x508   : > { %1604 = vadd.xlane.f32.xlu2 %v1603_v36  ;;  %v1706_v44 = vmul.f32 %v11084_v24, %v11084_v24  ;;  %v11099_v31 = vpop.xlane.xlu0 %1776  ;;  %v2046_v34 = vmul.f32 %v8610_v45, %v11065_v37  ;;  %v2244_v48 = vmul.f32 %v10778_v10, %v2209_v27  ;;  %vm2052_vm6 = vweird.f32 %v8610_v45  ;;  %vm11134_vm7 = vmor %vm2041_vm3, %vm2042_vm4 }
 0x509   : > { %v2034_v16 = vsel %vm2033_vm15, %v8606_v5, %v2030_v1  ;;  %v2037_v26 = vmul.f32 %v11081_v46, %v2036_v17  ;;  %8613 = vrsqrt.f32 %v11102_v6  ;;  %vm11140_vm8 = vmor %vm2051_vm5, %vm2052_vm6  ;;  %vm2061_vm12 = vweird.f32 %v11102_v6 }
 0x50a   : > { %v1784_v54 = vsel %vm1515_vm10, %v1706_v44, 0.0  ;;  %v2210_v40 = vmul.f32 %v2034_v16, %v10883_v15  ;;  %v2047_v15 = vmul.f32 %v8610_v45, %v2046_v34  ;;  %v2279_v11 = vadd.f32 %v10789_v42, %v2244_v48 }
 0x50b   : > { %v2038_v22 = vmul.f32 0.5, %v2037_v26  ;;  %1785 = vadd.xlane.f32.xlu1 %v1784_v54  ;;  %v1590_v20 = vpop.xlane.xlu2 %1589  ;;  %v11106_v21 = vpop.eup %8611  ;;  %v11160_v54 = vld [vmem:[%s10138_s22 + $0xf8] sm:$0xff] }
 0x50c   : > { %v1643_v43 = vmul.f32 %v10296_v2, %v1590_v20  ;;  %v2245_v35 = vmul.f32 %v10778_v10, %v2210_v40  ;;  %v2048_v38 = vmul.f32 0.5, %v2047_v15  ;;  %v2066_v52 = vmul.f32 %v11106_v21, %v11076_v3  ;;  %v1593_v53 = vpop.xlane.xlu1 %1592 }
 0x50d   : > { %v2039_v5 = vsub.f32 1.5, %v2038_v22  ;;  %v1644_v18 = vmul.f32 %v10296_v2, %v1593_v53  ;;  %v1609_v48 = vsel %vm1515_vm10, %v11160_v54, 0.0  ;;  %vm2072_vm11 = vweird.f32 %v11106_v21 }
 0x50e   : > { %v11117_v61 = vsub.f32 %v10988_v59, %v1643_v43  ;;  %v2280_v30 = vadd.f32 %v10789_v42, %v2245_v35  ;;  %v2049_v55 = vsub.f32 1.5, %v2048_v38  ;;  %v2067_v62 = vmul.f32 %v11106_v21, %v2066_v52  ;;  %vm2073_vm14 = vmor %vm2071_vm9, %vm2072_vm11 }
 0x50f   : > { %v2040_v63 = vmul.f32 %v11081_v46, %v2039_v5  ;;  %v8614_v29 = vpop.eup %8613  ;;  %v11146_v7 = vsub.f32 %v10996_v23, %v1644_v18 }
 0x510   : > { %1607 = vadd.xlane.f32.xlu2 %v1606_v28  ;;  %v1707_v59 = vmul.f32 %v11117_v61, %v11117_v61  ;;  %v1599_v36 = vpop.xlane.xlu0 %1598  ;;  %v3288_v1 = vpack.c.bf16 %v2280_v30, %v2279_v11  ;;  %v2050_v44 = vmul.f32 %v8610_v45, %v2049_v55  ;;  %v2056_v27 = vmul.f32 %v8614_v29, %v11102_v6 }
 0x511   : > { %v2044_v0 = vsel %vm11134_vm7, %v11081_v46, %v2040_v63  ;;  %v1646_v37 = vmul.f32 %v10296_v2, %v1599_v36  ;;  %v1708_v16 = vmul.f32 %v11146_v7, %v11146_v7  ;;  %v2068_v20 = vmul.f32 0.5, %v2067_v62 }
 0x512   : > { %v1787_v17 = vsel %vm1515_vm10, %v1707_v59, 0.0  ;;  %7992 = vmatmul.msk.bf16.gmra.mxu3 %vm1515_vm10, %v3288_v1  ;;  %v2054_v23 = vsel %vm11140_vm8, %v8610_v45, %v2050_v44  ;;  %v2057_v26 = vmul.f32 %v8614_v29, %v2056_v27  ;;  %v2211_v46 = vmul.f32 %v2044_v0, %v10914_v58 }
 0x513   : > { %1788 = vadd.xlane.f32.xlu1 %v1787_v17  ;;  %v2212_v40 = vmul.f32 %v2054_v23, %v10943_v39  ;;  %v11165_v22 = vsub.f32 %v11000_v25, %v1646_v37  ;;  %v1790_v34 = vsel %vm1515_vm10, %v1708_v16, 0.0  ;;  %v11174_v39 = vpop.f32.mrf.mxu3  ;;  %v2069_v52 = vsub.f32 1.5, %v2068_v20 }
 0x514   : > { %v2058_v43 = vmul.f32 0.5, %v2057_v26  ;;  %1791 = vadd.xlane.f32.xlu0 %v1790_v34  ;;  %v1596_v28 = vpop.xlane.xlu1 %1595  ;;  %v2246_v38 = vmul.f32 %v10778_v10, %v2211_v46  ;;  %vm2062_vm13 = vweird.f32 %v8614_v29 }
 0x515   : > { %v1645_v45 = vmul.f32 %v10296_v2, %v1596_v28  ;;  %v1710_v5 = vmul.f32 %v11165_v22, %v11165_v22  ;;  %v2247_v58 = vmul.f32 %v10778_v10, %v2212_v40  ;;  %v2070_v13 = vmul.f32 %v11106_v21, %v2069_v52  ;;  %vm2063_vm15 = vmor %vm2061_vm12, %vm2062_vm13 }
 0x516   : > { %v2059_v53 = vsub.f32 1.5, %v2058_v43  ;;  %v2281_v59 = vadd.f32 %v10789_v42, %v2246_v38 }
 0x517   : > { %v11177_v15 = vsub.f32 %v11011_v56, %v1645_v45  ;;  %v1796_v35 = vsel %vm1515_vm10, %v1710_v5, 0.0  ;;  %v2282_v56 = vadd.f32 %v10789_v42, %v2247_v58  ;;  %v2074_v6 = vsel %vm2073_vm14, %v11106_v21, %v2070_v13 }
 0x518   : > { %v1602_v25 = vpop.xlane.xlu0 %1601  ;;  %1797 = vadd.xlane.f32.xlu2 %v1796_v35  ;;  %v2214_v0 = vmul.f32 %v2074_v6, %v10953_v12 }
 0x519   : > { %v1647_v63 = vmul.f32 %v10296_v2, %v1602_v25  ;;  %v1709_v30 = vmul.f32 %v11177_v15, %v11177_v15  ;;  %v3289_v55 = vpack.c.bf16 %v2282_v56, %v2281_v59 }
 0x51a   : > { %v2249_v62 = vmul.f32 %v10778_v10, %v2214_v0 }
 0x51b   : > { %1610 = vadd.xlane.f32.xlu1 %v1609_v48  ;;  %v11185_v11 = vsub.f32 %v11014_v41, %v1647_v63  ;;  %v1793_v3 = vsel %vm1515_vm10, %v1709_v30, 0.0  ;;  %v2060_v41 = vmul.f32 %v8614_v29, %v2059_v53  ;;  %v11197_v50 = vpop.f32.mrf.mxu3 }
 0x51c   : > { %1794 = vadd.xlane.f32.xlu0 %v1793_v3  ;;  %v2284_v16 = vadd.f32 %v10789_v42, %v2249_v62 }
 0x51d   : > { %v1711_v18 = vmul.f32 %v11185_v11, %v11185_v11  ;;  %v2064_v1 = vsel %vm2063_vm15, %v8614_v29, %v2060_v41 }
 0x51e   : > { %v2213_v17 = vmul.f32 %v2064_v1, %v10961_v9 }
 0x51f   : > { %v1799_v36 = vsel %vm1515_vm10, %v1711_v18, 0.0 }
 0x520   : > { %v2248_v44 = vmul.f32 %v10778_v10, %v2213_v17  ;;  %v1831_v10 = vmul.f32 %v11099_v31, %v10296_v2 }
 0x522   : > { %7993 = vmatmul.msk.bf16.gmra.mxu3 %vm1515_vm10, %v3289_v55  ;;  %v2283_v37 = vadd.f32 %v10789_v42, %v2248_v44  ;;  %v1863_v26 = vadd.f32 1e-05, %v1831_v10 }
 0x523   : > { %1800 = vadd.xlane.f32.xlu1 %v1799_v36  ;;  %v11205_v27 = vpop.f32.mrf.mxu3 }
 0x524   : > { %v3290_v23 = vpack.c.bf16 %v2284_v16, %v2283_v37  ;;  %8615 = vrsqrt.f32 %v1863_v26  ;;  %vm2081_vm3 = vweird.f32 %v1863_v26 }
 0x52a   : > { %v8616_v40 = vpop.eup %8615 }
 0x52b   : > { %v11210_v21 = vpop.f32.mrf.mxu3  ;;  %v2076_v34 = vmul.f32 %v8616_v40, %v1863_v26  ;;  %vm2082_vm4 = vweird.f32 %v8616_v40  ;;  %v11241_v26 = vld [vmem:[%s14144_s19] ss:$0 sm:$0xff] }
 0x52c   : > { %vm2083_vm5 = vmor %vm2081_vm3, %vm2082_vm4 }
 0x52d   : > { %v2077_v43 = vmul.f32 %v8616_v40, %v2076_v34 }
 0x52f   : > { %v2078_v5 = vmul.f32 0.5, %v2077_v43 }
 0x531   : > { %v2079_v25 = vsub.f32 1.5, %v2078_v5  ;;  %v11252_v5 = vld [vmem:[#allocation5] ss:$0 sm:$0xff] }
 0x532   : > { %7994 = vmatmul.msk.bf16.gmra.mxu3 %vm1515_vm10, %v3290_v23 }
 0x533   : > { %v11212_v29 = vpop.f32.mrf.mxu3  ;;  %v2080_v52 = vmul.f32 %v8616_v40, %v2079_v25 }
 0x535   : > { %v2084_v30 = vsel %vm2083_vm5, %v8616_v40, %v2080_v52 }
 0x536   : > { %v2215_v6 = vmul.f32 %v2084_v30, %v10976_v49 }
 0x538   : > { %v2250_v49 = vmul.f32 %v11241_v26, %v2215_v6 }
 0x53b   : > { %v11214_v9 = vpop.f32.mrf.mxu3 }
 0x543   : > { %v11216_v12 = vpop.f32.mrf.mxu3 }
 0x54b   : > { %v11220_v46 = vpop.f32.mrf.mxu3 }
 0x553   : > { %v11222_v20 = vpop.f32.mrf.mxu3 }
 0x55b   : > { %v11225_v58 = vpop.f32.mrf.mxu3 }
 0x563   : > { %v11228_v18 = vpop.f32.mrf.mxu3 }
 0x56b   : > { %v1780_v28 = vpop.xlane.xlu2 %1779 }
 0x56c   : > { %v1832_v48 = vmul.f32 %v1780_v28, %v10296_v2 }
 0x56e   : > { %v1864_v45 = vadd.f32 1e-05, %v1832_v48 }
 0x570   : > { %8617 = vrsqrt.f32 %v1864_v45  ;;  %vm2091_vm7 = vweird.f32 %v1864_v45 }
 0x573   : > { %v1783_v35 = vpop.xlane.xlu2 %1782 }
 0x574   : > { %v1833_v31 = vmul.f32 %v1783_v35, %v10296_v2 }
 0x576   : > { %v8618_v63 = vpop.eup %8617  ;;  %v1865_v38 = vadd.f32 1e-05, %v1833_v31 }
 0x577   : > { %v2086_v53 = vmul.f32 %v8618_v63, %v1864_v45  ;;  %vm2092_vm6 = vweird.f32 %v8618_v63 }
 0x578   : > { %8619 = vrsqrt.f32 %v1865_v38  ;;  %vm2093_vm8 = vmor %vm2091_vm7, %vm2092_vm6  ;;  %vm2101_vm11 = vweird.f32 %v1865_v38 }
 0x579   : > { %v2087_v56 = vmul.f32 %v8618_v63, %v2086_v53 }
 0x57b   : > { %v2088_v59 = vmul.f32 0.5, %v2087_v56  ;;  %v1605_v3 = vpop.xlane.xlu2 %1604 }
 0x57c   : > { %v1648_v13 = vmul.f32 %v10296_v2, %v1605_v3 }
 0x57d   : > { %v2089_v41 = vsub.f32 1.5, %v2088_v59 }
 0x57e   : > { %v8620_v55 = vpop.eup %8619  ;;  %v11232_v36 = vsub.f32 %v11063_v51, %v1648_v13  ;;  %v1786_v0 = vpop.xlane.xlu1 %1785 }
 0x57f   : > { %v2090_v1 = vmul.f32 %v8618_v63, %v2089_v41  ;;  %v2096_v17 = vmul.f32 %v8620_v55, %v1865_v38  ;;  %v1834_v44 = vmul.f32 %v1786_v0, %v10296_v2  ;;  %vm2102_vm9 = vweird.f32 %v8620_v55 }
 0x580   : > { %v1712_v62 = vmul.f32 %v11232_v36, %v11232_v36  ;;  %vm2103_vm12 = vmor %vm2101_vm11, %vm2102_vm9 }
 0x581   : > { %v2094_v37 = vsel %vm2093_vm8, %v8618_v63, %v2090_v1  ;;  %v2097_v16 = vmul.f32 %v8620_v55, %v2096_v17  ;;  %v1866_v10 = vadd.f32 1e-05, %v1834_v44 }
 0x582   : > { %v2216_v23 = vmul.f32 %v2094_v37, %v11032_v47  ;;  %v1802_v51 = vsel %vm1515_vm10, %v1712_v62, 0.0  ;;  %v11244_v43 = vpop.f32.mrf.mxu3  ;;  %v2285_v47 = vadd.f32 %v10789_v42, %v2250_v49 }
 0x583   : > { %v2098_v40 = vmul.f32 0.5, %v2097_v16  ;;  %v1608_v34 = vpop.xlane.xlu2 %1607  ;;  %1803 = vadd.xlane.f32.xlu0 %v1802_v51  ;;  %8621 = vrsqrt.f32 %v1866_v10  ;;  %vm2111_vm14 = vweird.f32 %v1866_v10 }
 0x584   : > { %v1649_v28 = vmul.f32 %v10296_v2, %v1608_v34  ;;  %v2251_v48 = vmul.f32 %v11241_v26, %v2216_v23 }
 0x585   : > { %v2099_v35 = vsub.f32 1.5, %v2098_v40 }
 0x586   : > { %v11249_v45 = vsub.f32 %v11097_v32, %v1649_v28  ;;  %v2286_v25 = vadd.f32 %v11252_v5, %v2251_v48  ;;  %v1789_v31 = vpop.xlane.xlu1 %1788 }
 0x587   : > { %v1835_v63 = vmul.f32 %v1789_v31, %v10296_v2  ;;  %v2100_v59 = vmul.f32 %v8620_v55, %v2099_v35  ;;  %v1792_v3 = vpop.xlane.xlu0 %1791 }
 0x588   : > { %v3291_v52 = vpack.c.bf16 %v2286_v25, %v2285_v47  ;;  %v1713_v53 = vmul.f32 %v11249_v45, %v11249_v45  ;;  %v1836_v13 = vmul.f32 %v1792_v3, %v10296_v2 }
 0x589   : > { %v8622_v56 = vpop.eup %8621  ;;  %v1867_v30 = vadd.f32 1e-05, %v1835_v63  ;;  %v2104_v17 = vsel %vm2103_vm12, %v8620_v55, %v2100_v59 }
 0x58a   : > { %7995 = vmatmul.msk.bf16.gmra.mxu3 %vm1515_vm10, %v3291_v52  ;;  %v1805_v32 = vsel %vm1515_vm10, %v1713_v53, 0.0  ;;  %v2106_v42 = vmul.f32 %v8622_v56, %v1866_v10  ;;  %v11261_v6 = vpop.f32.mrf.mxu3  ;;  %v1868_v1 = vadd.f32 1e-05, %v1836_v13  ;;  %vm2112_vm13 = vweird.f32 %v8622_v56 }
 0x58b   : > { %1806 = vadd.xlane.f32.xlu2 %v1805_v32  ;;  %8623 = vrsqrt.f32 %v1867_v30  ;;  %v1798_v62 = vpop.xlane.xlu2 %1797  ;;  %v2217_v49 = vmul.f32 %v2104_v17, %v11045_v8  ;;  %vm2113_vm15 = vmor %vm2111_vm14, %vm2112_vm13  ;;  %vm2121_vm4 = vweird.f32 %v1867_v30 }
 0x58c   : > { %v2107_v41 = vmul.f32 %v8622_v56, %v2106_v42  ;;  %8625 = vrsqrt.f32 %v1868_v1  ;;  %v1838_v16 = vmul.f32 %v1798_v62, %v10296_v2  ;;  %vm2131_vm5 = vweird.f32 %v1868_v1 }
 0x58d   : > { %v2252_v10 = vmul.f32 %v11241_v26, %v2217_v49 }
 0x58e   : > { %v2108_v0 = vmul.f32 0.5, %v2107_v41  ;;  %v1611_v44 = vpop.xlane.xlu1 %1610  ;;  %v11269_v40 = vadd.f32 1e-05, %v1838_v16 }
 0x58f   : > { %v1650_v37 = vmul.f32 %v10296_v2, %v1611_v44  ;;  %v1795_v28 = vpop.xlane.xlu0 %1794 }
 0x590   : > { %v2109_v23 = vsub.f32 1.5, %v2108_v0  ;;  %8627 = vrsqrt.f32 %v11269_v40  ;;  %v1837_v48 = vmul.f32 %v1795_v28, %v10296_v2  ;;  %vm2151_vm9 = vweird.f32 %v11269_v40 }
 0x591   : > { %v8624_v51 = vpop.eup %8623  ;;  %v11267_v38 = vsub.f32 %v11160_v54, %v1650_v37 }
 0x592   : > { %v2110_v34 = vmul.f32 %v8622_v56, %v2109_v23  ;;  %v2116_v55 = vmul.f32 %v8624_v51, %v1867_v30  ;;  %v8626_v8 = vpop.eup %8625  ;;  %v1869_v31 = vadd.f32 1e-05, %v1837_v48  ;;  %vm2122_vm3 = vweird.f32 %v8624_v51 }
 0x593   : > { %v1714_v47 = vmul.f32 %v11267_v38, %v11267_v38  ;;  %v2126_v53 = vmul.f32 %v8626_v8, %v1868_v1  ;;  %vm2132_vm6 = vweird.f32 %v8626_v8  ;;  %vm2123_vm7 = vmor %vm2121_vm4, %vm2122_vm3 }
 0x594   : > { %v2114_v25 = vsel %vm2113_vm15, %v8622_v56, %v2110_v34  ;;  %v2117_v35 = vmul.f32 %v8624_v51, %v2116_v55  ;;  %8629 = vrsqrt.f32 %v1869_v31  ;;  %vm2133_vm8 = vmor %vm2131_vm5, %vm2132_vm6  ;;  %vm2141_vm12 = vweird.f32 %v1869_v31 }
 0x595   : > { %v2218_v54 = vmul.f32 %v2114_v25, %v11084_v24  ;;  %v1808_v63 = vsel %vm1515_vm10, %v1714_v47, 0.0  ;;  %v11278_v32 = vpop.f32.mrf.mxu3  ;;  %v2127_v56 = vmul.f32 %v8626_v8, %v2126_v53  ;;  %v2287_v24 = vadd.f32 %v11252_v5, %v2252_v10  ;;  %v11291_v10 = vld [vmem:[#allocation16] ss:$0 sm:$0xff] }
 0x596   : > { %v2118_v52 = vmul.f32 0.5, %v2117_v35  ;;  %1809 = vadd.xlane.f32.xlu1 %v1808_v63  ;;  %v8628_v3 = vpop.eup %8627 }
 0x597   : > { %v2253_v59 = vmul.f32 %v11241_v26, %v2218_v54  ;;  %v2128_v17 = vmul.f32 0.5, %v2127_v56  ;;  %v2146_v0 = vmul.f32 %v8628_v3, %v11269_v40  ;;  %vm2152_vm11 = vweird.f32 %v8628_v3 }
 0x598   : > { %v2119_v42 = vsub.f32 1.5, %v2118_v52  ;;  %vm2153_vm14 = vmor %vm2151_vm9, %vm2152_vm11 }
 0x599   : > { %v2288_v13 = vadd.f32 %v11252_v5, %v2253_v59  ;;  %v2129_v37 = vsub.f32 1.5, %v2128_v17  ;;  %v2147_v16 = vmul.f32 %v8628_v3, %v2146_v0  ;;  %v3367_v59 = vadd.f32 %v11291_v10, %v11120_v19 }
 0x59a   : > { %v2120_v41 = vmul.f32 %v8624_v51, %v2119_v42  ;;  %v8630_v23 = vpop.eup %8629 }
 0x59b   : > { %v3292_v44 = vpack.c.bf16 %v2288_v13, %v2287_v24  ;;  %v2130_v30 = vmul.f32 %v8626_v8, %v2129_v37  ;;  %v2136_v1 = vmul.f32 %v8630_v23, %v1869_v31  ;;  %v2148_v28 = vmul.f32 0.5, %v2147_v16 }
 0x59c   : > { %v2124_v62 = vsel %vm2123_vm7, %v8624_v51, %v2120_v41  ;;  %vm2142_vm13 = vweird.f32 %v8630_v23  ;;  %v3369_v13 = vadd.f32 %v11291_v10, %v11174_v39  ;;  %v3374_v37 = vadd.f32 %v11291_v10, %v11205_v27  ;;  %v1801_v27 = vpop.xlane.xlu1 %1800 }
 0x59d   : > { %7996 = vmatmul.msk.bf16.gmra.mxu3 %vm1515_vm10, %v3292_v44  ;;  %v2219_v49 = vmul.f32 %v2124_v62, %v11117_v61  ;;  %v11286_v34 = vpop.f32.mrf.mxu3  ;;  %v2134_v55 = vsel %vm2133_vm8, %v8626_v8, %v2130_v30  ;;  %v2137_v48 = vmul.f32 %v8630_v23, %v2136_v1  ;;  %v2149_v54 = vsub.f32 1.5, %v2148_v28  ;;  %vm2143_vm15 = vmor %vm2141_vm12, %vm2142_vm13 }
 0x59e   : > { %v2220_v47 = vmul.f32 %v2134_v55, %v11146_v7  ;;  %v3377_v30 = vadd.f32 %v11291_v10, %v11210_v21  ;;  %v3379_v1 = vadd.f32 %v11291_v10, %v11212_v29  ;;  %v1839_v55 = vmul.f32 %v1801_v27, %v10296_v2 }
 0x59f   : > { %v2138_v25 = vmul.f32 0.5, %v2137_v48  ;;  %v2254_v51 = vmul.f32 %v11241_v26, %v2219_v49  ;;  %v2150_v52 = vmul.f32 %v8628_v3, %v2149_v54  ;;  %v3382_v49 = vadd.f32 %v11291_v10, %v11214_v9 }
 0x5a0   : > { %v2255_v35 = vmul.f32 %v11241_v26, %v2220_v47  ;;  %v3384_v28 = vadd.f32 %v11291_v10, %v11216_v12  ;;  %v1871_v21 = vadd.f32 1e-05, %v1839_v55  ;;  %v3387_v48 = vadd.f32 %v11291_v10, %v11220_v46 }
 0x5a1   : > { %v2139_v63 = vsub.f32 1.5, %v2138_v25  ;;  %v2289_v8 = vadd.f32 %v11252_v5, %v2254_v51  ;;  %v2154_v56 = vsel %vm2153_vm14, %v8628_v3, %v2150_v52  ;;  %v3389_v29 = vadd.f32 %v11291_v10, %v11222_v20 }
 0x5a2   : > { %v2290_v61 = vadd.f32 %v11252_v5, %v2255_v35  ;;  %v2222_v40 = vmul.f32 %v2154_v56, %v11165_v22  ;;  %v3372_v22 = vadd.f32 %v11291_v10, %v11197_v50  ;;  %8631 = vrsqrt.f32 %v1871_v21 }
 0x5a3   : > { %v2140_v7 = vmul.f32 %v8630_v23, %v2139_v63  ;;  %v3392_v12 = vadd.f32 %v11291_v10, %v11225_v58  ;;  %vm2161_vm3 = vweird.f32 %v1871_v21 }
 0x5a4   : > { %v3293_v42 = vpack.c.bf16 %v2290_v61, %v2289_v8  ;;  %v2257_v0 = vmul.f32 %v11241_v26, %v2222_v40 }
 0x5a5   : > { %v3406_v53 = vpop.f32.mrf.mxu3  ;;  %v2144_v24 = vsel %vm2143_vm15, %v8630_v23, %v2140_v7  ;;  %v3394_v7 = vadd.f32 %v11291_v10, %v11228_v18 }
 0x5a6   : > { %v2221_v31 = vmul.f32 %v2144_v24, %v11177_v15  ;;  %v3407_v41 = vadd.f32 %v11291_v10, %v3406_v53  ;;  %v2292_v44 = vadd.f32 %v11252_v5, %v2257_v0 }
 0x5a8   : > { %v2256_v19 = vmul.f32 %v11241_v26, %v2221_v31  ;;  %v8632_v47 = vpop.eup %8631 }
 0x5a9   : > { %v2156_v25 = vmul.f32 %v8632_v47, %v1871_v21  ;;  %vm2162_vm4 = vweird.f32 %v8632_v47  ;;  %v3402_v21 = vadd.f32 %v11291_v10, %v11278_v32 }
 0x5aa   : > { %v2291_v3 = vadd.f32 %v11252_v5, %v2256_v19  ;;  %vm2163_vm5 = vmor %vm2161_vm3, %vm2162_vm4  ;;  %vm3844_vm3 = vcmask 392192   ;;  %vm3848_vm4 = vcmask 654336  }
 0x5ab   : > { %v2157_v9 = vmul.f32 %v8632_v47, %v2156_v25 }
 0x5ac   : > { %3446 = vxpose.xlu0.b32.start [1/16] (narrow) %v3367_v59, 8  ;;  %v3294_v62 = vpack.c.bf16 %v2292_v44, %v2291_v3 }
 0x5ad   : > { %7997 = vmatmul.msk.bf16.gmra.mxu3 %vm1515_vm10, %v3293_v42  ;;  %v3408_v17 = vpop.f32.mrf.mxu3  ;;  %v2158_v63 = vmul.f32 0.5, %v2157_v9 }
 0x5ae   : > { %v3409_v15 = vadd.f32 %v11291_v10, %v3408_v17 }
 0x5af   : > { %v2159_v61 = vsub.f32 1.5, %v2158_v63 }
 0x5b1   : > { %v2160_v53 = vmul.f32 %v8632_v47, %v2159_v61 }
 0x5b3   : > { %v2164_v58 = vsel %vm2163_vm5, %v8632_v47, %v2160_v53  ;;  %vm4632_vm5 = vcmask 195584  }
 0x5b4   : > { %3478 = vxpose.xlu2.b32.start [1/16] (narrow) %v3407_v41, 8  ;;  %3447 = vxpose.xlu0.b32.cont [2/16] (narrow) %v3369_v13, 8  ;;  %v2223_v31 = vmul.f32 %v2164_v58, %v11185_v11  ;;  %v3397_v13 = vadd.f32 %v11291_v10, %v11244_v43 }
 0x5b5   : > { %v3411_v39 = vpop.f32.mrf.mxu3 }
 0x5b6   : > { %v3412_v16 = vadd.f32 %v11291_v10, %v3411_v39 }
 0x5bc   : > { %3479 = vxpose.xlu2.b32.cont [2/16] (narrow) %v3409_v15, 8  ;;  %3448 = vxpose.xlu0.b32.cont [3/16] (narrow) %v3372_v22, 8 }
 0x5bd   : > { %7998 = vmatmul.msk.bf16.gmra.mxu3 %vm1515_vm10, %v3294_v62  ;;  %v3413_v23 = vpop.f32.mrf.mxu3  ;;  %v2258_v62 = vmul.f32 %v11241_v26, %v2223_v31 }
 0x5be   : > { %v3414_v50 = vadd.f32 %v11291_v10, %v3413_v23  ;;  %v3399_v23 = vadd.f32 %v11291_v10, %v11261_v6 }
 0x5c4   : > { %3480 = vxpose.xlu2.b32.cont [3/16] (narrow) %v3412_v16, 8  ;;  %3449 = vxpose.xlu0.b32.cont [4/16] (narrow) %v3374_v37, 8  ;;  %v2293_v37 = vadd.f32 %v11252_v5, %v2258_v62 }
 0x5cc   : > { %3481 = vxpose.xlu2.b32.cont [4/16] (narrow) %v3414_v50, 8  ;;  %3450 = vxpose.xlu0.b32.cont [5/16] (narrow) %v3377_v30, 8 }
 0x5d4   : > { %3451 = vxpose.xlu0.b32.cont [6/16] (narrow) %v3379_v1, 8 }
 0x5dc   : > { %3452 = vxpose.xlu0.b32.cont [7/16] (narrow) %v3382_v49, 8 }
 0x5e4   : > { %3453 = vxpose.xlu0.b32.cont [8/16] (narrow) %v3384_v28, 8 }
 0x5ec   : > { %3454 = vxpose.xlu0.b32.cont [9/16] (narrow) %v3387_v48, 8 }
 0x5f4   : > { %3455 = vxpose.xlu0.b32.cont [10/16] (narrow) %v3389_v29, 8 }
 0x5f6   : > { %v1804_v51 = vpop.xlane.xlu0 %1803 }
 0x5f7   : > { %v1840_v35 = vmul.f32 %v1804_v51, %v10296_v2 }
 0x5f9   : > { %v1872_v54 = vadd.f32 1e-05, %v1840_v35 }
 0x5fb   : > { %8633 = vrsqrt.f32 %v1872_v54  ;;  %vm2171_vm7 = vweird.f32 %v1872_v54 }
 0x5fc   : > { %3456 = vxpose.xlu0.b32.cont [11/16] (narrow) %v3392_v12, 8  ;;  %v3404_v12 = vadd.f32 %v11291_v10, %v11286_v34 }
 0x5fe   : > { %v1807_v46 = vpop.xlane.xlu2 %1806 }
 0x5ff   : > { %v1841_v8 = vmul.f32 %v1807_v46, %v10296_v2 }
 0x601   : > { %v8634_v20 = vpop.eup %8633  ;;  %v1873_v52 = vadd.f32 1e-05, %v1841_v8 }
 0x602   : > { %v2166_v59 = vmul.f32 %v8634_v20, %v1872_v54  ;;  %vm2172_vm6 = vweird.f32 %v8634_v20 }
 0x603   : > { %8635 = vrsqrt.f32 %v1873_v52  ;;  %vm2173_vm8 = vmor %vm2171_vm7, %vm2172_vm6  ;;  %vm2181_vm9 = vweird.f32 %v1873_v52  ;;  %vm3850_vm6 = vcmask 785408   ;;  %vm3852_vm7 = vcmask 916480  }
 0x604   : > { %v2167_v42 = vmul.f32 %v8634_v20, %v2166_v59  ;;  %3457 = vxpose.xlu0.b32.cont [12/16] (narrow) %v3394_v7, 8 }
 0x606   : > { %v2168_v56 = vmul.f32 0.5, %v2167_v42 }
 0x608   : > { %v2169_v24 = vsub.f32 1.5, %v2168_v56 }
 0x609   : > { %v8636_v40 = vpop.eup %8635  ;;  %v1810_v18 = vpop.xlane.xlu1 %1809 }
 0x60a   : > { %v2170_v41 = vmul.f32 %v8634_v20, %v2169_v24  ;;  %v2176_v17 = vmul.f32 %v8636_v40, %v1873_v52  ;;  %v1842_v19 = vmul.f32 %v1810_v18, %v10296_v2  ;;  %vm2182_vm11 = vweird.f32 %v8636_v40 }
 0x60b   : > { %vm2183_vm12 = vmor %vm2181_vm9, %vm2182_vm11 }
 0x60c   : > { %v2174_v0 = vsel %vm2173_vm8, %v8634_v20, %v2170_v41  ;;  %v2177_v3 = vmul.f32 %v8636_v40, %v2176_v17  ;;  %3458 = vxpose.xlu0.b32.cont [13/16] (narrow) %v3397_v13, 8  ;;  %v1874_v22 = vadd.f32 1e-05, %v1842_v19  ;;  %vm3930_vm8 = vcmask 31744  }
 0x60d   : > { %v2224_v44 = vmul.f32 %v2174_v0, %v11232_v36  ;;  %v3416_v15 = vpop.f32.mrf.mxu3 }
 0x60e   : > { %v2178_v11 = vmul.f32 0.5, %v2177_v3  ;;  %v3417_v39 = vadd.f32 %v11291_v10, %v3416_v15  ;;  %8637 = vrsqrt.f32 %v1874_v22  ;;  %vm2191_vm14 = vweird.f32 %v1874_v22 }
 0x60f   : > { %v2259_v43 = vmul.f32 %v11241_v26, %v2224_v44 }
 0x610   : > { %3482 = vxpose.xlu2.b32.cont [5/16] (narrow) %v3417_v39, 8  ;;  %v2179_v30 = vsub.f32 1.5, %v2178_v11 }
 0x611   : > { %v2294_v16 = vadd.f32 %v11252_v5, %v2259_v43 }
 0x612   : > { %v2180_v49 = vmul.f32 %v8636_v40, %v2179_v30 }
 0x613   : > { %v3295_v36 = vpack.c.bf16 %v2294_v16, %v2293_v37 }
 0x614   : > { %3459 = vxpose.xlu0.b32.cont [14/16] (narrow) %v3399_v23, 8  ;;  %v8638_v50 = vpop.eup %8637  ;;  %v2184_v6 = vsel %vm2183_vm12, %v8636_v40, %v2180_v49 }
 0x615   : > { %v3418_v1 = vpop.f32.mrf.mxu3  ;;  %7999 = vmatmul.msk.bf16.gmra.mxu3 %vm1515_vm10, %v3295_v36  ;;  %v2186_v27 = vmul.f32 %v8638_v50, %v1874_v22  ;;  %vm2192_vm13 = vweird.f32 %v8638_v50  ;;  %v2225_v29 = vmul.f32 %v2184_v6, %v11249_v45 }
 0x616   : > { %v3419_v55 = vadd.f32 %v11291_v10, %v3418_v1  ;;  %vm2193_vm15 = vmor %vm2191_vm14, %vm2192_vm13 }
 0x617   : > { %v2187_v28 = vmul.f32 %v8638_v50, %v2186_v27  ;;  %v2260_v54 = vmul.f32 %v11241_v26, %v2225_v29 }
 0x618   : > { %3483 = vxpose.xlu2.b32.cont [6/16] (narrow) %v3419_v55, 8  ;;  %v2402_v55 = vpop.f32.mrf.mxu0 }
 0x619   : > { %v2188_v48 = vmul.f32 0.5, %v2187_v28  ;;  %v2295_v45 = vadd.f32 %v11252_v5, %v2260_v54 }
 0x61b   : > { %v2189_v47 = vsub.f32 1.5, %v2188_v48 }
 0x61c   : > { %3460 = vxpose.xlu0.b32.cont [15/16] (narrow) %v3402_v21, 8 }
 0x61d   : > { %v2190_v25 = vmul.f32 %v8638_v50, %v2189_v47 }
 0x61f   : > { %v2194_v9 = vsel %vm2193_vm15, %v8638_v50, %v2190_v25 }
 0x620   : > { %v2226_v51 = vmul.f32 %v2194_v9, %v11267_v38  ;;  %v3421_v35 = vpop.f32.mrf.mxu3  ;;  %v2404_v9 = vpop.f32.mrf.mxu0 }
 0x621   : > { %v3422_v32 = vadd.f32 %v11291_v10, %v3421_v35 }
 0x622   : > { %v2261_v63 = vmul.f32 %v11241_v26, %v2226_v51  ;;  %v3273_v51 = vmul.f32 0.35355338, %v11052_v60 }
 0x623   : > { %3484 = vxpose.xlu2.b32.cont [7/16] (narrow) %v3422_v32, 8 }
 0x624   : > { %3461 = vxpose.xlu0.b32.end [16/16] (narrow) %v3404_v12, 8  ;;  %v2296_v61 = vadd.f32 %v11252_v5, %v2261_v63 }
 0x626   : > { %v3296_v46 = vpack.c.bf16 %v2296_v61, %v2295_v45 }
 0x628   : > { %v3423_v8 = vpop.f32.mrf.mxu3  ;;  %8000 = vmatmul.msk.bf16.gmra.mxu3 %vm1515_vm10, %v3296_v46  ;;  %v3208_v63 = vpop.f32.mrf.mxu0 }
 0x629   : > { %v3424_v38 = vadd.f32 %v11291_v10, %v3423_v8  ;;  %v3275_v8 = vmul.f32 0.35355338, %v3208_v63 }
 0x62b   : > { %3485 = vxpose.xlu2.b32.cont [8/16] (narrow) %v3424_v38, 8 }
 0x630   : > { %v3426_v20 = vpop.f32.mrf.mxu3 }
 0x631   : > { %v3427_v34 = vadd.f32 %v11291_v10, %v3426_v20 }
 0x633   : > { %3486 = vxpose.xlu2.b32.cont [9/16] (narrow) %v3427_v34, 8 }
 0x638   : > { %v3428_v52 = vpop.f32.mrf.mxu3 }
 0x639   : > { %v3429_v26 = vadd.f32 %v11291_v10, %v3428_v52  ;;  %v3268_v52 = vpop.f32.mrf.mxu2 }
 0x63b   : > { %3487 = vxpose.xlu2.b32.cont [10/16] (narrow) %v3429_v26, 8 }
 0x640   : > { %v3431_v7 = vpop.f32.mrf.mxu3 }
 0x641   : > { %v3432_v53 = vadd.f32 %v11291_v10, %v3431_v7 }
 0x643   : > { %3488 = vxpose.xlu2.b32.cont [11/16] (narrow) %v3432_v53, 8 }
 0x648   : > { %v3433_v5 = vpop.f32.mrf.mxu3 }
 0x649   : > { %v3434_v59 = vadd.f32 %v11291_v10, %v3433_v5  ;;  %v3279_v5 = vmul.f32 0.35355338, %v3268_v52 }
 0x64b   : > { %3489 = vxpose.xlu2.b32.cont [12/16] (narrow) %v3434_v59, 8 }
 0x650   : > { %v3462_v42 = vpop.trf.xlu0 }
 0x651   : > { %3517 = vrot.lane.b32.xlu1 %v3462_v42, %s9639_s9 }
 0x659   : > { %3511 = vrot.lane.b32.xlu1 %v3462_v42, %s9636_s18 }
 0x661   : > { %3514 = vrot.lane.b32.xlu1 %v3462_v42, %s9640_s11 }
 0x669   : > { %3529 = vrot.lane.b32.xlu1 %v3462_v42, %s9641_s2 }
 0x671   : > { %3523 = vrot.lane.b32.xlu1 %v3462_v42, %s14040_s17 }
 0x679   : > { %3526 = vrot.lane.b32.xlu1 %v3462_v42, %s9643_s16 }
 0x681   : > { %3520 = vrot.lane.b32.xlu1 %v3462_v42, %s9644_s23 }
 0x698   : > { %v3436_v58 = vpop.f32.mrf.mxu3 }
 0x699   : > { %v3437_v56 = vadd.f32 %v11291_v10, %v3436_v58  ;;  %v3238_v58 = vpop.f32.mrf.mxu1 }
 0x69b   : > { %3490 = vxpose.xlu2.b32.cont [13/16] (narrow) %v3437_v56, 8 }
 0x6a0   : > { %v3438_v24 = vpop.f32.mrf.mxu3 }
 0x6a1   : > { %v3439_v40 = vadd.f32 %v11291_v10, %v3438_v24 }
 0x6a3   : > { %3491 = vxpose.xlu2.b32.cont [14/16] (narrow) %v3439_v40, 8  ;;  %v3277_v40 = vmul.f32 0.35355338, %v3238_v58 }
 0x6ab   : > { %v3441_v31 = vpop.f32.mrf.mxu3 }
 0x6ac   : > { %v3442_v13 = vadd.f32 %v11291_v10, %v3441_v31 }
 0x6ae   : > { %3492 = vxpose.xlu2.b32.cont [15/16] (narrow) %v3442_v13, 8 }
 0x6b3   : > { %v3443_v41 = vpop.f32.mrf.mxu3 }
 0x6b4   : > { %v3444_v17 = vadd.f32 %v11291_v10, %v3443_v41 }
 0x6b6   : > { %3493 = vxpose.xlu2.b32.end [16/16] (narrow) %v3444_v17, 8 }
 0x6c3   : > { %v3518_v18 = vpop.permute.xlu1 %3517 }
 0x6c4   : > { %v3560_v43 = vrot.slane %v3518_v18, 4  ;;  %v8549_v18 = vld [vmem:[#allocation11] ss:$0 sm:$0xff] }
 0x6cb   : > { %v3512_v0 = vpop.permute.xlu1 %3511 }
 0x6cc   : > { %v3561_v23 = vsel %vm2428_vm1, %v3560_v43, %v3512_v0  ;;  %v11430_v0 = vadd.f32 %v8549_v18, %v2404_v9 }
 0x6cd   : > { %v3565_v1 = vperm.slane %v3561_v23, %v10376_v57 }
 0x6cf   : > { %v3578_v28 = vrot.slane %v3565_v1, 4 }
 0x6d3   : > { %v3515_v3 = vpop.permute.xlu1 %3514 }
 0x6d4   : > { %v3554_v30 = vrot.slane %v3515_v3, 4  ;;  %v11432_v3 = vadd.f32 %v8549_v18, %v2402_v55 }
 0x6d6   : > { %v3555_v49 = vsel %vm2428_vm1, %v3554_v30, %v3462_v42 }
 0x6d7   : > { %v11377_v19 = vpop.trf.xlu2  ;;  %v3559_v21 = vperm.slane %v3555_v49, %v10376_v57 }
 0x6d8   : > { %3539 = vrot.lane.b32.xlu1 %v11377_v19, %s9639_s9 }
 0x6d9   : > { %v3579_v48 = vsel %vm2428_vm1, %v3578_v28, %v3559_v21  ;;  %v3580_v54 = vrot.slane %v3559_v21, 4 }
 0x6da   : > { %v3585_v29 = vperm.slane %v3579_v48, %v10379_v4 }
 0x6db   : > { %v3530_v44 = vpop.permute.xlu1 %3529  ;;  %v3581_v61 = vsel %vm2428_vm1, %v3565_v1, %v3580_v54  ;;  %v3270_v54 = vpop.f32.mrf.mxu2 }
 0x6dc   : > { %v3572_v15 = vrot.slane %v3530_v44, 4  ;;  %v3604_v45 = vrot.slane %v3585_v29, 4  ;;  %v3589_v20 = vperm.slane %v3581_v61, %v10379_v4  ;;  %v11436_v44 = vpack.i.bf16 %v11430_v0, %v11432_v3 }
 0x6de   : > { %v3608_v26 = vrot.slane %v3589_v20, 4 }
 0x6e0   : > { %3533 = vrot.lane.b32.xlu1 %v11377_v19, %s9636_s18 }
 0x6e3   : > { %v3524_v10 = vpop.permute.xlu1 %3523 }
 0x6e4   : > { %v3573_v62 = vsel %vm2428_vm1, %v3572_v15, %v3524_v10 }
 0x6e5   : > { %v3577_v37 = vperm.slane %v3573_v62, %v10376_v57 }
 0x6e7   : > { %v3590_v36 = vrot.slane %v3577_v37, 4 }
 0x6e8   : > { %3536 = vrot.lane.b32.xlu1 %v11377_v19, %s9640_s11 }
 0x6eb   : > { %v3527_v22 = vpop.permute.xlu1 %3526 }
 0x6ec   : > { %v3566_v11 = vrot.slane %v3527_v22, 4 }
 0x6f0   : > { %3551 = vrot.lane.b32.xlu1 %v11377_v19, %s9641_s2 }
 0x6f3   : > { %v3521_v39 = vpop.permute.xlu1 %3520 }
 0x6f4   : > { %v3567_v16 = vsel %vm2428_vm1, %v3566_v11, %v3521_v39 }
 0x6f5   : > { %v3571_v50 = vperm.slane %v3567_v16, %v10376_v57 }
 0x6f7   : > { %v3591_v27 = vsel %vm2428_vm1, %v3590_v36, %v3571_v50  ;;  %v3592_v32 = vrot.slane %v3571_v50, 4 }
 0x6f8   : > { %3545 = vrot.lane.b32.xlu1 %v11377_v19, %s14040_s17  ;;  %v3597_v6 = vperm.slane %v3591_v27, %v10379_v4  ;;  %s14159_s17 = smov 104  }
 0x6f9   : > { %v3593_v38 = vsel %vm2428_vm1, %v3577_v37, %v3592_v32 }
 0x6fa   : > { %v3602_v47 = vrot.slane %v3597_v6, 4  ;;  %v3605_v46 = vsel %vm2428_vm1, %v3597_v6, %v3604_v45  ;;  %v3601_v34 = vperm.slane %v3593_v38, %v10379_v4 }
 0x6fb   : > { %v11415_v60 = vadd.f32 %v3605_v46, %v3275_v8 }
 0x6fc   : > { %v3603_v25 = vsel %vm2428_vm1, %v3602_v47, %v3585_v29  ;;  %v3609_v53 = vsel %vm2428_vm1, %v3601_v34, %v3608_v26  ;;  %v3606_v42 = vrot.slane %v3601_v34, 4  ;;  %v3210_v29 = vpop.f32.mrf.mxu0  ;;  %v3280_v34 = vmul.f32 0.35355338, %v3270_v54 }
 0x6fd   : > { %v11407_v35 = vadd.f32 %v3603_v25, %v3273_v51  ;;  %v4182_v7 = vsel %vm1515_vm10, %v11415_v60, -inf  ;;  %v11421_v59 = vadd.f32 %v3609_v53, %v3279_v5  ;;  %v3276_v63 = vmul.f32 0.35355338, %v3210_v29 }
 0x6fe   : > { %v3607_v24 = vsel %vm2428_vm1, %v3606_v42, %v3589_v20  ;;  %v3240_v20 = vpop.f32.mrf.mxu1 }
 0x6ff   : > { %v4176_v12 = vsel %vm1515_vm10, %v11407_v35, -inf  ;;  %v4194_v56 = vsel %vm1515_vm10, %v11421_v59, -inf  ;;  %v11426_v31 = vadd.f32 %v3607_v24, %v3277_v40  ;;  %v3278_v42 = vmul.f32 0.35355338, %v3240_v20 }
 0x700   : > { %3548 = vrot.lane.b32.xlu1 %v11377_v19, %s9643_s16  ;;  %v3274_v24 = vmul.f32 0.35355338, %v11087_v33 }
 0x701   : > { %v4188_v13 = vsel %vm1515_vm10, %v11426_v31, -inf  ;;  %v3674_v29 = vrot.slane %v11426_v31, 4 }
 0x708   : > { %3542 = vrot.lane.b32.xlu1 %v11377_v19, %s9644_s23 }
 0x727   : > { %4177 = vmax.xlane.f32.xlu2 %v4176_v12 }
 0x732   : > { %4183 = vmax.xlane.f32.xlu1 %v4182_v7 }
 0x73a   : > { %4195 = vmax.xlane.f32.xlu1 %v4194_v56 }
 0x742   : > { %4189 = vmax.xlane.f32.xlu1 %v4188_v13 }
 0x74a   : > { %v3540_v41 = vpop.permute.xlu1 %3539 }
 0x74b   : > { %v3616_v11 = vrot.slane %v3540_v41, 4 }
 0x752   : > { %v3534_v17 = vpop.permute.xlu1 %3533 }
 0x753   : > { %v3617_v39 = vsel %vm2428_vm1, %v3616_v11, %v3534_v17 }
 0x754   : > { %v3621_v37 = vperm.slane %v3617_v39, %v10376_v57 }
 0x756   : > { %v3634_v50 = vrot.slane %v3621_v37, 4 }
 0x75a   : > { %v3537_v10 = vpop.permute.xlu1 %3536 }
 0x75b   : > { %8516 = vrot.lane.b32.xlu1 %v11436_v44, %s9636_s18  ;;  %v3610_v62 = vrot.slane %v3537_v10, 4 }
 0x75d   : > { %v3611_v43 = vsel %vm2428_vm1, %v3610_v62, %v11377_v19 }
 0x75e   : > { %v3615_v16 = vperm.slane %v3611_v43, %v10376_v57 }
 0x760   : > { %v3636_v1 = vrot.slane %v3615_v16, 4  ;;  %v3635_v49 = vsel %vm2428_vm1, %v3634_v50, %v3615_v16 }
 0x761   : > { %v3641_v19 = vperm.slane %v3635_v49, %v10379_v4 }
 0x762   : > { %v3552_v22 = vpop.permute.xlu1 %3551  ;;  %v3637_v28 = vsel %vm2428_vm1, %v3621_v37, %v3636_v1 }
 0x763   : > { %8521 = vrot.lane.b32.xlu1 %v11436_v44, %s14159_s17  ;;  %v3628_v30 = vrot.slane %v3552_v22, 4  ;;  %v3645_v25 = vperm.slane %v3637_v28, %v10379_v4  ;;  %v3660_v32 = vrot.slane %v3641_v19, 4  ;;  %s14160_s17 = smov 120  }
 0x765   : > { %v3664_v38 = vrot.slane %v3645_v25, 4 }
 0x76a   : > { %v3546_v15 = vpop.permute.xlu1 %3545 }
 0x76b   : > { %v3629_v36 = vsel %vm2428_vm1, %v3628_v30, %v3546_v15 }
 0x76c   : > { %v3633_v27 = vperm.slane %v3629_v36, %v10376_v57 }
 0x76e   : > { %v3646_v48 = vrot.slane %v3633_v27, 4 }
 0x772   : > { %v3549_v23 = vpop.permute.xlu1 %3548 }
 0x773   : > { %v3622_v55 = vrot.slane %v3549_v23, 4 }
 0x77a   : > { %v3543_v21 = vpop.permute.xlu1 %3542 }
 0x77b   : > { %v3623_v6 = vsel %vm2428_vm1, %v3622_v55, %v3543_v21 }
 0x77c   : > { %v3627_v47 = vperm.slane %v3623_v6, %v10376_v57 }
 0x77e   : > { %v3647_v9 = vsel %vm2428_vm1, %v3646_v48, %v3627_v47  ;;  %v3648_v51 = vrot.slane %v3627_v47, 4 }
 0x77f   : > { %v3653_v12 = vperm.slane %v3647_v9, %v10379_v4 }
 0x780   : > { %v3649_v45 = vsel %vm2428_vm1, %v3633_v27, %v3648_v51  ;;  %v3688_v51 = vrot.slane %v11415_v60, 4 }
 0x781   : > { %v3657_v61 = vperm.slane %v3649_v45, %v10379_v4  ;;  %v3658_v46 = vrot.slane %v3653_v12, 4  ;;  %v3661_v8 = vsel %vm2428_vm1, %v3653_v12, %v3660_v32  ;;  %v3676_v45 = vrot.slane %v11407_v35, 4 }
 0x782   : > { %v11460_v52 = vadd.f32 %v3661_v8, %v3276_v63 }
 0x783   : > { %v3662_v26 = vrot.slane %v3657_v61, 4  ;;  %v3665_v7 = vsel %vm2428_vm1, %v3657_v61, %v3664_v38  ;;  %v3659_v58 = vsel %vm2428_vm1, %v3658_v46, %v3641_v19  ;;  %v3689_v61 = vsel %vm2428_vm1, %v11421_v59, %v3688_v51 }
 0x784   : > { %v4185_v53 = vsel %vm1515_vm10, %v11460_v52, -inf  ;;  %v11465_v5 = vadd.f32 %v3665_v7, %v3280_v34  ;;  %v11473_v41 = vadd.f32 %v3659_v58, %v3274_v24  ;;  %v3697_v38 = vperm.slane %v3689_v61, %v10376_v57 }
 0x785   : > { %4186 = vmax.xlane.f32.xlu0 %v4185_v53  ;;  %v3663_v56 = vsel %vm2428_vm1, %v3662_v26, %v3645_v25  ;;  %v3675_v25 = vsel %vm2428_vm1, %v3674_v29, %v11407_v35  ;;  %v3677_v20 = vsel %vm2428_vm1, %v11426_v31, %v3676_v45 }
 0x786   : > { %v3742_v40 = vrot.slane %v11465_v5, 4  ;;  %v11471_v13 = vadd.f32 %v3663_v56, %v3278_v42  ;;  %v4179_v33 = vsel %vm1515_vm10, %v11473_v41, -inf  ;;  %v4197_v39 = vsel %vm1515_vm10, %v11465_v5, -inf }
 0x787   : > { %v3681_v9 = vperm.slane %v3675_v25, %v10376_v57  ;;  %v3710_v26 = vrot.slane %v3697_v38, 4 }
 0x788   : > { %v3743_v17 = vsel %vm2428_vm1, %v3742_v40, %v11460_v52  ;;  %v3730_v18 = vrot.slane %v11471_v13, 4  ;;  %v4191_v16 = vsel %vm1515_vm10, %v11471_v13, -inf }
 0x789   : > { %v11479_v10 = vperm.slane %v3743_v17, %v10376_v57  ;;  %v3700_v32 = vrot.slane %v3681_v9, 4 }
 0x78a   : > { %v3731_v22 = vsel %vm2428_vm1, %v3730_v18, %v11473_v41 }
 0x78b   : > { %v3754_v15 = vrot.slane %v11479_v10, 4  ;;  %v11487_v62 = vperm.slane %v3731_v22, %v10376_v57 }
 0x78d   : > { %4180 = vmax.xlane.f32.xlu1 %v4179_v33  ;;  %v11491_v11 = vsel %vm2428_vm1, %v3754_v15, %v11487_v62 }
 0x795   : > { %4198 = vmax.xlane.f32.xlu1 %v4197_v39 }
 0x79a   : > { %v4178_v43 = vpop.xlane.xlu2 %4177 }
 0x79b   : > { %v4200_v37 = vsub.f32 %v11407_v35, %v4178_v43 }
 0x79d   : > { %v4208_v23 = vmul.f32 1.442695, %v4200_v37  ;;  %4192 = vmax.xlane.f32.xlu1 %v4191_v16 }
 0x79f   : > { %8639 = vpow2.f32 %v4208_v23 }
 0x7a5   : > { %v11498_v30 = vpop.eup %8639  ;;  %v4184_v36 = vpop.xlane.xlu1 %4183 }
 0x7a6   : > { %v4224_v50 = vsel %vm1515_vm10, %v11498_v30, 0.0  ;;  %v4202_v54 = vsub.f32 %v11415_v60, %v4184_v36 }
 0x7a7   : > { %4225 = vadd.xlane.f32.xlu2 %v4224_v50 }
 0x7a8   : > { %v4212_v63 = vmul.f32 1.442695, %v4202_v54 }
 0x7ad   : > { %v4196_v1 = vpop.xlane.xlu1 %4195 }
 0x7ae   : > { %v4206_v49 = vsub.f32 %v11421_v59, %v4196_v1 }
 0x7b0   : > { %v4220_v27 = vmul.f32 1.442695, %v4206_v49 }
 0x7b2   : > { %8641 = vpow2.f32 %v4220_v27 }
 0x7b5   : > { %v4190_v55 = vpop.xlane.xlu1 %4189 }
 0x7b6   : > { %v4204_v28 = vsub.f32 %v11426_v31, %v4190_v55  ;;  %8526 = vrot.lane.b32.xlu1 %v11436_v44, %s14160_s17  ;;  %v3686_v44 = vrot.slane %v11421_v59, 4  ;;  %v3744_v55 = vrot.slane %v11460_v52, 4  ;;  %s14065_s17 = smov 8  }
 0x7b8   : > { %v11506_v21 = vpop.eup %8641  ;;  %v4216_v19 = vmul.f32 1.442695, %v4204_v28  ;;  %v3687_v12 = vsel %vm2428_vm1, %v3686_v44, %v11415_v60  ;;  %v3685_v60 = vperm.slane %v3677_v20, %v10376_v57  ;;  %v3745_v25 = vsel %vm2428_vm1, %v11465_v5, %v3744_v55 }
 0x7b9   : > { %v4242_v6 = vsel %vm1515_vm10, %v11506_v21, 0.0  ;;  %v3693_v46 = vperm.slane %v3687_v12, %v10376_v57 }
 0x7ba   : > { %8643 = vpow2.f32 %v4216_v19  ;;  %4243 = vadd.xlane.f32.xlu2 %v4242_v6  ;;  %v3711_v59 = vsel %vm2428_vm1, %v3710_v26, %v3685_v60  ;;  %v3712_v22 = vrot.slane %v3685_v60, 4  ;;  %v3756_v6 = vrot.slane %v11487_v62, 4 }
 0x7bb   : > { %v3701_v8 = vsel %vm2428_vm1, %v3693_v46, %v3700_v32  ;;  %8645 = vpow2.f32 %v4212_v63  ;;  %v3717_v53 = vperm.slane %v3711_v59, %v10379_v4  ;;  %v3698_v31 = vrot.slane %v3693_v46, 4 }
 0x7bc   : > { %v11532_v34 = vperm.slane %v3701_v8, %v10379_v4  ;;  %v3713_v43 = vsel %vm2428_vm1, %v3697_v38, %v3712_v22  ;;  %v3757_v51 = vsel %vm2428_vm1, %v11479_v10, %v3756_v6  ;;  %v3753_v62 = vperm.slane %v3745_v25, %v10376_v57 }
 0x7bd   : > { %v3699_v42 = vsel %vm2428_vm1, %v3698_v31, %v3681_v9  ;;  %v3726_v39 = vrot.slane %v3717_v53, 4  ;;  %v11559_v23 = vperm.slane %v3713_v43, %v10379_v4  ;;  %v11586_v54 = vperm.slane %v3757_v51, %v10379_v4 }
 0x7be   : > { %v11548_v56 = vperm.slane %v3699_v42, %v10379_v4  ;;  %v3766_v32 = vrot.slane %v3753_v62, 4  ;;  %v2982_v42 = vrot.slane %v11430_v0, 4 }
 0x7bf   : > { %v3727_v16 = vsel %vm2428_vm1, 0.0, %v3726_v39  ;;  %v3728_v27 = vrot.slane %v11559_v23, 4 }
 0x7c0   : > { %v11510_v48 = vpop.eup %8643  ;;  %v3722_v24 = vrot.slane %v11548_v56, 4 }
 0x7c1   : > { %v4236_v47 = vsel %vm1515_vm10, %v11510_v48, 0.0  ;;  %v11537_v35 = vpop.eup %8645  ;;  %v3729_v19 = vsel %vm2428_vm1, 0.0, %v3728_v27 }
 0x7c2   : > { %4237 = vadd.xlane.f32.xlu2 %v4236_v47  ;;  %v4230_v7 = vsel %vm1515_vm10, %v11537_v35, 0.0  ;;  %v3723_v18 = vsel %vm2428_vm1, 0.0, %v3722_v24  ;;  %v3732_v47 = vrot.slane %v11473_v41, 4  ;;  %v2926_v24 = vrot.slane %v11432_v3, 4 }
 0x7cd   : > { %v11545_v58 = vpop.permute.xlu1 %8516 }
 0x7ce   : > { %v8519_v26 = vunpack.i.h.bf16 %v11545_v58  ;;  %v8518_v59 = vunpack.i.l.bf16 %v11545_v58 }
 0x7d0   : > { %v2924_v31 = vrot.slane %v8518_v59, 4 }
 0x7d2   : > { %v2925_v58 = vsel %vm2428_vm1, %v2924_v31, %v11432_v3 }
 0x7d5   : > { %v11551_v40 = vpop.permute.xlu1 %8521 }
 0x7d6   : > { %v8524_v22 = vunpack.i.h.bf16 %v11551_v40 }
 0x7da   : > { %3791 = vrot.lane.b32.xlu2 %v11532_v34, %s9643_s16 }
 0x7e0   : > { %4231 = vadd.xlane.f32.xlu1 %v4230_v7 }
 0x7e2   : > { %3799 = vrot.lane.b32.xlu2 %v3717_v53, %s9644_s23  ;;  %v2980_v53 = vrot.slane %v8519_v26, 4 }
 0x7f8   : > { %v4187_v17 = vpop.xlane.xlu0 %4186 }
 0x7f9   : > { %v4203_v15 = vsub.f32 %v11460_v52, %v4187_v17  ;;  %3787 = vrot.lane.b32.xlu1 %v3723_v18, %s9641_s2  ;;  %v2983_v17 = vsel %vm2428_vm1, %v8519_v26, %v2982_v42  ;;  %v2981_v18 = vsel %vm2428_vm1, %v2980_v53, %v11430_v0 }
 0x7fa   : > { %v2987_v39 = vperm.slane %v2981_v18, %v10376_v57  ;;  %v2991_v43 = vperm.slane %v2983_v17, %v10376_v57 }
 0x7fb   : > { %v4214_v33 = vmul.f32 1.442695, %v4203_v15  ;;  %v8523_v15 = vunpack.i.l.bf16 %v11551_v40 }
 0x7fc   : > { %v3006_v6 = vrot.slane %v2987_v39, 4 }
 0x7fd   : > { %8647 = vpow2.f32 %v4214_v33  ;;  %v2927_v33 = vsel %vm2428_vm1, %v8518_v59, %v2926_v24  ;;  %v2936_v0 = vrot.slane %v8523_v15, 4 }
 0x7fe   : > { %v2935_v3 = vperm.slane %v2927_v33, %v10376_v57 }
 0x800   : > { %v4181_v37 = vpop.xlane.xlu1 %4180 }
 0x801   : > { %v4201_v36 = vsub.f32 %v11473_v41, %v4181_v37  ;;  %3803 = vrot.lane.b32.xlu1 %v3727_v16, %s9639_s9  ;;  %v3733_v41 = vsel %vm2428_vm1, %v11471_v13, %v3732_v47  ;;  %v2931_v37 = vperm.slane %v2925_v58, %v10376_v57 }
 0x802   : > { %v3741_v12 = vperm.slane %v3733_v41, %v10376_v57 }
 0x803   : > { %v11563_v50 = vpop.eup %8647  ;;  %v4210_v1 = vmul.f32 1.442695, %v4201_v36  ;;  %v3724_v36 = vrot.slane %v11532_v34, 4  ;;  %v3018_v34 = vrot.slane %v2991_v43, 4 }
 0x804   : > { %v4233_v49 = vsel %vm1515_vm10, %v11563_v50, 0.0  ;;  %v3767_v46 = vsel %vm2428_vm1, %v3766_v32, %v3741_v12  ;;  %v3768_v38 = vrot.slane %v3741_v12, 4  ;;  %v2962_v32 = vrot.slane %v2935_v3, 4 }
 0x805   : > { %8649 = vpow2.f32 %v4210_v1  ;;  %4234 = vadd.xlane.f32.xlu0 %v4233_v49  ;;  %v11598_v8 = vperm.slane %v3767_v46, %v10379_v4  ;;  %v2992_v1 = vrot.slane %v8524_v22, 4  ;;  %v3725_v25 = vsel %vm2428_vm1, 0.0, %v3724_v36 }
 0x806   : > { %v3769_v60 = vsel %vm2428_vm1, %v3753_v62, %v3768_v38 }
 0x807   : > { %v11610_v7 = vperm.slane %v3769_v60, %v10379_v4 }
 0x808   : > { %v4199_v28 = vpop.xlane.xlu1 %4198 }
 0x809   : > { %v4207_v29 = vsub.f32 %v11465_v5, %v4199_v28  ;;  %3811 = vrot.lane.b32.xlu1 %v3729_v19, %s9636_s18 }
 0x80b   : > { %v11576_v44 = vpop.eup %8649  ;;  %v4222_v9 = vmul.f32 1.442695, %v4207_v29 }
 0x80c   : > { %v4227_v52 = vsel %vm1515_vm10, %v11576_v44, 0.0 }
 0x80d   : > { %8651 = vpow2.f32 %v4222_v9  ;;  %4228 = vadd.xlane.f32.xlu0 %v4227_v52  ;;  %v2950_v9 = vrot.slane %v2931_v37, 4 }
 0x810   : > { %v4193_v5 = vpop.xlane.xlu1 %4192 }
 0x811   : > { %v4205_v63 = vsub.f32 %v11471_v13, %v4193_v5  ;;  %3819 = vrot.lane.b32.xlu1 %v11586_v54, %s9643_s16  ;;  %s9645_s16 = smov 24  }
 0x813   : > { %v11592_v10 = vpop.eup %8651  ;;  %v4218_v45 = vmul.f32 1.442695, %v4205_v63 }
 0x814   : > { %v4245_v61 = vsel %vm1515_vm10, %v11592_v10, 0.0 }
 0x815   : > { %8653 = vpow2.f32 %v4218_v45  ;;  %4246 = vadd.xlane.f32.xlu0 %v4245_v61 }
 0x819   : > { %3827 = vrot.lane.b32.xlu1 %v11598_v8, %s9644_s23  ;;  %s14161_s23 = smov 48  }
 0x81b   : > { %v11602_v13 = vpop.eup %8653 }
 0x81c   : > { %v4239_v20 = vsel %vm1515_vm10, %v11602_v13, 0.0 }
 0x81d   : > { %4240 = vadd.xlane.f32.xlu0 %v4239_v20 }
 0x821   : > { %3835 = vrot.lane.b32.xlu1 %v11610_v7, %s9640_s11 }
 0x828   : > { %v8527_v16 = vpop.permute.xlu1 %8526 }
 0x829   : > { %v8529_v49 = vunpack.i.h.bf16 %v8527_v16  ;;  %v8528_v27 = vunpack.i.l.bf16 %v8527_v16 }
 0x82b   : > { %v2993_v55 = vsel %vm2428_vm1, %v2992_v1, %v8529_v49  ;;  %v2994_v40 = vrot.slane %v8529_v49, 4  ;;  %v2937_v28 = vsel %vm2428_vm1, %v2936_v0, %v8528_v27  ;;  %v2938_v19 = vrot.slane %v8528_v27, 4 }
 0x82c   : > { %v2999_v47 = vperm.slane %v2993_v55, %v10376_v57  ;;  %v2943_v29 = vperm.slane %v2937_v28, %v10376_v57 }
 0x82d   : > { %v2995_v52 = vsel %vm2428_vm1, %v8524_v22, %v2994_v40  ;;  %v2939_v51 = vsel %vm2428_vm1, %v8523_v15, %v2938_v19 }
 0x82e   : > { %v3003_v62 = vperm.slane %v2995_v52, %v10376_v57  ;;  %v3004_v41 = vrot.slane %v2999_v47, 4  ;;  %v3007_v5 = vsel %vm2428_vm1, %v2999_v47, %v3006_v6  ;;  %v2947_v12 = vperm.slane %v2939_v51, %v10376_v57 }
 0x82f   : > { %v3015_v63 = vperm.slane %v3007_v5, %v10379_v4  ;;  %v2948_v45 = vrot.slane %v2943_v29, 4  ;;  %v2951_v61 = vsel %vm2428_vm1, %v2943_v29, %v2950_v9 }
 0x830   : > { %v3005_v46 = vsel %vm2428_vm1, %v3004_v41, %v2987_v39  ;;  %v3016_v38 = vrot.slane %v3003_v62, 4  ;;  %v3019_v20 = vsel %vm2428_vm1, %v3003_v62, %v3018_v34  ;;  %v2959_v60 = vperm.slane %v2951_v61, %v10379_v4 }
 0x831   : > { %v3011_v26 = vperm.slane %v3005_v46, %v10379_v4  ;;  %v3027_v59 = vperm.slane %v3019_v20, %v10379_v4  ;;  %v3030_v53 = vrot.slane %v3015_v63, 4  ;;  %v2949_v31 = vsel %vm2428_vm1, %v2948_v45, %v2931_v37  ;;  %3795 = vrot.lane.b32.xlu0 %v3725_v25, %s14161_s23 }
 0x832   : > { %v3017_v42 = vsel %vm2428_vm1, %v3016_v38, %v2991_v43  ;;  %v2955_v24 = vperm.slane %v2949_v31, %v10379_v4  ;;  %v2960_v17 = vrot.slane %v2947_v12, 4  ;;  %v2963_v18 = vsel %vm2428_vm1, %v2947_v12, %v2962_v32 }
 0x833   : > { %v3023_v58 = vperm.slane %v3017_v42, %v10379_v4  ;;  %v3028_v22 = vrot.slane %v3011_v26, 4  ;;  %v3031_v15 = vsel %vm2428_vm1, 0.0, %v3030_v53  ;;  %v3034_v33 = vrot.slane %v3027_v59, 4 }
 0x834   : > { %v2961_v39 = vsel %vm2428_vm1, %v2960_v17, %v2935_v3  ;;  %v2971_v16 = vperm.slane %v2963_v18, %v10379_v4  ;;  %v2972_v37 = vrot.slane %v2955_v24, 4  ;;  %v3095_v0 = vrot.slane %v3031_v15, 4 }
 0x835   : > { %v3032_v36 = vrot.slane %v3023_v58, 4  ;;  %v3035_v1 = vsel %vm2428_vm1, 0.0, %v3034_v33  ;;  %v2967_v43 = vperm.slane %v2961_v39, %v10379_v4  ;;  %v2974_v49 = vrot.slane %v2959_v60, 4 }
 0x836   : > { %v2978_v27 = vrot.slane %v2971_v16, 4  ;;  %v3029_v55 = vsel %vm2428_vm1, 0.0, %v3028_v22  ;;  %v3106_v40 = vrot.slane %v3035_v1, 4  ;;  %v2973_v28 = vsel %vm2428_vm1, 0.0, %v2972_v37 }
 0x837   : > { %v2976_v19 = vrot.slane %v2967_v43, 4  ;;  %v2975_v6 = vsel %vm2428_vm1, 0.0, %v2974_v49  ;;  %v3036_v47 = vsel %vm2428_vm1, %v2974_v49, %v2955_v24  ;;  %v3033_v52 = vsel %vm2428_vm1, 0.0, %v3032_v36 }
 0x838   : > { %v2979_v3 = vsel %vm2428_vm1, 0.0, %v2978_v27  ;;  %v3047_v29 = vsel %vm2428_vm1, %v2978_v27, %v2967_v43  ;;  %v3041_v25 = vrot.slane %v2975_v6, 4  ;;  %v3040_v51 = vperm.slane %v3036_v47, %v10376_v57 }
 0x839   : > { %v3052_v34 = vrot.slane %v2979_v3, 4  ;;  %v2977_v9 = vsel %vm2428_vm1, 0.0, %v2976_v19  ;;  %v3051_v62 = vperm.slane %v3047_v29, %v10376_v57  ;;  %v3090_v41 = vsel %vm2428_vm1, %v3030_v53, %v3011_v26 }
 0x83a   : > { %v3096_v5 = vsel %vm2428_vm1, %v3095_v0, %v3029_v55  ;;  %v3042_v12 = vsel %vm2428_vm1, %v3041_v25, %v2973_v28  ;;  %v3094_v63 = vperm.slane %v3090_v41, %v10376_v57  ;;  %v3060_v46 = vrot.slane %v3040_v51, 4 }
 0x83b   : > { %v3053_v32 = vsel %vm2428_vm1, %v3052_v34, %v2977_v9  ;;  %v3046_v45 = vperm.slane %v3042_v12, %v10376_v57  ;;  %v3072_v38 = vrot.slane %v3051_v62, 4  ;;  %v3100_v20 = vperm.slane %v3096_v5, %v10376_v57 }
 0x83c   : > { %v3057_v61 = vperm.slane %v3053_v32, %v10376_v57  ;;  %v3101_v60 = vsel %vm2428_vm1, %v3034_v33, %v3023_v58  ;;  %v3107_v26 = vsel %vm2428_vm1, %v3106_v40, %v3033_v52  ;;  %v3114_v42 = vrot.slane %v3094_v63, 4 }
 0x83d   : > { %v3058_v59 = vrot.slane %v3046_v45, 4  ;;  %v3105_v31 = vperm.slane %v3101_v60, %v10376_v57  ;;  %v3111_v24 = vperm.slane %v3107_v26, %v10376_v57  ;;  %v3112_v17 = vrot.slane %v3100_v20, 4 }
 0x83e   : > { %v3070_v53 = vrot.slane %v3057_v61, 4  ;;  %v3061_v18 = vsel %vm2428_vm1, %v3046_v45, %v3060_v46  ;;  %v3073_v22 = vsel %vm2428_vm1, %v3057_v61, %v3072_v38  ;;  %v3115_v40 = vsel %vm2428_vm1, %v3100_v20, %v3114_v42 }
 0x83f   : > { %v3059_v15 = vsel %vm2428_vm1, %v3058_v59, %v3040_v51  ;;  %v3126_v16 = vrot.slane %v3105_v31, 4  ;;  %v3113_v37 = vsel %vm2428_vm1, %v3112_v17, %v3094_v63  ;;  %v3124_v36 = vrot.slane %v3111_v24, 4 }
 0x840   : > { %v3071_v39 = vsel %vm2428_vm1, %v3070_v53, %v3051_v62  ;;  %v3065_v58 = vperm.slane %v3059_v15, %v10379_v4  ;;  %v3119_v1 = vperm.slane %v3113_v37, %v10379_v4  ;;  %v3069_v43 = vperm.slane %v3061_v18, %v10379_v4 }
 0x841   : > { %v3077_v33 = vperm.slane %v3071_v39, %v10379_v4  ;;  %v3081_v0 = vperm.slane %v3073_v22, %v10379_v4  ;;  %v3125_v55 = vsel %vm2428_vm1, %v3124_v36, %v3105_v31  ;;  %v3123_v3 = vperm.slane %v3115_v40, %v10379_v4 }
 0x842   : > { %v3084_v27 = vrot.slane %v3065_v58, 4  ;;  %v3131_v28 = vperm.slane %v3125_v55, %v10379_v4  ;;  %v3138_v19 = vrot.slane %v3119_v1, 4  ;;  %v3088_v6 = vrot.slane %v3069_v43, 4 }
 0x843   : > { %v3082_v49 = vrot.slane %v3077_v33, 4  ;;  %v3127_v29 = vsel %vm2428_vm1, %v3111_v24, %v3126_v16  ;;  %v3086_v34 = vrot.slane %v3081_v0, 4  ;;  %v3142_v12 = vrot.slane %v3123_v3, 4 }
 0x844   : > { %v3085_v47 = vsel %vm2428_vm1, %v3077_v33, %v3084_v27  ;;  %v3136_v9 = vrot.slane %v3131_v28, 4  ;;  %v3139_v52 = vsel %vm2428_vm1, %v3131_v28, %v3138_v19  ;;  %v3089_v62 = vsel %vm2428_vm1, %v3081_v0, %v3088_v6 }
 0x845   : > { %v3083_v25 = vsel %vm2428_vm1, %v3082_v49, %v3065_v58  ;;  %v3146_v51 = vpack.c.bf16 %v3085_v47, %v3085_v47  ;;  %v3147_v41 = vpack.c.bf16 %v3139_v52, %v3139_v52  ;;  %v3135_v5 = vperm.slane %v3127_v29, %v10379_v4 }
 0x846   : > { %v3150_v32 = vpack.c.bf16 %v3089_v62, %v3089_v62  ;;  %v3137_v45 = vsel %vm2428_vm1, %v3136_v9, %v3119_v1  ;;  %v3144_v61 = vpack.c.bf16 %v3083_v25, %v3083_v25  ;;  %v3087_v46 = vsel %vm2428_vm1, %v3086_v34, %v3069_v43  ;;  %v4226_v1 = vpop.xlane.xlu2 %4225 }
 0x847   : > { %v4307_v63 = vunpack.c.l.b16 %v3146_v51  ;;  %v4308_v38 = vunpack.c.l.b16 %v3147_v41  ;;  %v3143_v20 = vsel %vm2428_vm1, %v3135_v5, %v3142_v12  ;;  %v3145_v26 = vpack.c.bf16 %v3137_v45, %v3137_v45 }
 0x848   : > { %v4363_v60 = vunpack.c.l.b16 %v3150_v32  ;;  %v3151_v59 = vpack.c.bf16 %v3143_v20, %v3143_v20  ;;  %v4279_v53 = vunpack.c.l.b16 %v3144_v61  ;;  %v3140_v31 = vrot.slane %v3135_v5, 4 }
 0x849   : > { %v3148_v42 = vpack.c.bf16 %v3087_v46, %v3087_v46  ;;  %v4309_v24 = vpack.c.b16 %v4308_v38, %v4307_v63  ;;  %v4280_v17 = vunpack.c.l.b16 %v3145_v26 }
 0x84a   : > { %v4364_v18 = vunpack.c.l.b16 %v3151_v59  ;;  %v3141_v22 = vsel %vm2428_vm1, %v3140_v31, %v3123_v3 }
 0x84b   : > { %4321 = vmatpush.bf16.msrb.mxu2 %v4309_v24  ;;  %v4281_v15 = vpack.c.b16 %v4280_v17, %v4279_v53  ;;  %v3149_v39 = vpack.c.bf16 %v3141_v22, %v3141_v22  ;;  %v4335_v16 = vunpack.c.l.b16 %v3148_v42 }
 0x84c   : > { %v4365_v58 = vpack.c.b16 %v4364_v18, %v4363_v60 }
 0x84d   : > { %4293 = vmatpush.bf16.msra.mxu1 %v4281_v15  ;;  %v4336_v33 = vunpack.c.l.b16 %v3149_v39 }
 0x84e   : > { %v4244_v27 = vpop.xlane.xlu2 %4243 }
 0x84f   : > { %4377 = vmatpush.bf16.msra.mxu2 %v4365_v58  ;;  %v4337_v37 = vpack.c.b16 %v4336_v33, %v4335_v16 }
 0x851   : > { %4349 = vmatpush.bf16.msrb.mxu1 %v4337_v37 }
 0x853   : > { %v4232_v36 = vpop.xlane.xlu1 %4231 }
 0x854   : > { %8655 = vrcp.f32 %v4232_v36 }
 0x856   : > { %v4238_v51 = vpop.xlane.xlu2 %4237 }
 0x85a   : > { %v8656_v0 = vpop.eup %8655 }
 0x85b   : > { %v4258_v49 = vmul.f32 %v8656_v0, %v11537_v35 }
 0x85d   : > { %v4266_v40 = vpack.c.bf16 %v4258_v49, %v4258_v49 }
 0x85f   : > { %v4302_v29 = vunpack.c.l.b16 %v4266_v40 }
 0x878   : > { %v4235_v43 = vpop.xlane.xlu0 %4234 }
 0x879   : > { %8657 = vrcp.f32 %v4235_v43 }
 0x87a   : > { %8659 = vrcp.f32 %v4226_v1 }
 0x87f   : > { %v8658_v55 = vpop.eup %8657 }
 0x880   : > { %v4259_v28 = vmul.f32 %v8658_v55, %v11563_v50  ;;  %v4229_v19 = vpop.xlane.xlu0 %4228  ;;  %v8660_v6 = vpop.eup %8659 }
 0x881   : > { %8661 = vrcp.f32 %v4229_v19  ;;  %v4256_v47 = vmul.f32 %v8660_v6, %v11498_v30 }
 0x882   : > { %v4267_v3 = vpack.c.bf16 %v4259_v28, %v4259_v28  ;;  %8663 = vrcp.f32 %v4244_v27 }
 0x883   : > { %v4264_v52 = vpack.c.bf16 %v4256_v47, %v4256_v47 }
 0x884   : > { %v4303_v25 = vunpack.c.l.b16 %v4267_v3 }
 0x885   : > { %v4274_v5 = vunpack.c.l.b16 %v4264_v52 }
 0x886   : > { %v4304_v34 = vpack.c.b16 %v4303_v25, %v4302_v29 }
 0x887   : > { %v8662_v9 = vpop.eup %8661 }
 0x888   : > { %v4257_v35 = vmul.f32 %v8662_v9, %v11576_v44  ;;  %v4247_v62 = vpop.xlane.xlu0 %4246  ;;  %8035 = vmatmul.msk.bf16.vlgmr.msrb.gmra.mxu2 %vm1515_vm10, %v4304_v34  ;;  %v8664_v41 = vpop.eup %8663 }
 0x889   : > { %8665 = vrcp.f32 %v4247_v62  ;;  %v4262_v12 = vmul.f32 %v8664_v41, %v11506_v21 }
 0x88a   : > { %v4265_v50 = vpack.c.bf16 %v4257_v35, %v4257_v35  ;;  %8667 = vrcp.f32 %v4238_v51 }
 0x88b   : > { %v4270_v45 = vpack.c.bf16 %v4262_v12, %v4262_v12 }
 0x88c   : > { %v4275_v32 = vunpack.c.l.b16 %v4265_v50 }
 0x88d   : > { %v4358_v20 = vunpack.c.l.b16 %v4270_v45 }
 0x88e   : > { %v4276_v30 = vpack.c.b16 %v4275_v32, %v4274_v5 }
 0x88f   : > { %v8666_v63 = vpop.eup %8665 }
 0x890   : > { %v4263_v61 = vmul.f32 %v8666_v63, %v11592_v10  ;;  %v4241_v46 = vpop.xlane.xlu0 %4240  ;;  %8034 = vmatmul.msk.bf16.vlgmr.msra.gmra.mxu1 %vm1515_vm10, %v4276_v30  ;;  %v8668_v44 = vpop.eup %8667 }
 0x891   : > { %8669 = vrcp.f32 %v4241_v46  ;;  %v4260_v60 = vmul.f32 %v8668_v44, %v11510_v48 }
 0x892   : > { %v4271_v38 = vpack.c.bf16 %v4263_v61, %v4263_v61 }
 0x893   : > { %v4268_v31 = vpack.c.bf16 %v4260_v60, %v4260_v60 }
 0x894   : > { %v4359_v26 = vunpack.c.l.b16 %v4271_v38 }
 0x895   : > { %v4330_v24 = vunpack.c.l.b16 %v4268_v31 }
 0x896   : > { %v4360_v59 = vpack.c.b16 %v4359_v26, %v4358_v20 }
 0x897   : > { %v8670_v53 = vpop.eup %8669 }
 0x898   : > { %v4261_v21 = vmul.f32 %v8670_v53, %v11602_v13  ;;  %8037 = vmatmul.msk.bf16.vlgmr.msra.gmra.mxu2 %vm1515_vm10, %v4360_v59 }
 0x89a   : > { %v4269_v42 = vpack.c.bf16 %v4261_v21, %v4261_v21 }
 0x89c   : > { %v4331_v10 = vunpack.c.l.b16 %v4269_v42 }
 0x89e   : > { %v4332_v17 = vpack.c.b16 %v4331_v10, %v4330_v24 }
 0x8a0   : > { %8036 = vmatmul.msk.bf16.vlgmr.msrb.gmra.mxu1 %vm1515_vm10, %v4332_v17 }
 0x90b   : > { %v4323_v18 = vpop.f32.mrf.mxu2 }
 0x90c   : > { %v4398_v16 = vrot.slane %v4323_v18, 4 }
 0x90d   : > { %v4295_v22 = vpop.f32.mrf.mxu1 }
 0x90e   : > { %v4386_v58 = vrot.slane %v4295_v22, 4 }
 0x913   : > { %v4325_v15 = vpop.f32.mrf.mxu2 }
 0x914   : > { %v4454_v29 = vrot.slane %v4325_v15, 4 }
 0x915   : > { %v4297_v39 = vpop.f32.mrf.mxu1 }
 0x916   : > { %v4442_v50 = vrot.slane %v4297_v39, 4 }
 0x91b   : > { %v4379_v48 = vpop.f32.mrf.mxu2 }
 0x91c   : > { %v4396_v33 = vrot.slane %v4379_v48, 4  ;;  %v4399_v37 = vsel %vm2428_vm1, %v4379_v48, %v4398_v16 }
 0x91d   : > { %v4407_v13 = vperm.slane %v4399_v37, %v10376_v57  ;;  %v4351_v36 = vpop.f32.mrf.mxu1 }
 0x91e   : > { %v4397_v1 = vsel %vm2428_vm1, %v4396_v33, %v4323_v18  ;;  %v4384_v43 = vrot.slane %v4351_v36, 4  ;;  %v4387_v0 = vsel %vm2428_vm1, %v4351_v36, %v4386_v58 }
 0x91f   : > { %v4403_v49 = vperm.slane %v4397_v1, %v10376_v57  ;;  %v4420_v27 = vrot.slane %v4407_v13, 4  ;;  %v4395_v55 = vperm.slane %v4387_v0, %v10376_v57 }
 0x920   : > { %v4385_v40 = vsel %vm2428_vm1, %v4384_v43, %v4295_v22 }
 0x921   : > { %v4408_v28 = vrot.slane %v4403_v49, 4  ;;  %v4391_v19 = vperm.slane %v4385_v40, %v10376_v57  ;;  %v4421_v6 = vsel %vm2428_vm1, %v4420_v27, %v4395_v55  ;;  %v4422_v3 = vrot.slane %v4395_v55, 4 }
 0x922   : > { %v4427_v47 = vperm.slane %v4421_v6, %v10379_v4 }
 0x923   : > { %v4409_v25 = vsel %vm2428_vm1, %v4408_v28, %v4391_v19  ;;  %v4410_v34 = vrot.slane %v4391_v19, 4  ;;  %v4423_v9 = vsel %vm2428_vm1, %v4407_v13, %v4422_v3  ;;  %v4381_v52 = vpop.f32.mrf.mxu2 }
 0x924   : > { %v4415_v51 = vperm.slane %v4409_v25, %v10379_v4  ;;  %v4431_v35 = vperm.slane %v4423_v9, %v10379_v4  ;;  %v4436_v62 = vrot.slane %v4427_v47, 4  ;;  %v4452_v41 = vrot.slane %v4381_v52, 4 }
 0x925   : > { %v4411_v5 = vsel %vm2428_vm1, %v4403_v49, %v4410_v34  ;;  %v4455_v12 = vsel %vm2428_vm1, %v4381_v52, %v4454_v29  ;;  %v4353_v32 = vpop.f32.mrf.mxu1 }
 0x926   : > { %v4419_v30 = vperm.slane %v4411_v5, %v10379_v4  ;;  %v4432_v63 = vrot.slane %v4415_v51, 4  ;;  %v4438_v45 = vrot.slane %v4431_v35, 4  ;;  %v4453_v61 = vsel %vm2428_vm1, %v4452_v41, %v4325_v15 }
 0x927   : > { %v4463_v46 = vperm.slane %v4455_v12, %v10376_v57  ;;  %v4440_v44 = vrot.slane %v4353_v32, 4  ;;  %v4443_v38 = vsel %vm2428_vm1, %v4353_v32, %v4442_v50  ;;  %v4437_v60 = vsel %vm2428_vm1, 0.0, %v4436_v62 }
 0x928   : > { %v4434_v20 = vrot.slane %v4419_v30, 4  ;;  %v4439_v26 = vsel %vm2428_vm1, 0.0, %v4438_v45  ;;  %v4507_v59 = vsel %vm2428_vm1, %v4438_v45, %v4427_v47  ;;  %v4459_v21 = vperm.slane %v4453_v61, %v10376_v57 }
 0x929   : > { %v4511_v53 = vperm.slane %v4507_v59, %v10376_v57  ;;  %v4512_v31 = vrot.slane %v4439_v26, 4  ;;  %v4476_v42 = vrot.slane %v4463_v46, 4  ;;  %v4441_v17 = vsel %vm2428_vm1, %v4440_v44, %v4297_v39 }
 0x92a   : > { %v4435_v24 = vsel %vm2428_vm1, 0.0, %v4434_v20  ;;  %v4496_v10 = vsel %vm2428_vm1, %v4434_v20, %v4415_v51  ;;  %v4451_v18 = vperm.slane %v4443_v38, %v10376_v57  ;;  %v4433_v22 = vsel %vm2428_vm1, 0.0, %v4432_v63 }
 0x92b   : > { %v4501_v15 = vrot.slane %v4435_v24, 4  ;;  %v4513_v16 = vsel %vm2428_vm1, %v4512_v31, %v4437_v60  ;;  %v4464_v48 = vrot.slane %v4459_v21, 4  ;;  %v4447_v33 = vperm.slane %v4441_v17, %v10376_v57 }
 0x92c   : > { %v4517_v58 = vperm.slane %v4513_v16, %v10376_v57  ;;  %v4477_v37 = vsel %vm2428_vm1, %v4476_v42, %v4451_v18  ;;  %v4478_v13 = vrot.slane %v4451_v18, 4  ;;  %v4532_v36 = vrot.slane %v4511_v53, 4 }
 0x92d   : > { %v4483_v1 = vperm.slane %v4477_v37, %v10379_v4  ;;  %v4500_v39 = vperm.slane %v4496_v10, %v10376_v57  ;;  %v4502_v43 = vsel %vm2428_vm1, %v4501_v15, %v4433_v22  ;;  %v4465_v49 = vsel %vm2428_vm1, %v4464_v48, %v4447_v33 }
 0x92e   : > { %v4530_v0 = vrot.slane %v4517_v58, 4  ;;  %v4466_v27 = vrot.slane %v4447_v33, 4  ;;  %v4479_v55 = vsel %vm2428_vm1, %v4463_v46, %v4478_v13  ;;  %v4471_v40 = vperm.slane %v4465_v49, %v10379_v4 }
 0x92f   : > { %v4487_v28 = vperm.slane %v4479_v55, %v10379_v4  ;;  %v4506_v19 = vperm.slane %v4502_v43, %v10376_v57  ;;  %v4492_v3 = vrot.slane %v4483_v1, 4  ;;  %v4520_v47 = vrot.slane %v4500_v39, 4 }
 0x930   : > { %v4467_v6 = vsel %vm2428_vm1, %v4459_v21, %v4466_v27  ;;  %v4531_v29 = vsel %vm2428_vm1, %v4530_v0, %v4511_v53  ;;  %v4533_v52 = vsel %vm2428_vm1, %v4517_v58, %v4532_v36  ;;  %v4488_v35 = vrot.slane %v4471_v40, 4 }
 0x931   : > { %v4475_v25 = vperm.slane %v4467_v6, %v10379_v4  ;;  %v4494_v34 = vrot.slane %v4487_v28, 4  ;;  %v4518_v9 = vrot.slane %v4506_v19, 4  ;;  %v4537_v51 = vperm.slane %v4531_v29, %v10379_v4 }
 0x932   : > { %v4493_v5 = vsel %vm2428_vm1, 0.0, %v4492_v3  ;;  %v4521_v30 = vsel %vm2428_vm1, %v4506_v19, %v4520_v47  ;;  %v4541_v45 = vperm.slane %v4533_v52, %v10379_v4  ;;  %v4489_v26 = vsel %vm2428_vm1, 0.0, %v4488_v35 }
 0x933   : > { %v4490_v62 = vrot.slane %v4475_v25, 4  ;;  %v4495_v41 = vsel %vm2428_vm1, 0.0, %v4494_v34  ;;  %v4561_v50 = vsel %vm2428_vm1, %v4494_v34, %v4483_v1  ;;  %v4519_v46 = vsel %vm2428_vm1, %v4518_v9, %v4500_v39 }
 0x934   : > { %v4565_v12 = vperm.slane %v4561_v50, %v10376_v57  ;;  %v4566_v32 = vrot.slane %v4495_v41, 4  ;;  %v4542_v60 = vrot.slane %v4537_v51, 4  ;;  %v4525_v31 = vperm.slane %v4519_v46, %v10379_v4 }
 0x935   : > { %v4491_v63 = vsel %vm2428_vm1, 0.0, %v4490_v62  ;;  %v4550_v61 = vsel %vm2428_vm1, %v4490_v62, %v4471_v40  ;;  %v4529_v21 = vperm.slane %v4521_v30, %v10379_v4  ;;  %v4546_v10 = vrot.slane %v4541_v45, 4  ;;  %v8169_v30 = vld [vmem:[#allocation13] sm:$0xff] }
 0x936   : > { %v4555_v44 = vrot.slane %v4491_v63, 4  ;;  %v4567_v38 = vsel %vm2428_vm1, %v4566_v32, %v4493_v5  ;;  %v4554_v20 = vperm.slane %v4550_v61, %v10376_v57  ;;  %v4586_v53 = vrot.slane %v4565_v12, 4  ;;  %v8170_v32 = vld [vmem:[#allocation13 + $0x8] sm:$0xff]  ;;  %v3792_v63 = vpop.permute.xlu2 %3791 }
 0x937   : > { %v4571_v59 = vperm.slane %v4567_v38, %v10376_v57  ;;  %v11782_v16 = vsel %vm2428_vm1, %v4542_v60, %v4525_v31  ;;  %v4548_v13 = vrot.slane %v4529_v21, 4  ;;  %v4547_v1 = vsel %vm2428_vm1, %v4546_v10, %v4529_v21  ;;  %4665 = vmatpush.bf16.msra.mxu1 %v8170_v32 }
 0x938   : > { %v4556_v42 = vsel %vm2428_vm1, %v4555_v44, %v4489_v26  ;;  %v4574_v24 = vrot.slane %v4554_v20, 4  ;;  %v4544_v49 = vrot.slane %v4525_v31, 4  ;;  %v3761_v9 = vperm.slane %v11491_v11, %v10379_v4 }
 0x939   : > { %v4560_v17 = vperm.slane %v4556_v42, %v10376_v57  ;;  %v4587_v18 = vsel %vm2428_vm1, %v4571_v59, %v4586_v53  ;;  %v4584_v15 = vrot.slane %v4571_v59, 4  ;;  %v4549_v28 = vsel %vm2428_vm1, %v4541_v45, %v4548_v13  ;;  %v3796_v45 = vpop.permute.xlu0 %3795 }
 0x93a   : > { %v4595_v22 = vperm.slane %v4587_v18, %v10379_v4  ;;  %v4545_v29 = vsel %vm2428_vm1, %v4537_v51, %v4544_v49  ;;  %v3778_v52 = vrot.slane %v3761_v9, 4  ;;  %v3780_v51 = vrot.slane %v11586_v54, 4 }
 0x93b   : > { %v4575_v48 = vsel %vm2428_vm1, %v4560_v17, %v4574_v24  ;;  %v4572_v58 = vrot.slane %v4560_v17, 4  ;;  %v4585_v36 = vsel %vm2428_vm1, %v4584_v15, %v4565_v12  ;;  %v3782_v41 = vrot.slane %v11598_v8, 4  ;;  %4666 = vmatpush.bf16.msra.mxu1 %v8169_v30 }
 0x93c   : > { %v4583_v33 = vperm.slane %v4575_v48, %v10379_v4  ;;  %v4600_v37 = vrot.slane %v4595_v22, 4  ;;  %v4591_v39 = vperm.slane %v4585_v36, %v10379_v4  ;;  %v3779_v35 = vsel %vm2428_vm1, 0.0, %v3778_v52 }
 0x93d   : > { %v4573_v57 = vsel %vm2428_vm1, %v4572_v58, %v4554_v20  ;;  %v3781_v62 = vsel %vm2428_vm1, 0.0, %v3780_v51  ;;  %v3783_v50 = vsel %vm2428_vm1, 0.0, %v3782_v41 }
 0x93e   : > { %v4601_v43 = vsel %vm2428_vm1, %v4600_v37, %v4583_v33  ;;  %v4602_v0 = vrot.slane %v4583_v33, 4  ;;  %v4579_v27 = vperm.slane %v4573_v57, %v10379_v4  ;;  %v4596_v40 = vrot.slane %v4591_v39, 4  ;;  %v3800_v61 = vpop.permute.xlu2 %3799 }
 0x93f   : > { %v8530_v55 = vpack.i.bf16 %v4601_v43, %v4547_v1  ;;  %v3784_v4 = vrot.slane %v11610_v7, 4 }
 0x940   : > { %v4603_v19 = vsel %vm2428_vm1, %v4595_v22, %v4602_v0  ;;  %v4598_v6 = vrot.slane %v4579_v27, 4  ;;  %v4597_v47 = vsel %vm2428_vm1, %v4596_v40, %v4579_v27 }
 0x941   : > { %8531 = vrot.lane.b32.xlu0 %v8530_v55, %s9641_s2  ;;  %v8535_v3 = vpack.i.bf16 %v4603_v19, %v4549_v28  ;;  %v3785_v11 = vsel %vm2428_vm1, 0.0, %v3784_v4 }
 0x942   : > { %v4599_v25 = vsel %vm2428_vm1, %v4591_v39, %v4598_v6  ;;  %vm3846_vm1 = vcmask 523264   ;;  %v8553_v6 = vld [vmem:[#allocation14] ss:$0 sm:$0xff] }
 0x943   : > { %8536 = vrot.lane.b32.xlu2 %v8535_v3, %s9645_s16  ;;  %v8540_v34 = vpack.i.bf16 %v4599_v25, %v4545_v29  ;;  %v8809_v29 = vld [vmem:[%s10184_s13] sm:$0xff] }
 0x945   : > { %8541 = vrot.lane.b32.xlu1 %v8540_v34, %s14065_s17 }
 0x949   : > { %3807 = vrot.lane.b32.xlu0 %v11559_v23, %s9640_s11  ;;  %v3788_v23 = vpop.permute.xlu1 %3787  ;;  %s14189_s11 = sld [smem:[#allocation69_spill]] }
 0x94a   : > { %v3842_v7 = vsel %vm1515_vm10, %v11548_v56, %v3788_v23 }
 0x94b   : > { %v3843_v38 = vsel %vm1403_vm0, %v3842_v7, %v3792_v63 }
 0x94c   : > { %v3845_v20 = vsel %vm3844_vm3, %v3843_v38, %v3796_v45 }
 0x94d   : > { %v3847_v59 = vsel %vm3846_vm1, %v3845_v20, %v3800_v61 }
 0x951   : > { %3815 = vrot.lane.b32.xlu0 %v3779_v35, %s9641_s2  ;;  %v3804_v5 = vpop.permute.xlu1 %3803 }
 0x952   : > { %v3849_v15 = vsel %vm3848_vm4, %v3847_v59, %v3804_v5 }
 0x959   : > { %3823 = vrot.lane.b32.xlu0 %v3781_v62, %s14161_s23  ;;  %v3812_v12 = vpop.permute.xlu1 %3811  ;;  %s14212_s23 = sshll.u32 %s10132_s6, 8 }
 0x95a   : > { %s13097_s16 = scalar_lea.vmem [#allocation33], %s14212_s23 }
 0x961   : > { %3831 = vrot.lane.b32.xlu0 %v3783_v50, %s9639_s9  ;;  %v3820_v54 = vpop.permute.xlu1 %3819  ;;  %s14188_s9 = sld [smem:[#allocation63_spill]] }
 0x969   : > { %3839 = vrot.lane.b32.xlu0 %v3785_v11, %s9636_s18  ;;  %v3828_v8 = vpop.permute.xlu1 %3827  ;;  %s14162_s18 = sld [smem:[#allocation60_spill]] }
 0x96f   : > { %v3861_v19 = vld [vmem:[%s14162_s18] sm:$0xf]  ;;  %s14245_s18 = sld [smem:[#allocation71_spill]] }
 0x971   : > { %v3836_v46 = vpop.permute.xlu1 %3835 }
 0x99d   : > { %v8537_v60 = vpop.permute.xlu2 %8536 }
 0x99e   : > { %v8539_v56 = vunpack.i.h.bf16 %v8537_v60  ;;  %v8538_v24 = vunpack.i.l.bf16 %v8537_v60  ;;  %v11864_v60 = vld [vmem:[#allocation17] ss:$0 sm:$0xff] }
 0x9b3   : > { %v8532_v44 = vpop.permute.xlu0 %8531 }
 0x9b4   : > { %v8534_v21 = vunpack.i.h.bf16 %v8532_v44  ;;  %v8533_v42 = vunpack.i.l.bf16 %v8532_v44 }
 0x9b7   : > { %v8542_v26 = vpop.permute.xlu1 %8541 }
 0x9b8   : > { %v8544_v53 = vunpack.i.h.bf16 %v8542_v26  ;;  %v8543_v31 = vunpack.i.l.bf16 %v8542_v26 }
 0x9ba   : > { %v4629_v10 = vsel %vm3162_vm2, %v4597_v47, %v8544_v53  ;;  %v4628_v17 = vsel %vm3162_vm2, %v11782_v16, %v8543_v31  ;;  %vm4027_vm2 = vcmask 1043456   ;;  %v8811_v53 = vld [vmem:[%s10138_s22] sm:$0xff] }
 0x9bb   : > { %v4631_v18 = vsel %vm1515_vm10, %v4629_v10, %v8534_v21  ;;  %v4630_v22 = vsel %vm1515_vm10, %v4628_v17, %v8533_v42  ;;  %v3808_v48 = vpop.permute.xlu0 %3807  ;;  %8001 = vmatpush.msk.msrb.mxu0 %vm4027_vm2, %v3861_v19  ;;  %v8812_v10 = vld [vmem:[%s10138_s22 + $0x8] sm:$0xff] }
 0x9bc   : > { %v4634_v58 = vsel %vm4632_vm5, %v4631_v18, %v8539_v56  ;;  %v4633_v33 = vsel %vm4632_vm5, %v4630_v22, %v8538_v24  ;;  %v3851_v37 = vsel %vm3850_vm6, %v3849_v15, %v3808_v48 }
 0x9bd   : > { %v4635_v13 = vpack.c.bf16 %v4634_v58, %v4633_v33  ;;  %v3853_v36 = vsel %vm3852_vm7, %v3851_v37, %v3812_v12  ;;  %v8813_v58 = vld [vmem:[%s10138_s22 + $0x10] sm:$0xff] }
 0x9be   : > { %3866 = vxpose.xlu2.b32.start.end [1/1] (short) %v3853_v36, 128 }
 0x9bf   : > { %8046 = vmatmul.msk.bf16.vlgmr.msra.gmra.mxu1 %vm1403_vm0, %v4635_v13 }
 0x9c3   : > { %v3816_v16 = vpop.permute.xlu0 %3815 }
 0x9c4   : > { %v3854_v57 = vsel %vm1515_vm10, %v3761_v9, %v3816_v16 }
 0x9c5   : > { %v3855_v39 = vsel %vm1403_vm0, %v3854_v57, %v3820_v54  ;;  %v8810_v54 = vld [vmem:[%s10184_s13 + $0x8] sm:$0xff]  ;;  %s14180_s13 = sld [smem:[#allocation67_spill]] }
 0x9cb   : > { %v3824_v1 = vpop.permute.xlu0 %3823 }
 0x9cc   : > { %v3856_v0 = vsel %vm3844_vm3, %v3855_v39, %v3824_v1  ;;  %v8814_v1 = vld [vmem:[%s10138_s22 + $0x18] sm:$0xff] }
 0x9cd   : > { %v3857_v49 = vsel %vm3846_vm1, %v3856_v0, %v3828_v8 }
 0x9d3   : > { %v3832_v43 = vpop.permute.xlu0 %3831 }
 0x9d4   : > { %v3858_v27 = vsel %vm3848_vm4, %v3857_v49, %v3832_v43 }
 0x9d5   : > { %v3859_v40 = vsel %vm3850_vm6, %v3858_v27, %v3836_v46  ;;  %v8815_v27 = vld [vmem:[%s10138_s22 + $0x20] sm:$0xff] }
 0x9db   : > { %v3840_v55 = vpop.permute.xlu0 %3839 }
 0x9dc   : > { %v3860_v28 = vsel %vm3852_vm7, %v3859_v40, %v3840_v55 }
 0x9dd   : > { %3898 = vxpose.xlu1.b32.start.end [1/1] (short) %v3860_v28, 128 }
 0xa3c   : > { %v4668_v3 = vpop.f32.mrf.mxu1 }
 0xa3d   : > { %v4669_v47 = vadd.f32 %v8553_v6, %v4668_v3  ;;  %v8816_v3 = vld [vmem:[%s10138_s22 + $0x28] sm:$0xff] }
 0xa3f   : > { %v11839_v25 = vadd.f32 %v8809_v29, %v4669_v47 }
 0xa41   : > { %v4677_v34 = vsel %vm1403_vm0, %v11839_v25, 0.0 }
 0xa42   : > { %4678 = vadd.xlane.f32.xlu0 %v4677_v34 }
 0xa44   : > { %v4670_v23 = vpop.f32.mrf.mxu1 }
 0xa45   : > { %v4671_v5 = vadd.f32 %v8553_v6, %v4670_v23 }
 0xa47   : > { %v11854_v32 = vadd.f32 %v8810_v54, %v4671_v5 }
 0xa49   : > { %v4680_v30 = vsel %vm1403_vm0, %v11854_v32, 0.0 }
 0xa57   : > { %v3882_v9 = vpop.trf.xlu2 }
 0xa58   : > { %8002 = vmatmul.msk.f32.vlgmr.msrb.gmra.mxu0 %vm3930_vm8, %v3882_v9 }
 0xa5f   : > { %v3883_v52 = vpop.trf.xlu2 }
 0xa60   : > { %8003 = vmatmul.msk.f32.gmra.mxu0 %vm3930_vm8, %v3883_v52 }
 0xa67   : > { %v3884_v35 = vpop.trf.xlu2 }
 0xa68   : > { %8004 = vmatmul.msk.f32.gmra.mxu0 %vm3930_vm8, %v3884_v35 }
 0xa6f   : > { %v3885_v51 = vpop.trf.xlu2 }
 0xa70   : > { %8005 = vmatmul.msk.f32.gmra.mxu0 %vm3930_vm8, %v3885_v51 }
 0xa77   : > { %v3886_v62 = vpop.trf.xlu2 }
 0xa78   : > { %8006 = vmatmul.msk.f32.gmra.mxu0 %vm3930_vm8, %v3886_v62 }
 0xa7f   : > { %v3887_v41 = vpop.trf.xlu2 }
 0xa80   : > { %8007 = vmatmul.msk.f32.gmra.mxu0 %vm3930_vm8, %v3887_v41 }
 0xa81   : > { %v3914_v61 = vpop.trf.xlu1 }
 0xa87   : > { %v3888_v50 = vpop.trf.xlu2 }
 0xa88   : > { %8008 = vmatmul.msk.f32.gmra.mxu0 %vm3930_vm8, %v3888_v50 }
 0xa89   : > { %v3915_v7 = vpop.trf.xlu1 }
 0xa8f   : > { %v3889_v4 = vpop.trf.xlu2 }
 0xa90   : > { %8009 = vmatmul.msk.f32.gmra.mxu0 %vm3930_vm8, %v3889_v4 }
 0xa91   : > { %v3916_v20 = vpop.trf.xlu1 }
 0xa97   : > { %v3890_v11 = vpop.trf.xlu2 }
 0xa98   : > { %8010 = vmatmul.msk.f32.gmra.mxu0 %vm3930_vm8, %v3890_v11 }
 0xa99   : > { %v3917_v21 = vpop.trf.xlu1 }
 0xa9f   : > { %v3891_v12 = vpop.trf.xlu2 }
 0xaa0   : > { %8011 = vmatmul.msk.f32.gmra.mxu0 %vm3930_vm8, %v3891_v12 }
 0xaa1   : > { %v3918_v18 = vpop.trf.xlu1 }
 0xaa7   : > { %v3892_v63 = vpop.trf.xlu2  ;;  %4681 = vadd.xlane.f32.xlu2 %v4680_v30 }
 0xaa8   : > { %8012 = vmatmul.msk.f32.gmra.mxu0 %vm3930_vm8, %v3892_v63 }
 0xaa9   : > { %v3919_v13 = vpop.trf.xlu1 }
 0xaaf   : > { %v3893_v8 = vpop.trf.xlu2 }
 0xab0   : > { %8013 = vmatmul.msk.f32.gmra.mxu0 %vm3930_vm8, %v3893_v8 }
 0xab1   : > { %v3920_v0 = vpop.trf.xlu1 }
 0xab5   : > { %v4679_v8 = vpop.xlane.xlu0 %4678 }
 0xab7   : > { %v3894_v45 = vpop.trf.xlu2 }
 0xab8   : > { %8014 = vmatmul.msk.f32.gmra.mxu0 %vm3930_vm8, %v3894_v45 }
 0xab9   : > { %v3921_v6 = vpop.trf.xlu1 }
 0xabf   : > { %v3895_v46 = vpop.trf.xlu2 }
 0xac0   : > { %8015 = vmatmul.msk.f32.gmra.mxu0 %vm3930_vm8, %v3895_v46 }
 0xac1   : > { %v3922_v9 = vpop.trf.xlu1 }
 0xac7   : > { %v3896_v44 = vpop.trf.xlu2 }
 0xac8   : > { %8016 = vmatmul.msk.f32.gmra.mxu0 %vm3930_vm8, %v3896_v44 }
 0xac9   : > { %v3923_v35 = vpop.trf.xlu1 }
 0xacf   : > { %v3897_v38 = vpop.trf.xlu2 }
 0xad0   : > { %8017 = vmatmul.msk.f32.gmra.mxu0 %vm3930_vm8, %v3897_v38 }
 0xad1   : > { %v3924_v41 = vpop.trf.xlu1 }
 0xad5   : > { %v4048_v26 = vpop.f32.mrf.mxu0 }
 0xad6   : > { %v4049_v59 = vadd.f32 %v11864_v60, %v4048_v26 }
 0xad8   : > { %v11868_v31 = vadd.f32 %v8811_v53, %v4049_v59  ;;  %8018 = vmatmul.msk.f32.gmra.mxu0 %vm3930_vm8, %v3914_v61 }
 0xad9   : > { %v3925_v4 = vpop.trf.xlu1 }
 0xada   : > { %14163 = vst [vmem:[#allocation77_spill] sm:$0xff] %v11868_v31  ;;  %v4917_v42 = vsel %vm1515_vm10, %v11868_v31, 0.0 }
 0xadb   : > { %4918 = vadd.xlane.f32.xlu0 %v4917_v42 }
 0xadd   : > { %v4051_v56 = vpop.f32.mrf.mxu0 }
 0xade   : > { %v4052_v24 = vadd.f32 %v11864_v60, %v4051_v56 }
 0xae0   : > { %v11875_v17 = vadd.f32 %v8812_v10, %v4052_v24  ;;  %8019 = vmatmul.msk.f32.gmra.mxu0 %vm3930_vm8, %v3915_v7 }
 0xae1   : > { %v3926_v23 = vpop.trf.xlu1 }
 0xae2   : > { %14164 = vst [vmem:[#allocation78_spill] sm:$0xff] %v11875_v17  ;;  %v4920_v22 = vsel %vm1515_vm10, %v11875_v17, 0.0 }
 0xae3   : > { %4921 = vadd.xlane.f32.xlu0 %v4920_v22 }
 0xae5   : > { %v4054_v15 = vpop.f32.mrf.mxu0 }
 0xae6   : > { %v4055_v48 = vadd.f32 %v11864_v60, %v4054_v15 }
 0xae8   : > { %v11882_v33 = vadd.f32 %v8813_v58, %v4055_v48  ;;  %8020 = vmatmul.msk.f32.gmra.mxu0 %vm3930_vm8, %v3916_v20 }
 0xae9   : > { %v3927_v12 = vpop.trf.xlu1 }
 0xaea   : > { %14165 = vst [vmem:[#allocation79_spill] sm:$0xff] %v11882_v33  ;;  %v4923_v37 = vsel %vm1515_vm10, %v11882_v33, 0.0 }
 0xaeb   : > { %4924 = vadd.xlane.f32.xlu1 %v4923_v37 }
 0xaed   : > { %v4057_v36 = vpop.f32.mrf.mxu0 }
 0xaee   : > { %v4058_v16 = vadd.f32 %v11864_v60, %v4057_v36 }
 0xaf0   : > { %v11889_v57 = vadd.f32 %v8814_v1, %v4058_v16  ;;  %8021 = vmatmul.msk.f32.gmra.mxu0 %vm3930_vm8, %v3917_v21  ;;  %v8818_v16 = vld [vmem:[%s10138_s22 + $0x38] sm:$0xff] }
 0xaf1   : > { %v3928_v63 = vpop.trf.xlu1 }
 0xaf2   : > { %14166 = vst [vmem:[#allocation80_spill] sm:$0xff] %v11889_v57  ;;  %v4926_v39 = vsel %vm1515_vm10, %v11889_v57, 0.0 }
 0xaf3   : > { %4927 = vadd.xlane.f32.xlu0 %v4926_v39  ;;  %v8819_v39 = vld [vmem:[%s10138_s22 + $0x90] sm:$0xff] }
 0xaf5   : > { %v4060_v43 = vpop.f32.mrf.mxu0 }
 0xaf6   : > { %v4061_v49 = vadd.f32 %v11864_v60, %v4060_v43 }
 0xaf8   : > { %v11896_v55 = vadd.f32 %v8815_v27, %v4061_v49  ;;  %8022 = vmatmul.msk.f32.gmra.mxu0 %vm3930_vm8, %v3918_v18  ;;  %v8817_v18 = vld [vmem:[%s10138_s22 + $0x30] sm:$0xff] }
 0xaf9   : > { %v3929_v7 = vpop.trf.xlu1  ;;  %v8820_v49 = vld [vmem:[%s10138_s22 + $0x70] sm:$0xff] }
 0xafa   : > { %14167 = vst [vmem:[#allocation81_spill] sm:$0xff] %v11896_v55  ;;  %v4929_v40 = vsel %vm1515_vm10, %v11896_v55, 0.0 }
 0xafb   : > { %4930 = vadd.xlane.f32.xlu0 %v4929_v40 }
 0xafd   : > { %v4063_v28 = vpop.f32.mrf.mxu0 }
 0xafe   : > { %v4064_v19 = vadd.f32 %v11864_v60, %v4063_v28 }
 0xb00   : > { %v11903_v47 = vadd.f32 %v8816_v3, %v4064_v19  ;;  %8023 = vmatmul.msk.f32.gmra.mxu0 %vm3930_vm8, %v3919_v13 }
 0xb02   : > { %14168 = vst [vmem:[#allocation82_spill] sm:$0xff] %v11903_v47  ;;  %v4932_v29 = vsel %vm1515_vm10, %v11903_v47, 0.0 }
 0xb03   : > { %4933 = vadd.xlane.f32.xlu0 %v4932_v29 }
 0xb05   : > { %v4066_v34 = vpop.f32.mrf.mxu0 }
 0xb06   : > { %v4067_v42 = vadd.f32 %v11864_v60, %v4066_v34 }
 0xb08   : > { %8024 = vmatmul.msk.f32.gmra.mxu0 %vm3930_vm8, %v3920_v0  ;;  %v11952_v22 = vadd.f32 %v8817_v18, %v4067_v42 }
 0xb0a   : > { %14169 = vst [vmem:[#allocation83_spill] sm:$0xff] %v11952_v22  ;;  %v4935_v48 = vsel %vm1515_vm10, %v11952_v22, 0.0 }
 0xb0d   : > { %v4069_v52 = vpop.f32.mrf.mxu0 }
 0xb0e   : > { %v4070_v15 = vadd.f32 %v11864_v60, %v4069_v52 }
 0xb10   : > { %8025 = vmatmul.msk.f32.gmra.mxu0 %vm3930_vm8, %v3921_v6  ;;  %v11960_v1 = vadd.f32 %v8818_v16, %v4070_v15 }
 0xb12   : > { %14170 = vst [vmem:[#allocation84_spill] sm:$0xff] %v11960_v1  ;;  %v4938_v28 = vsel %vm1515_vm10, %v11960_v1, 0.0 }
 0xb15   : > { %v11910_v51 = vpop.f32.mrf.mxu0 }
 0xb18   : > { %8026 = vmatmul.msk.f32.gmra.mxu0 %vm3930_vm8, %v3922_v9 }
 0xb1d   : > { %v11913_v62 = vpop.f32.mrf.mxu0 }
 0xb20   : > { %8027 = vmatmul.msk.f32.gmra.mxu0 %vm3930_vm8, %v3923_v35 }
 0xb25   : > { %v11916_v50 = vpop.f32.mrf.mxu0 }
 0xb28   : > { %8028 = vmatmul.msk.f32.gmra.mxu0 %vm3930_vm8, %v3924_v41  ;;  %v4073_v41 = vadd.f32 %v11864_v60, %v11910_v51 }
 0xb2d   : > { %v11919_v11 = vpop.f32.mrf.mxu0 }
 0xb30   : > { %8029 = vmatmul.msk.f32.gmra.mxu0 %vm3930_vm8, %v3925_v4 }
 0xb35   : > { %v11922_v5 = vpop.f32.mrf.mxu0 }
 0xb38   : > { %8030 = vmatmul.msk.f32.gmra.mxu0 %vm3930_vm8, %v3926_v23  ;;  %v8821_v23 = vld [vmem:[%s10138_s22 + $0x40] sm:$0xff] }
 0xb3d   : > { %v11925_v54 = vpop.f32.mrf.mxu0 }
 0xb40   : > { %8031 = vmatmul.msk.f32.gmra.mxu0 %vm3930_vm8, %v3927_v12  ;;  %v11991_v12 = vadd.f32 %v8821_v23, %v4073_v41 }
 0xb42   : > { %14173 = vst [vmem:[#allocation87_spill] sm:$0xff] %v11991_v12 }
 0xb45   : > { %v4090_v30 = vpop.f32.mrf.mxu0 }
 0xb46   : > { %v4091_v37 = vadd.f32 %v11864_v60, %v4090_v30  ;;  %v4076_v30 = vadd.f32 %v11864_v60, %v11913_v62 }
 0xb48   : > { %8032 = vmatmul.msk.f32.gmra.mxu0 %vm3930_vm8, %v3928_v63  ;;  %v11967_v27 = vadd.f32 %v8820_v49, %v4091_v37  ;;  %v4941_v63 = vsel %vm1515_vm10, %v11991_v12, 0.0  ;;  %v8823_v49 = vld [vmem:[%s10138_s22 + $0x50] sm:$0xff] }
 0xb4a   : > { %14172 = vst [vmem:[#allocation86_spill] sm:$0xff] %v11967_v27  ;;  %v4959_v3 = vsel %vm1515_vm10, %v11967_v27, 0.0 }
 0xb4b   : > { %4960 = vadd.xlane.f32.xlu2 %v4959_v3  ;;  %v8824_v3 = vld [vmem:[%s10138_s22 + $0x58] sm:$0xff] }
 0xb4d   : > { %v11929_v45 = vpop.f32.mrf.mxu0 }
 0xb4e   : > { %v4919_v61 = vpop.xlane.xlu0 %4918 }
 0xb4f   : > { %v5013_v46 = vmul.f32 %v4919_v61, %v10296_v2  ;;  %v8822_v61 = vld [vmem:[%s10138_s22 + $0x48] sm:$0xff] }
 0xb50   : > { %8033 = vmatmul.msk.f32.gmra.mxu0 %vm3930_vm8, %v3929_v7  ;;  %v4683_v7 = vmul.f32 %v4679_v8, %v10192_v14 }
 0xb51   : > { %v11934_v44 = vsub.f32 %v11868_v31, %v5013_v46  ;;  %v11998_v46 = vadd.f32 %v8822_v61, %v4076_v30 }
 0xb53   : > { %v5077_v38 = vmul.f32 %v11934_v44, %v11934_v44  ;;  %14174 = vst [vmem:[#allocation88_spill] sm:$0xff] %v11998_v46  ;;  %v4944_v51 = vsel %vm1515_vm10, %v11998_v46, 0.0 }
 0xb55   : > { %v11938_v20 = vpop.f32.mrf.mxu0  ;;  %v5109_v26 = vsel %vm1515_vm10, %v5077_v38, 0.0  ;;  %v12004_v38 = vsub.f32 %v11839_v25, %v4683_v7 }
 0xb56   : > { %5110 = vadd.xlane.f32.xlu0 %v5109_v26  ;;  %v4922_v59 = vpop.xlane.xlu0 %4921  ;;  %v4682_v26 = vpop.xlane.xlu2 %4681 }
 0xb57   : > { %v5014_v53 = vmul.f32 %v4922_v59, %v10296_v2  ;;  %v4684_v59 = vmul.f32 %v4682_v26, %v10192_v14  ;;  %v4687_v62 = vmul.f32 %v12004_v38, %v12004_v38 }
 0xb59   : > { %v11943_v21 = vsub.f32 %v11875_v17, %v5014_v53  ;;  %v12010_v42 = vsub.f32 %v11854_v32, %v4684_v59 }
 0xb5b   : > { %v5078_v56 = vmul.f32 %v11943_v21, %v11943_v21 }
 0xb5d   : > { %v11948_v24 = vpop.f32.mrf.mxu0  ;;  %v5112_v10 = vsel %vm1515_vm10, %v5078_v56, 0.0  ;;  %v4689_v56 = vsel %vm1403_vm0, %v4687_v62, 0.0 }
 0xb5e   : > { %5113 = vadd.xlane.f32.xlu0 %v5112_v10  ;;  %v4925_v13 = vpop.xlane.xlu1 %4924  ;;  %v4688_v10 = vmul.f32 %v12010_v42, %v12010_v42 }
 0xb5f   : > { %v5015_v0 = vmul.f32 %v4925_v13, %v10296_v2 }
 0xb60   : > { %v4692_v15 = vsel %vm1403_vm0, %v4688_v10, 0.0 }
 0xb61   : > { %v11974_v19 = vsub.f32 %v11882_v33, %v5015_v0 }
 0xb63   : > { %v5079_v34 = vmul.f32 %v11974_v19, %v11974_v19 }
 0xb65   : > { %v4102_v58 = vpop.f32.mrf.mxu0  ;;  %v5115_v52 = vsel %vm1515_vm10, %v5079_v34, 0.0 }
 0xb66   : > { %v4103_v36 = vadd.f32 %v11864_v60, %v4102_v58  ;;  %4936 = vadd.xlane.f32.xlu0 %v4935_v48  ;;  %v4928_v6 = vpop.xlane.xlu0 %4927 }
 0xb67   : > { %v5016_v29 = vmul.f32 %v4928_v6, %v10296_v2 }
 0xb68   : > { %v11963_v43 = vadd.f32 %v8819_v39, %v4103_v36  ;;  %v4079_v39 = vadd.f32 %v11864_v60, %v11916_v50 }
 0xb69   : > { %v11982_v9 = vsub.f32 %v11889_v57, %v5016_v29 }
 0xb6a   : > { %14171 = vst [vmem:[#allocation85_spill] sm:$0xff] %v11963_v43  ;;  %v4971_v40 = vsel %vm1515_vm10, %v11963_v43, 0.0 }
 0xb6b   : > { %4972 = vadd.xlane.f32.xlu1 %v4971_v40  ;;  %v5080_v35 = vmul.f32 %v11982_v9, %v11982_v9  ;;  %v12033_v40 = vadd.f32 %v8823_v49, %v4079_v39  ;;  %v12054_v39 = vld [vmem:[#allocation26] ss:$0 sm:$0xff] }
 0xb6d   : > { %v5118_v4 = vsel %vm1515_vm10, %v5080_v35, 0.0  ;;  %14175 = vst [vmem:[#allocation89_spill] sm:$0xff] %v12033_v40  ;;  %v4947_v6 = vsel %vm1515_vm10, %v12033_v40, 0.0 }
 0xb6e   : > { %4939 = vadd.xlane.f32.xlu0 %v4938_v28  ;;  %v4931_v53 = vpop.xlane.xlu0 %4930  ;;  %v4082_v28 = vadd.f32 %v11864_v60, %v11919_v11 }
 0xb6f   : > { %v5017_v8 = vmul.f32 %v4931_v53, %v10296_v2 }
 0xb70   : > { %v12040_v29 = vadd.f32 %v8824_v3, %v4082_v28 }
 0xb71   : > { %v12017_v18 = vsub.f32 %v11896_v55, %v5017_v8 }
 0xb72   : > { %14176 = vst [vmem:[#allocation90_spill] sm:$0xff] %v12040_v29  ;;  %v4950_v34 = vsel %vm1515_vm10, %v12040_v29, 0.0 }
 0xb73   : > { %v5081_v37 = vmul.f32 %v12017_v18, %v12017_v18 }
 0xb75   : > { %v5121_v36 = vsel %vm1515_vm10, %v5081_v37, 0.0 }
 0xb76   : > { %5116 = vadd.xlane.f32.xlu0 %v5115_v52  ;;  %v4934_v48 = vpop.xlane.xlu0 %4933 }
 0xb77   : > { %v5018_v58 = vmul.f32 %v4934_v48, %v10296_v2 }
 0xb79   : > { %v12024_v13 = vsub.f32 %v11903_v47, %v5018_v58 }
 0xb7b   : > { %v5082_v16 = vmul.f32 %v12024_v13, %v12024_v13 }
 0xb7d   : > { %v5124_v0 = vsel %vm1515_vm10, %v5082_v16, 0.0 }
 0xb7e   : > { %5119 = vadd.xlane.f32.xlu0 %v5118_v4 }
 0xb86   : > { %4942 = vadd.xlane.f32.xlu0 %v4941_v63 }
 0xb8e   : > { %4945 = vadd.xlane.f32.xlu0 %v4944_v51 }
 0xb96   : > { %4690 = vadd.xlane.f32.xlu0 %v4689_v56 }
 0xb9e   : > { %4693 = vadd.xlane.f32.xlu0 %v4692_v15 }
 0xba6   : > { %5122 = vadd.xlane.f32.xlu0 %v5121_v36 }
 0xbae   : > { %5125 = vadd.xlane.f32.xlu0 %v5124_v0 }
 0xbb6   : > { %4948 = vadd.xlane.f32.xlu0 %v4947_v6  ;;  %v4085_v6 = vadd.f32 %v11864_v60, %v11922_v5 }
 0xbbe   : > { %4951 = vadd.xlane.f32.xlu0 %v4950_v34 }
 0xbc9   : > { %v5111_v50 = vpop.xlane.xlu0 %5110 }
 0xbca   : > { %v5205_v52 = vmul.f32 %v5111_v50, %v10296_v2  ;;  %v12064_v50 = vld [vmem:[#allocation28] ss:$0 sm:$0xff] }
 0xbcc   : > { %v5237_v35 = vadd.f32 1e-05, %v5205_v52 }
 0xbce   : > { %8671 = vrsqrt.f32 %v5237_v35  ;;  %vm5275_vm11 = vweird.f32 %v5237_v35 }
 0xbd1   : > { %v5114_v41 = vpop.xlane.xlu0 %5113 }
 0xbd2   : > { %v5206_v4 = vmul.f32 %v5114_v41, %v10296_v2 }
 0xbd4   : > { %v8672_v11 = vpop.eup %8671  ;;  %v5238_v23 = vadd.f32 1e-05, %v5206_v4  ;;  %v8825_v4 = vld [vmem:[%s10138_s22 + $0x60] sm:$0xff] }
 0xbd5   : > { %v5270_v30 = vmul.f32 %v8672_v11, %v5237_v35  ;;  %vm5276_vm9 = vweird.f32 %v8672_v11 }
 0xbd6   : > { %8673 = vrsqrt.f32 %v5238_v23  ;;  %vm5277_vm12 = vmor %vm5275_vm11, %vm5276_vm9  ;;  %vm5285_vm14 = vweird.f32 %v5238_v23 }
 0xbd7   : > { %v5271_v63 = vmul.f32 %v8672_v11, %v5270_v30 }
 0xbd9   : > { %v5272_v61 = vmul.f32 0.5, %v5271_v63  ;;  %v4937_v7 = vpop.xlane.xlu0 %4936 }
 0xbda   : > { %v5019_v51 = vmul.f32 %v4937_v7, %v10296_v2 }
 0xbdb   : > { %v5273_v26 = vsub.f32 1.5, %v5272_v61 }
 0xbdc   : > { %v8674_v59 = vpop.eup %8673  ;;  %v12048_v62 = vsub.f32 %v11952_v22, %v5019_v51 }
 0xbdd   : > { %v5274_v53 = vmul.f32 %v8672_v11, %v5273_v26  ;;  %v5280_v56 = vmul.f32 %v8674_v59, %v5238_v23  ;;  %vm5286_vm13 = vweird.f32 %v8674_v59 }
 0xbde   : > { %v5083_v8 = vmul.f32 %v12048_v62, %v12048_v62  ;;  %vm5287_vm15 = vmor %vm5285_vm14, %vm5286_vm13 }
 0xbdf   : > { %v5281_v10 = vmul.f32 %v8674_v59, %v5280_v56  ;;  %v5278_v48 = vsel %vm5277_vm12, %v8672_v11, %v5274_v53  ;;  %v12070_v11 = vadd.f32 %v8825_v4, %v4085_v6 }
 0xbe0   : > { %v5127_v15 = vsel %vm1515_vm10, %v5083_v8, 0.0  ;;  %v5589_v0 = vmul.f32 %v5278_v48, %v11934_v44 }
 0xbe1   : > { %v5282_v58 = vmul.f32 0.5, %v5281_v10  ;;  %5128 = vadd.xlane.f32.xlu0 %v5127_v15  ;;  %v4940_v37 = vpop.xlane.xlu0 %4939  ;;  %14177 = vst [vmem:[#allocation91_spill] sm:$0xff] %v12070_v11  ;;  %v4953_v7 = vsel %vm1515_vm10, %v12070_v11, 0.0 }
 0xbe2   : > { %v5020_v36 = vmul.f32 %v4940_v37, %v10296_v2  ;;  %v5624_v52 = vmul.f32 %v12054_v39, %v5589_v0 }
 0xbe3   : > { %v5283_v16 = vsub.f32 1.5, %v5282_v58 }
 0xbe4   : > { %v12058_v49 = vsub.f32 %v11960_v1, %v5020_v36  ;;  %v12075_v30 = vadd.f32 %v12064_v50, %v5624_v52 }
 0xbe5   : > { %v5284_v28 = vmul.f32 %v8674_v59, %v5283_v16 }
 0xbe6   : > { %v5084_v3 = vmul.f32 %v12058_v49, %v12058_v49 }
 0xbe7   : > { %v5288_v34 = vsel %vm5287_vm15, %v8674_v59, %v5284_v28  ;;  %v8826_v59 = vld [vmem:[%s10138_s22 + $0x68] sm:$0xff] }
 0xbe8   : > { %v5590_v35 = vmul.f32 %v5288_v34, %v11943_v21  ;;  %v5130_v44 = vsel %vm1515_vm10, %v5084_v3, 0.0  ;;  %v4088_v21 = vadd.f32 %v11864_v60, %v11925_v54 }
 0xbe9   : > { %5131 = vadd.xlane.f32.xlu0 %v5130_v44  ;;  %v5117_v41 = vpop.xlane.xlu0 %5116 }
 0xbea   : > { %v5625_v5 = vmul.f32 %v12054_v39, %v5590_v35  ;;  %v5207_v23 = vmul.f32 %v5117_v41, %v10296_v2  ;;  %v12087_v53 = vadd.f32 %v8826_v59, %v4088_v21 }
 0xbec   : > { %v12078_v63 = vadd.f32 %v12064_v50, %v5625_v5  ;;  %v5239_v61 = vadd.f32 1e-05, %v5207_v23  ;;  %14178 = vst [vmem:[#allocation92_spill] sm:$0xff] %v12087_v53  ;;  %v4956_v54 = vsel %vm1515_vm10, %v12087_v53, 0.0 }
 0xbee   : > { %8675 = vrsqrt.f32 %v5239_v61  ;;  %v5691_v51 = vpack.c.bf16 %v12078_v63, %v12075_v30  ;;  %vm5295_vm4 = vweird.f32 %v5239_v61 }
 0xbf1   : > { %4954 = vadd.xlane.f32.xlu0 %v4953_v7  ;;  %v5120_v26 = vpop.xlane.xlu0 %5119 }
 0xbf2   : > { %v5208_v56 = vmul.f32 %v5120_v26, %v10296_v2 }
 0xbf4   : > { %v8676_v8 = vpop.eup %8675  ;;  %v5240_v10 = vadd.f32 1e-05, %v5208_v56 }
 0xbf5   : > { %v5290_v15 = vmul.f32 %v8676_v8, %v5239_v61  ;;  %vm5296_vm3 = vweird.f32 %v8676_v8  ;;  %v4094_v61 = vadd.f32 %v11864_v60, %v11929_v45 }
 0xbf6   : > { %8677 = vrsqrt.f32 %v5240_v10  ;;  %vm5297_vm5 = vmor %vm5295_vm4, %vm5296_vm3  ;;  %vm5305_vm7 = vweird.f32 %v5240_v10 }
 0xbf7   : > { %v5291_v48 = vmul.f32 %v8676_v8, %v5290_v15 }
 0xbf9   : > { %v5292_v58 = vmul.f32 0.5, %v5291_v48  ;;  %4957 = vadd.xlane.f32.xlu0 %v4956_v54  ;;  %v4943_v37 = vpop.xlane.xlu0 %4942  ;;  %v8827_v48 = vld [vmem:[%s10138_s22 + $0x78] sm:$0xff] }
 0xbfa   : > { %v5021_v36 = vmul.f32 %v4943_v37, %v10296_v2 }
 0xbfb   : > { %v5293_v16 = vsub.f32 1.5, %v5292_v58  ;;  %v12112_v58 = vadd.f32 %v8827_v48, %v4094_v61  ;;  %v8557_v48 = vld [vmem:[#allocation19] ss:$0 sm:$0xff] }
 0xbfc   : > { %v8678_v0 = vpop.eup %8677  ;;  %v12094_v28 = vsub.f32 %v11991_v12, %v5021_v36 }
 0xbfd   : > { %v5294_v6 = vmul.f32 %v8676_v8, %v5293_v16  ;;  %v5300_v3 = vmul.f32 %v8678_v0, %v5240_v10  ;;  %vm5306_vm6 = vweird.f32 %v8678_v0  ;;  %14179 = vst [vmem:[#allocation93_spill] sm:$0xff] %v12112_v58 }
 0xbfe   : > { %v5085_v34 = vmul.f32 %v12094_v28, %v12094_v28  ;;  %vm5307_vm2 = vmor %vm5305_vm7, %vm5306_vm6 }
 0xbff   : > { %v5301_v52 = vmul.f32 %v8678_v0, %v5300_v3  ;;  %v5298_v44 = vsel %vm5297_vm5, %v8676_v8, %v5294_v6  ;;  %v8172_v6 = vld [vmem:[#allocation22 + $0x8] sm:$0xff] }
 0xc00   : > { %v5133_v35 = vsel %vm1515_vm10, %v5085_v34, 0.0  ;;  %v5591_v21 = vmul.f32 %v5298_v44, %v11974_v19  ;;  %4761 = vmatpush.bf16.msrb.mxu2 %v8172_v6  ;;  %v8171_v44 = vld [vmem:[#allocation22] sm:$0xff]  ;;  %v8558_v6 = vld [vmem:[#allocation20] ss:$0 sm:$0xff] }
 0xc01   : > { %v5302_v41 = vmul.f32 0.5, %v5301_v52  ;;  %5134 = vadd.xlane.f32.xlu0 %v5133_v35  ;;  %v4946_v4 = vpop.xlane.xlu0 %4945 }
 0xc02   : > { %v5022_v5 = vmul.f32 %v4946_v4, %v10296_v2  ;;  %v5626_v54 = vmul.f32 %v12054_v39, %v5591_v21  ;;  %v8177_v21 = vld [vmem:[%s14180_s13] sm:$0xff]  ;;  %s8180_s13 = sshll.u32 %s14131_s15, 4 }
 0xc03   : > { %v5303_v23 = vsub.f32 1.5, %v5302_v41 }
 0xc04   : > { %v12102_v7 = vsub.f32 %v11998_v46, %v5022_v5  ;;  %v12117_v36 = vadd.f32 %v12064_v50, %v5626_v54  ;;  %4762 = vmatpush.bf16.msrb.mxu2 %v8171_v44 }
 0xc05   : > { %v5304_v26 = vmul.f32 %v8678_v0, %v5303_v23 }
 0xc06   : > { %v5086_v59 = vmul.f32 %v12102_v7, %v12102_v7 }
 0xc07   : > { %v5308_v56 = vsel %vm5307_vm2, %v8678_v0, %v5304_v26 }
 0xc08   : > { %v5592_v8 = vmul.f32 %v5308_v56, %v11982_v9  ;;  %v5136_v15 = vsel %vm1515_vm10, %v5086_v59, 0.0  ;;  %v4962_v9 = vsel %vm1515_vm10, %v12112_v58, 0.0  ;;  %5774 = vmatpush.bf16.msra.mxu2 %v8177_v21 }
 0xc09   : > { %5137 = vadd.xlane.f32.xlu0 %v5136_v15  ;;  %v4691_v19 = vpop.xlane.xlu0 %4690 }
 0xc0a   : > { %v4695_v10 = vmul.f32 %v4691_v19, %v10192_v14  ;;  %v5627_v45 = vmul.f32 %v12054_v39, %v5592_v8 }
 0xc0c   : > { %v4697_v37 = vadd.f32 1e-05, %v4695_v10  ;;  %v12120_v16 = vadd.f32 %v12064_v50, %v5627_v45 }
 0xc0e   : > { %8679 = vrsqrt.f32 %v4697_v37  ;;  %v5692_v0 = vpack.c.bf16 %v12120_v16, %v12117_v36  ;;  %vm4705_vm9 = vweird.f32 %v4697_v37 }
 0xc11   : > { %4963 = vadd.xlane.f32.xlu0 %v4962_v9  ;;  %v4694_v3 = vpop.xlane.xlu0 %4693 }
 0xc12   : > { %v4696_v34 = vmul.f32 %v4694_v3, %v10192_v14 }
 0xc14   : > { %v8680_v52 = vpop.eup %8679  ;;  %v4698_v35 = vadd.f32 1e-05, %v4696_v34 }
 0xc15   : > { %v4700_v41 = vmul.f32 %v8680_v52, %v4697_v37  ;;  %vm4706_vm8 = vweird.f32 %v8680_v52 }
 0xc16   : > { %8681 = vrsqrt.f32 %v4698_v35  ;;  %vm4707_vm11 = vmor %vm4705_vm9, %vm4706_vm8  ;;  %vm4715_vm13 = vweird.f32 %v4698_v35 }
 0xc17   : > { %v4701_v4 = vmul.f32 %v8680_v52, %v4700_v41 }
 0xc19   : > { %v4702_v5 = vmul.f32 0.5, %v4701_v4  ;;  %v5123_v23 = vpop.xlane.xlu0 %5122 }
 0xc1a   : > { %v5209_v21 = vmul.f32 %v5123_v23, %v10296_v2 }
 0xc1b   : > { %v4703_v26 = vsub.f32 1.5, %v4702_v5 }
 0xc1c   : > { %v8682_v61 = vpop.eup %8681 }
 0xc1d   : > { %v4704_v59 = vmul.f32 %v8680_v52, %v4703_v26  ;;  %v4710_v56 = vmul.f32 %v8682_v61, %v4698_v35  ;;  %vm4716_vm12 = vweird.f32 %v8682_v61 }
 0xc1e   : > { %vm4717_vm14 = vmor %vm4715_vm13, %vm4716_vm12 }
 0xc1f   : > { %v4711_v8 = vmul.f32 %v8682_v61, %v4710_v56  ;;  %v4708_v14 = vsel %vm4707_vm11, %v8680_v52, %v4704_v59  ;;  %v5241_v59 = vadd.f32 1e-05, %v5209_v21 }
 0xc20   : > { %v4719_v10 = vmul.f32 %v4708_v14, %v12004_v38  ;;  %v8828_v14 = vld [vmem:[%s10138_s22 + $0x80] sm:$0xff] }
 0xc21   : > { %v4712_v15 = vmul.f32 0.5, %v4711_v8  ;;  %v5126_v54 = vpop.xlane.xlu0 %5125  ;;  %vm5315_vm6 = vweird.f32 %v5241_v59 }
 0xc22   : > { %v4724_v3 = vmul.f32 %v8557_v48, %v4719_v10  ;;  %v5210_v41 = vmul.f32 %v5126_v54, %v10296_v2 }
 0xc23   : > { %v4713_v19 = vsub.f32 1.5, %v4712_v15 }
 0xc24   : > { %v4729_v4 = vadd.f32 %v8558_v6, %v4724_v3  ;;  %v5242_v35 = vadd.f32 1e-05, %v5210_v41  ;;  %v8829_v3 = vld [vmem:[%s10138_s22 + $0x88] sm:$0xff] }
 0xc25   : > { %v4714_v45 = vmul.f32 %v8682_v61, %v4713_v19 }
 0xc26   : > { %8683 = vrsqrt.f32 %v5242_v35  ;;  %vm5325_vm4 = vweird.f32 %v5242_v35 }
 0xc27   : > { %v4718_v9 = vsel %vm4717_vm14, %v8682_v61, %v4714_v45  ;;  %8685 = vrsqrt.f32 %v5241_v59 }
 0xc28   : > { %v4720_v34 = vmul.f32 %v4718_v9, %v12010_v42  ;;  %v4097_v42 = vadd.f32 %v11864_v60, %v11938_v20 }
 0xc29   : > { %v4949_v44 = vpop.xlane.xlu0 %4948 }
 0xc2a   : > { %v4725_v37 = vmul.f32 %v8557_v48, %v4720_v34  ;;  %v5023_v52 = vmul.f32 %v4949_v44, %v10296_v2  ;;  %v12144_v15 = vadd.f32 %v8828_v14, %v4097_v42  ;;  %v4100_v48 = vadd.f32 %v11864_v60, %v11948_v24 }
 0xc2c   : > { %v4730_v5 = vadd.f32 %v8558_v6, %v4725_v37  ;;  %v12134_v38 = vsub.f32 %v12033_v40, %v5023_v52  ;;  %14181 = vst [vmem:[#allocation94_spill] sm:$0xff] %v12144_v15  ;;  %v8684_v19 = vpop.eup %8683  ;;  %v4965_v10 = vsel %vm1515_vm10, %v12144_v15, 0.0  ;;  %v12157_v34 = vadd.f32 %v8829_v3, %v4100_v48 }
 0xc2d   : > { %v8686_v9 = vpop.eup %8685  ;;  %v5320_v6 = vmul.f32 %v8684_v19, %v5242_v35  ;;  %vm5326_vm15 = vweird.f32 %v8684_v19 }
 0xc2e   : > { %v4731_v26 = vpack.c.bf16 %v4730_v5, %v4729_v4  ;;  %v5087_v61 = vmul.f32 %v12134_v38, %v12134_v38  ;;  %14182 = vst [vmem:[#allocation95_spill] sm:$0xff] %v12157_v34  ;;  %v5310_v44 = vmul.f32 %v8686_v9, %v5241_v59  ;;  %v4968_v24 = vsel %vm1515_vm10, %v12157_v34, 0.0  ;;  %vm5327_vm5 = vmor %vm5325_vm4, %vm5326_vm15 }
 0xc2f   : > { %v5321_v37 = vmul.f32 %v8684_v19, %v5320_v6  ;;  %vm5316_vm3 = vweird.f32 %v8686_v9 }
 0xc30   : > { %8055 = vmatmul.msk.bf16.vlgmr.msrb.gmra.mxu2 %vm1403_vm0, %v4731_v26  ;;  %v5139_v56 = vsel %vm1515_vm10, %v5087_v61, 0.0  ;;  %v5311_v41 = vmul.f32 %v8686_v9, %v5310_v44  ;;  %vm5317_vm7 = vmor %vm5315_vm6, %vm5316_vm3 }
 0xc31   : > { %5140 = vadd.xlane.f32.xlu2 %v5139_v56  ;;  %v4952_v8 = vpop.xlane.xlu0 %4951  ;;  %v5322_v52 = vmul.f32 0.5, %v5321_v37 }
 0xc32   : > { %v5024_v23 = vmul.f32 %v4952_v8, %v10296_v2  ;;  %v5312_v4 = vmul.f32 0.5, %v5311_v41 }
 0xc33   : > { %v5323_v5 = vsub.f32 1.5, %v5322_v52 }
 0xc34   : > { %v12147_v54 = vsub.f32 %v12040_v29, %v5024_v23  ;;  %v5313_v21 = vsub.f32 1.5, %v5312_v4 }
 0xc35   : > { %v5324_v26 = vmul.f32 %v8684_v19, %v5323_v5 }
 0xc36   : > { %v5088_v20 = vmul.f32 %v12147_v54, %v12147_v54  ;;  %v5314_v61 = vmul.f32 %v8686_v9, %v5313_v21 }
 0xc37   : > { %v5328_v42 = vsel %vm5327_vm5, %v8684_v19, %v5324_v26 }
 0xc38   : > { %v5142_v45 = vsel %vm1515_vm10, %v5088_v20, 0.0  ;;  %v5318_v30 = vsel %vm5317_vm7, %v8686_v9, %v5314_v61  ;;  %v5594_v63 = vmul.f32 %v5328_v42, %v12024_v13  ;;  %v4961_v61 = vpop.xlane.xlu2 %4960 }
 0xc39   : > { %4966 = vadd.xlane.f32.xlu2 %v4965_v10  ;;  %5143 = vadd.xlane.f32.xlu0 %v5142_v45 }
 0xc3a   : > { %v5629_v23 = vmul.f32 %v12054_v39, %v5594_v63 }
 0xc3c   : > { %v5664_v14 = vadd.f32 %v12064_v50, %v5629_v23 }
 0xc40   : > { %8079 = vmatmul.msk.bf16.vlgmr.msra.gmra.mxu2 %vm1515_vm10, %v5691_v51  ;;  %v5593_v51 = vmul.f32 %v5318_v30, %v12017_v18  ;;  %v4105_v18 = vpop.f32.mrf.mxu0 }
 0xc41   : > { %4969 = vadd.xlane.f32.xlu0 %v4968_v24  ;;  %v4106_v4 = vadd.f32 %v11864_v60, %v4105_v18 }
 0xc42   : > { %v5628_v59 = vmul.f32 %v12054_v39, %v5593_v51 }
 0xc44   : > { %v5663_v36 = vadd.f32 %v12064_v50, %v5628_v59  ;;  %v5027_v59 = vmul.f32 %v4961_v61, %v10296_v2 }
 0xc46   : > { %v12201_v18 = vsub.f32 %v11967_v27, %v5027_v59 }
 0xc48   : > { %v4108_v5 = vpop.f32.mrf.mxu0 }
 0xc50   : > { %8080 = vmatmul.msk.bf16.gmra.mxu2 %vm1515_vm10, %v5692_v0  ;;  %v5693_v0 = vpack.c.bf16 %v5664_v14, %v5663_v36 }
 0xc54   : > { %v5129_v56 = vpop.xlane.xlu0 %5128 }
 0xc55   : > { %v5211_v8 = vmul.f32 %v5129_v56, %v10296_v2  ;;  %v8830_v56 = vld [vmem:[%s10138_s22 + $0x98] sm:$0xff] }
 0xc57   : > { %v5243_v35 = vadd.f32 1e-05, %v5211_v8  ;;  %v12188_v8 = vadd.f32 %v8830_v56, %v4106_v4 }
 0xc59   : > { %8687 = vrsqrt.f32 %v5243_v35  ;;  %vm5335_vm8 = vweird.f32 %v5243_v35 }
 0xc5c   : > { %v5132_v20 = vpop.xlane.xlu0 %5131 }
 0xc5d   : > { %v5212_v16 = vmul.f32 %v5132_v20, %v10296_v2 }
 0xc5f   : > { %v8688_v13 = vpop.eup %8687  ;;  %v5244_v19 = vadd.f32 1e-05, %v5212_v16  ;;  %v4109_v16 = vadd.f32 %v11864_v60, %v4108_v5 }
 0xc60   : > { %v5330_v48 = vmul.f32 %v8688_v13, %v5243_v35  ;;  %8081 = vmatmul.msk.bf16.gmra.mxu2 %vm1515_vm10, %v5693_v0  ;;  %vm5336_vm2 = vweird.f32 %v8688_v13 }
 0xc61   : > { %8689 = vrsqrt.f32 %v5244_v19  ;;  %vm5337_vm9 = vmor %vm5335_vm8, %vm5336_vm2  ;;  %vm5345_vm12 = vweird.f32 %v5244_v19 }
 0xc62   : > { %v5331_v10 = vmul.f32 %v8688_v13, %v5330_v48 }
 0xc64   : > { %v5332_v45 = vmul.f32 0.5, %v5331_v10  ;;  %v4955_v9 = vpop.xlane.xlu0 %4954  ;;  %v4111_v10 = vpop.f32.mrf.mxu0 }
 0xc65   : > { %v5025_v6 = vmul.f32 %v4955_v9, %v10296_v2  ;;  %v4112_v5 = vadd.f32 %v11864_v60, %v4111_v10 }
 0xc66   : > { %v5333_v3 = vsub.f32 1.5, %v5332_v45 }
 0xc67   : > { %v8690_v44 = vpop.eup %8689  ;;  %v12180_v37 = vsub.f32 %v12070_v11, %v5025_v6  ;;  %v8840_v11 = vld [vmem:[%s10138_s22 + $0xe0] sm:$0xff] }
 0xc68   : > { %v5334_v24 = vmul.f32 %v8688_v13, %v5333_v3  ;;  %v5340_v41 = vmul.f32 %v8690_v44, %v5244_v19  ;;  %vm5346_vm11 = vweird.f32 %v8690_v44  ;;  %v8831_v3 = vld [vmem:[%s10138_s22 + $0xa0] sm:$0xff] }
 0xc69   : > { %v5089_v52 = vmul.f32 %v12180_v37, %v12180_v37  ;;  %vm5347_vm13 = vmor %vm5345_vm12, %vm5346_vm11 }
 0xc6a   : > { %v5341_v21 = vmul.f32 %v8690_v44, %v5340_v41  ;;  %v5338_v42 = vsel %vm5337_vm9, %v8688_v13, %v5334_v24  ;;  %v4974_v13 = vsel %vm1515_vm10, %v12188_v8, 0.0 }
 0xc6b   : > { %v5145_v26 = vsel %vm1515_vm10, %v5089_v52, 0.0  ;;  %v5595_v35 = vmul.f32 %v5338_v42, %v12048_v62  ;;  %v5091_v52 = vmul.f32 %v12201_v18, %v12201_v18 }
 0xc6c   : > { %v5342_v30 = vmul.f32 0.5, %v5341_v21  ;;  %5146 = vadd.xlane.f32.xlu2 %v5145_v26  ;;  %v4958_v63 = vpop.xlane.xlu0 %4957 }
 0xc6d   : > { %v5026_v51 = vmul.f32 %v4958_v63, %v10296_v2  ;;  %v5630_v19 = vmul.f32 %v12054_v39, %v5595_v35  ;;  %v5151_v26 = vsel %vm1515_vm10, %v5091_v52, 0.0 }
 0xc6e   : > { %v5343_v23 = vsub.f32 1.5, %v5342_v30  ;;  %v4114_v30 = vpop.f32.mrf.mxu0 }
 0xc6f   : > { %v12193_v14 = vsub.f32 %v12087_v53, %v5026_v51  ;;  %v5665_v41 = vadd.f32 %v12064_v50, %v5630_v19  ;;  %v8832_v51 = vld [vmem:[%s10138_s22 + $0xa8] sm:$0xff]  ;;  %v8833_v19 = vld [vmem:[%s10138_s22 + $0xb0] sm:$0xff] }
 0xc70   : > { %v5344_v20 = vmul.f32 %v8690_v44, %v5343_v23  ;;  %v12222_v56 = vadd.f32 %v8832_v51, %v4112_v5 }
 0xc71   : > { %v5090_v36 = vmul.f32 %v12193_v14, %v12193_v14 }
 0xc72   : > { %v5348_v0 = vsel %vm5347_vm13, %v8690_v44, %v5344_v20  ;;  %v12209_v44 = vadd.f32 %v8831_v3, %v4109_v16  ;;  %v4115_v20 = vadd.f32 %v11864_v60, %v4114_v30 }
 0xc73   : > { %v5596_v62 = vmul.f32 %v5348_v0, %v12058_v49  ;;  %v5148_v48 = vsel %vm1515_vm10, %v5090_v36, 0.0  ;;  %v4980_v36 = vsel %vm1515_vm10, %v12222_v56, 0.0 }
 0xc74   : > { %4975 = vadd.xlane.f32.xlu2 %v4974_v13  ;;  %5149 = vadd.xlane.f32.xlu0 %v5148_v48  ;;  %v5135_v45 = vpop.xlane.xlu0 %5134  ;;  %14183 = vst [vmem:[#allocation96_spill] sm:$0xff] %v12209_v44  ;;  %v4977_v21 = vsel %vm1515_vm10, %v12209_v44, 0.0  ;;  %v12229_v10 = vadd.f32 %v8833_v19, %v4115_v20 }
 0xc75   : > { %v5213_v9 = vmul.f32 %v5135_v45, %v10296_v2  ;;  %v5631_v6 = vmul.f32 %v12054_v39, %v5596_v62 }
 0xc76   : > { %14184 = vst [vmem:[#allocation97_spill] sm:$0xff] %v12229_v10  ;;  %v4983_v52 = vsel %vm1515_vm10, %v12229_v10, 0.0 }
 0xc77   : > { %v5245_v24 = vadd.f32 1e-05, %v5213_v9  ;;  %v5666_v49 = vadd.f32 %v12064_v50, %v5631_v6  ;;  %v4117_v9 = vpop.f32.mrf.mxu0 }
 0xc79   : > { %8691 = vrsqrt.f32 %v5245_v24  ;;  %v5694_v4 = vpack.c.bf16 %v5666_v49, %v5665_v41  ;;  %vm5355_vm15 = vweird.f32 %v5245_v24 }
 0xc7b   : > { %8082 = vmatmul.msk.bf16.gmra.mxu2 %vm1515_vm10, %v5694_v4 }
 0xc7c   : > { %4978 = vadd.xlane.f32.xlu2 %v4977_v21  ;;  %5152 = vadd.xlane.f32.xlu0 %v5151_v26  ;;  %v5138_v61 = vpop.xlane.xlu0 %5137 }
 0xc7d   : > { %v5214_v42 = vmul.f32 %v5138_v61, %v10296_v2 }
 0xc7f   : > { %v8692_v63 = vpop.eup %8691  ;;  %v5246_v23 = vadd.f32 1e-05, %v5214_v42  ;;  %v4120_v30 = vpop.f32.mrf.mxu0 }
 0xc80   : > { %v5350_v59 = vmul.f32 %v8692_v63, %v5245_v24  ;;  %vm5356_vm14 = vweird.f32 %v8692_v63 }
 0xc81   : > { %8693 = vrsqrt.f32 %v5246_v23  ;;  %vm5357_vm3 = vmor %vm5355_vm15, %vm5356_vm14  ;;  %vm5365_vm5 = vweird.f32 %v5246_v23 }
 0xc82   : > { %v5351_v35 = vmul.f32 %v8692_v63, %v5350_v59 }
 0xc84   : > { %v5352_v16 = vmul.f32 0.5, %v5351_v35  ;;  %4981 = vadd.xlane.f32.xlu0 %v4980_v36  ;;  %v4964_v0 = vpop.xlane.xlu0 %4963 }
 0xc85   : > { %v5028_v13 = vmul.f32 %v4964_v0, %v10296_v2 }
 0xc86   : > { %v5353_v62 = vsub.f32 1.5, %v5352_v16 }
 0xc87   : > { %v8694_v48 = vpop.eup %8693  ;;  %v12232_v45 = vsub.f32 %v12112_v58, %v5028_v13  ;;  %v12246_v16 = vpop.f32.mrf.mxu0 }
 0xc88   : > { %v5354_v6 = vmul.f32 %v8692_v63, %v5353_v62  ;;  %v5360_v3 = vmul.f32 %v8694_v48, %v5246_v23  ;;  %vm5366_vm4 = vweird.f32 %v8694_v48 }
 0xc89   : > { %v5092_v41 = vmul.f32 %v12232_v45, %v12232_v45  ;;  %vm5367_vm6 = vmor %vm5365_vm5, %vm5366_vm4 }
 0xc8a   : > { %v5361_v49 = vmul.f32 %v8694_v48, %v5360_v3  ;;  %v5358_v5 = vsel %vm5357_vm3, %v8692_v63, %v5354_v6 }
 0xc8b   : > { %v5154_v4 = vsel %vm1515_vm10, %v5092_v41, 0.0  ;;  %v5597_v61 = vmul.f32 %v5358_v5, %v12094_v28 }
 0xc8c   : > { %v5362_v21 = vmul.f32 0.5, %v5361_v49  ;;  %4984 = vadd.xlane.f32.xlu0 %v4983_v52  ;;  %5155 = vadd.xlane.f32.xlu1 %v5154_v4  ;;  %v8559_v4 = vld [vmem:[#allocation23] ss:$0 sm:$0xff] }
 0xc8d   : > { %v5632_v59 = vmul.f32 %v12054_v39, %v5597_v61 }
 0xc8e   : > { %v5363_v26 = vsub.f32 1.5, %v5362_v21  ;;  %v4118_v21 = vadd.f32 %v11864_v60, %v4117_v9 }
 0xc8f   : > { %v5667_v63 = vadd.f32 %v12064_v50, %v5632_v59  ;;  %v12249_v0 = vpop.f32.mrf.mxu0 }
 0xc90   : > { %v5364_v42 = vmul.f32 %v8694_v48, %v5363_v26 }
 0xc92   : > { %v5368_v24 = vsel %vm5367_vm6, %v8694_v48, %v5364_v42 }
 0xc93   : > { %v5598_v51 = vmul.f32 %v5368_v24, %v12102_v7  ;;  %v4973_v24 = vpop.xlane.xlu1 %4972 }
 0xc94   : > { %v5031_v9 = vmul.f32 %v4973_v24, %v10296_v2  ;;  %v12289_v24 = vld [vmem:[#allocation17] ss:$0 sm:$0xff] }
 0xc95   : > { %v5633_v35 = vmul.f32 %v12054_v39, %v5598_v51 }
 0xc97   : > { %v5668_v20 = vadd.f32 %v12064_v50, %v5633_v35  ;;  %v12256_v49 = vpop.f32.mrf.mxu0 }
 0xc99   : > { %v5695_v36 = vpack.c.bf16 %v5668_v20, %v5667_v63  ;;  %v8834_v20 = vld [vmem:[%s10138_s22 + $0xb8] sm:$0xff] }
 0xc9b   : > { %8083 = vmatmul.msk.bf16.gmra.mxu2 %vm1515_vm10, %v5695_v36  ;;  %v12266_v36 = vadd.f32 %v8834_v20, %v4118_v21  ;;  %v8836_v21 = vld [vmem:[%s10138_s22 + $0xc0] sm:$0xff] }
 0xca4   : > { %v5141_v28 = vpop.xlane.xlu2 %5140 }
 0xca5   : > { %v5215_v23 = vmul.f32 %v5141_v28, %v10296_v2 }
 0xca7   : > { %v5247_v13 = vadd.f32 1e-05, %v5215_v23 }
 0xca9   : > { %8695 = vrsqrt.f32 %v5247_v13  ;;  %vm5375_vm2 = vweird.f32 %v5247_v13 }
 0xcac   : > { %v4967_v7 = vpop.xlane.xlu2 %4966  ;;  %v5144_v62 = vpop.xlane.xlu0 %5143 }
 0xcad   : > { %v5029_v48 = vmul.f32 %v4967_v7, %v10296_v2  ;;  %v5216_v19 = vmul.f32 %v5144_v62, %v10296_v2 }
 0xcaf   : > { %v8696_v6 = vpop.eup %8695  ;;  %v12254_v3 = vsub.f32 %v12144_v15, %v5029_v48  ;;  %v5248_v41 = vadd.f32 1e-05, %v5216_v19 }
 0xcb0   : > { %v5370_v52 = vmul.f32 %v8696_v6, %v5247_v13  ;;  %vm5376_vm7 = vweird.f32 %v8696_v6  ;;  %v12293_v13 = vsub.f32 %v11963_v43, %v5031_v9 }
 0xcb1   : > { %8697 = vrsqrt.f32 %v5248_v41  ;;  %v5093_v5 = vmul.f32 %v12254_v3, %v12254_v3  ;;  %vm12281_vm8 = vmor %vm5375_vm2, %vm5376_vm7  ;;  %vm5385_vm11 = vweird.f32 %v5248_v41 }
 0xcb2   : > { %v5371_v26 = vmul.f32 %v8696_v6, %v5370_v52 }
 0xcb3   : > { %v4764_v61 = vpop.f32.mrf.mxu2  ;;  %v5157_v42 = vsel %vm1515_vm10, %v5093_v5, 0.0  ;;  %v12279_v5 = vpop.f32.mrf.mxu0 }
 0xcb4   : > { %v5372_v51 = vmul.f32 0.5, %v5371_v26  ;;  %v12262_v59 = vadd.f32 %v8559_v4, %v4764_v61  ;;  %5158 = vadd.xlane.f32.xlu1 %v5157_v42  ;;  %v4970_v35 = vpop.xlane.xlu0 %4969  ;;  %v4986_v42 = vsel %vm1515_vm10, %v12266_v36, 0.0 }
 0xcb5   : > { %v5030_v63 = vmul.f32 %v4970_v35, %v10296_v2 }
 0xcb6   : > { %v5373_v28 = vsub.f32 1.5, %v5372_v51  ;;  %v12269_v23 = vmul.f32 0.70710677, %v12262_v59  ;;  %v4121_v51 = vadd.f32 %v12289_v24, %v4120_v30 }
 0xcb7   : > { %v8698_v60 = vpop.eup %8697  ;;  %v12273_v7 = vsub.f32 %v12157_v34, %v5030_v63 }
 0xcb8   : > { %v5374_v62 = vmul.f32 %v8696_v6, %v5373_v28  ;;  %v5380_v48 = vmul.f32 %v8698_v60, %v5248_v41  ;;  %v4773_v19 = vmul.f32 %v12269_v23, %v12269_v23  ;;  %vm5386_vm9 = vweird.f32 %v8698_v60 }
 0xcb9   : > { %v5094_v52 = vmul.f32 %v12273_v7, %v12273_v7  ;;  %vm5387_vm12 = vmor %vm5385_vm11, %vm5386_vm9 }
 0xcba   : > { %v5381_v26 = vmul.f32 %v8698_v60, %v5380_v48  ;;  %v12285_v61 = vmin.f32 %v4773_v19, 16.0  ;;  %v5378_v35 = vsel %vm12281_vm8, %v8696_v6, %v5374_v62  ;;  %v12304_v6 = vadd.f32 %v8836_v21, %v4121_v51 }
 0xcbb   : > { %v4766_v63 = vpop.f32.mrf.mxu2  ;;  %v5160_v20 = vsel %vm1515_vm10, %v5094_v52, 0.0  ;;  %v5599_v30 = vmul.f32 %v5378_v35, %v12134_v38  ;;  %v5095_v52 = vmul.f32 %v12293_v13, %v12293_v13  ;;  %v4124_v38 = vadd.f32 %v12289_v24, %v12246_v16 }
 0xcbc   : > { %v5382_v28 = vmul.f32 0.5, %v5381_v26  ;;  %v4775_v48 = vmul.f32 2.1237322e-06, %v12285_v61  ;;  %v4786_v19 = vmul.f32 3.8918573e-05, %v12285_v61  ;;  %v12300_v34 = vadd.f32 %v8559_v4, %v4766_v63  ;;  %4987 = vadd.xlane.f32.xlu1 %v4986_v42  ;;  %5161 = vadd.xlane.f32.xlu2 %v5160_v20 }
 0xcbd   : > { %v12313_v63 = vld [vmem:[#allocation29] ss:$0 sm:$0xff]  ;;  %v5634_v41 = vmul.f32 %v12054_v39, %v5599_v30  ;;  %v5163_v16 = vsel %vm1515_vm10, %v5095_v52, 0.0 }
 0xcbe   : > { %v5383_v9 = vsub.f32 1.5, %v5382_v28  ;;  %v4776_v43 = vadd.f32 0.00028619796, %v4775_v48  ;;  %v4787_v15 = vadd.f32 0.001143296, %v4786_v19  ;;  %v4989_v19 = vsel %vm1515_vm10, %v12304_v6, 0.0 }
 0xcbf   : > { %v12307_v62 = vmul.f32 0.70710677, %v12300_v34 }
 0xcc0   : > { %v5384_v26 = vmul.f32 %v8698_v60, %v5383_v9  ;;  %v4777_v4 = vmul.f32 %v4776_v43, %v12285_v61  ;;  %v4788_v42 = vmul.f32 %v4787_v15, %v12285_v61  ;;  %v4135_v9 = vpop.f32.mrf.mxu0 }
 0xcc1   : > { %v4813_v51 = vmul.f32 %v12307_v62, %v12307_v62 }
 0xcc2   : > { %v5388_v35 = vsel %vm5387_vm12, %v8698_v60, %v5384_v26  ;;  %v4778_v20 = vadd.f32 0.0036580483, %v4777_v4  ;;  %v4789_v28 = vadd.f32 0.014752088, %v4788_v42  ;;  %v8837_v42 = vld [vmem:[%s10138_s22 + $0xc8] sm:$0xff] }
 0xcc3   : > { %v5600_v43 = vmul.f32 %v5388_v35, %v12147_v54  ;;  %v12322_v48 = vmin.f32 %v4813_v51, 16.0  ;;  %v5776_v15 = vpop.f32.mrf.mxu2  ;;  %v12336_v51 = vadd.f32 %v8837_v42, %v4124_v38 }
 0xcc4   : > { %v4779_v21 = vmul.f32 %v4778_v20, %v12285_v61  ;;  %v4790_v60 = vmul.f32 %v4789_v28, %v12285_v61  ;;  %v12330_v26 = vadd.f32 %v12313_v63, %v5776_v15  ;;  %4990 = vadd.xlane.f32.xlu1 %v4989_v19  ;;  %5164 = vadd.xlane.f32.xlu2 %v5163_v16 }
 0xcc5   : > { %v4815_v54 = vmul.f32 2.1237322e-06, %v12322_v48  ;;  %v4826_v30 = vmul.f32 3.8918573e-05, %v12322_v48  ;;  %v5635_v4 = vmul.f32 %v12054_v39, %v5600_v43  ;;  %v5669_v20 = vadd.f32 %v12064_v50, %v5634_v41 }
 0xcc6   : > { %v4780_v52 = vadd.f32 0.05243302, %v4779_v21  ;;  %v4791_v35 = vadd.f32 0.112945676, %v4790_v60  ;;  %v12340_v15 = vmul.f32 0.70710677, %v12330_v26 }
 0xcc7   : > { %v4816_v58 = vadd.f32 0.00028619796, %v4815_v54  ;;  %v4827_v28 = vadd.f32 0.001143296, %v4826_v30  ;;  %v5670_v19 = vadd.f32 %v12064_v50, %v5635_v4  ;;  %v4992_v60 = vsel %vm1515_vm10, %v12336_v51, 0.0 }
 0xcc8   : > { %v4781_v16 = vmul.f32 %v4780_v52, %v12285_v61  ;;  %v4792_v27 = vmul.f32 %v4791_v35, %v12285_v61  ;;  %v5920_v43 = vmul.f32 %v12340_v15, %v12340_v15  ;;  %v4127_v54 = vadd.f32 %v12289_v24, %v12249_v0 }
 0xcc9   : > { %v4817_v39 = vmul.f32 %v4816_v58, %v12322_v48  ;;  %v4828_v38 = vmul.f32 %v4827_v28, %v12322_v48  ;;  %v5696_v21 = vpack.c.bf16 %v5670_v19, %v5669_v20  ;;  %v4138_v28 = vpop.f32.mrf.mxu0 }
 0xcca   : > { %v4793_v41 = vadd.f32 0.4994258, %v4792_v27  ;;  %v12353_v4 = vmin.f32 %v5920_v43, 16.0  ;;  %v4782_v27 = vadd.f32 0.18741608, %v4781_v16  ;;  %v8838_v43 = vld [vmem:[%s10138_s22 + $0xd0] sm:$0xff] }
 0xccb   : > { %v4818_v50 = vadd.f32 0.0036580483, %v4817_v39  ;;  %v4829_v30 = vadd.f32 0.014752088, %v4828_v38  ;;  %v5778_v42 = vpop.f32.mrf.mxu2  ;;  %8084 = vmatmul.msk.bf16.gmra.mxu2 %vm1515_vm10, %v5696_v21  ;;  %v12370_v21 = vadd.f32 %v8838_v43, %v4127_v54 }
 0xccc   : > { %v4794_v58 = vmul.f32 %v4793_v41, %v12285_v61  ;;  %v12358_v52 = vadd.f32 %v12313_v63, %v5778_v42  ;;  %4993 = vadd.xlane.f32.xlu2 %v4992_v60  ;;  %v5922_v0 = vmul.f32 2.1237322e-06, %v12353_v4  ;;  %v5933_v39 = vmul.f32 3.8918573e-05, %v12353_v4 }
 0xccd   : > { %v4819_v35 = vmul.f32 %v4818_v50, %v12322_v48  ;;  %v4830_v20 = vmul.f32 %v4829_v30, %v12322_v48  ;;  %v4130_v50 = vadd.f32 %v12289_v24, %v12256_v49  ;;  %v4133_v30 = vadd.f32 %v12289_v24, %v12279_v5 }
 0xcce   : > { %v12363_v19 = vadd.f32 1.0, %v4794_v58  ;;  %v12367_v38 = vmul.f32 0.70710677, %v12358_v52  ;;  %v5923_v60 = vadd.f32 0.00028619796, %v5922_v0  ;;  %v4136_v42 = vadd.f32 %v12289_v24, %v4135_v9 }
 0xccf   : > { %v4820_v41 = vadd.f32 0.05243302, %v4819_v35  ;;  %v4831_v16 = vadd.f32 0.112945676, %v4830_v20  ;;  %v4139_v58 = vadd.f32 %v12289_v24, %v4138_v28  ;;  %v5934_v20 = vadd.f32 0.001143296, %v5933_v39 }
 0xcd0   : > { %8699 = vrcp.f32 %v12363_v19  ;;  %v5924_v35 = vmul.f32 %v5923_v60, %v12353_v4  ;;  %v5960_v0 = vmul.f32 %v12367_v38, %v12367_v38  ;;  %v4783_v49 = vmul.f32 %v4782_v27, %v12285_v61  ;;  %v8839_v24 = vld [vmem:[%s10138_s22 + $0xd8] sm:$0xff]  ;;  %v8841_v61 = vld [vmem:[%s10138_s22 + $0xe8] sm:$0xff] }
 0xcd1   : > { %v4832_v54 = vmul.f32 %v4831_v16, %v12322_v48  ;;  %v4821_v5 = vmul.f32 %v4820_v41, %v12322_v48  ;;  %v4995_v9 = vsel %vm1515_vm10, %v12370_v21, 0.0  ;;  %v12388_v28 = vadd.f32 %v8839_v24, %v4130_v50  ;;  %v8842_v41 = vld [vmem:[%s10138_s22 + $0xf0] sm:$0xff] }
 0xcd2   : > { %v5925_v16 = vadd.f32 0.0036580483, %v5924_v35  ;;  %v5935_v60 = vmul.f32 %v5934_v20, %v12353_v4  ;;  %v12391_v53 = vmin.f32 %v5960_v0, 16.0  ;;  %v12394_v29 = vadd.f32 %v8840_v11, %v4133_v30 }
 0xcd3   : > { %v4833_v43 = vadd.f32 0.4994258, %v4832_v54  ;;  %14187 = vst [vmem:[#allocation98_spill] sm:$0xff] %v12388_v28  ;;  %v5781_v39 = vpop.f32.mrf.mxu2  ;;  %v12397_v27 = vadd.f32 %v8841_v61, %v4136_v42  ;;  %v12400_v54 = vadd.f32 %v8842_v41, %v4139_v58  ;;  %v4784_v24 = vadd.f32 1.1283791, %v4783_v49 }
 0xcd4   : > { %4996 = vadd.xlane.f32.xlu2 %v4995_v9  ;;  %v5926_v35 = vmul.f32 %v5925_v16, %v12353_v4  ;;  %v5936_v20 = vadd.f32 0.014752088, %v5935_v60  ;;  %v5962_v0 = vmul.f32 2.1237322e-06, %v12391_v53  ;;  %v5973_v9 = vmul.f32 3.8918573e-05, %v12391_v53 }
 0xcd5   : > { %v4834_v40 = vmul.f32 %v4833_v43, %v12322_v48  ;;  %v4822_v30 = vadd.f32 0.18741608, %v4821_v5  ;;  %v12412_v16 = vadd.f32 %v12313_v63, %v5781_v39  ;;  %v8176_v60 = vld [vmem:[%s14188_s9 + $0x18] sm:$0xff]  ;;  %v12417_v49 = vsel %vm1515_vm10, %v12388_v28, 0.0 }
 0xcd6   : > { %v8700_v50 = vpop.eup %8699  ;;  %v5927_v61 = vadd.f32 0.05243302, %v5926_v35  ;;  %v5937_v58 = vmul.f32 %v5936_v20, %v12353_v4  ;;  %v5963_v41 = vadd.f32 0.00028619796, %v5962_v0  ;;  %v5974_v43 = vadd.f32 0.001143296, %v5973_v9  ;;  %4901 = vmatpush.bf16.msrb.mxu1 %v8176_v60 }
 0xcd7   : > { %v4797_v11 = vmul.f32 %v8700_v50, %v12363_v19  ;;  %v12407_v42 = vadd.f32 1.0, %v4834_v40  ;;  %v4805_v5 = vand.u32 2147483647, %v12363_v19  ;;  %v4807_v40 = vand.u32 2147483648, %v12363_v19 }
 0xcd8   : > { %v5928_v35 = vmul.f32 %v5927_v61, %v12353_v4  ;;  %v5938_v20 = vadd.f32 0.112945676, %v5937_v58  ;;  %vm4802_vm13 = vweird.f32 %v8700_v50  ;;  %v5964_v9 = vmul.f32 %v5963_v41, %v12391_v53 }
 0xcd9   : > { %v4798_v46 = vsub.f32 1.0, %v4797_v11  ;;  %8701 = vrcp.f32 %v12407_v42  ;;  %v5975_v11 = vmul.f32 %v5974_v43, %v12391_v53  ;;  %v4785_v39 = vmul.f32 %v4784_v24, %v12269_v23 }
 0xcda   : > { %vm4801_vm14 = vweird.f32 %v12363_v19  ;;  %v4823_v12 = vmul.f32 %v4822_v30, %v12322_v48  ;;  %v5939_v1 = vmul.f32 %v5938_v20, %v12353_v4  ;;  %v5965_v47 = vadd.f32 0.0036580483, %v5964_v9 }
 0xcdb   : > { %v4799_v0 = vmul.f32 %v8700_v50, %v4798_v46  ;;  %v5976_v55 = vadd.f32 0.014752088, %v5975_v11  ;;  %v12429_v61 = vmul.f32 0.70710677, %v12412_v16  ;;  %vm4803_vm15 = vmor %vm4801_vm14, %vm4802_vm13  ;;  %vm4806_vm3 = vcmp.eq.f32.partialorder %v4805_v5, 8.507059e+37  ;;  %v5783_v43 = vpop.f32.mrf.mxu2 }
 0xcdc   : > { %v4808_v46 = vor.u32 1.1754944e-38, %v4807_v40  ;;  %v5929_v58 = vadd.f32 0.18741608, %v5928_v35  ;;  %v5940_v41 = vadd.f32 0.4994258, %v5939_v1  ;;  %v5966_v19 = vmul.f32 %v5965_v47, %v12391_v53 }
 0xcdd   : > { %v4800_v22 = vadd.f32 %v8700_v50, %v4799_v0  ;;  %v5977_v48 = vmul.f32 %v5976_v55, %v12391_v53  ;;  %v6000_v24 = vmul.f32 %v12429_v61, %v12429_v61  ;;  %v4824_v20 = vadd.f32 1.1283791, %v4823_v12 }
 0xcde   : > { %v4845_v5 = vand.u32 2147483647, %v12407_v42  ;;  %v5941_v1 = vmul.f32 %v5940_v41, %v12353_v4  ;;  %v4847_v55 = vand.u32 2147483648, %v12407_v42  ;;  %v5967_v11 = vadd.f32 0.05243302, %v5966_v19 }
 0xcdf   : > { %v8702_v60 = vpop.eup %8701  ;;  %v4804_v23 = vsel %vm4803_vm15, %v8700_v50, %v4800_v22  ;;  %v5978_v35 = vadd.f32 0.112945676, %v5977_v48  ;;  %v12439_v22 = vadd.f32 %v12313_v63, %v5783_v43  ;;  %v5930_v50 = vmul.f32 %v5929_v58, %v12353_v4 }
 0xce0   : > { %v4809_v30 = vsel %vm4806_vm3, %v4808_v46, %v4804_v23  ;;  %v4837_v0 = vmul.f32 %v8702_v60, %v12407_v42  ;;  %v12443_v9 = vmin.f32 %v6000_v24, 16.0  ;;  %vm4842_vm4 = vweird.f32 %v8702_v60 }
 0xce1   : > { %v4810_v40 = vmul.f32 %v4809_v30, %v4785_v39  ;;  %v12445_v12 = vadd.f32 1.0, %v5941_v1  ;;  %v5979_v46 = vmul.f32 %v5978_v35, %v12391_v53  ;;  %v8175_v39 = vld [vmem:[%s14188_s9 + $0x10] sm:$0xff]  ;;  %v4769_v30 = vmul.f32 0.5, %v12262_v59  ;;  %v8174_v59 = vld [vmem:[%s14188_s9 + $0x8] sm:$0xff] }
 0xce2   : > { %v4838_v47 = vsub.f32 1.0, %v4837_v0  ;;  %v6002_v48 = vmul.f32 2.1237322e-06, %v12443_v9  ;;  %v6013_v43 = vmul.f32 3.8918573e-05, %v12443_v9  ;;  %vm4841_vm5 = vweird.f32 %v12407_v42  ;;  %4902 = vmatpush.bf16.msrb.mxu1 %v8175_v39 }
 0xce3   : > { %v8056_v23 = vclamps-f32 %v4810_v40, 1.0  ;;  %8703 = vrcp.f32 %v12445_v12  ;;  %v12455_v4 = vmul.f32 0.70710677, %v12439_v22  ;;  %vm4846_vm6 = vcmp.eq.f32.partialorder %v4845_v5, 8.507059e+37  ;;  %vm4843_vm7 = vmor %vm4841_vm5, %vm4842_vm4 }
 0xce4   : > { %v4839_v41 = vmul.f32 %v8702_v60, %v4838_v47  ;;  %v5931_v19 = vadd.f32 1.1283791, %v5930_v50  ;;  %v5980_v24 = vadd.f32 0.4994258, %v5979_v46  ;;  %v4825_v0 = vmul.f32 %v4824_v20, %v12307_v62 }
 0xce5   : > { %v4848_v40 = vor.u32 1.1754944e-38, %v4847_v55  ;;  %v6003_v1 = vadd.f32 0.00028619796, %v6002_v48  ;;  %v6014_v35 = vadd.f32 0.001143296, %v6013_v43  ;;  %v4853_v47 = vadd.f32 1.0, %v8056_v23 }
 0xce6   : > { %v4840_v58 = vadd.f32 %v8702_v60, %v4839_v41  ;;  %v5968_v57 = vmul.f32 %v5967_v11, %v12391_v53  ;;  %v5981_v33 = vmul.f32 %v5980_v24, %v12391_v53  ;;  %v6040_v62 = vmul.f32 %v12455_v4, %v12455_v4  ;;  %4903 = vmatpush.bf16.msrb.mxu1 %v8174_v59  ;;  %v5147_v11 = vpop.xlane.xlu2 %5146 }
 0xce7   : > { %v6004_v39 = vmul.f32 %v6003_v1, %v12443_v9  ;;  %v6015_v5 = vmul.f32 %v6014_v35, %v12443_v9  ;;  %v4770_v20 = vmul.f32 0.5, %v12300_v34  ;;  %v5932_v50 = vmul.f32 %v5931_v19, %v12340_v15  ;;  %v8173_v19 = vld [vmem:[%s14188_s9] sm:$0xff] }
 0xce8   : > { %v4844_v42 = vsel %vm4843_vm7, %v8702_v60, %v4840_v58  ;;  %v12468_v60 = vadd.f32 1.0, %v5981_v33  ;;  %v5954_v23 = vand.u32 2147483648, %v12445_v12  ;;  %v12471_v43 = vmin.f32 %v6040_v62, 16.0  ;;  %v5786_v62 = vpop.f32.mrf.mxu2 }
 0xce9   : > { %v4849_v17 = vsel %vm4846_vm6, %v4848_v40, %v4844_v42  ;;  %v8704_v46 = vpop.eup %8703  ;;  %v6005_v41 = vadd.f32 0.0036580483, %v6004_v39  ;;  %v6016_v48 = vadd.f32 0.014752088, %v6015_v5  ;;  %vm5948_vm2 = vweird.f32 %v12445_v12 }
 0xcea   : > { %v4850_v55 = vmul.f32 %v4849_v17, %v4825_v0  ;;  %v5944_v24 = vmul.f32 %v8704_v46, %v12445_v12  ;;  %v5952_v17 = vand.u32 2147483647, %v12445_v12  ;;  %v4855_v34 = vmul.f32 %v4853_v47, %v4769_v30  ;;  %4904 = vmatpush.bf16.msrb.mxu1 %v8173_v19 }
 0xceb   : > { %v5969_v15 = vadd.f32 0.18741608, %v5968_v57  ;;  %8705 = vrcp.f32 %v12468_v60  ;;  %v5217_v33 = vmul.f32 %v5147_v11, %v10296_v2  ;;  %v6006_v1 = vmul.f32 %v6005_v41, %v12443_v9 }
 0xcec   : > { %v8057_v58 = vclamps-f32 %v4850_v55, 1.0  ;;  %v5945_v40 = vsub.f32 1.0, %v5944_v24  ;;  %v6017_v35 = vmul.f32 %v6016_v48, %v12443_v9  ;;  %vm5949_vm8 = vweird.f32 %v8704_v46 }
 0xced   : > { %v5955_v59 = vor.u32 1.1754944e-38, %v5954_v23  ;;  %v6042_v42 = vmul.f32 2.1237322e-06, %v12471_v43  ;;  %v6053_v39 = vmul.f32 3.8918573e-05, %v12471_v43  ;;  %v5970_v55 = vmul.f32 %v5969_v15, %v12391_v53  ;;  %vm5950_vm9 = vmor %vm5948_vm2, %vm5949_vm8 }
 0xcee   : > { %v4854_v0 = vadd.f32 1.0, %v8057_v58  ;;  %v5946_v57 = vmul.f32 %v8704_v46, %v5945_v40  ;;  %v6007_v47 = vadd.f32 0.05243302, %v6006_v1  ;;  %v6018_v5 = vadd.f32 0.112945676, %v6017_v35 }
 0xcef   : > { %v6043_v11 = vadd.f32 0.00028619796, %v6042_v42  ;;  %v6054_v58 = vadd.f32 0.001143296, %v6053_v39  ;;  %v12484_v24 = vadd.f32 1e-05, %v5217_v33  ;;  %v12495_v53 = vadd.f32 %v12313_v63, %v5786_v62 }
 0xcf0   : > { %v4856_v30 = vmul.f32 %v4854_v0, %v4770_v20  ;;  %v5947_v48 = vadd.f32 %v8704_v46, %v5946_v57  ;;  %v6008_v23 = vmul.f32 %v6007_v47, %v12443_v9  ;;  %v6019_v31 = vmul.f32 %v6018_v5, %v12443_v9 }
 0xcf1   : > { %v8706_v28 = vpop.eup %8705  ;;  %v6044_v20 = vmul.f32 %v6043_v11, %v12471_v43  ;;  %v6055_v19 = vmul.f32 %v6054_v58, %v12471_v43  ;;  %8707 = vrsqrt.f32 %v12484_v24  ;;  %vm5953_vm11 = vcmp.eq.f32.partialorder %v5952_v17, 8.507059e+37 }
 0xcf2   : > { %v4857_v41 = vpack.c.bf16 %v4856_v30, %v4855_v34  ;;  %v5951_v34 = vsel %vm5950_vm9, %v8704_v46, %v5947_v48  ;;  %v5984_v15 = vmul.f32 %v8706_v28, %v12468_v60  ;;  %v6009_v33 = vadd.f32 0.18741608, %v6008_v23  ;;  %v8179_v48 = vld [vmem:[%s14189_s11 + $0x8] sm:$0xff] }
 0xcf3   : > { %v5956_v0 = vsel %vm5953_vm11, %v5955_v59, %v5951_v34  ;;  %v6020_v40 = vadd.f32 0.4994258, %v6019_v31  ;;  %v6045_v12 = vadd.f32 0.0036580483, %v6044_v20  ;;  %v6056_v1 = vadd.f32 0.014752088, %v6055_v19  ;;  %v4976_v59 = vpop.xlane.xlu2 %4975  ;;  %7354 = vmatpush.bf16.msra.mxu1 %v8179_v48  ;;  %8182 = vmatpush.bf16.msra.mxu3 %v8179_v48 }
 0xcf4   : > { %8074 = vmatmul.msk.bf16.vlgmr.msrb.gmra.mxu1 %vm3846_vm1, %v4857_v41  ;;  %v5957_v35 = vmul.f32 %v5956_v0, %v5932_v50  ;;  %v5971_v42 = vadd.f32 1.1283791, %v5970_v55  ;;  %v5985_v39 = vsub.f32 1.0, %v5984_v15  ;;  %v5994_v30 = vand.u32 2147483648, %v12468_v60 }
 0xcf5   : > { %v6021_v57 = vmul.f32 %v6020_v40, %v12443_v9  ;;  %v6046_v46 = vmul.f32 %v6045_v12, %v12471_v43  ;;  %v6057_v17 = vmul.f32 %v6056_v1, %v12471_v43  ;;  %v12504_v47 = vmul.f32 0.70710677, %v12495_v53 }
 0xcf6   : > { %v5986_v5 = vmul.f32 %v8706_v28, %v5985_v39  ;;  %vm5989_vm1 = vweird.f32 %v8706_v28  ;;  %v5992_v31 = vand.u32 2147483647, %v12468_v60  ;;  %v12509_v50 = vsel %vm1515_vm10, %v12394_v29, 0.0 }
 0xcf7   : > { %v12511_v62 = vpop.eup %8707  ;;  %v6010_v55 = vmul.f32 %v6009_v33, %v12443_v9  ;;  %v12514_v11 = vadd.f32 1.0, %v6021_v57  ;;  %v6047_v58 = vadd.f32 0.05243302, %v6046_v46  ;;  %v6058_v41 = vadd.f32 0.112945676, %v6057_v17 }
 0xcf8   : > { %v5972_v23 = vmul.f32 %v5971_v42, %v12367_v38  ;;  %v5987_v20 = vadd.f32 %v8706_v28, %v5986_v5  ;;  %vm5988_vm12 = vweird.f32 %v12468_v60  ;;  %v5995_v19 = vor.u32 1.1754944e-38, %v5994_v30  ;;  %v8178_v5 = vld [vmem:[%s14189_s11] sm:$0xff]  ;;  %s9446_s11 = scalar_lea.hbm %s14245_s18, 32 }
 0xcf9   : > { %v8095_v34 = vclamps-f32 %v5957_v35, 1.0  ;;  %vm5990_vm13 = vmor %vm5988_vm12, %vm5989_vm1  ;;  %8709 = vrcp.f32 %v12514_v11  ;;  %v6080_v15 = vmul.f32 %v12504_v47, %v12504_v47  ;;  %v5032_v9 = vmul.f32 %v4976_v59, %v10296_v2  ;;  %v5150_v35 = vpop.xlane.xlu0 %5149  ;;  %7355 = vmatpush.bf16.msra.mxu1 %v8178_v5  ;;  %8183 = vmatpush.bf16.msra.mxu3 %v8178_v5 }
 0xcfa   : > { %v5991_v33 = vsel %vm5990_vm13, %v8706_v28, %v5987_v20  ;;  %vm5993_vm14 = vcmp.eq.f32.partialorder %v5992_v31, 8.507059e+37  ;;  %v6059_v38 = vmul.f32 %v6058_v41, %v12471_v43  ;;  %v5390_v60 = vmul.f32 %v12511_v62, %v12484_v24 }
 0xcfb   : > { %v5856_v0 = vmul.f32 0.5, %v12330_v26  ;;  %v5996_v40 = vsel %vm5993_vm14, %v5995_v19, %v5991_v33  ;;  %v6011_v12 = vadd.f32 1.1283791, %v6010_v55  ;;  %v6048_v1 = vmul.f32 %v6047_v58, %v12471_v43 }
 0xcfc   : > { %v5857_v42 = vmul.f32 0.5, %v12358_v52  ;;  %v5997_v39 = vmul.f32 %v5996_v40, %v5972_v23  ;;  %v12531_v30 = vmul.f32 0.5, %v12412_v16  ;;  %v6060_v28 = vadd.f32 0.4994258, %v6059_v38 }
 0xcfd   : > { %v7200_v57 = vadd.f32 1.0, %v8095_v34  ;;  %v12534_v46 = vmul.f32 0.5, %v12439_v22  ;;  %v12536_v17 = vmin.f32 %v6080_v15, 16.0  ;;  %v12539_v26 = vsub.f32 %v12188_v8, %v5032_v9  ;;  %v5788_v15 = vpop.f32.mrf.mxu2 }
 0xcfe   : > { %v8096_v31 = vclamps-f32 %v5997_v39, 1.0  ;;  %v6061_v59 = vmul.f32 %v6060_v28, %v12471_v43  ;;  %v5391_v52 = vmul.f32 %v12511_v62, %v5390_v60  ;;  %v5218_v55 = vmul.f32 %v5150_v35, %v10296_v2  ;;  %v4979_v35 = vpop.xlane.xlu2 %4978 }
 0xcff   : > { %v8710_v16 = vpop.eup %8709  ;;  %v12546_v58 = vmul.f32 %v6011_v12, %v12429_v61  ;;  %v6049_v41 = vadd.f32 0.18741608, %v6048_v1  ;;  %v6082_v22 = vmul.f32 2.1237322e-06, %v12536_v17  ;;  %v6093_v48 = vmul.f32 3.8918573e-05, %v12536_v17 }
 0xd00   : > { %v7201_v23 = vadd.f32 1.0, %v8096_v31  ;;  %v6024_v20 = vmul.f32 %v8710_v16, %v12514_v11  ;;  %v6032_v19 = vand.u32 2147483647, %v12514_v11  ;;  %v6034_v34 = vand.u32 2147483648, %v12514_v11 }
 0xd01   : > { %v7232_v9 = vmul.f32 %v7200_v57, %v5856_v0  ;;  %v12553_v33 = vadd.f32 1.0, %v6061_v59  ;;  %v6083_v61 = vadd.f32 0.00028619796, %v6082_v22  ;;  %v6094_v38 = vadd.f32 0.001143296, %v6093_v48 }
 0xd02   : > { %v7233_v60 = vmul.f32 %v7201_v23, %v5857_v42  ;;  %v6025_v40 = vsub.f32 1.0, %v6024_v20  ;;  %v5392_v12 = vmul.f32 0.5, %v5391_v52  ;;  %v12555_v1 = vadd.f32 1e-05, %v5218_v55 }
 0xd03   : > { %vm6028_vm15 = vweird.f32 %v12514_v11  ;;  %v6050_v39 = vmul.f32 %v6049_v41, %v12471_v43  ;;  %8711 = vrcp.f32 %v12553_v33  ;;  %v12561_v28 = vadd.f32 %v12313_v63, %v5788_v15  ;;  %v5153_v43 = vpop.xlane.xlu0 %5152 }
 0xd04   : > { %v7264_v0 = vpack.c.bf16 %v7233_v60, %v7232_v9  ;;  %v6026_v57 = vmul.f32 %v8710_v16, %v6025_v40  ;;  %vm6029_vm3 = vweird.f32 %v8710_v16  ;;  %v6084_v5 = vmul.f32 %v6083_v61, %v12536_v17 }
 0xd05   : > { %vm12564_vm4 = vcmp.eq.f32.partialorder %v6032_v19, 8.507059e+37  ;;  %v6035_v31 = vor.u32 1.1754944e-38, %v6034_v34  ;;  %v6095_v59 = vmul.f32 %v6094_v38, %v12536_v17  ;;  %v5033_v52 = vmul.f32 %v4979_v35, %v10296_v2  ;;  %vm6030_vm5 = vmor %vm6028_vm15, %vm6029_vm3 }
 0xd06   : > { %v6027_v55 = vadd.f32 %v8710_v16, %v6026_v57  ;;  %v5393_v41 = vsub.f32 1.5, %v5392_v12  ;;  %v6085_v22 = vadd.f32 0.0036580483, %v6084_v5  ;;  %8713 = vrsqrt.f32 %v12555_v1  ;;  %8135 = vmatmul.msk.bf16.vlgmr.msra.gmra.mxu1 %vm1403_vm0, %v7264_v0 }
 0xd07   : > { %vm5395_vm6 = vweird.f32 %v12484_v24  ;;  %vm5396_vm7 = vweird.f32 %v12511_v62  ;;  %v6096_v48 = vadd.f32 0.014752088, %v6095_v59  ;;  %v12577_v23 = vmul.f32 0.70710677, %v12561_v28 }
 0xd08   : > { %v5096_v20 = vmul.f32 %v12539_v26, %v12539_v26  ;;  %v6031_v19 = vsel %vm6030_vm5, %v8710_v16, %v6027_v55  ;;  %v6051_v34 = vadd.f32 1.1283791, %v6050_v39  ;;  %v6086_v15 = vmul.f32 %v6085_v22, %v12536_v17  ;;  %vm12617_vm9 = vmor %vm5395_vm6, %vm5396_vm7 }
 0xd09   : > { %v5219_v9 = vmul.f32 %v5153_v43, %v10296_v2  ;;  %v8712_v61 = vpop.eup %8711  ;;  %v6036_v11 = vsel %vm12564_vm4, %v6035_v31, %v6031_v19  ;;  %v6097_v38 = vmul.f32 %v6096_v48, %v12536_v17  ;;  %v6120_v60 = vmul.f32 %v12577_v23, %v12577_v23 }
 0xd0a   : > { %v5166_v40 = vsel %vm1515_vm10, %v5096_v20, 0.0  ;;  %v6064_v12 = vmul.f32 %v8712_v61, %v12553_v33  ;;  %v5394_v16 = vmul.f32 %v12511_v62, %v5393_v41  ;;  %v6087_v35 = vadd.f32 0.05243302, %v6086_v15 }
 0xd0b   : > { %v12592_v39 = vsub.f32 %v12209_v44, %v5033_v52  ;;  %5167 = vadd.xlane.f32.xlu0 %v5166_v40  ;;  %vm6068_vm2 = vweird.f32 %v12553_v33  ;;  %v6098_v0 = vadd.f32 0.112945676, %v6097_v38  ;;  %v12595_v57 = vmin.f32 %v6120_v60, 16.0 }
 0xd0c   : > { %v12597_v5 = vadd.f32 1e-05, %v5219_v9  ;;  %v12599_v42 = vpop.eup %8713  ;;  %v6037_v31 = vmul.f32 %v6036_v11, %v12546_v58  ;;  %v6065_v59 = vsub.f32 1.0, %v6064_v12  ;;  %v6074_v43 = vand.u32 2147483648, %v12553_v33 }
 0xd0d   : > { %v6088_v55 = vmul.f32 %v6087_v35, %v12536_v17  ;;  %vm6069_vm8 = vweird.f32 %v8712_v61  ;;  %v6099_v52 = vmul.f32 %v6098_v0, %v12536_v17  ;;  %v5400_v41 = vmul.f32 %v12599_v42, %v12555_v1  ;;  %v4982_v0 = vpop.xlane.xlu0 %4981 }
 0xd0e   : > { %v6122_v22 = vmul.f32 2.1237322e-06, %v12595_v57  ;;  %v6066_v48 = vmul.f32 %v8712_v61, %v6065_v59  ;;  %v6133_v19 = vmul.f32 3.8918573e-05, %v12595_v57  ;;  %v5097_v58 = vmul.f32 %v12592_v39, %v12592_v39  ;;  %vm12625_vm11 = vmor %vm6068_vm2, %vm6069_vm8 }
 0xd0f   : > { %v6089_v20 = vadd.f32 0.18741608, %v6088_v55  ;;  %v6072_v15 = vand.u32 2147483647, %v12553_v33  ;;  %v6100_v9 = vadd.f32 0.4994258, %v6099_v52  ;;  %8715 = vrsqrt.f32 %v12597_v5 }
 0xd10   : > { %v6123_v11 = vadd.f32 0.00028619796, %v6122_v22  ;;  %v8097_v38 = vclamps-f32 %v6037_v31, 1.0  ;;  %v6067_v60 = vadd.f32 %v8712_v61, %v6066_v48  ;;  %v5401_v12 = vmul.f32 %v12599_v42, %v5400_v41 }
 0xd11   : > { %v6134_v35 = vadd.f32 0.001143296, %v6133_v19  ;;  %v5398_v31 = vsel %vm12617_vm9, %v12511_v62, %v5394_v16  ;;  %v6090_v24 = vmul.f32 %v6089_v20, %v12536_v17  ;;  %v6101_v55 = vmul.f32 %v6100_v9, %v12536_v17  ;;  %v5791_v19 = vpop.f32.mrf.mxu2 }
 0xd12   : > { %v6124_v52 = vmul.f32 %v6123_v11, %v12595_v57  ;;  %v6071_v41 = vsel %vm12625_vm11, %v8712_v61, %v6067_v60  ;;  %v6075_v22 = vor.u32 1.1754944e-38, %v6074_v43  ;;  %v5169_v48 = vsel %vm1515_vm10, %v5097_v58, 0.0 }
 0xd13   : > { %v6135_v33 = vmul.f32 %v6134_v35, %v12595_v57  ;;  %vm6073_vm1 = vcmp.eq.f32.partialorder %v6072_v15, 8.507059e+37  ;;  %v12639_v44 = vadd.f32 1.0, %v6101_v55  ;;  %5170 = vadd.xlane.f32.xlu0 %v5169_v48  ;;  %v5034_v62 = vmul.f32 %v4982_v0, %v10296_v2  ;;  %v5156_v35 = vpop.xlane.xlu1 %5155 }
 0xd14   : > { %v6125_v40 = vadd.f32 0.0036580483, %v6124_v52  ;;  %v7202_v16 = vadd.f32 1.0, %v8097_v38  ;;  %v6076_v17 = vsel %vm6073_vm1, %v6075_v22, %v6071_v41  ;;  %v5402_v20 = vmul.f32 0.5, %v5401_v12 }
 0xd15   : > { %v6136_v9 = vadd.f32 0.014752088, %v6135_v33  ;;  %v12642_v11 = vpop.eup %8715  ;;  %v6052_v61 = vmul.f32 %v6051_v34, %v12455_v4  ;;  %v6091_v43 = vadd.f32 1.1283791, %v6090_v24  ;;  %8717 = vrcp.f32 %v12639_v44 }
 0xd16   : > { %v12647_v58 = vadd.f32 %v12313_v63, %v5791_v19  ;;  %v12650_v15 = vmul.f32 %v5398_v31, %v12180_v37  ;;  %vm5405_vm12 = vweird.f32 %v12555_v1  ;;  %v6126_v38 = vmul.f32 %v6125_v40, %v12595_v57 }
 0xd17   : > { %v6137_v60 = vmul.f32 %v6136_v9, %v12595_v57  ;;  %v6077_v12 = vmul.f32 %v6076_v17, %v6052_v61  ;;  %vm5406_vm13 = vweird.f32 %v12599_v42  ;;  %v5410_v4 = vmul.f32 %v12642_v11, %v12597_v5 }
 0xd18   : > { %v12659_v34 = vsub.f32 %v12222_v56, %v5034_v62  ;;  %v12662_v0 = vmul.f32 %v7202_v16, %v12531_v30  ;;  %v5403_v37 = vsub.f32 1.5, %v5402_v20  ;;  %v6127_v59 = vadd.f32 0.05243302, %v6126_v38  ;;  %vm12697_vm4 = vmor %vm5405_vm12, %vm5406_vm13 }
 0xd19   : > { %v6138_v31 = vadd.f32 0.112945676, %v6137_v60  ;;  %v12665_v24 = vmul.f32 %v6091_v43, %v12504_v47  ;;  %v6112_v55 = vand.u32 2147483647, %v12639_v44  ;;  %v5411_v52 = vmul.f32 %v12642_v11, %v5410_v4 }
 0xd1a   : > { %v12670_v41 = vmul.f32 0.70710677, %v12647_v58  ;;  %vm6108_vm14 = vweird.f32 %v12639_v44  ;;  %v6114_v22 = vand.u32 2147483648, %v12639_v44  ;;  %v6128_v30 = vmul.f32 %v6127_v59, %v12595_v57  ;;  %v5793_v59 = vpop.f32.mrf.mxu2 }
 0xd1b   : > { %v6139_v33 = vmul.f32 %v6138_v31, %v12595_v57  ;;  %v5220_v48 = vmul.f32 %v5156_v35, %v10296_v2  ;;  %v8718_v19 = vpop.eup %8717  ;;  %v8098_v47 = vclamps-f32 %v6077_v12, 1.0  ;;  %v5412_v40 = vmul.f32 0.5, %v5411_v52  ;;  %4999 = vadd.xlane.f32.xlu0 %v12417_v49 }
 0xd1c   : > { %v6160_v62 = vmul.f32 %v12670_v41, %v12670_v41  ;;  %v5098_v16 = vmul.f32 %v12659_v34, %v12659_v34  ;;  %v6104_v17 = vmul.f32 %v8718_v19, %v12639_v44  ;;  %v5404_v20 = vmul.f32 %v12599_v42, %v5403_v37  ;;  %v4985_v37 = vpop.xlane.xlu0 %4984 }
 0xd1d   : > { %v6129_v9 = vadd.f32 0.18741608, %v6128_v30  ;;  %v6140_v61 = vadd.f32 0.4994258, %v6139_v33  ;;  %vm5415_vm15 = vweird.f32 %v12597_v5  ;;  %vm5416_vm3 = vweird.f32 %v12642_v11 }
 0xd1e   : > { %v12686_v43 = vmin.f32 %v6160_v62, 16.0  ;;  %v12688_v38 = vadd.f32 1e-05, %v5220_v48  ;;  %v5172_v60 = vsel %vm1515_vm10, %v5098_v16, 0.0  ;;  %v6105_v49 = vsub.f32 1.0, %v6104_v17  ;;  %vm12736_vm2 = vmor %vm5415_vm15, %vm5416_vm3 }
 0xd1f   : > { %v6130_v12 = vmul.f32 %v6129_v9, %v12595_v57  ;;  %v6141_v4 = vmul.f32 %v6140_v61, %v12595_v57  ;;  %v5413_v35 = vsub.f32 1.5, %v5412_v40  ;;  %5173 = vadd.xlane.f32.xlu1 %v5172_v60  ;;  %v7203_v31 = vadd.f32 1.0, %v8098_v47 }
 0xd20   : > { %v6162_v30 = vmul.f32 2.1237322e-06, %v12686_v43  ;;  %v6173_v33 = vmul.f32 3.8918573e-05, %v12686_v43  ;;  %8719 = vrsqrt.f32 %v12688_v38  ;;  %v6106_v57 = vmul.f32 %v8718_v19, %v6105_v49 }
 0xd21   : > { %vm6109_vm5 = vweird.f32 %v8718_v19  ;;  %v5408_v48 = vsel %vm12697_vm4, %v12599_v42, %v5404_v20  ;;  %v12707_v47 = vadd.f32 1.0, %v6141_v4  ;;  %v5035_v62 = vmul.f32 %v4985_v37, %v10296_v2 }
 0xd22   : > { %v6163_v40 = vadd.f32 0.00028619796, %v6162_v30  ;;  %v6174_v1 = vadd.f32 0.001143296, %v6173_v33  ;;  %v12711_v16 = vadd.f32 %v12313_v63, %v5793_v59  ;;  %v6107_v17 = vadd.f32 %v8718_v19, %v6106_v57  ;;  %vm6110_vm6 = vmor %vm6108_vm14, %vm6109_vm5  ;;  %v12761_v57 = vld [vmem:[#allocation26] ss:$0 sm:$0xff] }
 0xd23   : > { %v6131_v9 = vadd.f32 1.1283791, %v6130_v12  ;;  %8721 = vrcp.f32 %v12707_v47  ;;  %v12715_v61 = vmul.f32 %v12642_v11, %v5413_v35  ;;  %vm6113_vm7 = vcmp.eq.f32.partialorder %v6112_v55, 8.507059e+37  ;;  %5002 = vadd.xlane.f32.xlu0 %v12509_v50 }
 0xd24   : > { %v6115_v42 = vor.u32 1.1754944e-38, %v6114_v22  ;;  %v5602_v20 = vmul.f32 %v5408_v48, %v12193_v14  ;;  %v6164_v60 = vmul.f32 %v6163_v40, %v12686_v43  ;;  %v12723_v63 = vmul.f32 %v7203_v31, %v12534_v46 }
 0xd25   : > { %v6111_v49 = vsel %vm6110_vm6, %v8718_v19, %v6107_v17  ;;  %v6175_v12 = vmul.f32 %v6174_v1, %v12686_v43  ;;  %v12727_v4 = vmul.f32 0.70710677, %v12711_v16  ;;  %v6154_v55 = vand.u32 2147483648, %v12707_v47 }
 0xd26   : > { %v12729_v35 = vpop.eup %8719  ;;  %v6116_v44 = vsel %vm6113_vm7, %v6115_v42, %v6111_v49  ;;  %v6165_v50 = vadd.f32 0.0036580483, %v6164_v60  ;;  %v12741_v46 = vsub.f32 %v12229_v10, %v5035_v62  ;;  %v12744_v22 = vmul.f32 %v6131_v9, %v12577_v23 }
 0xd27   : > { %v5418_v19 = vsel %vm12736_vm2, %v12642_v11, %v12715_v61  ;;  %v6176_v37 = vadd.f32 0.014752088, %v6175_v12  ;;  %v5420_v5 = vmul.f32 %v12729_v35, %v12688_v38  ;;  %vm5425_vm8 = vweird.f32 %v12688_v38 }
 0xd28   : > { %v6117_v59 = vmul.f32 %v6116_v44, %v12665_v24  ;;  %vm6148_vm9 = vweird.f32 %v12707_v47  ;;  %v6152_v31 = vand.u32 2147483647, %v12707_v47  ;;  %v6166_v23 = vmul.f32 %v6165_v50, %v12686_v43 }
 0xd29   : > { %v6200_v52 = vmul.f32 %v12727_v4, %v12727_v4  ;;  %v8722_v30 = vpop.eup %8721  ;;  %v6177_v11 = vmul.f32 %v6176_v37, %v12686_v43  ;;  %v5421_v33 = vmul.f32 %v12729_v35, %v5420_v5  ;;  %v5636_v48 = vmul.f32 %v12761_v57, %v12650_v15 }
 0xd2a   : > { %v5637_v24 = vmul.f32 %v12761_v57, %v5602_v20  ;;  %v6144_v40 = vmul.f32 %v8722_v30, %v12707_v47  ;;  %v6155_v1 = vor.u32 1.1754944e-38, %v6154_v55  ;;  %vm5426_vm11 = vweird.f32 %v12729_v35  ;;  %v12775_v55 = vld [vmem:[#allocation28] ss:$0 sm:$0xff] }
 0xd2b   : > { %v12768_v62 = vmin.f32 %v6200_v52, 16.0  ;;  %v6167_v17 = vadd.f32 0.05243302, %v6166_v23  ;;  %v6178_v9 = vadd.f32 0.112945676, %v6177_v11  ;;  %v5422_v61 = vmul.f32 0.5, %v5421_v33  ;;  %vm12786_vm12 = vmor %vm5425_vm8, %vm5426_vm11 }
 0xd2c   : > { %v5099_v42 = vmul.f32 %v12741_v46, %v12741_v46  ;;  %v8099_v60 = vclamps-f32 %v6117_v59, 1.0  ;;  %v6145_v49 = vsub.f32 1.0, %v6144_v40  ;;  %v5671_v14 = vadd.f32 %v12775_v55, %v5636_v48  ;;  %v5796_v40 = vpop.f32.mrf.mxu2 }
 0xd2d   : > { %v6202_v12 = vmul.f32 2.1237322e-06, %v12768_v62  ;;  %v6213_v15 = vmul.f32 3.8918573e-05, %v12768_v62  ;;  %v6179_v20 = vmul.f32 %v6178_v9, %v12686_v43  ;;  %v5423_v44 = vsub.f32 1.5, %v5422_v61 }
 0xd2e   : > { %v5672_v50 = vadd.f32 %v12775_v55, %v5637_v24  ;;  %v6146_v37 = vmul.f32 %v8722_v30, %v6145_v49  ;;  %vm6149_vm1 = vweird.f32 %v8722_v30  ;;  %v5175_v33 = vsel %vm1515_vm10, %v5099_v42, 0.0  ;;  %v12801_v49 = vld [vmem:[#allocation29] ss:$0 sm:$0xff] }
 0xd2f   : > { %v6203_v5 = vadd.f32 0.00028619796, %v6202_v12  ;;  %v6214_v23 = vadd.f32 0.001143296, %v6213_v15  ;;  %v6180_v52 = vadd.f32 0.4994258, %v6179_v20  ;;  %v5424_v59 = vmul.f32 %v12729_v35, %v5423_v44  ;;  %5176 = vadd.xlane.f32.xlu1 %v5175_v33  ;;  %vm6150_vm13 = vmor %vm6148_vm9, %vm6149_vm1 }
 0xd30   : > { %v5697_v11 = vpack.c.bf16 %v5672_v50, %v5671_v14  ;;  %v6147_v10 = vadd.f32 %v8722_v30, %v6146_v37  ;;  %v6168_v9 = vmul.f32 %v6167_v17, %v12686_v43  ;;  %v7265_v38 = vpack.c.bf16 %v12723_v63, %v12662_v0 }
 0xd31   : > { %v6204_v24 = vmul.f32 %v6203_v5, %v12768_v62  ;;  %v6215_v61 = vmul.f32 %v6214_v23, %v12768_v62  ;;  %v6181_v42 = vmul.f32 %v6180_v52, %v12686_v43  ;;  %v5428_v17 = vsel %vm12786_vm12, %v12729_v35, %v5424_v59 }
 0xd32   : > { %8085 = vmatmul.msk.bf16.gmra.mxu2 %vm1515_vm10, %v5697_v11  ;;  %v12804_v12 = vadd.f32 %v12801_v49, %v5796_v40  ;;  %v6151_v15 = vsel %vm6150_vm13, %v8722_v30, %v6147_v10  ;;  %vm6153_vm14 = vcmp.eq.f32.partialorder %v6152_v31, 8.507059e+37  ;;  %v5603_v47 = vmul.f32 %v5418_v19, %v12201_v18  ;;  %8136 = vmatmul.msk.bf16.gmra.mxu1 %vm1403_vm0, %v7265_v38 }
 0xd33   : > { %v6205_v20 = vadd.f32 0.0036580483, %v6204_v24  ;;  %v6156_v44 = vsel %vm6153_vm14, %v6155_v1, %v6151_v15  ;;  %v12807_v14 = vadd.f32 1.0, %v6181_v42  ;;  %v5604_v35 = vmul.f32 %v5428_v17, %v12232_v45 }
 0xd34   : > { %v6216_v50 = vadd.f32 0.014752088, %v6215_v61  ;;  %v6157_v0 = vmul.f32 %v6156_v44, %v12744_v22  ;;  %v12814_v37 = vmul.f32 0.70710677, %v12804_v12  ;;  %v7204_v10 = vadd.f32 1.0, %v8099_v60  ;;  %v5798_v52 = vpop.f32.mrf.mxu2 }
 0xd35   : > { %v6206_v63 = vmul.f32 %v6205_v20, %v12768_v62  ;;  %v6169_v31 = vadd.f32 0.18741608, %v6168_v9  ;;  %8723 = vrcp.f32 %v12807_v14  ;;  %v5004_v18 = vsel %vm1515_vm10, %v12397_v27, 0.0  ;;  %v5159_v9 = vpop.xlane.xlu1 %5158 }
 0xd36   : > { %v8100_v19 = vclamps-f32 %v6157_v0, 1.0  ;;  %v6217_v45 = vmul.f32 %v6216_v50, %v12768_v62  ;;  %v6240_v1 = vmul.f32 %v12814_v37, %v12814_v37  ;;  %v5860_v22 = vmul.f32 0.5, %v12495_v53 }
 0xd37   : > { %v6207_v30 = vadd.f32 0.05243302, %v6206_v63  ;;  %v5007_v5 = vsel %vm1515_vm10, %v12400_v54, 0.0  ;;  %v5638_v60 = vmul.f32 %v12761_v57, %v5603_v47  ;;  %v5639_v23 = vmul.f32 %v12761_v57, %v5604_v35  ;;  %5005 = vadd.xlane.f32.xlu1 %v5004_v18 }
 0xd38   : > { %v5861_v59 = vmul.f32 0.5, %v12561_v28  ;;  %v7205_v11 = vadd.f32 1.0, %v8100_v19  ;;  %v6218_v33 = vadd.f32 0.112945676, %v6217_v45  ;;  %v12828_v40 = vmin.f32 %v6240_v1, 16.0 }
 0xd39   : > { %v7236_v48 = vmul.f32 %v7204_v10, %v5860_v22  ;;  %v6170_v24 = vmul.f32 %v6169_v31, %v12686_v43  ;;  %v5674_v53 = vadd.f32 %v12775_v55, %v5639_v23  ;;  %v12833_v61 = vadd.f32 %v12801_v49, %v5798_v52 }
 0xd3a   : > { %v6208_v42 = vmul.f32 %v6207_v30, %v12768_v62  ;;  %v6219_v17 = vmul.f32 %v6218_v33, %v12768_v62  ;;  %v6242_v28 = vmul.f32 2.1237322e-06, %v12828_v40  ;;  %v5221_v38 = vmul.f32 %v5159_v9, %v10296_v2  ;;  %v5162_v9 = vpop.xlane.xlu2 %5161 }
 0xd3b   : > { %v8724_v15 = vpop.eup %8723  ;;  %v7237_v47 = vmul.f32 %v7205_v11, %v5861_v59  ;;  %v6253_v20 = vmul.f32 3.8918573e-05, %v12828_v40  ;;  %v5673_v44 = vadd.f32 %v12775_v55, %v5638_v60  ;;  %v12842_v43 = vmul.f32 0.70710677, %v12833_v61 }
 0xd3c   : > { %v6184_v35 = vmul.f32 %v8724_v15, %v12807_v14  ;;  %v6192_v50 = vand.u32 2147483647, %v12807_v14  ;;  %v6194_v0 = vand.u32 2147483648, %v12807_v14  ;;  %v6220_v63 = vadd.f32 0.4994258, %v6219_v17 }
 0xd3d   : > { %v6243_v10 = vadd.f32 0.00028619796, %v6242_v28  ;;  %v6254_v31 = vadd.f32 0.001143296, %v6253_v20  ;;  %v5698_v18 = vpack.c.bf16 %v5674_v53, %v5673_v44  ;;  %v6280_v19 = vmul.f32 %v12842_v43, %v12842_v43 }
 0xd3e   : > { %v6185_v30 = vsub.f32 1.0, %v6184_v35  ;;  %v6209_v45 = vadd.f32 0.18741608, %v6208_v42  ;;  %v6221_v1 = vmul.f32 %v6220_v63, %v12768_v62  ;;  %v12850_v22 = vadd.f32 1e-05, %v5221_v38  ;;  %v4988_v63 = vpop.xlane.xlu1 %4987 }
 0xd3f   : > { %v6244_v60 = vmul.f32 %v6243_v10, %v12828_v40  ;;  %v6255_v23 = vmul.f32 %v6254_v31, %v12828_v40  ;;  %v7266_v52 = vpack.c.bf16 %v7237_v47, %v7236_v48  ;;  %v12854_v59 = vmin.f32 %v6280_v19, 16.0  ;;  %5008 = vadd.xlane.f32.xlu1 %v5007_v5 }
 0xd40   : > { %v6186_v11 = vmul.f32 %v8724_v15, %v6185_v30  ;;  %vm6189_vm15 = vweird.f32 %v8724_v15  ;;  %v12856_v33 = vadd.f32 1.0, %v6221_v1  ;;  %8725 = vrsqrt.f32 %v12850_v22 }
 0xd41   : > { %v6245_v53 = vadd.f32 0.0036580483, %v6244_v60  ;;  %v6256_v42 = vadd.f32 0.014752088, %v6255_v23  ;;  %v6282_v17 = vmul.f32 2.1237322e-06, %v12854_v59  ;;  %vm6188_vm3 = vweird.f32 %v12807_v14 }
 0xd42   : > { %8086 = vmatmul.msk.bf16.gmra.mxu2 %vm1515_vm10, %v5698_v18  ;;  %v6171_v28 = vadd.f32 1.1283791, %v6170_v24  ;;  %v6187_v38 = vadd.f32 %v8724_v15, %v6186_v11  ;;  %8727 = vrcp.f32 %v12856_v33  ;;  %vm6190_vm4 = vmor %vm6188_vm3, %vm6189_vm15  ;;  %v6195_v48 = vor.u32 1.1754944e-38, %v6194_v0  ;;  %8137 = vmatmul.msk.bf16.gmra.mxu1 %vm1403_vm0, %v7266_v52  ;;  %v12878_v11 = vpop.xlane.xlu2 %5164 }
 0xd43   : > { %v6246_v47 = vmul.f32 %v6245_v53, %v12828_v40  ;;  %v6257_v5 = vmul.f32 %v6256_v42, %v12828_v40  ;;  %v6283_v20 = vadd.f32 0.00028619796, %v6282_v17  ;;  %vm6193_vm5 = vcmp.eq.f32.partialorder %v6192_v50, 8.507059e+37 }
 0xd44   : > { %v6191_v44 = vsel %vm6190_vm4, %v8724_v15, %v6187_v38  ;;  %v6293_v35 = vmul.f32 3.8918573e-05, %v12854_v59  ;;  %v6210_v10 = vmul.f32 %v6209_v45, %v12768_v62  ;;  %v6172_v0 = vmul.f32 %v6171_v28, %v12670_v41 }
 0xd45   : > { %v6196_v24 = vsel %vm6193_vm5, %v6195_v48, %v6191_v44  ;;  %v6258_v14 = vadd.f32 0.112945676, %v6257_v5  ;;  %v6247_v18 = vadd.f32 0.05243302, %v6246_v47  ;;  %v6284_v19 = vmul.f32 %v6283_v20, %v12854_v59  ;;  %v4141_v5 = vpop.f32.mrf.mxu0 }
 0xd46   : > { %v12868_v31 = vpop.eup %8725  ;;  %v6294_v30 = vadd.f32 0.001143296, %v6293_v35  ;;  %v5036_v50 = vmul.f32 %v4988_v63, %v10296_v2  ;;  %v6197_v23 = vmul.f32 %v6196_v24, %v6172_v0  ;;  %v5222_v45 = vmul.f32 %v5162_v9, %v10296_v2 }
 0xd47   : > { %v6259_v1 = vmul.f32 %v6258_v14, %v12828_v40  ;;  %v5430_v15 = vmul.f32 %v12868_v31, %v12850_v22  ;;  %v6285_v52 = vadd.f32 0.0036580483, %v6284_v19  ;;  %v6211_v41 = vadd.f32 1.1283791, %v6210_v10  ;;  %v8846_v19 = vld [vmem:[#allocation17] ss:$0 sm:$0xff] }
 0xd48   : > { %v8728_v60 = vpop.eup %8727  ;;  %v6295_v62 = vmul.f32 %v6294_v30, %v12854_v59  ;;  %v6232_v42 = vand.u32 2147483647, %v12856_v33  ;;  %v6234_v28 = vand.u32 2147483648, %v12856_v33  ;;  %v6248_v38 = vmul.f32 %v6247_v18, %v12828_v40 }
 0xd49   : > { %v6224_v53 = vmul.f32 %v8728_v60, %v12856_v33  ;;  %v6260_v17 = vadd.f32 0.4994258, %v6259_v1  ;;  %v5431_v47 = vmul.f32 %v12868_v31, %v5430_v15  ;;  %v6286_v9 = vmul.f32 %v6285_v52, %v12854_v59 }
 0xd4a   : > { %v6296_v48 = vadd.f32 0.014752088, %v6295_v62  ;;  %v12887_v35 = vadd.f32 1e-05, %v5222_v45  ;;  %v8101_v63 = vclamps-f32 %v6197_v23, 1.0  ;;  %v12891_v14 = vsub.f32 %v12266_v36, %v5036_v50  ;;  %v4991_v23 = vpop.xlane.xlu1 %4990 }
 0xd4b   : > { %v6225_v20 = vsub.f32 1.0, %v6224_v53  ;;  %v6261_v44 = vmul.f32 %v6260_v17, %v12828_v40  ;;  %v5432_v10 = vmul.f32 0.5, %v5431_v47  ;;  %vm6229_vm6 = vweird.f32 %v8728_v60 }
 0xd4c   : > { %v6297_v24 = vmul.f32 %v6296_v48, %v12854_v59  ;;  %8729 = vrsqrt.f32 %v12887_v35  ;;  %v12896_v30 = vadd.f32 %v8846_v19, %v4141_v5  ;;  %v6212_v1 = vmul.f32 %v6211_v41, %v12727_v4  ;;  %v4994_v48 = vpop.xlane.xlu2 %4993 }
 0xd4d   : > { %v6226_v0 = vmul.f32 %v8728_v60, %v6225_v20  ;;  %v12893_v18 = vadd.f32 1.0, %v6261_v44  ;;  %v6249_v15 = vadd.f32 0.18741608, %v6248_v38  ;;  %vm6228_vm7 = vweird.f32 %v12856_v33 }
 0xd4e   : > { %v6298_v52 = vadd.f32 0.112945676, %v6297_v24  ;;  %v6287_v50 = vadd.f32 0.05243302, %v6286_v9  ;;  %vm6230_vm2 = vmor %vm6228_vm7, %vm6229_vm6  ;;  %vm6233_vm8 = vcmp.eq.f32.partialorder %v6232_v42, 8.507059e+37  ;;  %v6235_v45 = vor.u32 1.1754944e-38, %v6234_v28 }
 0xd4f   : > { %v6227_v62 = vadd.f32 %v8728_v60, %v6226_v0  ;;  %8731 = vrcp.f32 %v12893_v18  ;;  %v5433_v17 = vsub.f32 1.5, %v5432_v10  ;;  %v7206_v47 = vadd.f32 1.0, %v8101_v63 }
 0xd50   : > { %v6299_v53 = vmul.f32 %v6298_v52, %v12854_v59  ;;  %v5037_v4 = vmul.f32 %v4991_v23, %v10296_v2  ;;  %v5100_v41 = vmul.f32 %v12891_v14, %v12891_v14  ;;  %v5862_v38 = vmul.f32 0.5, %v12647_v58 }
 0xd51   : > { %v6231_v5 = vsel %vm6230_vm2, %v8728_v60, %v6227_v62  ;;  %v5863_v33 = vmul.f32 0.5, %v12711_v16  ;;  %v6250_v44 = vmul.f32 %v6249_v15, %v12828_v40  ;;  %v6288_v9 = vmul.f32 %v6287_v50, %v12854_v59  ;;  %v5801_v62 = vpop.f32.mrf.mxu2 }
 0xd52   : > { %v6236_v20 = vsel %vm6233_vm8, %v6235_v45, %v6231_v5  ;;  %v8730_v42 = vpop.eup %8729  ;;  %v6300_v24 = vadd.f32 0.4994258, %v6299_v53  ;;  %v12910_v63 = vsub.f32 %v12304_v6, %v5037_v4  ;;  %v5434_v60 = vmul.f32 %v12868_v31, %v5433_v17 }
 0xd53   : > { %v6237_v28 = vmul.f32 %v6236_v20, %v6212_v1  ;;  %vm5435_vm9 = vweird.f32 %v12850_v22  ;;  %vm5436_vm11 = vweird.f32 %v12868_v31  ;;  %v5440_v58 = vmul.f32 %v8730_v42, %v12887_v35 }
 0xd54   : > { %v7238_v10 = vmul.f32 %v7206_v47, %v5862_v38  ;;  %v6301_v40 = vmul.f32 %v6300_v24, %v12854_v59  ;;  %v5178_v19 = vsel %vm1515_vm10, %v5100_v41, 0.0  ;;  %v6251_v1 = vadd.f32 1.1283791, %v6250_v44  ;;  %vm5437_vm1 = vmor %vm5435_vm9, %vm5436_vm11 }
 0xd55   : > { %v8732_v16 = vpop.eup %8731  ;;  %v8102_v0 = vclamps-f32 %v6237_v28, 1.0  ;;  %v6272_v52 = vand.u32 2147483647, %v12893_v18  ;;  %v5441_v23 = vmul.f32 %v8730_v42, %v5440_v58  ;;  %5179 = vadd.xlane.f32.xlu2 %v5178_v19  ;;  %v6289_v45 = vadd.f32 0.18741608, %v6288_v9  ;;  %v4997_v9 = vpop.xlane.xlu2 %4996 }
 0xd56   : > { %v6264_v15 = vmul.f32 %v8732_v16, %v12893_v18  ;;  %v12920_v53 = vadd.f32 1.0, %v6301_v40  ;;  %v5101_v17 = vmul.f32 %v12910_v63, %v12910_v63  ;;  %v5438_v5 = vsel %vm5437_vm1, %v12868_v31, %v5434_v60 }
 0xd57   : > { %v7207_v50 = vadd.f32 1.0, %v8102_v0  ;;  %v5442_v4 = vmul.f32 0.5, %v5441_v23  ;;  %v5038_v41 = vmul.f32 %v4994_v48, %v10296_v2  ;;  %vm5446_vm12 = vweird.f32 %v8730_v42 }
 0xd58   : > { %v6265_v47 = vsub.f32 1.0, %v6264_v15  ;;  %8733 = vrcp.f32 %v12920_v53  ;;  %v12932_v20 = vadd.f32 %v12801_v49, %v5801_v62  ;;  %vm6269_vm13 = vweird.f32 %v8732_v16 }
 0xd59   : > { %v7239_v38 = vmul.f32 %v7207_v50, %v5863_v33  ;;  %v6274_v22 = vand.u32 2147483648, %v12893_v18  ;;  %v5443_v28 = vsub.f32 1.5, %v5442_v4  ;;  %v5605_v24 = vmul.f32 %v5438_v5, %v12254_v3 }
 0xd5a   : > { %v6266_v44 = vmul.f32 %v8732_v16, %v6265_v47  ;;  %vm5445_vm14 = vweird.f32 %v12887_v35  ;;  %v5181_v48 = vsel %vm1515_vm10, %v5101_v17, 0.0  ;;  %vm6268_vm15 = vweird.f32 %v12893_v18  ;;  %v8847_v17 = vld [vmem:[%s10138_s22 + $0xf8] sm:$0xff]  ;;  %s7944_s22 = sshll.u32 %s10132_s6, 4 }
 0xd5b   : > { %v7267_v31 = vpack.c.bf16 %v7239_v38, %v7238_v10  ;;  %v5444_v60 = vmul.f32 %v8730_v42, %v5443_v28  ;;  %vm5447_vm3 = vmor %vm5445_vm14, %vm5446_vm12  ;;  %v12940_v58 = vsub.f32 %v12336_v51, %v5038_v41  ;;  %vm12946_vm5 = vcmp.eq.f32.partialorder %v6272_v52, 8.507059e+37  ;;  %s13041_s2 = scalar_lea.vmem [#allocation32], %s7944_s22  ;;  %s7520_s22 = scalar_lea.hbm %s14245_s18, %s8180_s13 }
 0xd5c   : > { %v6267_v33 = vadd.f32 %v8732_v16, %v6266_v44  ;;  %vm12942_vm4 = vmor %vm6268_vm15, %vm6269_vm13  ;;  %v6290_v35 = vmul.f32 %v6289_v45, %v12854_v59  ;;  %v5039_v18 = vmul.f32 %v4997_v9, %v10296_v2  ;;  %v12954_v10 = vmul.f32 0.70710677, %v12932_v20  ;;  %s7521_s23 = sshll.u32 %s13041_s2, 4  ;;  %s7523_s17 = sshll.u32 %s7520_s22, 4  ;;  %s7522_s23 = int_to_ptr.vmem [resolvable:$true] %s7521_s23  ;;  %s7524_s17 = int_to_ptr.hbm [resolvable:$true] %s7523_s17 }
 0xd5d   : > { %8138 = vmatmul.msk.bf16.gmra.mxu1 %vm1403_vm0, %v7267_v31  ;;  %v6275_v19 = vor.u32 1.1754944e-38, %v6274_v22  ;;  %v5448_v15 = vsel %vm5447_vm3, %v8730_v42, %v5444_v60  ;;  %5182 = vadd.xlane.f32.xlu2 %v5181_v48  ;;  %v5102_v52 = vmul.f32 %v12940_v58, %v12940_v58  ;;  %v5640_v45 = vmul.f32 %v12761_v57, %v5605_v24  ;;  %s9440_s8 = sshra.s32 %s7524_s17, 4  ;;  %s9441_s8 = int_to_ptr.hbm [resolvable:$true] %s9440_s8 }
 0xd5e   : > { %v6271_v40 = vsel %vm12942_vm4, %v8732_v16, %v6267_v33  ;;  %v8734_v23 = vpop.eup %8733  ;;  %v5606_v62 = vmul.f32 %v5448_v15, %v12273_v7  ;;  %v12962_v59 = vsub.f32 %v12370_v21, %v5039_v18  ;;  %v6320_v50 = vmul.f32 %v12954_v10, %v12954_v10  ;;  %s9442_s9 = scalar_lea.hbm %s9441_s8, 16  ;;  %p9447_p0 = scmp.lt.s32.totalorder %s9441_s8, %s14245_s18 }
 0xd5f   : > { %v12969_v16 = vadd.f32 %v8847_v17, %v12896_v30  ;;  %v6276_v42 = vsel %vm12946_vm5, %v6275_v19, %v6271_v40  ;;  %v6304_v47 = vmul.f32 %v8734_v23, %v12920_v53  ;;  %v5184_v5 = vsel %vm1515_vm10, %v5102_v52, 0.0  ;;  %p9443_p1 = scmp.ne.s32.totalorder %s9441_s8, %s9442_s9  ;;  %p9448_p5 = scmp.lt.s32.totalorder %s9446_s11, %s9442_s9 }
 0xd60   : > { %v6252_v7 = vmul.f32 %v6251_v1, %v12814_v37  ;;  %v6291_v4 = vadd.f32 1.1283791, %v6290_v35  ;;  %5185 = vadd.xlane.f32.xlu0 %v5184_v5  ;;  %v12976_v41 = vmin.f32 %v6320_v50, 16.0  ;;  %v5641_v38 = vmul.f32 %v12761_v57, %v5606_v62  ;;  %v5803_v62 = vpop.f32.mrf.mxu2 }
 0xd61   : > { %v6305_v44 = vsub.f32 1.0, %v6304_v47  ;;  %v6314_v22 = vand.u32 2147483648, %v12920_v53  ;;  %v5223_v30 = vmul.f32 %v12878_v11, %v10296_v2  ;;  %v5103_v28 = vmul.f32 %v12962_v59, %v12962_v59  ;;  %p9444_p10 = pnand %p9443_p1, %p14246_p4  ;;  %p9449_p8 = por %p9448_p5, %p9447_p0 }
 0xd62   : > { %v6277_v9 = vmul.f32 %v6276_v42, %v6252_v7  ;;  %v6333_v24 = vmul.f32 3.8918573e-05, %v12976_v41  ;;  %v5675_v37 = vadd.f32 %v12775_v55, %v5640_v45  ;;  %v5676_v1 = vadd.f32 %v12775_v55, %v5641_v38 }
 0xd63   : > { %v6306_v31 = vmul.f32 %v8734_v23, %v6305_v44  ;;  %vm6309_vm6 = vweird.f32 %v8734_v23  ;;  %v6312_v48 = vand.u32 2147483647, %v12920_v53  ;;  %v6322_v33 = vmul.f32 2.1237322e-06, %v12976_v41  ;;  %p9445_p13 = pneg %p9444_p10 }
 0xd64   : > { %v5010_v60 = vsel %vm1515_vm10, %v12969_v16, 0.0  ;;  %v6334_v11 = vadd.f32 0.001143296, %v6333_v24  ;;  %v5699_v0 = vpack.c.bf16 %v5676_v1, %v5675_v37  ;;  %vm6308_vm7 = vweird.f32 %v12920_v53 }
 0xd65   : > { %v6307_v3 = vadd.f32 %v8734_v23, %v6306_v31  ;;  %v12992_v35 = vadd.f32 1e-05, %v5223_v30  ;;  %5011 = vadd.xlane.f32.xlu2 %v5010_v60  ;;  %v5187_v18 = vsel %vm1515_vm10, %v5103_v28, 0.0  ;;  %v8103_v40 = vclamps-f32 %v6277_v9, 1.0  ;;  %vm6310_vm2 = vmor %vm6308_vm7, %vm6309_vm6  ;;  %p9450_p7 = pnand %p9449_p8, %p9445_p13 }
 0xd66   : > { %v6292_v19 = vmul.f32 %v6291_v4, %v12842_v43  ;;  %v6315_v15 = vor.u32 1.1754944e-38, %v6314_v22  ;;  %v6335_v52 = vmul.f32 %v6334_v11, %v12976_v41  ;;  %8087 = vmatmul.msk.bf16.gmra.mxu2 %vm1515_vm10, %v5699_v0  ;;  %vm6313_vm8 = vcmp.eq.f32.partialorder %v6312_v48, 8.507059e+37 }
 0xd67   : > { %v6311_v50 = vsel %vm6310_vm2, %v8734_v23, %v6307_v3  ;;  %v6323_v45 = vadd.f32 0.00028619796, %v6322_v33  ;;  %v12999_v53 = vadd.f32 %v12801_v49, %v5803_v62  ;;  %8735 = vrsqrt.f32 %v12992_v35 }
 0xd68   : > { %v6316_v17 = vsel %vm6313_vm8, %v6315_v15, %v6311_v50  ;;  %v6336_v42 = vadd.f32 0.014752088, %v6335_v52  ;;  %5188 = vadd.xlane.f32.xlu0 %v5187_v18  ;;  %v7208_v5 = vadd.f32 1.0, %v8103_v40  ;;  %v5864_v44 = vmul.f32 0.5, %v12804_v12 }
 0xd69   : > { %v6317_v47 = vmul.f32 %v6316_v17, %v6292_v19  ;;  %v13003_v43 = vmul.f32 0.70710677, %v12999_v53  ;;  %v6324_v23 = vmul.f32 %v6323_v45, %v12976_v41  ;;  %v5865_v30 = vmul.f32 0.5, %v12833_v61 }
 0xd6a   : > { %v6337_v7 = vmul.f32 %v6336_v42, %v12976_v41  ;;  %v7240_v24 = vmul.f32 %v7208_v5, %v5864_v44  ;;  %vm5455_vm1 = vweird.f32 %v12992_v35 }
 0xd6b   : > { %v8104_v4 = vclamps-f32 %v6317_v47, 1.0  ;;  %v6360_v38 = vmul.f32 %v13003_v43, %v13003_v43  ;;  %v6325_v48 = vadd.f32 0.0036580483, %v6324_v23 }
 0xd6c   : > { %v6338_v22 = vadd.f32 0.112945676, %v6337_v7 }
 0xd6d   : > { %v7209_v28 = vadd.f32 1.0, %v8104_v4  ;;  %v13011_v9 = vmin.f32 %v6360_v38, 16.0  ;;  %v13014_v1 = vpop.eup %8735  ;;  %v6326_v40 = vmul.f32 %v6325_v48, %v12976_v41 }
 0xd6e   : > { %v6339_v37 = vmul.f32 %v6338_v22, %v12976_v41  ;;  %v5450_v61 = vmul.f32 %v13014_v1, %v12992_v35  ;;  %vm5456_vm9 = vweird.f32 %v13014_v1 }
 0xd6f   : > { %v7241_v31 = vmul.f32 %v7209_v28, %v5865_v30  ;;  %v6362_v33 = vmul.f32 2.1237322e-06, %v13011_v9  ;;  %v6373_v60 = vmul.f32 3.8918573e-05, %v13011_v9  ;;  %v6327_v17 = vadd.f32 0.05243302, %v6326_v40  ;;  %vm13046_vm12 = vmor %vm5455_vm1, %vm5456_vm9 }
 0xd70   : > { %v6340_v11 = vadd.f32 0.4994258, %v6339_v37  ;;  %v5451_v45 = vmul.f32 %v13014_v1, %v5450_v61 }
 0xd71   : > { %v6363_v0 = vadd.f32 0.00028619796, %v6362_v33  ;;  %v6374_v12 = vadd.f32 0.001143296, %v6373_v60  ;;  %v7268_v3 = vpack.c.bf16 %v7241_v31, %v7240_v24  ;;  %v6328_v4 = vmul.f32 %v6327_v17, %v12976_v41  ;;  %v8561_v24 = vld [vmem:[#allocation25] ss:$0 sm:$0xff]  ;;  %v4906_v37 = vpop.f32.mrf.mxu1 }
 0xd72   : > { %v6341_v18 = vmul.f32 %v6340_v11, %v12976_v41  ;;  %v5452_v7 = vmul.f32 0.5, %v5451_v45 }
 0xd73   : > { %v6364_v19 = vmul.f32 %v6363_v0, %v13011_v9  ;;  %v6375_v15 = vmul.f32 %v6374_v12, %v13011_v9  ;;  %8139 = vmatmul.msk.bf16.gmra.mxu1 %vm1403_vm0, %v7268_v3  ;;  %v6329_v33 = vadd.f32 0.18741608, %v6328_v4  ;;  %v4907_v0 = vadd.f32 %v8561_v24, %v4906_v37 }
 0xd74   : > { %v6342_v52 = vadd.f32 1.0, %v6341_v18  ;;  %v5453_v31 = vsub.f32 1.5, %v5452_v7 }
 0xd75   : > { %v6365_v62 = vadd.f32 0.0036580483, %v6364_v19  ;;  %v6376_v50 = vadd.f32 0.014752088, %v6375_v15  ;;  %v4911_v40 = vadd.f32 %v4907_v0, %v11839_v25  ;;  %v6330_v15 = vmul.f32 %v6329_v33, %v12976_v41 }
 0xd76   : > { %8737 = vrcp.f32 %v6342_v52  ;;  %v5454_v19 = vmul.f32 %v13014_v1, %v5453_v31  ;;  %v6354_v25 = vand.u32 2147483648, %v6342_v52  ;;  %vm6348_vm13 = vweird.f32 %v6342_v52 }
 0xd77   : > { %v6377_v42 = vmul.f32 %v6376_v50, %v13011_v9  ;;  %v6366_v47 = vmul.f32 %v6365_v62, %v13011_v9  ;;  %4913 = vst.msk [vmem:[%s13041_s2] sm:$0xff] %vm1403_vm0, %v4911_v40  ;;  %v6352_v17 = vand.u32 2147483647, %v6342_v52 }
 0xd78   : > { %v5458_v41 = vsel %vm13046_vm12, %v13014_v1, %v5454_v19 }
 0xd79   : > { %v6378_v5 = vadd.f32 0.112945676, %v6377_v42  ;;  %v6367_v44 = vadd.f32 0.05243302, %v6366_v47  ;;  %v6331_v47 = vadd.f32 1.1283791, %v6330_v15  ;;  %v5607_v1 = vmul.f32 %v5458_v41, %v12293_v13 }
 0xd7a   : > { %vm6353_vm15 = vcmp.eq.f32.partialorder %v6352_v17, 8.507059e+37 }
 0xd7b   : > { %v6379_v23 = vmul.f32 %v6378_v5, %v13011_v9  ;;  %v6368_v12 = vmul.f32 %v6367_v44, %v13011_v9  ;;  %v4908_v44 = vpop.f32.mrf.mxu1 }
 0xd7c   : > { %v8738_v38 = vpop.eup %8737  ;;  %v4909_v31 = vadd.f32 %v8561_v24, %v4908_v44  ;;  %v5642_v24 = vmul.f32 %v12761_v57, %v5607_v1  ;;  %v14211_v1 = vld [vmem:[#allocation77_spill] sm:$0xff] }
 0xd7d   : > { %v6344_v22 = vmul.f32 %v8738_v38, %v6342_v52  ;;  %v6380_v30 = vadd.f32 0.4994258, %v6379_v23  ;;  %vm6349_vm11 = vweird.f32 %v8738_v38  ;;  %v6369_v50 = vadd.f32 0.18741608, %v6368_v12 }
 0xd7e   : > { %v5168_v28 = vpop.xlane.xlu0 %5167  ;;  %vm13053_vm14 = vmor %vm6348_vm13, %vm6349_vm11  ;;  %v4912_v0 = vadd.f32 %v4909_v31, %v11854_v32 }
 0xd7f   : > { %v5224_v48 = vmul.f32 %v5168_v28, %v10296_v2  ;;  %v6345_v60 = vsub.f32 1.0, %v6344_v22  ;;  %v6381_v11 = vmul.f32 %v6380_v30, %v13011_v9  ;;  %v6370_v23 = vmul.f32 %v6369_v50, %v13011_v9 }
 0xd80   : > { %v6355_v22 = vor.u32 1.1754944e-38, %v6354_v25  ;;  %4914 = vst.msk [vmem:[%s13041_s2 + $0x8] sm:$0xff] %vm1403_vm0, %v4912_v0  ;;  %v5866_v0 = vmul.f32 0.5, %v12932_v20 }
 0xd81   : > { %v13034_v3 = vadd.f32 1e-05, %v5224_v48  ;;  %v6346_v61 = vmul.f32 %v8738_v38, %v6345_v60  ;;  %v6382_v18 = vadd.f32 1.0, %v6381_v11  ;;  %v6332_v48 = vmul.f32 %v6331_v47, %v12954_v10  ;;  %v14210_v47 = vld [vmem:[#allocation98_spill] sm:$0xff] }
 0xd82   : > { %v6371_v9 = vadd.f32 1.1283791, %v6370_v23 }
 0xd83   : > { %8739 = vrsqrt.f32 %v13034_v3  ;;  %v6347_v62 = vadd.f32 %v8738_v38, %v6346_v61  ;;  %v6392_v11 = vand.u32 2147483647, %v6382_v18  ;;  %v6394_v12 = vand.u32 2147483648, %v6382_v18  ;;  %v7357_v25 = vpop.f32.mrf.mxu1 }
 0xd84   : > { %8741 = vrcp.f32 %v6382_v18  ;;  %vm5465_vm4 = vweird.f32 %v13034_v3  ;;  %v6372_v32 = vmul.f32 %v6371_v9, %v13003_v43  ;;  %vm6388_vm6 = vweird.f32 %v6382_v18 }
 0xd85   : > { %v6351_v4 = vsel %vm13053_vm14, %v8738_v38, %v6347_v62  ;;  %v13073_v62 = vld [vmem:[#allocation31] ss:$0 sm:$0xff]  ;;  %vm6393_vm7 = vcmp.eq.f32.partialorder %v6392_v11, 8.507059e+37  ;;  %v6395_v17 = vor.u32 1.1754944e-38, %v6394_v12  ;;  %v5867_v12 = vmul.f32 0.5, %v12999_v53  ;;  %v14213_v53 = vld [vmem:[#allocation78_spill] sm:$0xff] }
 0xd86   : > { %v5171_v42 = vpop.xlane.xlu0 %5170  ;;  %v6356_v33 = vsel %vm6353_vm15, %v6355_v22, %v6351_v4 }
 0xd87   : > { %v5225_v7 = vmul.f32 %v5171_v42, %v10296_v2  ;;  %v6357_v40 = vmul.f32 %v6356_v33, %v6332_v48 }
 0xd89   : > { %v8740_v35 = vpop.eup %8739  ;;  %v13062_v28 = vadd.f32 1e-05, %v5225_v7  ;;  %v7358_v7 = vadd.f32 %v13073_v62, %v7357_v25  ;;  %v8105_v4 = vclamps-f32 %v6357_v40, 1.0  ;;  %v5677_v40 = vadd.f32 %v12775_v55, %v5642_v24 }
 0xd8a   : > { %v8742_v52 = vpop.eup %8741  ;;  %v5460_v30 = vmul.f32 %v8740_v35, %v13034_v3  ;;  %vm5466_vm5 = vweird.f32 %v8740_v35 }
 0xd8b   : > { %v6384_v37 = vmul.f32 %v8742_v52, %v6382_v18  ;;  %8743 = vrsqrt.f32 %v13062_v28  ;;  %vm6389_vm3 = vweird.f32 %v8742_v52  ;;  %vm5467_vm8 = vmor %vm5465_vm4, %vm5466_vm5  ;;  %vm5475_vm11 = vweird.f32 %v13062_v28 }
 0xd8c   : > { %v5461_v60 = vmul.f32 %v8740_v35, %v5460_v30  ;;  %vm6390_vm2 = vmor %vm6388_vm6, %vm6389_vm3 }
 0xd8d   : > { %v6385_v38 = vsub.f32 1.0, %v6384_v37  ;;  %v7437_v37 = vadd.f32 %v7358_v7, %v14211_v1 }
 0xd8e   : > { %v5462_v61 = vmul.f32 0.5, %v5461_v60  ;;  %v5000_v13 = vpop.xlane.xlu0 %4999 }
 0xd8f   : > { %v6386_v19 = vmul.f32 %v8742_v52, %v6385_v38  ;;  %v5040_v15 = vmul.f32 %v5000_v13, %v10296_v2  ;;  %7469 = vst.msk [vmem:[%s13097_s16] sm:$0xff] %vm1515_vm10, %v7437_v37 }
 0xd90   : > { %v5463_v10 = vsub.f32 1.5, %v5462_v61 }
 0xd91   : > { %v6387_v50 = vadd.f32 %v8742_v52, %v6386_v19  ;;  %v13076_v45 = vpop.eup %8743  ;;  %v13080_v5 = vsub.f32 %v14210_v47, %v5040_v15  ;;  %v7359_v19 = vpop.f32.mrf.mxu1 }
 0xd92   : > { %v5464_v42 = vmul.f32 %v8740_v35, %v5463_v10  ;;  %v5174_v41 = vpop.xlane.xlu1 %5173  ;;  %v5470_v43 = vmul.f32 %v13076_v45, %v13062_v28  ;;  %vm5476_vm9 = vweird.f32 %v13076_v45 }
 0xd93   : > { %v6391_v23 = vsel %vm6390_vm2, %v8742_v52, %v6387_v50  ;;  %v5226_v18 = vmul.f32 %v5174_v41, %v10296_v2  ;;  %v5104_v30 = vmul.f32 %v13080_v5, %v13080_v5  ;;  %vm5477_vm1 = vmor %vm5475_vm11, %vm5476_vm9 }
 0xd94   : > { %v6396_v44 = vsel %vm6393_vm7, %v6395_v17, %v6391_v23  ;;  %v5468_v22 = vsel %vm5467_vm8, %v8740_v35, %v5464_v42  ;;  %v5471_v52 = vmul.f32 %v13076_v45, %v5470_v43  ;;  %v7210_v35 = vadd.f32 1.0, %v8105_v4 }
 0xd95   : > { %v6397_v31 = vmul.f32 %v6396_v44, %v6372_v32  ;;  %v5608_v48 = vmul.f32 %v5468_v22, %v12539_v26  ;;  %v5258_v33 = vadd.f32 1e-05, %v5226_v18  ;;  %v5190_v3 = vsel %vm1515_vm10, %v5104_v30, 0.0 }
 0xd96   : > { %v5472_v9 = vmul.f32 0.5, %v5471_v52  ;;  %5191 = vadd.xlane.f32.xlu1 %v5190_v3  ;;  %v5003_v38 = vpop.xlane.xlu0 %5002  ;;  %v7360_v32 = vadd.f32 %v13073_v62, %v7359_v19  ;;  %v7242_v50 = vmul.f32 %v7210_v35, %v5866_v0 }
 0xd97   : > { %v8106_v60 = vclamps-f32 %v6397_v31, 1.0  ;;  %8745 = vrsqrt.f32 %v5258_v33  ;;  %v5041_v11 = vmul.f32 %v5003_v38, %v10296_v2  ;;  %v5643_v26 = vmul.f32 %v12761_v57, %v5608_v48 }
 0xd98   : > { %v5473_v13 = vsub.f32 1.5, %v5472_v9  ;;  %v7438_v42 = vadd.f32 %v7360_v32, %v14213_v53  ;;  %vm5485_vm13 = vweird.f32 %v5258_v33 }
 0xd99   : > { %v7211_v61 = vadd.f32 1.0, %v8106_v60  ;;  %v13107_v10 = vsub.f32 %v12394_v29, %v5041_v11  ;;  %v5678_v15 = vadd.f32 %v12775_v55, %v5643_v26 }
 0xd9a   : > { %v5474_v7 = vmul.f32 %v13076_v45, %v5473_v13  ;;  %7470 = vst.msk [vmem:[%s13097_s16 + $0x8] sm:$0xff] %vm1515_vm10, %v7438_v42 }
 0xd9b   : > { %v7243_v25 = vmul.f32 %v7211_v61, %v5867_v12  ;;  %v5700_v17 = vpack.c.bf16 %v5678_v15, %v5677_v40  ;;  %v5105_v20 = vmul.f32 %v13107_v10, %v13107_v10 }
 0xd9c   : > { %v5478_v18 = vsel %vm5477_vm1, %v13076_v45, %v5474_v7  ;;  %v14215_v7 = vld [vmem:[#allocation80_spill] sm:$0xff] }
 0xd9d   : > { %v8746_v41 = vpop.eup %8745  ;;  %v7269_v24 = vpack.c.bf16 %v7243_v25, %v7242_v50  ;;  %8088 = vmatmul.msk.bf16.gmra.mxu2 %vm1515_vm10, %v5700_v17  ;;  %v5193_v23 = vsel %vm1515_vm10, %v5105_v20, 0.0  ;;  %v5609_v37 = vmul.f32 %v5478_v18, %v12592_v39 }
 0xd9e   : > { %v5480_v4 = vmul.f32 %v8746_v41, %v5258_v33  ;;  %5194 = vadd.xlane.f32.xlu2 %v5193_v23  ;;  %vm5486_vm12 = vweird.f32 %v8746_v41 }
 0xd9f   : > { %8140 = vmatmul.msk.bf16.gmra.mxu1 %vm1403_vm0, %v7269_v24  ;;  %vm5487_vm14 = vmor %vm5485_vm13, %vm5486_vm12  ;;  %v5644_v3 = vmul.f32 %v12761_v57, %v5609_v37 }
 0xda0   : > { %v5481_v43 = vmul.f32 %v8746_v41, %v5480_v4 }
 0xda1   : > { %v5679_v9 = vadd.f32 %v12775_v55, %v5644_v3 }
 0xda2   : > { %v5482_v44 = vmul.f32 0.5, %v5481_v43  ;;  %v5177_v22 = vpop.xlane.xlu1 %5176 }
 0xda3   : > { %v5227_v1 = vmul.f32 %v5177_v22, %v10296_v2 }
 0xda4   : > { %v5483_v30 = vsub.f32 1.5, %v5482_v44 }
 0xda5   : > { %v13125_v52 = vadd.f32 1e-05, %v5227_v1 }
 0xda6   : > { %v5484_v31 = vmul.f32 %v8746_v41, %v5483_v30 }
 0xda7   : > { %8747 = vrsqrt.f32 %v13125_v52  ;;  %vm5495_vm3 = vweird.f32 %v13125_v52 }
 0xda8   : > { %v5488_v48 = vsel %vm5487_vm14, %v8746_v41, %v5484_v31 }
 0xda9   : > { %v5610_v28 = vmul.f32 %v5488_v48, %v12659_v34 }
 0xdaa   : > { %v5006_v35 = vpop.xlane.xlu1 %5005 }
 0xdab   : > { %v5645_v45 = vmul.f32 %v12761_v57, %v5610_v28  ;;  %v5042_v60 = vmul.f32 %v5006_v35, %v10296_v2 }
 0xdad   : > { %v5680_v39 = vadd.f32 %v12775_v55, %v5645_v45  ;;  %v13135_v33 = vsub.f32 %v12397_v27, %v5042_v60  ;;  %v13141_v57 = vpop.eup %8747  ;;  %v14214_v55 = vld [vmem:[#allocation79_spill] sm:$0xff] }
 0xdae   : > { %v5490_v13 = vmul.f32 %v13141_v57, %v13125_v52  ;;  %vm5496_vm15 = vweird.f32 %v13141_v57 }
 0xdaf   : > { %v5701_v38 = vpack.c.bf16 %v5680_v39, %v5679_v9  ;;  %v5106_v34 = vmul.f32 %v13135_v33, %v13135_v33  ;;  %v7362_v11 = vpop.f32.mrf.mxu1  ;;  %v14216_v39 = vld [vmem:[#allocation81_spill] sm:$0xff]  ;;  %vm13199_vm4 = vmor %vm5495_vm3, %vm5496_vm15 }
 0xdb0   : > { %v7363_v26 = vadd.f32 %v13073_v62, %v7362_v11  ;;  %v5491_v20 = vmul.f32 %v13141_v57, %v5490_v13 }
 0xdb1   : > { %8089 = vmatmul.msk.bf16.gmra.mxu2 %vm1515_vm10, %v5701_v38  ;;  %v5196_v0 = vsel %vm1515_vm10, %v5106_v34, 0.0 }
 0xdb2   : > { %5197 = vadd.xlane.f32.xlu0 %v5196_v0  ;;  %v5009_v12 = vpop.xlane.xlu1 %5008  ;;  %v7439_v61 = vadd.f32 %v7363_v26, %v14214_v55  ;;  %v5492_v43 = vmul.f32 0.5, %v5491_v20 }
 0xdb3   : > { %v5043_v19 = vmul.f32 %v5009_v12, %v10296_v2 }
 0xdb4   : > { %7471 = vst.msk [vmem:[%s13097_s16 + $0x10] sm:$0xff] %vm1515_vm10, %v7439_v61  ;;  %v5493_v48 = vsub.f32 1.5, %v5492_v43 }
 0xdb5   : > { %v5806_v40 = vpop.f32.mrf.mxu2  ;;  %v13154_v32 = vsub.f32 %v12400_v54, %v5043_v19 }
 0xdb6   : > { %v13149_v15 = vadd.f32 %v12801_v49, %v5806_v40  ;;  %v5494_v26 = vmul.f32 %v13141_v57, %v5493_v48 }
 0xdb7   : > { %v5107_v25 = vmul.f32 %v13154_v32, %v13154_v32  ;;  %v7364_v17 = vpop.f32.mrf.mxu1 }
 0xdb8   : > { %v13157_v50 = vmul.f32 0.70710677, %v13149_v15  ;;  %v7365_v42 = vadd.f32 %v13073_v62, %v7364_v17 }
 0xdb9   : > { %v5199_v41 = vsel %vm1515_vm10, %v5107_v25, 0.0 }
 0xdba   : > { %v6400_v53 = vmul.f32 %v13157_v50, %v13157_v50  ;;  %5200 = vadd.xlane.f32.xlu1 %v5199_v41  ;;  %v7440_v4 = vadd.f32 %v7365_v42, %v14215_v7 }
 0xdbc   : > { %v13166_v24 = vmin.f32 %v6400_v53, 16.0  ;;  %7472 = vst.msk [vmem:[%s13097_s16 + $0x18] sm:$0xff] %vm1515_vm10, %v7440_v4 }
 0xdbd   : > { %v5808_v23 = vpop.f32.mrf.mxu2 }
 0xdbe   : > { %v6402_v18 = vmul.f32 2.1237322e-06, %v13166_v24  ;;  %v6413_v44 = vmul.f32 3.8918573e-05, %v13166_v24  ;;  %v13172_v22 = vadd.f32 %v12801_v49, %v5808_v23 }
 0xdbf   : > { %v7367_v31 = vpop.f32.mrf.mxu1 }
 0xdc0   : > { %v6403_v30 = vadd.f32 0.00028619796, %v6402_v18  ;;  %v6414_v1 = vadd.f32 0.001143296, %v6413_v44  ;;  %v13177_v37 = vmul.f32 0.70710677, %v13172_v22  ;;  %v7368_v35 = vadd.f32 %v13073_v62, %v7367_v31 }
 0xdc2   : > { %v6404_v28 = vmul.f32 %v6403_v30, %v13166_v24  ;;  %v6415_v3 = vmul.f32 %v6414_v1, %v13166_v24  ;;  %v6440_v45 = vmul.f32 %v13177_v37, %v13177_v37  ;;  %v7441_v38 = vadd.f32 %v7368_v35, %v14216_v39 }
 0xdc4   : > { %v6405_v60 = vadd.f32 0.0036580483, %v6404_v28  ;;  %v6416_v9 = vadd.f32 0.014752088, %v6415_v3  ;;  %v13186_v34 = vmin.f32 %v6440_v45, 16.0  ;;  %7473 = vst.msk [vmem:[%s13097_s16 + $0x20] sm:$0xff] %vm1515_vm10, %v7441_v38 }
 0xdc5   : > { %v5811_v11 = vpop.f32.mrf.mxu2 }
 0xdc6   : > { %v6406_v0 = vmul.f32 %v6405_v60, %v13166_v24  ;;  %v6417_v12 = vmul.f32 %v6416_v9, %v13166_v24  ;;  %v13194_v55 = vadd.f32 %v12801_v49, %v5811_v11  ;;  %v6442_v61 = vmul.f32 2.1237322e-06, %v13186_v34  ;;  %v13224_v9 = vld [vmem:[#allocation29] ss:$0 sm:$0xff] }
 0xdc7   : > { %v6453_v40 = vmul.f32 3.8918573e-05, %v13186_v34  ;;  %v7369_v42 = vpop.f32.mrf.mxu1  ;;  %v5498_v49 = vsel %vm13199_vm4, %v13141_v57, %v5494_v26  ;;  %v14219_v57 = vld [vmem:[#allocation82_spill] sm:$0xff] }
 0xdc8   : > { %v6407_v19 = vadd.f32 0.05243302, %v6406_v0  ;;  %v6418_v13 = vadd.f32 0.112945676, %v6417_v12  ;;  %v6443_v17 = vadd.f32 0.00028619796, %v6442_v61  ;;  %v7370_v7 = vadd.f32 %v13073_v62, %v7369_v42  ;;  %v5180_v4 = vpop.xlane.xlu2 %5179 }
 0xdc9   : > { %v6454_v20 = vadd.f32 0.001143296, %v6453_v40  ;;  %v13204_v53 = vmul.f32 0.70710677, %v13194_v55  ;;  %v5228_v44 = vmul.f32 %v5180_v4, %v10296_v2  ;;  %v5611_v45 = vmul.f32 %v5498_v49, %v12741_v46 }
 0xdca   : > { %v6408_v41 = vmul.f32 %v6407_v19, %v13166_v24  ;;  %v6419_v52 = vmul.f32 %v6418_v13, %v13166_v24  ;;  %v6444_v23 = vmul.f32 %v6443_v17, %v13186_v34  ;;  %v7442_v31 = vadd.f32 %v7370_v7, %v14219_v57  ;;  %v13242_v17 = vld [vmem:[#allocation26] ss:$0 sm:$0xff] }
 0xdcb   : > { %v6455_v43 = vmul.f32 %v6454_v20, %v13186_v34  ;;  %v6480_v18 = vmul.f32 %v13204_v53, %v13204_v53  ;;  %v13232_v0 = vadd.f32 1e-05, %v5228_v44  ;;  %v5646_v20 = vmul.f32 %v13242_v17, %v5611_v45 }
 0xdcc   : > { %v6409_v30 = vadd.f32 0.18741608, %v6408_v41  ;;  %v6420_v1 = vadd.f32 0.4994258, %v6419_v52  ;;  %v6445_v48 = vadd.f32 0.0036580483, %v6444_v23 }
 0xdcd   : > { %v6456_v28 = vadd.f32 0.014752088, %v6455_v43  ;;  %v13218_v3 = vmin.f32 %v6480_v18, 16.0  ;;  %v5813_v35 = vpop.f32.mrf.mxu2  ;;  %7474 = vst.msk [vmem:[%s13097_s16 + $0x28] sm:$0xff] %vm1515_vm10, %v7442_v31  ;;  %v13252_v4 = vmul.f32 0.5, %v13149_v15  ;;  %v13263_v31 = vmul.f32 0.5, %v13172_v22 }
 0xdce   : > { %v6421_v60 = vmul.f32 %v6420_v1, %v13166_v24  ;;  %v13227_v39 = vadd.f32 %v13224_v9, %v5813_v35  ;;  %v6446_v38 = vmul.f32 %v6445_v48, %v13186_v34  ;;  %v6410_v40 = vmul.f32 %v6409_v30, %v13166_v24  ;;  %v13257_v1 = vld [vmem:[#allocation28] ss:$0 sm:$0xff] }
 0xdcf   : > { %v6457_v11 = vmul.f32 %v6456_v28, %v13186_v34  ;;  %v6482_v26 = vmul.f32 2.1237322e-06, %v13218_v3  ;;  %v6493_v46 = vmul.f32 3.8918573e-05, %v13218_v3  ;;  %v13260_v57 = vadd.f32 %v13257_v1, %v5646_v20 }
 0xdd0   : > { %v13234_v12 = vadd.f32 1.0, %v6421_v60  ;;  %v13238_v61 = vmul.f32 0.70710677, %v13227_v39  ;;  %v6447_v19 = vadd.f32 0.05243302, %v6446_v38  ;;  %v5183_v24 = vpop.xlane.xlu2 %5182  ;;  %vm5505_vm8 = vweird.f32 %v13232_v0 }
 0xdd1   : > { %v6458_v13 = vadd.f32 0.112945676, %v6457_v11  ;;  %v6483_v25 = vadd.f32 0.00028619796, %v6482_v26  ;;  %v6494_v52 = vadd.f32 0.001143296, %v6493_v46  ;;  %v5229_v15 = vmul.f32 %v5183_v24, %v10296_v2 }
 0xdd2   : > { %8749 = vrcp.f32 %v13234_v12  ;;  %v6448_v42 = vmul.f32 %v6447_v19, %v13186_v34  ;;  %v6520_v7 = vmul.f32 %v13238_v61, %v13238_v61  ;;  %v6411_v23 = vadd.f32 1.1283791, %v6410_v40 }
 0xdd3   : > { %v6459_v49 = vmul.f32 %v6458_v13, %v13186_v34  ;;  %v6484_v41 = vmul.f32 %v6483_v25, %v13218_v3  ;;  %8751 = vrsqrt.f32 %v13232_v0  ;;  %v6495_v44 = vmul.f32 %v6494_v52, %v13218_v3 }
 0xdd4   : > { %v13255_v30 = vmin.f32 %v6520_v7, 16.0  ;;  %v6449_v48 = vadd.f32 0.18741608, %v6448_v42  ;;  %v6412_v26 = vmul.f32 %v6411_v23, %v13157_v50  ;;  %v6432_v22 = vand.u32 2147483647, %v13234_v12 }
 0xdd5   : > { %v6460_v43 = vadd.f32 0.4994258, %v6459_v49  ;;  %v6485_v18 = vadd.f32 0.0036580483, %v6484_v41  ;;  %v6496_v60 = vadd.f32 0.014752088, %v6495_v44  ;;  %vm6428_vm6 = vweird.f32 %v13234_v12 }
 0xdd6   : > { %v6522_v38 = vmul.f32 2.1237322e-06, %v13255_v30  ;;  %v6533_v11 = vmul.f32 3.8918573e-05, %v13255_v30  ;;  %v6434_v41 = vand.u32 2147483648, %v13234_v12  ;;  %v6450_v52 = vmul.f32 %v6449_v48, %v13186_v34 }
 0xdd7   : > { %v6461_v28 = vmul.f32 %v6460_v43, %v13186_v34  ;;  %v6486_v45 = vmul.f32 %v6485_v18, %v13218_v3  ;;  %v6497_v25 = vmul.f32 %v6496_v60, %v13218_v3  ;;  %v13282_v24 = vadd.f32 1e-05, %v5229_v15 }
 0xdd8   : > { %v8750_v35 = vpop.eup %8749  ;;  %v6523_v20 = vadd.f32 0.00028619796, %v6522_v38  ;;  %v6534_v42 = vadd.f32 0.001143296, %v6533_v11  ;;  %vm13289_vm7 = vcmp.eq.f32.partialorder %v6432_v22, 8.507059e+37  ;;  %v6435_v11 = vor.u32 1.1754944e-38, %v6434_v41 }
 0xdd9   : > { %v6424_v46 = vmul.f32 %v8750_v35, %v13234_v12  ;;  %v13273_v40 = vadd.f32 1.0, %v6461_v28  ;;  %v13275_v19 = vpop.eup %8751  ;;  %v6487_v13 = vadd.f32 0.05243302, %v6486_v45  ;;  %vm6429_vm5 = vweird.f32 %v8750_v35 }
 0xdda   : > { %v6498_v7 = vadd.f32 0.112945676, %v6497_v25  ;;  %v6524_v43 = vmul.f32 %v6523_v20, %v13255_v30  ;;  %v6535_v18 = vmul.f32 %v6534_v42, %v13255_v30  ;;  %v5500_v44 = vmul.f32 %v13275_v19, %v13232_v0  ;;  %vm6430_vm2 = vmor %vm6428_vm6, %vm6429_vm5  ;;  %v7372_v12 = vpop.f32.mrf.mxu1 }
 0xddb   : > { %v6425_v49 = vsub.f32 1.0, %v6424_v46  ;;  %8753 = vrcp.f32 %v13273_v40  ;;  %v6488_v50 = vmul.f32 %v6487_v13, %v13218_v3  ;;  %v6451_v46 = vadd.f32 1.1283791, %v6450_v52 }
 0xddc   : > { %v6499_v28 = vmul.f32 %v6498_v7, %v13218_v3  ;;  %v6525_v15 = vadd.f32 0.0036580483, %v6524_v43  ;;  %v6536_v60 = vadd.f32 0.014752088, %v6535_v18  ;;  %v5501_v38 = vmul.f32 %v13275_v19, %v5500_v44 }
 0xddd   : > { %v6426_v23 = vmul.f32 %v8750_v35, %v6425_v49  ;;  %v6489_v48 = vadd.f32 0.18741608, %v6488_v50  ;;  %8755 = vrsqrt.f32 %v13282_v24  ;;  %v5186_v50 = vpop.xlane.xlu0 %5185  ;;  %v6472_v43 = vand.u32 2147483647, %v13273_v40 }
 0xdde   : > { %v6500_v13 = vadd.f32 0.4994258, %v6499_v28  ;;  %v6526_v20 = vmul.f32 %v6525_v15, %v13255_v30  ;;  %v6537_v42 = vmul.f32 %v6536_v60, %v13255_v30  ;;  %v5502_v49 = vmul.f32 0.5, %v5501_v38 }
 0xddf   : > { %v6427_v45 = vadd.f32 %v8750_v35, %v6426_v23  ;;  %v6490_v41 = vmul.f32 %v6489_v48, %v13218_v3  ;;  %v5230_v15 = vmul.f32 %v5186_v50, %v10296_v2  ;;  %v6452_v34 = vmul.f32 %v6451_v46, %v13177_v37 }
 0xde0   : > { %v6538_v18 = vadd.f32 0.112945676, %v6537_v42  ;;  %v6527_v28 = vadd.f32 0.05243302, %v6526_v20  ;;  %v6474_v60 = vand.u32 2147483648, %v13273_v40  ;;  %vm6468_vm11 = vweird.f32 %v13273_v40 }
 0xde1   : > { %v8754_v22 = vpop.eup %8753  ;;  %v6431_v25 = vsel %vm6430_vm2, %v8750_v35, %v6427_v45  ;;  %v6501_v35 = vmul.f32 %v6500_v13, %v13218_v3  ;;  %v5503_v45 = vsub.f32 1.5, %v5502_v49  ;;  %v6491_v3 = vadd.f32 1.1283791, %v6490_v41  ;;  %v5012_v13 = vpop.xlane.xlu2 %5011 }
 0xde2   : > { %v6436_v7 = vsel %vm13289_vm7, %v6435_v11, %v6431_v25  ;;  %v6464_v23 = vmul.f32 %v8754_v22, %v13273_v40  ;;  %v6539_v48 = vmul.f32 %v6538_v18, %v13255_v30  ;;  %vm6469_vm9 = vweird.f32 %v8754_v22  ;;  %v7374_v18 = vpop.f32.mrf.mxu1 }
 0xde3   : > { %v6437_v52 = vmul.f32 %v6436_v7, %v6412_v26  ;;  %v13309_v38 = vadd.f32 1.0, %v6501_v35  ;;  %v13312_v11 = vpop.eup %8755  ;;  %vm13315_vm1 = vcmp.eq.f32.partialorder %v6472_v43, 8.507059e+37  ;;  %vm5506_vm12 = vweird.f32 %v13275_v19  ;;  %vm6470_vm13 = vmor %vm6468_vm11, %vm6469_vm9 }
 0xde4   : > { %v6465_v44 = vsub.f32 1.0, %v6464_v23  ;;  %v6528_v46 = vmul.f32 %v6527_v28, %v13255_v30  ;;  %v6540_v42 = vadd.f32 0.4994258, %v6539_v48  ;;  %v5504_v49 = vmul.f32 %v13275_v19, %v5503_v45  ;;  %vm13340_vm14 = vmor %vm5505_vm8, %vm5506_vm12 }
 0xde5   : > { %v8107_v26 = vclamps-f32 %v6437_v52, 1.0  ;;  %8757 = vrcp.f32 %v13309_v38  ;;  %v6475_v50 = vor.u32 1.1754944e-38, %v6474_v60  ;;  %v5510_v7 = vmul.f32 %v13312_v11, %v13282_v24 }
 0xde6   : > { %v6466_v25 = vmul.f32 %v8754_v22, %v6465_v44  ;;  %v5044_v40 = vmul.f32 %v5012_v13, %v10296_v2  ;;  %v13326_v23 = vadd.f32 1e-05, %v5230_v15  ;;  %v13329_v43 = vmul.f32 %v6491_v3, %v13204_v53 }
 0xde7   : > { %v7212_v41 = vadd.f32 1.0, %v8107_v26  ;;  %v6541_v35 = vmul.f32 %v6540_v42, %v13255_v30  ;;  %v6512_v28 = vand.u32 2147483647, %v13309_v38  ;;  %v6514_v45 = vand.u32 2147483648, %v13309_v38 }
 0xde8   : > { %v6467_v37 = vadd.f32 %v8754_v22, %v6466_v25  ;;  %v5511_v53 = vmul.f32 %v13312_v11, %v5510_v7  ;;  %v6529_v60 = vadd.f32 0.18741608, %v6528_v46  ;;  %v5508_v26 = vsel %vm13340_vm14, %v13275_v19, %v5504_v49  ;;  %v5189_v19 = vpop.xlane.xlu0 %5188 }
 0xde9   : > { %v13345_v48 = vadd.f32 1.0, %v6541_v35  ;;  %v5816_v25 = vpop.f32.mrf.mxu2  ;;  %vm5515_vm15 = vweird.f32 %v13282_v24  ;;  %v13352_v0 = vsub.f32 %v12969_v16, %v5044_v40  ;;  %8759 = vrsqrt.f32 %v13326_v23 }
 0xdea   : > { %v6471_v52 = vsel %vm6470_vm13, %v8754_v22, %v6467_v37  ;;  %v5512_v13 = vmul.f32 0.5, %v5511_v53  ;;  %v7373_v20 = vadd.f32 %v13073_v62, %v7372_v12  ;;  %vm6508_vm3 = vweird.f32 %v13309_v38 }
 0xdeb   : > { %v6476_v44 = vsel %vm13315_vm1, %v6475_v50, %v6471_v52  ;;  %v8758_v3 = vpop.eup %8757  ;;  %vm13359_vm4 = vcmp.eq.f32.partialorder %v6512_v28, 8.507059e+37  ;;  %v6515_v49 = vor.u32 1.1754944e-38, %v6514_v45  ;;  %8761 = vrcp.f32 %v13345_v48 }
 0xdec   : > { %v6477_v22 = vmul.f32 %v6476_v44, %v6452_v34  ;;  %v7244_v34 = vmul.f32 %v7212_v41, %v13252_v4  ;;  %v6504_v46 = vmul.f32 %v8758_v3, %v13309_v38  ;;  %v5612_v50 = vmul.f32 %v5508_v26, %v12891_v14  ;;  %v14228_v4 = vld [vmem:[#allocation83_spill] sm:$0xff] }
 0xded   : > { %v5513_v40 = vsub.f32 1.5, %v5512_v13  ;;  %v7443_v41 = vadd.f32 %v7373_v20, %v14228_v4  ;;  %v6530_v52 = vmul.f32 %v6529_v60, %v13255_v30  ;;  %vm5516_vm5 = vweird.f32 %v13312_v11  ;;  %v14231_v4 = vld [vmem:[#allocation84_spill] sm:$0xff] }
 0xdee   : > { %v8108_v37 = vclamps-f32 %v6477_v22, 1.0  ;;  %v6505_v12 = vsub.f32 1.0, %v6504_v46  ;;  %v5108_v35 = vmul.f32 %v13352_v0, %v13352_v0  ;;  %v5231_v44 = vmul.f32 %v5189_v19, %v10296_v2  ;;  %vm13399_vm8 = vmor %vm5515_vm15, %vm5516_vm5 }
 0xdef   : > { %vm6509_vm6 = vweird.f32 %v8758_v3  ;;  %v5514_v14 = vmul.f32 %v13312_v11, %v5513_v40  ;;  %7475 = vst.msk [vmem:[%s13097_s16 + $0x30] sm:$0xff] %vm1515_vm10, %v7443_v41  ;;  %v13375_v53 = vpop.eup %8759  ;;  %v7375_v60 = vadd.f32 %v13073_v62, %v7374_v18  ;;  %v5647_v26 = vmul.f32 %v13242_v17, %v5612_v50 }
 0xdf0   : > { %v7213_v7 = vadd.f32 1.0, %v8108_v37  ;;  %v6506_v45 = vmul.f32 %v8758_v3, %v6505_v12  ;;  %v7377_v15 = vpop.f32.mrf.mxu1  ;;  %v5202_v30 = vsel %vm1515_vm10, %v5108_v35, 0.0  ;;  %v13378_v22 = vadd.f32 1e-05, %v5231_v44  ;;  %vm6510_vm7 = vmor %vm6508_vm3, %vm6509_vm6 }
 0xdf1   : > { %5203 = vadd.xlane.f32.xlu2 %v5202_v30  ;;  %v13385_v37 = vadd.f32 %v13224_v9, %v5816_v25  ;;  %v8762_v46 = vpop.eup %8761  ;;  %v6531_v19 = vadd.f32 1.1283791, %v6530_v52  ;;  %vm5525_vm2 = vweird.f32 %v13326_v23  ;;  %v6554_v50 = vand.u32 2147483648, %v13345_v48  ;;  %v5818_v12 = vpop.f32.mrf.mxu2 }
 0xdf2   : > { %v7245_v28 = vmul.f32 %v7213_v7, %v13263_v31  ;;  %v6507_v20 = vadd.f32 %v8758_v3, %v6506_v45  ;;  %v5520_v31 = vmul.f32 %v13375_v53, %v13326_v23  ;;  %v6552_v7 = vand.u32 2147483647, %v13345_v48 }
 0xdf3   : > { %8763 = vrsqrt.f32 %v13378_v22  ;;  %v5518_v40 = vsel %vm13399_vm8, %v13312_v11, %v5514_v14  ;;  %v7444_v41 = vadd.f32 %v7375_v60, %v14231_v4  ;;  %v5682_v24 = vadd.f32 %v13257_v1, %v5647_v26 }
 0xdf4   : > { %v7270_v13 = vpack.c.bf16 %v7245_v28, %v7244_v34  ;;  %v6511_v18 = vsel %vm6510_vm7, %v8758_v3, %v6507_v20  ;;  %v6544_v34 = vmul.f32 %v8762_v46, %v13345_v48  ;;  %v5521_v25 = vmul.f32 %v13375_v53, %v5520_v31 }
 0xdf5   : > { %v6516_v3 = vsel %vm13359_vm4, %v6515_v49, %v6511_v18  ;;  %vm5526_vm9 = vweird.f32 %v13375_v53  ;;  %v13414_v44 = vmul.f32 0.70710677, %v13385_v37  ;;  %vm6549_vm11 = vweird.f32 %v8762_v46  ;;  %7476 = vst.msk [vmem:[%s13097_s16 + $0x38] sm:$0xff] %vm1515_vm10, %v7444_v41 }
 0xdf6   : > { %8141 = vmatmul.msk.bf16.gmra.mxu1 %vm1403_vm0, %v7270_v13  ;;  %v6545_v52 = vsub.f32 1.0, %v6544_v34  ;;  %v5522_v35 = vmul.f32 0.5, %v5521_v25  ;;  %v5702_v42 = vpack.c.bf16 %v5682_v24, %v13260_v57  ;;  %v13420_v49 = vadd.f32 %v13224_v9, %v5818_v12  ;;  %vm5527_vm13 = vmor %vm5525_vm2, %vm5526_vm9  ;;  %v14233_v24 = vld [vmem:[#allocation88_spill] sm:$0xff] }
 0xdf7   : > { %v7378_v11 = vadd.f32 %v13073_v62, %v7377_v15  ;;  %v6517_v28 = vmul.f32 %v6516_v3, %v13329_v43  ;;  %v6560_v30 = vmul.f32 %v13414_v44, %v13414_v44  ;;  %v6532_v13 = vmul.f32 %v6531_v19, %v13238_v61  ;;  %v14232_v15 = vld [vmem:[#allocation87_spill] sm:$0xff] }
 0xdf8   : > { %v6546_v45 = vmul.f32 %v8762_v46, %v6545_v52  ;;  %v5523_v14 = vsub.f32 1.5, %v5522_v35  ;;  %v7379_v60 = vpop.f32.mrf.mxu1  ;;  %vm6548_vm1 = vweird.f32 %v13345_v48  ;;  %8090 = vmatmul.msk.bf16.gmra.mxu2 %vm1515_vm10, %v5702_v42  ;;  %v13432_v57 = vmul.f32 0.70710677, %v13420_v49 }
 0xdf9   : > { %v13426_v26 = vpop.eup %8763  ;;  %v7445_v43 = vadd.f32 %v7378_v11, %v14232_v15  ;;  %vm6553_vm12 = vcmp.eq.f32.partialorder %v6552_v7, 8.507059e+37  ;;  %v6555_v31 = vor.u32 1.1754944e-38, %v6554_v50  ;;  %vm6550_vm14 = vmor %vm6548_vm1, %vm6549_vm11  ;;  %v5613_v61 = vmul.f32 %v5518_v40, %v12910_v63 }
 0xdfa   : > { %v6547_v20 = vadd.f32 %v8762_v46, %v6546_v45  ;;  %v5524_v18 = vmul.f32 %v13375_v53, %v5523_v14  ;;  %v13442_v48 = vmin.f32 %v6560_v30, 16.0  ;;  %v6600_v19 = vmul.f32 %v13432_v57, %v13432_v57 }
 0xdfb   : > { %7477 = vst.msk [vmem:[%s13097_s16 + $0x40] sm:$0xff] %vm1515_vm10, %v7445_v43  ;;  %v7380_v7 = vadd.f32 %v13073_v62, %v7379_v60  ;;  %v8109_v34 = vclamps-f32 %v6517_v28, 1.0  ;;  %v5530_v23 = vmul.f32 %v13426_v26, %v13378_v22  ;;  %v5870_v40 = vmul.f32 0.5, %v13194_v55 }
 0xdfc   : > { %v6551_v50 = vsel %vm6550_vm14, %v8762_v46, %v6547_v20  ;;  %v5528_v38 = vsel %vm5527_vm13, %v13375_v53, %v5524_v18  ;;  %v6562_v63 = vmul.f32 2.1237322e-06, %v13442_v48  ;;  %v6573_v3 = vmul.f32 3.8918573e-05, %v13442_v48 }
 0xdfd   : > { %v6556_v25 = vsel %vm6553_vm12, %v6555_v31, %v6551_v50  ;;  %v5614_v12 = vmul.f32 %v5528_v38, %v12940_v58  ;;  %v13456_v41 = vmin.f32 %v6600_v19, 16.0  ;;  %v7446_v46 = vadd.f32 %v7380_v7, %v14233_v24 }
 0xdfe   : > { %v6557_v4 = vmul.f32 %v6556_v25, %v6532_v13  ;;  %v6563_v52 = vadd.f32 0.00028619796, %v6562_v63  ;;  %v6574_v53 = vadd.f32 0.001143296, %v6573_v3  ;;  %v5648_v35 = vmul.f32 %v13242_v17, %v5613_v61 }
 0xdff   : > { %v5649_v42 = vmul.f32 %v13242_v17, %v5614_v12  ;;  %v7214_v11 = vadd.f32 1.0, %v8109_v34  ;;  %v6602_v28 = vmul.f32 2.1237322e-06, %v13456_v41  ;;  %v6613_v45 = vmul.f32 3.8918573e-05, %v13456_v41  ;;  %7478 = vst.msk [vmem:[%s13097_s16 + $0x48] sm:$0xff] %vm1515_vm10, %v7446_v46 }
 0xe00   : > { %v8110_v58 = vclamps-f32 %v6557_v4, 1.0  ;;  %v5531_v55 = vmul.f32 %v13426_v26, %v5530_v23  ;;  %v6564_v14 = vmul.f32 %v6563_v52, %v13442_v48  ;;  %v6575_v30 = vmul.f32 %v6574_v53, %v13442_v48 }
 0xe01   : > { %v5684_v60 = vadd.f32 %v13257_v1, %v5649_v42  ;;  %v5871_v13 = vmul.f32 0.5, %v13227_v39  ;;  %v6603_v43 = vadd.f32 0.00028619796, %v6602_v28  ;;  %v6614_v20 = vadd.f32 0.001143296, %v6613_v45 }
 0xe02   : > { %v7215_v15 = vadd.f32 1.0, %v8110_v58  ;;  %v6565_v31 = vadd.f32 0.0036580483, %v6564_v14  ;;  %v6576_v18 = vadd.f32 0.014752088, %v6575_v30  ;;  %v5683_v61 = vadd.f32 %v13257_v1, %v5648_v35 }
 0xe03   : > { %v7246_v19 = vmul.f32 %v7214_v11, %v5870_v40  ;;  %v6604_v34 = vmul.f32 %v6603_v43, %v13456_v41  ;;  %v6615_v50 = vmul.f32 %v6614_v20, %v13456_v41  ;;  %v5532_v38 = vmul.f32 0.5, %v5531_v55 }
 0xe04   : > { %v7247_v7 = vmul.f32 %v7215_v15, %v5871_v13  ;;  %v6577_v23 = vmul.f32 %v6576_v18, %v13442_v48  ;;  %v5703_v25 = vpack.c.bf16 %v5684_v60, %v5683_v61  ;;  %v6566_v39 = vmul.f32 %v6565_v31, %v13442_v48 }
 0xe05   : > { %v6605_v63 = vadd.f32 0.0036580483, %v6604_v34  ;;  %v6616_v3 = vadd.f32 0.014752088, %v6615_v50  ;;  %v5533_v53 = vsub.f32 1.5, %v5532_v38  ;;  %vm5536_vm15 = vweird.f32 %v13426_v26 }
 0xe06   : > { %v7271_v12 = vpack.c.bf16 %v7247_v7, %v7246_v19  ;;  %v6578_v4 = vadd.f32 0.112945676, %v6577_v23  ;;  %v6567_v35 = vadd.f32 0.05243302, %v6566_v39  ;;  %vm5535_vm3 = vweird.f32 %v13378_v22 }
 0xe07   : > { %v6617_v24 = vmul.f32 %v6616_v3, %v13456_v41  ;;  %v6606_v46 = vmul.f32 %v6605_v63, %v13456_v41  ;;  %v5534_v30 = vmul.f32 %v13426_v26, %v5533_v53  ;;  %vm5537_vm4 = vmor %vm5535_vm3, %vm5536_vm15 }
 0xe08   : > { %8142 = vmatmul.msk.bf16.gmra.mxu1 %vm1403_vm0, %v7271_v12  ;;  %v6579_v40 = vmul.f32 %v6578_v4, %v13442_v48  ;;  %8091 = vmatmul.msk.bf16.gmra.mxu2 %vm1515_vm10, %v5703_v25  ;;  %v6568_v60 = vmul.f32 %v6567_v35, %v13442_v48 }
 0xe09   : > { %v5192_v52 = vpop.xlane.xlu1 %5191  ;;  %v6618_v42 = vadd.f32 0.112945676, %v6617_v24  ;;  %v6607_v14 = vadd.f32 0.05243302, %v6606_v46  ;;  %v5538_v18 = vsel %vm5537_vm4, %v13426_v26, %v5534_v30 }
 0xe0a   : > { %v5232_v11 = vmul.f32 %v5192_v52, %v10296_v2  ;;  %v6580_v58 = vadd.f32 0.4994258, %v6579_v40  ;;  %v6569_v61 = vadd.f32 0.18741608, %v6568_v60  ;;  %v5615_v50 = vmul.f32 %v5538_v18, %v12962_v59  ;;  %v14234_v60 = vld [vmem:[#allocation89_spill] sm:$0xff] }
 0xe0b   : > { %v6619_v28 = vmul.f32 %v6618_v42, %v13456_v41  ;;  %v6608_v20 = vmul.f32 %v6607_v14, %v13456_v41 }
 0xe0c   : > { %v5264_v45 = vadd.f32 1e-05, %v5232_v11  ;;  %v6581_v55 = vmul.f32 %v6580_v58, %v13442_v48  ;;  %v6570_v22 = vmul.f32 %v6569_v61, %v13442_v48  ;;  %v5650_v4 = vmul.f32 %v13242_v17, %v5615_v50 }
 0xe0d   : > { %v6620_v13 = vadd.f32 0.4994258, %v6619_v28  ;;  %v6609_v38 = vadd.f32 0.18741608, %v6608_v20 }
 0xe0e   : > { %8765 = vrsqrt.f32 %v5264_v45  ;;  %v6582_v15 = vadd.f32 1.0, %v6581_v55  ;;  %v6571_v40 = vadd.f32 1.1283791, %v6570_v22  ;;  %vm5545_vm5 = vweird.f32 %v5264_v45 }
 0xe0f   : > { %v6621_v43 = vmul.f32 %v6620_v13, %v13456_v41  ;;  %v6610_v3 = vmul.f32 %v6609_v38, %v13456_v41  ;;  %v5685_v22 = vadd.f32 %v13257_v1, %v5650_v4 }
 0xe10   : > { %8767 = vrcp.f32 %v6582_v15  ;;  %v6594_v52 = vand.u32 2147483648, %v6582_v15  ;;  %v6592_v59 = vand.u32 2147483647, %v6582_v15  ;;  %vm6588_vm2 = vweird.f32 %v6582_v15 }
 0xe11   : > { %v5195_v31 = vpop.xlane.xlu2 %5194  ;;  %v6622_v19 = vadd.f32 1.0, %v6621_v43  ;;  %v6611_v41 = vadd.f32 1.1283791, %v6610_v3  ;;  %v6572_v18 = vmul.f32 %v6571_v40, %v13414_v44  ;;  %v13518_v40 = vld [vmem:[#allocation31] ss:$0 sm:$0xff] }
 0xe12   : > { %v5233_v34 = vmul.f32 %v5195_v31, %v10296_v2  ;;  %v6595_v14 = vor.u32 1.1754944e-38, %v6594_v52  ;;  %vm6593_vm1 = vcmp.eq.f32.partialorder %v6592_v59, 8.507059e+37 }
 0xe13   : > { %8769 = vrcp.f32 %v6622_v19  ;;  %v6634_v30 = vand.u32 2147483648, %v6622_v19  ;;  %v6632_v20 = vand.u32 2147483647, %v6622_v19  ;;  %vm6628_vm12 = vweird.f32 %v6622_v19 }
 0xe14   : > { %v8766_v7 = vpop.eup %8765  ;;  %v13493_v63 = vadd.f32 1e-05, %v5233_v34 }
 0xe15   : > { %v5540_v23 = vmul.f32 %v8766_v7, %v5264_v45  ;;  %vm5546_vm6 = vweird.f32 %v8766_v7  ;;  %vm6633_vm14 = vcmp.eq.f32.partialorder %v6632_v20, 8.507059e+37 }
 0xe16   : > { %v8768_v25 = vpop.eup %8767  ;;  %8771 = vrsqrt.f32 %v13493_v63  ;;  %vm5547_vm8 = vmor %vm5545_vm5, %vm5546_vm6  ;;  %vm5555_vm4 = vweird.f32 %v13493_v63 }
 0xe17   : > { %v5541_v12 = vmul.f32 %v8766_v7, %v5540_v23  ;;  %v6584_v39 = vmul.f32 %v8768_v25, %v6582_v15  ;;  %vm6589_vm7 = vweird.f32 %v8768_v25 }
 0xe18   : > { %vm6590_vm9 = vmor %vm6588_vm2, %vm6589_vm7 }
 0xe19   : > { %v5542_v26 = vmul.f32 0.5, %v5541_v12  ;;  %v8770_v24 = vpop.eup %8769  ;;  %v6585_v46 = vsub.f32 1.0, %v6584_v39 }
 0xe1a   : > { %v6624_v53 = vmul.f32 %v8770_v24, %v6622_v19  ;;  %vm6629_vm11 = vweird.f32 %v8770_v24 }
 0xe1b   : > { %v5543_v35 = vsub.f32 1.5, %v5542_v26  ;;  %v6586_v42 = vmul.f32 %v8768_v25, %v6585_v46  ;;  %vm6630_vm13 = vmor %vm6628_vm12, %vm6629_vm11 }
 0xe1c   : > { %v7382_v48 = vpop.f32.mrf.mxu1  ;;  %v6625_v58 = vsub.f32 1.0, %v6624_v53  ;;  %v13508_v38 = vpop.eup %8771 }
 0xe1d   : > { %v7383_v11 = vadd.f32 %v13073_v62, %v7382_v48  ;;  %v5544_v28 = vmul.f32 %v8766_v7, %v5543_v35  ;;  %v6587_v55 = vadd.f32 %v8768_v25, %v6586_v42  ;;  %v5550_v4 = vmul.f32 %v13508_v38, %v13493_v63  ;;  %v14235_v35 = vld [vmem:[#allocation90_spill] sm:$0xff] }
 0xe1e   : > { %v6626_v43 = vmul.f32 %v8770_v24, %v6625_v58  ;;  %v5872_v58 = vmul.f32 0.5, %v13385_v37  ;;  %vm5556_vm15 = vweird.f32 %v13508_v38 }
 0xe1f   : > { %v7447_v13 = vadd.f32 %v7383_v11, %v14234_v60  ;;  %v5548_v31 = vsel %vm5547_vm8, %v8766_v7, %v5544_v28  ;;  %v6591_v62 = vsel %vm6590_vm9, %v8768_v25, %v6587_v55  ;;  %v6635_v7 = vor.u32 1.1754944e-38, %v6634_v30  ;;  %vm5557_vm5 = vmor %vm5555_vm4, %vm5556_vm15 }
 0xe20   : > { %v5616_v15 = vmul.f32 %v5548_v31, %v13080_v5  ;;  %v5821_v61 = vpop.f32.mrf.mxu2  ;;  %v6596_v34 = vsel %vm6593_vm1, %v6595_v14, %v6591_v62  ;;  %v6627_v50 = vadd.f32 %v8770_v24, %v6626_v43  ;;  %v6612_v5 = vmul.f32 %v6611_v41, %v13432_v57 }
 0xe21   : > { %7479 = vst.msk [vmem:[%s13097_s16 + $0x50] sm:$0xff] %vm1515_vm10, %v7447_v13  ;;  %v13506_v45 = vadd.f32 %v13224_v9, %v5821_v61  ;;  %v6597_v23 = vmul.f32 %v6596_v34, %v6572_v18  ;;  %v5873_v28 = vmul.f32 0.5, %v13420_v49  ;;  %v5551_v60 = vmul.f32 %v13508_v38, %v5550_v4 }
 0xe22   : > { %v5651_v44 = vmul.f32 %v13242_v17, %v5616_v15  ;;  %v6631_v25 = vsel %vm6630_vm13, %v8770_v24, %v6627_v50 }
 0xe23   : > { %v13515_v12 = vmul.f32 0.70710677, %v13506_v45  ;;  %v8111_v39 = vclamps-f32 %v6597_v23, 1.0  ;;  %v6636_v3 = vsel %vm6633_vm14, %v6635_v7, %v6631_v25  ;;  %v5552_v61 = vmul.f32 0.5, %v5551_v60 }
 0xe24   : > { %v7384_v19 = vpop.f32.mrf.mxu1  ;;  %v5686_v26 = vadd.f32 %v13257_v1, %v5651_v44  ;;  %v6637_v52 = vmul.f32 %v6636_v3, %v6612_v5 }
 0xe25   : > { %v7385_v46 = vadd.f32 %v13518_v40, %v7384_v19  ;;  %v5198_v57 = vpop.xlane.xlu0 %5197  ;;  %v6640_v24 = vmul.f32 %v13515_v12, %v13515_v12  ;;  %v7216_v42 = vadd.f32 1.0, %v8111_v39  ;;  %v5553_v5 = vsub.f32 1.5, %v5552_v61 }
 0xe26   : > { %v5234_v59 = vmul.f32 %v5198_v57, %v10296_v2  ;;  %v5704_v53 = vpack.c.bf16 %v5686_v26, %v5685_v22  ;;  %v8112_v11 = vclamps-f32 %v6637_v52, 1.0 }
 0xe27   : > { %v7448_v48 = vadd.f32 %v7385_v46, %v14235_v35  ;;  %v13527_v41 = vmin.f32 %v6640_v24, 16.0  ;;  %v7248_v37 = vmul.f32 %v7216_v42, %v5872_v58 }
 0xe28   : > { %v5266_v55 = vadd.f32 1e-05, %v5234_v59  ;;  %v5823_v14 = vpop.f32.mrf.mxu2  ;;  %8092 = vmatmul.msk.bf16.gmra.mxu2 %vm1515_vm10, %v5704_v53  ;;  %v7217_v30 = vadd.f32 1.0, %v8112_v11  ;;  %v5554_v53 = vmul.f32 %v13508_v38, %v5553_v5 }
 0xe29   : > { %7480 = vst.msk [vmem:[%s13097_s16 + $0x58] sm:$0xff] %vm1515_vm10, %v7448_v48  ;;  %v6642_v13 = vmul.f32 2.1237322e-06, %v13527_v41  ;;  %v6653_v43 = vmul.f32 3.8918573e-05, %v13527_v41  ;;  %v13538_v20 = vadd.f32 %v13224_v9, %v5823_v14 }
 0xe2a   : > { %8773 = vrsqrt.f32 %v5266_v55  ;;  %v7249_v31 = vmul.f32 %v7217_v30, %v5873_v28  ;;  %vm5565_vm6 = vweird.f32 %v5266_v55 }
 0xe2b   : > { %v6643_v49 = vadd.f32 0.00028619796, %v6642_v13  ;;  %v6654_v18 = vadd.f32 0.001143296, %v6653_v43  ;;  %v13541_v62 = vmul.f32 0.70710677, %v13538_v20 }
 0xe2c   : > { %v7272_v15 = vpack.c.bf16 %v7249_v31, %v7248_v37 }
 0xe2d   : > { %v6655_v34 = vmul.f32 %v6654_v18, %v13527_v41  ;;  %v6644_v50 = vmul.f32 %v6643_v49, %v13527_v41  ;;  %v6680_v23 = vmul.f32 %v13541_v62, %v13541_v62  ;;  %v5558_v49 = vsel %vm5557_vm5, %v13508_v38, %v5554_v53 }
 0xe2e   : > { %8143 = vmatmul.msk.bf16.gmra.mxu1 %vm1403_vm0, %v7272_v15  ;;  %v5617_v5 = vmul.f32 %v5558_v49, %v13107_v10 }
 0xe2f   : > { %v6656_v7 = vadd.f32 0.014752088, %v6655_v34  ;;  %v13548_v22 = vmin.f32 %v6680_v23, 16.0  ;;  %v6645_v39 = vadd.f32 0.0036580483, %v6644_v50 }
 0xe30   : > { %v8774_v44 = vpop.eup %8773 }
 0xe31   : > { %v5560_v25 = vmul.f32 %v8774_v44, %v5266_v55  ;;  %v6657_v19 = vmul.f32 %v6656_v7, %v13527_v41  ;;  %v6682_v3 = vmul.f32 2.1237322e-06, %v13548_v22  ;;  %v6693_v26 = vmul.f32 3.8918573e-05, %v13548_v22 }
 0xe32   : > { %v6646_v42 = vmul.f32 %v6645_v39, %v13527_v41  ;;  %vm5566_vm3 = vweird.f32 %v8774_v44 }
 0xe33   : > { %v5561_v46 = vmul.f32 %v8774_v44, %v5560_v25  ;;  %v6658_v52 = vadd.f32 0.112945676, %v6657_v19  ;;  %v6683_v57 = vadd.f32 0.00028619796, %v6682_v3  ;;  %v6694_v24 = vadd.f32 0.001143296, %v6693_v26  ;;  %vm5567_vm7 = vmor %vm5565_vm6, %vm5566_vm3 }
 0xe34   : > { %v5826_v4 = vpop.f32.mrf.mxu2  ;;  %v6647_v18 = vadd.f32 0.05243302, %v6646_v42 }
 0xe35   : > { %v13554_v59 = vadd.f32 %v13224_v9, %v5826_v4  ;;  %v5562_v35 = vmul.f32 0.5, %v5561_v46  ;;  %v6659_v48 = vmul.f32 %v6658_v52, %v13527_v41  ;;  %v6684_v11 = vmul.f32 %v6683_v57, %v13548_v22 }
 0xe36   : > { %v6695_v58 = vmul.f32 %v6694_v24, %v13548_v22  ;;  %v6648_v25 = vmul.f32 %v6647_v18, %v13527_v41  ;;  %v5652_v4 = vmul.f32 %v13242_v17, %v5617_v5 }
 0xe37   : > { %v13563_v28 = vmul.f32 0.70710677, %v13554_v59  ;;  %v5563_v14 = vsub.f32 1.5, %v5562_v35  ;;  %v6660_v30 = vadd.f32 0.4994258, %v6659_v48 }
 0xe38   : > { %v6685_v60 = vadd.f32 0.0036580483, %v6684_v11  ;;  %v6696_v13 = vadd.f32 0.014752088, %v6695_v58  ;;  %v6649_v10 = vadd.f32 0.18741608, %v6648_v25 }
 0xe39   : > { %v6720_v43 = vmul.f32 %v13563_v28, %v13563_v28  ;;  %v5564_v37 = vmul.f32 %v8774_v44, %v5563_v14  ;;  %v6661_v31 = vmul.f32 %v6660_v30, %v13527_v41 }
 0xe3a   : > { %v6697_v15 = vmul.f32 %v6696_v13, %v13548_v22  ;;  %v6686_v63 = vmul.f32 %v6685_v60, %v13548_v22  ;;  %v5687_v60 = vadd.f32 %v13257_v1, %v5652_v4  ;;  %v6650_v13 = vmul.f32 %v6649_v10, %v13527_v41 }
 0xe3b   : > { %v5568_v61 = vsel %vm5567_vm7, %v8774_v44, %v5564_v37  ;;  %v6662_v34 = vadd.f32 1.0, %v6661_v31  ;;  %v13572_v50 = vmin.f32 %v6720_v43, 16.0 }
 0xe3c   : > { %v6698_v23 = vadd.f32 0.112945676, %v6697_v15  ;;  %v5828_v7 = vpop.f32.mrf.mxu2  ;;  %v5618_v55 = vmul.f32 %v5568_v61, %v13135_v33  ;;  %v6687_v19 = vadd.f32 0.05243302, %v6686_v63  ;;  %v6651_v5 = vadd.f32 1.1283791, %v6650_v13 }
 0xe3d   : > { %8775 = vrcp.f32 %v6662_v34  ;;  %v6722_v39 = vmul.f32 2.1237322e-06, %v13572_v50  ;;  %v6733_v44 = vmul.f32 3.8918573e-05, %v13572_v50  ;;  %v13581_v3 = vadd.f32 %v13224_v9, %v5828_v7 }
 0xe3e   : > { %v6699_v38 = vmul.f32 %v6698_v23, %v13548_v22  ;;  %v5653_v57 = vmul.f32 %v13242_v17, %v5618_v55  ;;  %v6688_v53 = vmul.f32 %v6687_v19, %v13548_v22  ;;  %vm6668_vm8 = vweird.f32 %v6662_v34 }
 0xe3f   : > { %v6734_v46 = vadd.f32 0.001143296, %v6733_v44  ;;  %v13584_v52 = vmul.f32 0.70710677, %v13581_v3  ;;  %v6723_v35 = vadd.f32 0.00028619796, %v6722_v39 }
 0xe40   : > { %v6700_v26 = vadd.f32 0.4994258, %v6699_v38  ;;  %v5688_v17 = vadd.f32 %v13257_v1, %v5653_v57  ;;  %v6689_v43 = vadd.f32 0.18741608, %v6688_v53  ;;  %v6674_v15 = vand.u32 2147483648, %v6662_v34  ;;  %v5201_v38 = vpop.xlane.xlu1 %5200 }
 0xe41   : > { %v6735_v48 = vmul.f32 %v6734_v46, %v13572_v50  ;;  %v6760_v9 = vmul.f32 %v13584_v52, %v13584_v52  ;;  %v6724_v37 = vmul.f32 %v6723_v35, %v13572_v50  ;;  %v6672_v1 = vand.u32 2147483647, %v6662_v34 }
 0xe42   : > { %v6701_v33 = vmul.f32 %v6700_v26, %v13548_v22  ;;  %v5705_v63 = vpack.c.bf16 %v5688_v17, %v5687_v60  ;;  %v6690_v19 = vmul.f32 %v6689_v43, %v13548_v22  ;;  %v6675_v46 = vor.u32 1.1754944e-38, %v6674_v15 }
 0xe43   : > { %v8776_v24 = vpop.eup %8775  ;;  %v6736_v58 = vadd.f32 0.014752088, %v6735_v48  ;;  %v13595_v30 = vmin.f32 %v6760_v9, 16.0  ;;  %v6725_v39 = vadd.f32 0.0036580483, %v6724_v37  ;;  %vm6673_vm11 = vcmp.eq.f32.partialorder %v6672_v1, 8.507059e+37 }
 0xe44   : > { %v6664_v42 = vmul.f32 %v8776_v24, %v6662_v34  ;;  %v13593_v11 = vadd.f32 1.0, %v6701_v33  ;;  %vm6669_vm2 = vweird.f32 %v8776_v24  ;;  %8093 = vmatmul.msk.bf16.gmra.mxu2 %vm1515_vm10, %v5705_v63  ;;  %v5235_v57 = vmul.f32 %v5201_v38, %v10296_v2 }
 0xe45   : > { %v6737_v49 = vmul.f32 %v6736_v58, %v13572_v50  ;;  %v6762_v18 = vmul.f32 2.1237322e-06, %v13595_v30  ;;  %v6773_v61 = vmul.f32 3.8918573e-05, %v13595_v30  ;;  %vm6670_vm9 = vmor %vm6668_vm8, %vm6669_vm2  ;;  %v6652_v35 = vmul.f32 %v6651_v5, %v13515_v12 }
 0xe46   : > { %v6665_v14 = vsub.f32 1.0, %v6664_v42  ;;  %8777 = vrcp.f32 %v13593_v11  ;;  %v6691_v22 = vadd.f32 1.1283791, %v6690_v19  ;;  %v6726_v9 = vmul.f32 %v6725_v39, %v13572_v50 }
 0xe47   : > { %v6738_v7 = vadd.f32 0.112945676, %v6737_v49  ;;  %v6763_v41 = vadd.f32 0.00028619796, %v6762_v18  ;;  %v6774_v55 = vadd.f32 0.001143296, %v6773_v61  ;;  %vm6708_vm12 = vweird.f32 %v13593_v11 }
 0xe48   : > { %v6666_v31 = vmul.f32 %v8776_v24, %v6665_v14  ;;  %v6714_v42 = vand.u32 2147483648, %v13593_v11  ;;  %v6712_v43 = vand.u32 2147483647, %v13593_v11  ;;  %v13618_v49 = vadd.f32 1e-05, %v5235_v57 }
 0xe49   : > { %v6739_v44 = vmul.f32 %v6738_v7, %v13572_v50  ;;  %v6764_v10 = vmul.f32 %v6763_v41, %v13595_v30  ;;  %v6775_v34 = vmul.f32 %v6774_v55, %v13595_v30  ;;  %v6727_v18 = vadd.f32 0.05243302, %v6726_v9 }
 0xe4a   : > { %v6667_v23 = vadd.f32 %v8776_v24, %v6666_v31  ;;  %v6692_v15 = vmul.f32 %v6691_v22, %v13541_v62  ;;  %v6715_v61 = vor.u32 1.1754944e-38, %v6714_v42  ;;  %vm6713_vm14 = vcmp.eq.f32.partialorder %v6712_v43, 8.507059e+37 }
 0xe4b   : > { %v6740_v53 = vadd.f32 0.4994258, %v6739_v44  ;;  %v6765_v14 = vadd.f32 0.0036580483, %v6764_v10  ;;  %v6728_v55 = vmul.f32 %v6727_v18, %v13572_v50  ;;  %v5874_v44 = vmul.f32 0.5, %v13506_v45 }
 0xe4c   : > { %v6671_v25 = vsel %vm6670_vm9, %v8776_v24, %v6667_v23  ;;  %v8778_v26 = vpop.eup %8777  ;;  %v6776_v24 = vadd.f32 0.014752088, %v6775_v34 }
 0xe4d   : > { %v6704_v33 = vmul.f32 %v8778_v26, %v13593_v11  ;;  %v6676_v4 = vsel %vm6673_vm11, %v6675_v46, %v6671_v25  ;;  %v6741_v58 = vmul.f32 %v6740_v53, %v13572_v50  ;;  %vm6709_vm1 = vweird.f32 %v8778_v26 }
 0xe4e   : > { %v6777_v60 = vmul.f32 %v6776_v24, %v13595_v30  ;;  %v6677_v17 = vmul.f32 %v6676_v4, %v6652_v35  ;;  %vm6710_vm13 = vmor %vm6708_vm12, %vm6709_vm1  ;;  %v6766_v63 = vmul.f32 %v6765_v14, %v13595_v30  ;;  %v6729_v10 = vadd.f32 0.18741608, %v6728_v55 }
 0xe4f   : > { %v6705_v48 = vsub.f32 1.0, %v6704_v33  ;;  %v6742_v37 = vadd.f32 1.0, %v6741_v58  ;;  %vm5575_vm11 = vweird.f32 %v13618_v49 }
 0xe50   : > { %v6778_v31 = vadd.f32 0.112945676, %v6777_v60  ;;  %v8113_v23 = vclamps-f32 %v6677_v17, 1.0  ;;  %v6767_v25 = vadd.f32 0.05243302, %v6766_v63 }
 0xe51   : > { %v6706_v13 = vmul.f32 %v8778_v26, %v6705_v48  ;;  %8779 = vrcp.f32 %v6742_v37  ;;  %v6730_v48 = vmul.f32 %v6729_v10, %v13572_v50  ;;  %vm6748_vm3 = vweird.f32 %v6742_v37 }
 0xe52   : > { %v6779_v7 = vmul.f32 %v6778_v31, %v13595_v30  ;;  %8781 = vrsqrt.f32 %v13618_v49  ;;  %v7218_v38 = vadd.f32 1.0, %v8113_v23  ;;  %v6768_v33 = vmul.f32 %v6767_v25, %v13595_v30 }
 0xe53   : > { %v6707_v12 = vadd.f32 %v8778_v26, %v6706_v13  ;;  %v6752_v14 = vand.u32 2147483647, %v6742_v37  ;;  %v6731_v60 = vadd.f32 1.1283791, %v6730_v48 }
 0xe54   : > { %v6780_v11 = vadd.f32 0.4994258, %v6779_v7  ;;  %v7250_v53 = vmul.f32 %v7218_v38, %v5874_v44  ;;  %v6769_v42 = vadd.f32 0.18741608, %v6768_v33 }
 0xe55   : > { %v6711_v1 = vsel %vm6710_vm13, %v8778_v26, %v6707_v12  ;;  %v5875_v26 = vmul.f32 0.5, %v13538_v20  ;;  %v6754_v20 = vand.u32 2147483648, %v6742_v37  ;;  %vm6753_vm5 = vcmp.eq.f32.partialorder %v6752_v14, 8.507059e+37 }
 0xe56   : > { %v6716_v41 = vsel %vm6713_vm14, %v6715_v61, %v6711_v1  ;;  %v6781_v19 = vmul.f32 %v6780_v11, %v13595_v30  ;;  %v6770_v50 = vmul.f32 %v6769_v42, %v13595_v30  ;;  %v6732_v63 = vmul.f32 %v6731_v60, %v13563_v28 }
 0xe57   : > { %v6717_v5 = vmul.f32 %v6716_v41, %v6692_v15  ;;  %v8780_v39 = vpop.eup %8779  ;;  %v6755_v31 = vor.u32 1.1754944e-38, %v6754_v20 }
 0xe58   : > { %v6744_v34 = vmul.f32 %v8780_v39, %v6742_v37  ;;  %v6782_v4 = vadd.f32 1.0, %v6781_v19  ;;  %v13630_v57 = vpop.eup %8781  ;;  %vm6749_vm15 = vweird.f32 %v8780_v39  ;;  %v6771_v7 = vadd.f32 1.1283791, %v6770_v50  ;;  %v8852_v50 = vld [vmem:[#allocation26] ss:$0 sm:$0xff] }
 0xe59   : > { %v8114_v62 = vclamps-f32 %v6717_v5, 1.0  ;;  %v5570_v45 = vmul.f32 %v13630_v57, %v13618_v49  ;;  %vm6750_vm4 = vmor %vm6748_vm3, %vm6749_vm15  ;;  %vm5576_vm9 = vweird.f32 %v13630_v57 }
 0xe5a   : > { %v6745_v35 = vsub.f32 1.0, %v6744_v34  ;;  %8783 = vrcp.f32 %v6782_v4  ;;  %v6792_v41 = vand.u32 2147483647, %v6782_v4  ;;  %v6794_v5 = vand.u32 2147483648, %v6782_v4  ;;  %vm5577_vm1 = vmor %vm5575_vm11, %vm5576_vm9 }
 0xe5b   : > { %v7219_v46 = vadd.f32 1.0, %v8114_v62  ;;  %v5571_v43 = vmul.f32 %v13630_v57, %v5570_v45  ;;  %vm6788_vm7 = vweird.f32 %v6782_v4 }
 0xe5c   : > { %v6746_v9 = vmul.f32 %v8780_v39, %v6745_v35  ;;  %v6795_v38 = vor.u32 1.1754944e-38, %v6794_v5  ;;  %vm6793_vm8 = vcmp.eq.f32.partialorder %v6792_v41, 8.507059e+37 }
 0xe5d   : > { %v7251_v24 = vmul.f32 %v7219_v46, %v5875_v26  ;;  %v5572_v1 = vmul.f32 0.5, %v5571_v43  ;;  %v14237_v43 = vld [vmem:[#allocation92_spill] sm:$0xff] }
 0xe5e   : > { %v6747_v58 = vadd.f32 %v8780_v39, %v6746_v9 }
 0xe5f   : > { %v7273_v22 = vpack.c.bf16 %v7251_v24, %v7250_v53  ;;  %v5573_v30 = vsub.f32 1.5, %v5572_v1  ;;  %v5877_v24 = vmul.f32 0.5, %v13581_v3 }
 0xe60   : > { %v6751_v17 = vsel %vm6750_vm4, %v8780_v39, %v6747_v58  ;;  %v8784_v13 = vpop.eup %8783 }
 0xe61   : > { %8144 = vmatmul.msk.bf16.gmra.mxu1 %vm1403_vm0, %v7273_v22  ;;  %v6784_v18 = vmul.f32 %v8784_v13, %v6782_v4  ;;  %v6756_v61 = vsel %vm6753_vm5, %v6755_v31, %v6751_v17  ;;  %vm6789_vm6 = vweird.f32 %v8784_v13  ;;  %v5574_v26 = vmul.f32 %v13630_v57, %v5573_v30  ;;  %v14236_v22 = vld [vmem:[#allocation91_spill] sm:$0xff] }
 0xe62   : > { %v6757_v55 = vmul.f32 %v6756_v61, %v6732_v63  ;;  %vm6790_vm2 = vmor %vm6788_vm7, %vm6789_vm6  ;;  %v8854_v63 = vld [vmem:[#allocation28] ss:$0 sm:$0xff] }
 0xe63   : > { %v6785_v37 = vsub.f32 1.0, %v6784_v18  ;;  %v5578_v9 = vsel %vm5577_vm1, %v13630_v57, %v5574_v26  ;;  %v13656_v18 = vld [vmem:[#allocation29] ss:$0 sm:$0xff] }
 0xe64   : > { %v5204_v12 = vpop.xlane.xlu2 %5203  ;;  %v8115_v62 = vclamps-f32 %v6757_v55, 1.0  ;;  %v5619_v49 = vmul.f32 %v5578_v9, %v13154_v32 }
 0xe65   : > { %v5236_v15 = vmul.f32 %v5204_v12, %v10296_v2  ;;  %v6786_v11 = vmul.f32 %v8784_v13, %v6785_v37  ;;  %v6772_v2 = vmul.f32 %v6771_v7, %v13584_v52  ;;  %v5876_v52 = vmul.f32 0.5, %v13554_v59 }
 0xe66   : > { %v7220_v34 = vadd.f32 1.0, %v8115_v62  ;;  %v5654_v12 = vmul.f32 %v8852_v50, %v5619_v49 }
 0xe67   : > { %v5268_v23 = vadd.f32 1e-05, %v5236_v15  ;;  %v6787_v25 = vadd.f32 %v8784_v13, %v6786_v11 }
 0xe68   : > { %v7252_v20 = vmul.f32 %v7220_v34, %v5876_v52  ;;  %v5689_v37 = vadd.f32 %v8854_v63, %v5654_v12 }
 0xe69   : > { %8785 = vrsqrt.f32 %v5268_v23  ;;  %v6791_v19 = vsel %vm6790_vm2, %v8784_v13, %v6787_v25  ;;  %vm5585_vm13 = vweird.f32 %v5268_v23 }
 0xe6a   : > { %v6796_v28 = vsel %vm6793_vm8, %v6795_v38, %v6791_v19  ;;  %v14238_v19 = vld [vmem:[#allocation86_spill] sm:$0xff] }
 0xe6b   : > { %v6797_v44 = vmul.f32 %v6796_v28, %v6772_v2 }
 0xe6d   : > { %v8116_v33 = vclamps-f32 %v6797_v44, 1.0 }
 0xe6f   : > { %v8786_v39 = vpop.eup %8785  ;;  %v7221_v35 = vadd.f32 1.0, %v8116_v33 }
 0xe70   : > { %v5580_v46 = vmul.f32 %v8786_v39, %v5268_v23  ;;  %vm5586_vm12 = vweird.f32 %v8786_v39 }
 0xe71   : > { %v7253_v42 = vmul.f32 %v7221_v35, %v5877_v24  ;;  %vm5587_vm14 = vmor %vm5585_vm13, %vm5586_vm12 }
 0xe72   : > { %v5581_v53 = vmul.f32 %v8786_v39, %v5580_v46 }
 0xe73   : > { %v7387_v10 = vpop.f32.mrf.mxu1  ;;  %v7274_v14 = vpack.c.bf16 %v7253_v42, %v7252_v20  ;;  %v14239_v42 = vld [vmem:[#allocation93_spill] sm:$0xff] }
 0xe74   : > { %v7388_v4 = vadd.f32 %v13518_v40, %v7387_v10  ;;  %v5582_v45 = vmul.f32 0.5, %v5581_v53 }
 0xe75   : > { %8145 = vmatmul.msk.bf16.gmra.mxu1 %vm1403_vm0, %v7274_v14 }
 0xe76   : > { %v7449_v48 = vadd.f32 %v7388_v4, %v14236_v22  ;;  %v5583_v58 = vsub.f32 1.5, %v5582_v45 }
 0xe78   : > { %7481 = vst.msk [vmem:[%s13097_s16 + $0x60] sm:$0xff] %vm1515_vm10, %v7449_v48  ;;  %v5584_v60 = vmul.f32 %v8786_v39, %v5583_v58 }
 0xe7a   : > { %v5588_v57 = vsel %vm5587_vm14, %v8786_v39, %v5584_v60 }
 0xe7b   : > { %v7389_v59 = vpop.f32.mrf.mxu1  ;;  %v5620_v17 = vmul.f32 %v5588_v57, %v13352_v0  ;;  %v5831_v13 = vpop.f32.mrf.mxu2 }
 0xe7c   : > { %v7390_v3 = vadd.f32 %v13518_v40, %v7389_v59  ;;  %v13659_v32 = vadd.f32 %v13656_v18, %v5831_v13 }
 0xe7d   : > { %v5655_v15 = vmul.f32 %v8852_v50, %v5620_v17 }
 0xe7e   : > { %v7450_v31 = vadd.f32 %v7390_v3, %v14237_v43  ;;  %v13664_v61 = vmul.f32 0.70710677, %v13659_v32 }
 0xe7f   : > { %v5690_v23 = vadd.f32 %v8854_v63, %v5655_v15 }
 0xe80   : > { %7482 = vst.msk [vmem:[%s13097_s16 + $0x68] sm:$0xff] %vm1515_vm10, %v7450_v31  ;;  %v6800_v0 = vmul.f32 %v13664_v61, %v13664_v61 }
 0xe81   : > { %v5706_v1 = vpack.c.bf16 %v5690_v23, %v5689_v37 }
 0xe82   : > { %v13668_v7 = vmin.f32 %v6800_v0, 16.0 }
 0xe83   : > { %v5833_v41 = vpop.f32.mrf.mxu2  ;;  %8094 = vmatmul.msk.bf16.gmra.mxu2 %vm1515_vm10, %v5706_v1 }
 0xe84   : > { %v6802_v5 = vmul.f32 2.1237322e-06, %v13668_v7  ;;  %v6813_v55 = vmul.f32 3.8918573e-05, %v13668_v7  ;;  %v13674_v11 = vadd.f32 %v13656_v18, %v5833_v41 }
 0xe85   : > { %v7392_v25 = vpop.f32.mrf.mxu1 }
 0xe86   : > { %v7393_v30 = vadd.f32 %v13518_v40, %v7392_v25  ;;  %v6803_v38 = vadd.f32 0.00028619796, %v6802_v5  ;;  %v6814_v62 = vadd.f32 0.001143296, %v6813_v55  ;;  %v13678_v2 = vmul.f32 0.70710677, %v13674_v11 }
 0xe88   : > { %v7451_v28 = vadd.f32 %v7393_v30, %v14238_v19  ;;  %v6804_v39 = vmul.f32 %v6803_v38, %v13668_v7  ;;  %v6815_v44 = vmul.f32 %v6814_v62, %v13668_v7  ;;  %v6840_v26 = vmul.f32 %v13678_v2, %v13678_v2 }
 0xe8a   : > { %7483 = vst.msk [vmem:[%s13097_s16 + $0x70] sm:$0xff] %vm1515_vm10, %v7451_v28  ;;  %v6816_v46 = vadd.f32 0.014752088, %v6815_v44  ;;  %v13687_v10 = vmin.f32 %v6840_v26, 16.0  ;;  %v6805_v33 = vadd.f32 0.0036580483, %v6804_v39 }
 0xe8b   : > { %v5836_v34 = vpop.f32.mrf.mxu2 }
 0xe8c   : > { %v6817_v4 = vmul.f32 %v6816_v46, %v13668_v7  ;;  %v13691_v53 = vadd.f32 %v13656_v18, %v5836_v34  ;;  %v6842_v24 = vmul.f32 2.1237322e-06, %v13687_v10  ;;  %v6853_v35 = vmul.f32 3.8918573e-05, %v13687_v10 }
 0xe8d   : > { %v7394_v52 = vpop.f32.mrf.mxu1  ;;  %v6806_v49 = vmul.f32 %v6805_v33, %v13668_v7 }
 0xe8e   : > { %v7395_v22 = vadd.f32 %v13518_v40, %v7394_v52  ;;  %v6818_v48 = vadd.f32 0.112945676, %v6817_v4  ;;  %v6843_v9 = vadd.f32 0.00028619796, %v6842_v24  ;;  %v6854_v45 = vadd.f32 0.001143296, %v6853_v35 }
 0xe8f   : > { %v13697_v20 = vmul.f32 0.70710677, %v13691_v53  ;;  %v6807_v50 = vadd.f32 0.05243302, %v6806_v49 }
 0xe90   : > { %v7452_v58 = vadd.f32 %v7395_v22, %v14239_v42  ;;  %v6819_v14 = vmul.f32 %v6818_v48, %v13668_v7  ;;  %v6844_v60 = vmul.f32 %v6843_v9, %v13687_v10  ;;  %v6855_v59 = vmul.f32 %v6854_v45, %v13687_v10 }
 0xe91   : > { %v6880_v3 = vmul.f32 %v13697_v20, %v13697_v20  ;;  %v6808_v25 = vmul.f32 %v6807_v50, %v13668_v7 }
 0xe92   : > { %7484 = vst.msk [vmem:[%s13097_s16 + $0x78] sm:$0xff] %vm1515_vm10, %v7452_v58  ;;  %v6820_v57 = vadd.f32 0.4994258, %v6819_v14  ;;  %v6845_v17 = vadd.f32 0.0036580483, %v6844_v60 }
 0xe93   : > { %v6856_v13 = vadd.f32 0.014752088, %v6855_v59  ;;  %v13708_v43 = vmin.f32 %v6880_v3, 16.0  ;;  %v5838_v31 = vpop.f32.mrf.mxu2  ;;  %v6809_v44 = vadd.f32 0.18741608, %v6808_v25 }
 0xe94   : > { %v6821_v12 = vmul.f32 %v6820_v57, %v13668_v7  ;;  %v13712_v15 = vadd.f32 %v13656_v18, %v5838_v31  ;;  %v6846_v0 = vmul.f32 %v6845_v17, %v13687_v10 }
 0xe95   : > { %v6857_v63 = vmul.f32 %v6856_v13, %v13687_v10  ;;  %v6882_v37 = vmul.f32 2.1237322e-06, %v13708_v43  ;;  %v6893_v1 = vmul.f32 3.8918573e-05, %v13708_v43  ;;  %v6810_v45 = vmul.f32 %v6809_v44, %v13668_v7 }
 0xe96   : > { %v6822_v23 = vadd.f32 1.0, %v6821_v12  ;;  %v13719_v41 = vmul.f32 0.70710677, %v13712_v15  ;;  %v6847_v62 = vadd.f32 0.05243302, %v6846_v0 }
 0xe97   : > { %v6858_v5 = vadd.f32 0.112945676, %v6857_v63  ;;  %v6883_v55 = vadd.f32 0.00028619796, %v6882_v37  ;;  %v6894_v19 = vadd.f32 0.001143296, %v6893_v1 }
 0xe98   : > { %8787 = vrcp.f32 %v6822_v23  ;;  %v6920_v28 = vmul.f32 %v13719_v41, %v13719_v41  ;;  %v6848_v52 = vmul.f32 %v6847_v62, %v13687_v10  ;;  %v6832_v60 = vand.u32 2147483647, %v6822_v23 }
 0xe99   : > { %v6859_v30 = vmul.f32 %v6858_v5, %v13687_v10  ;;  %v6884_v38 = vmul.f32 %v6883_v55, %v13708_v43  ;;  %v6895_v26 = vmul.f32 %v6894_v19, %v13708_v43  ;;  %v6834_v3 = vand.u32 2147483648, %v6822_v23 }
 0xe9a   : > { %v13727_v46 = vmin.f32 %v6920_v28, 16.0  ;;  %v6849_v57 = vadd.f32 0.18741608, %v6848_v52  ;;  %v6811_v7 = vadd.f32 1.1283791, %v6810_v45  ;;  %vm6828_vm3 = vweird.f32 %v6822_v23 }
 0xe9b   : > { %v6860_v39 = vadd.f32 0.4994258, %v6859_v30  ;;  %v6885_v33 = vadd.f32 0.0036580483, %v6884_v38  ;;  %v6896_v24 = vadd.f32 0.014752088, %v6895_v26 }
 0xe9c   : > { %v6922_v35 = vmul.f32 2.1237322e-06, %v13727_v46  ;;  %v6933_v22 = vmul.f32 3.8918573e-05, %v13727_v46  ;;  %v6835_v5 = vor.u32 1.1754944e-38, %v6834_v3  ;;  %v6850_v55 = vmul.f32 %v6849_v57, %v13687_v10 }
 0xe9d   : > { %v6861_v34 = vmul.f32 %v6860_v39, %v13687_v10  ;;  %v6897_v42 = vmul.f32 %v6896_v24, %v13708_v43  ;;  %v6886_v59 = vmul.f32 %v6885_v33, %v13708_v43  ;;  %vm6833_vm5 = vcmp.eq.f32.partialorder %v6832_v60, 8.507059e+37 }
 0xe9e   : > { %v8788_v4 = vpop.eup %8787  ;;  %v6923_v58 = vadd.f32 0.00028619796, %v6922_v35  ;;  %v6934_v49 = vadd.f32 0.001143296, %v6933_v22  ;;  %v6812_v39 = vmul.f32 %v6811_v7, %v13664_v61  ;;  %v6851_v33 = vadd.f32 1.1283791, %v6850_v55 }
 0xe9f   : > { %v6824_v48 = vmul.f32 %v8788_v4, %v6822_v23  ;;  %v13733_v9 = vadd.f32 1.0, %v6861_v34  ;;  %v6898_v17 = vadd.f32 0.112945676, %v6897_v42  ;;  %vm6829_vm15 = vweird.f32 %v8788_v4 }
 0xea0   : > { %v6924_v31 = vmul.f32 %v6923_v58, %v13727_v46  ;;  %v6935_v50 = vmul.f32 %v6934_v49, %v13727_v46  ;;  %v6887_v37 = vadd.f32 0.05243302, %v6886_v59  ;;  %vm6830_vm4 = vmor %vm6828_vm3, %vm6829_vm15 }
 0xea1   : > { %v6825_v14 = vsub.f32 1.0, %v6824_v48  ;;  %8789 = vrcp.f32 %v13733_v9  ;;  %v6899_v12 = vmul.f32 %v6898_v17, %v13708_v43  ;;  %v6874_v52 = vand.u32 2147483648, %v13733_v9 }
 0xea2   : > { %v6925_v0 = vadd.f32 0.0036580483, %v6924_v31  ;;  %v6936_v1 = vadd.f32 0.014752088, %v6935_v50  ;;  %v6888_v44 = vmul.f32 %v6887_v37, %v13708_v43  ;;  %v6872_v61 = vand.u32 2147483647, %v13733_v9 }
 0xea3   : > { %v6826_v13 = vmul.f32 %v8788_v4, %v6825_v14  ;;  %v6900_v25 = vadd.f32 0.4994258, %v6899_v12  ;;  %vm6868_vm7 = vweird.f32 %v13733_v9  ;;  %v6875_v57 = vor.u32 1.1754944e-38, %v6874_v52 }
 0xea4   : > { %v6926_v62 = vmul.f32 %v6925_v0, %v13727_v46  ;;  %v6937_v19 = vmul.f32 %v6936_v1, %v13727_v46  ;;  %v6889_v49 = vadd.f32 0.18741608, %v6888_v44  ;;  %v6852_v50 = vmul.f32 %v6851_v33, %v13678_v2 }
 0xea5   : > { %v6827_v63 = vadd.f32 %v8788_v4, %v6826_v13  ;;  %v6901_v26 = vmul.f32 %v6900_v25, %v13708_v43  ;;  %v14240_v13 = vld [vmem:[#allocation94_spill] sm:$0xff]  ;;  %vm6873_vm8 = vcmp.eq.f32.partialorder %v6872_v61, 8.507059e+37 }
 0xea6   : > { %v6938_v34 = vadd.f32 0.112945676, %v6937_v19  ;;  %v6927_v22 = vadd.f32 0.05243302, %v6926_v62  ;;  %v6890_v37 = vmul.f32 %v6889_v49, %v13708_v43  ;;  %v5878_v43 = vmul.f32 0.5, %v13659_v32 }
 0xea7   : > { %v8790_v30 = vpop.eup %8789  ;;  %v6831_v38 = vsel %vm6830_vm4, %v8788_v4, %v6827_v63  ;;  %v13750_v35 = vadd.f32 1.0, %v6901_v26  ;;  %v5879_v19 = vmul.f32 0.5, %v13674_v11 }
 0xea8   : > { %v6836_v28 = vsel %vm6833_vm5, %v6835_v5, %v6831_v38  ;;  %v6864_v23 = vmul.f32 %v8790_v30, %v13733_v9  ;;  %v6939_v48 = vmul.f32 %v6938_v34, %v13727_v46  ;;  %vm6869_vm6 = vweird.f32 %v8790_v30 }
 0xea9   : > { %v6837_v24 = vmul.f32 %v6836_v28, %v6812_v39  ;;  %8791 = vrcp.f32 %v13750_v35  ;;  %vm6870_vm2 = vmor %vm6868_vm7, %vm6869_vm6  ;;  %v6928_v17 = vmul.f32 %v6927_v22, %v13727_v46  ;;  %v6891_v39 = vadd.f32 1.1283791, %v6890_v37 }
 0xeaa   : > { %v6865_v10 = vsub.f32 1.0, %v6864_v23  ;;  %v6940_v59 = vadd.f32 0.4994258, %v6939_v48  ;;  %v6912_v44 = vand.u32 2147483647, %v13750_v35  ;;  %v6914_v26 = vand.u32 2147483648, %v13750_v35 }
 0xeab   : > { %v5841_v4 = vpop.f32.mrf.mxu2  ;;  %v7397_v45 = vpop.f32.mrf.mxu1  ;;  %v8117_v3 = vclamps-f32 %v6837_v24, 1.0  ;;  %v6929_v38 = vadd.f32 0.18741608, %v6928_v17  ;;  %vm6908_vm11 = vweird.f32 %v13750_v35 }
 0xeac   : > { %v6866_v42 = vmul.f32 %v8790_v30, %v6865_v10  ;;  %v7398_v58 = vadd.f32 %v13518_v40, %v7397_v45  ;;  %v13757_v14 = vadd.f32 %v13656_v18, %v5841_v4  ;;  %v6941_v12 = vmul.f32 %v6940_v59, %v13727_v46 }
 0xead   : > { %v7222_v25 = vadd.f32 1.0, %v8117_v3  ;;  %v6930_v32 = vmul.f32 %v6929_v38, %v13727_v46  ;;  %v6892_v3 = vmul.f32 %v6891_v39, %v13697_v20  ;;  %vm6913_vm12 = vcmp.eq.f32.partialorder %v6912_v44, 8.507059e+37 }
 0xeae   : > { %v6867_v60 = vadd.f32 %v8790_v30, %v6866_v42  ;;  %v7453_v31 = vadd.f32 %v7398_v58, %v14240_v13  ;;  %v13768_v9 = vmul.f32 0.70710677, %v13757_v14  ;;  %v13770_v1 = vadd.f32 1.0, %v6941_v12  ;;  %v14241_v42 = vld [vmem:[#allocation95_spill] sm:$0xff] }
 0xeaf   : > { %v8792_v55 = vpop.eup %8791  ;;  %v7254_v4 = vmul.f32 %v7222_v25, %v5878_v43  ;;  %v6931_v13 = vadd.f32 1.1283791, %v6930_v32 }
 0xeb0   : > { %v6871_v7 = vsel %vm6870_vm2, %v8790_v30, %v6867_v60  ;;  %7485 = vst.msk [vmem:[%s13097_s16 + $0x80] sm:$0xff] %vm1515_vm10, %v7453_v31  ;;  %v6960_v2 = vmul.f32 %v13768_v9, %v13768_v9  ;;  %v6904_v23 = vmul.f32 %v8792_v55, %v13750_v35  ;;  %8793 = vrcp.f32 %v13770_v1 }
 0xeb1   : > { %v6876_v63 = vsel %vm6873_vm8, %v6875_v57, %v6871_v7  ;;  %vm6909_vm9 = vweird.f32 %v8792_v55  ;;  %v6915_v57 = vor.u32 1.1754944e-38, %v6914_v26  ;;  %vm6948_vm14 = vweird.f32 %v13770_v1 }
 0xeb2   : > { %v6877_v0 = vmul.f32 %v6876_v63, %v6852_v50  ;;  %v6905_v33 = vsub.f32 1.0, %v6904_v23  ;;  %v13783_v10 = vmin.f32 %v6960_v2, 16.0  ;;  %vm6910_vm1 = vmor %vm6908_vm11, %vm6909_vm9 }
 0xeb3   : > { %v5843_v5 = vpop.f32.mrf.mxu2  ;;  %v7399_v30 = vpop.f32.mrf.mxu1 }
 0xeb4   : > { %v13775_v62 = vadd.f32 %v13656_v18, %v5843_v5  ;;  %v8118_v28 = vclamps-f32 %v6877_v0, 1.0  ;;  %v7400_v52 = vadd.f32 %v13518_v40, %v7399_v30  ;;  %v6906_v22 = vmul.f32 %v8792_v55, %v6905_v33 }
 0xeb5   : > { %v6962_v48 = vmul.f32 2.1237322e-06, %v13783_v10  ;;  %v6973_v45 = vmul.f32 3.8918573e-05, %v13783_v10  ;;  %v6952_v0 = vand.u32 2147483647, %v13770_v1 }
 0xeb6   : > { %v7223_v34 = vadd.f32 1.0, %v8118_v28  ;;  %v13788_v11 = vmul.f32 0.70710677, %v13775_v62  ;;  %v7454_v61 = vadd.f32 %v7400_v52, %v14241_v42  ;;  %v6907_v49 = vadd.f32 %v8792_v55, %v6906_v22  ;;  %v8794_v59 = vpop.eup %8793 }
 0xeb7   : > { %v6963_v46 = vadd.f32 0.00028619796, %v6962_v48  ;;  %v6974_v60 = vadd.f32 0.001143296, %v6973_v45  ;;  %v6944_v31 = vmul.f32 %v8794_v59, %v13770_v1  ;;  %v6954_v5 = vand.u32 2147483648, %v13770_v1 }
 0xeb8   : > { %v7255_v24 = vmul.f32 %v7223_v34, %v5879_v19  ;;  %v7000_v40 = vmul.f32 %v13788_v11, %v13788_v11  ;;  %7486 = vst.msk [vmem:[%s13097_s16 + $0x88] sm:$0xff] %vm1515_vm10, %v7454_v61  ;;  %v6911_v35 = vsel %vm6910_vm1, %v8792_v55, %v6907_v49  ;;  %vm6949_vm13 = vweird.f32 %v8794_v59 }
 0xeb9   : > { %v6964_v50 = vmul.f32 %v6963_v46, %v13783_v10  ;;  %v6916_v7 = vsel %vm6913_vm12, %v6915_v57, %v6911_v35  ;;  %v6975_v12 = vmul.f32 %v6974_v60, %v13783_v10  ;;  %v6945_v37 = vsub.f32 1.0, %v6944_v31  ;;  %vm6950_vm15 = vmor %vm6948_vm14, %vm6949_vm13 }
 0xeba   : > { %v7275_v58 = vpack.c.bf16 %v7255_v24, %v7254_v4  ;;  %v13800_v17 = vmin.f32 %v7000_v40, 16.0  ;;  %v6917_v30 = vmul.f32 %v6916_v7, %v6892_v3  ;;  %v6955_v26 = vor.u32 1.1754944e-38, %v6954_v5 }
 0xebb   : > { %v6965_v55 = vadd.f32 0.0036580483, %v6964_v50  ;;  %v6976_v25 = vadd.f32 0.014752088, %v6975_v12  ;;  %v6946_v43 = vmul.f32 %v8794_v59, %v6945_v37  ;;  %v6932_v34 = vmul.f32 %v6931_v13, %v13719_v41 }
 0xebc   : > { %8146 = vmatmul.msk.bf16.gmra.mxu1 %vm1403_vm0, %v7275_v58  ;;  %v7002_v20 = vmul.f32 2.1237322e-06, %v13800_v17  ;;  %v7013_v63 = vmul.f32 3.8918573e-05, %v13800_v17  ;;  %v8119_v32 = vclamps-f32 %v6917_v30, 1.0  ;;  %vm6953_vm3 = vcmp.eq.f32.partialorder %v6952_v0, 8.507059e+37 }
 0xebd   : > { %v6966_v19 = vmul.f32 %v6965_v55, %v13783_v10  ;;  %v6977_v28 = vmul.f32 %v6976_v25, %v13783_v10  ;;  %v6947_v44 = vadd.f32 %v8794_v59, %v6946_v43  ;;  %v5880_v57 = vmul.f32 0.5, %v13691_v53 }
 0xebe   : > { %v7003_v38 = vadd.f32 0.00028619796, %v7002_v20  ;;  %v7014_v2 = vadd.f32 0.001143296, %v7013_v63  ;;  %v7224_v41 = vadd.f32 1.0, %v8119_v32  ;;  %v5881_v35 = vmul.f32 0.5, %v13712_v15 }
 0xebf   : > { %v6978_v33 = vadd.f32 0.112945676, %v6977_v28  ;;  %v6951_v24 = vsel %vm6950_vm15, %v8794_v59, %v6947_v44  ;;  %v6967_v22 = vadd.f32 0.05243302, %v6966_v19 }
 0xec0   : > { %v7004_v23 = vmul.f32 %v7003_v38, %v13800_v17  ;;  %v7015_v39 = vmul.f32 %v7014_v2, %v13800_v17  ;;  %v6956_v48 = vsel %vm6953_vm3, %v6955_v26, %v6951_v24  ;;  %v7256_v12 = vmul.f32 %v7224_v41, %v5880_v57 }
 0xec1   : > { %v6979_v45 = vmul.f32 %v6978_v33, %v13783_v10  ;;  %v6957_v40 = vmul.f32 %v6956_v48, %v6932_v34  ;;  %v6968_v60 = vmul.f32 %v6967_v22, %v13783_v10 }
 0xec2   : > { %v7005_v52 = vadd.f32 0.0036580483, %v7004_v23  ;;  %v7016_v4 = vadd.f32 0.014752088, %v7015_v39 }
 0xec3   : > { %v6980_v1 = vadd.f32 0.4994258, %v6979_v45  ;;  %v8120_v46 = vclamps-f32 %v6957_v40, 1.0  ;;  %v6969_v63 = vadd.f32 0.18741608, %v6968_v60 }
 0xec4   : > { %v7006_v42 = vmul.f32 %v7005_v52, %v13800_v17  ;;  %v7017_v61 = vmul.f32 %v7016_v4, %v13800_v17 }
 0xec5   : > { %v6981_v3 = vmul.f32 %v6980_v1, %v13783_v10  ;;  %v7225_v13 = vadd.f32 1.0, %v8120_v46  ;;  %v6970_v53 = vmul.f32 %v6969_v63, %v13783_v10 }
 0xec6   : > { %v7007_v58 = vadd.f32 0.05243302, %v7006_v42  ;;  %v7018_v49 = vadd.f32 0.112945676, %v7017_v61 }
 0xec7   : > { %v6982_v31 = vadd.f32 1.0, %v6981_v3  ;;  %v7257_v20 = vmul.f32 %v7225_v13, %v5881_v35  ;;  %v5846_v37 = vpop.f32.mrf.mxu2  ;;  %v6971_v19 = vadd.f32 1.1283791, %v6970_v53 }
 0xec8   : > { %v7019_v59 = vmul.f32 %v7018_v49, %v13800_v17  ;;  %v7008_v50 = vmul.f32 %v7007_v58, %v13800_v17  ;;  %v13827_v55 = vadd.f32 %v13656_v18, %v5846_v37  ;;  %v13858_v37 = vld [vmem:[#allocation31] ss:$0 sm:$0xff] }
 0xec9   : > { %8795 = vrcp.f32 %v6982_v31  ;;  %v7276_v0 = vpack.c.bf16 %v7257_v20, %v7256_v12  ;;  %v6992_v10 = vand.u32 2147483647, %v6982_v31  ;;  %v6994_v26 = vand.u32 2147483648, %v6982_v31 }
 0xeca   : > { %v7020_v7 = vadd.f32 0.4994258, %v7019_v59  ;;  %v7009_v25 = vadd.f32 0.18741608, %v7008_v50  ;;  %v13832_v38 = vmul.f32 0.70710677, %v13827_v55  ;;  %v6972_v32 = vmul.f32 %v6971_v19, %v13768_v9 }
 0xecb   : > { %vm6988_vm5 = vweird.f32 %v6982_v31  ;;  %vm6993_vm6 = vcmp.eq.f32.partialorder %v6992_v10, 8.507059e+37  ;;  %v6995_v40 = vor.u32 1.1754944e-38, %v6994_v26 }
 0xecc   : > { %v7021_v5 = vmul.f32 %v7020_v7, %v13800_v17  ;;  %8147 = vmatmul.msk.bf16.gmra.mxu1 %vm1403_vm0, %v7276_v0  ;;  %v7010_v30 = vmul.f32 %v7009_v25, %v13800_v17  ;;  %v7040_v43 = vmul.f32 %v13832_v38, %v13832_v38 }
 0xece   : > { %v7022_v15 = vadd.f32 1.0, %v7021_v5  ;;  %v13837_v23 = vmin.f32 %v7040_v43, 16.0  ;;  %v7011_v33 = vadd.f32 1.1283791, %v7010_v30  ;;  %v14242_v43 = vld [vmem:[#allocation85_spill] sm:$0xff] }
 0xecf   : > { %v8796_v2 = vpop.eup %8795  ;;  %v5848_v39 = vpop.f32.mrf.mxu2 }
 0xed0   : > { %8797 = vrcp.f32 %v7022_v15  ;;  %v6984_v28 = vmul.f32 %v8796_v2, %v6982_v31  ;;  %v13840_v34 = vadd.f32 %v13656_v18, %v5848_v39  ;;  %v7042_v52 = vmul.f32 2.1237322e-06, %v13837_v23 }
 0xed1   : > { %v7053_v4 = vmul.f32 3.8918573e-05, %v13837_v23  ;;  %vm6989_vm4 = vweird.f32 %v8796_v2  ;;  %v7012_v58 = vmul.f32 %v7011_v33, %v13788_v11  ;;  %v7032_v60 = vand.u32 2147483647, %v7022_v15 }
 0xed2   : > { %v6985_v44 = vsub.f32 1.0, %v6984_v28  ;;  %v13846_v22 = vmul.f32 0.70710677, %v13840_v34  ;;  %v7043_v45 = vadd.f32 0.00028619796, %v7042_v52  ;;  %vm6990_vm7 = vmor %vm6988_vm5, %vm6989_vm4  ;;  %v7034_v3 = vand.u32 2147483648, %v7022_v15 }
 0xed3   : > { %v7054_v42 = vadd.f32 0.001143296, %v7053_v4  ;;  %vm7028_vm8 = vweird.f32 %v7022_v15  ;;  %vm7033_vm11 = vcmp.eq.f32.partialorder %v7032_v60, 8.507059e+37 }
 0xed4   : > { %v6986_v24 = vmul.f32 %v8796_v2, %v6985_v44  ;;  %v7080_v1 = vmul.f32 %v13846_v22, %v13846_v22  ;;  %v7044_v9 = vmul.f32 %v7043_v45, %v13837_v23  ;;  %v7035_v25 = vor.u32 1.1754944e-38, %v7034_v3 }
 0xed5   : > { %v7055_v41 = vmul.f32 %v7054_v42, %v13837_v23 }
 0xed6   : > { %v8798_v17 = vpop.eup %8797  ;;  %v6987_v61 = vadd.f32 %v8796_v2, %v6986_v24  ;;  %v13853_v59 = vmin.f32 %v7080_v1, 16.0  ;;  %v7045_v20 = vadd.f32 0.0036580483, %v7044_v9 }
 0xed7   : > { %v7024_v48 = vmul.f32 %v8798_v17, %v7022_v15  ;;  %vm7029_vm2 = vweird.f32 %v8798_v17  ;;  %v7056_v13 = vadd.f32 0.014752088, %v7055_v41 }
 0xed8   : > { %v6991_v46 = vsel %vm6990_vm7, %v8796_v2, %v6987_v61  ;;  %v7082_v50 = vmul.f32 2.1237322e-06, %v13853_v59  ;;  %v7093_v11 = vmul.f32 3.8918573e-05, %v13853_v59  ;;  %vm7030_vm9 = vmor %vm7028_vm8, %vm7029_vm2  ;;  %v7046_v52 = vmul.f32 %v7045_v20, %v13837_v23 }
 0xed9   : > { %v7025_v49 = vsub.f32 1.0, %v7024_v48  ;;  %v6996_v57 = vsel %vm6993_vm6, %v6995_v40, %v6991_v46  ;;  %v7057_v63 = vmul.f32 %v7056_v13, %v13837_v23  ;;  %v5882_v48 = vmul.f32 0.5, %v13757_v14 }
 0xeda   : > { %v6997_v31 = vmul.f32 %v6996_v57, %v6972_v32  ;;  %v7083_v53 = vadd.f32 0.00028619796, %v7082_v50  ;;  %v7094_v2 = vadd.f32 0.001143296, %v7093_v11  ;;  %v5883_v61 = vmul.f32 0.5, %v13775_v62 }
 0xedb   : > { %v7026_v35 = vmul.f32 %v8798_v17, %v7025_v49  ;;  %v7058_v30 = vadd.f32 0.112945676, %v7057_v63  ;;  %v7047_v9 = vadd.f32 0.05243302, %v7046_v52 }
 0xedc   : > { %v8121_v5 = vclamps-f32 %v6997_v31, 1.0  ;;  %v7084_v39 = vmul.f32 %v7083_v53, %v13853_v59  ;;  %v7095_v44 = vmul.f32 %v7094_v2, %v13853_v59 }
 0xedd   : > { %v7027_v12 = vadd.f32 %v8798_v17, %v7026_v35  ;;  %v7059_v26 = vmul.f32 %v7058_v30, %v13837_v23  ;;  %v7048_v62 = vmul.f32 %v7047_v9, %v13837_v23 }
 0xede   : > { %v7402_v7 = vpop.f32.mrf.mxu1  ;;  %v7226_v33 = vadd.f32 1.0, %v8121_v5  ;;  %v7096_v4 = vadd.f32 0.014752088, %v7095_v44  ;;  %v7085_v24 = vadd.f32 0.0036580483, %v7084_v39 }
 0xedf   : > { %v7403_v0 = vadd.f32 %v13858_v37, %v7402_v7  ;;  %v7031_v15 = vsel %vm7030_vm9, %v8798_v17, %v7027_v12  ;;  %v7060_v17 = vadd.f32 0.4994258, %v7059_v26  ;;  %v7049_v11 = vadd.f32 0.18741608, %v7048_v62 }
 0xee0   : > { %v7036_v28 = vsel %vm7033_vm11, %v7035_v25, %v7031_v15  ;;  %v7097_v45 = vmul.f32 %v7096_v4, %v13853_v59  ;;  %v7258_v49 = vmul.f32 %v7226_v33, %v5882_v48  ;;  %v7086_v3 = vmul.f32 %v7085_v24, %v13853_v59 }
 0xee1   : > { %v7455_v19 = vadd.f32 %v7403_v0, %v14242_v43  ;;  %v7037_v10 = vmul.f32 %v7036_v28, %v7012_v58  ;;  %v7061_v1 = vmul.f32 %v7060_v17, %v13837_v23  ;;  %v7050_v63 = vmul.f32 %v7049_v11, %v13837_v23 }
 0xee2   : > { %v7098_v41 = vadd.f32 0.112945676, %v7097_v45  ;;  %v7087_v13 = vadd.f32 0.05243302, %v7086_v3  ;;  %v5885_v62 = vmul.f32 0.5, %v13840_v34 }
 0xee3   : > { %7487 = vst.msk [vmem:[%s13097_s16 + $0x90] sm:$0xff] %vm1515_vm10, %v7455_v19  ;;  %v8122_v32 = vclamps-f32 %v7037_v10, 1.0  ;;  %v7062_v60 = vadd.f32 1.0, %v7061_v1  ;;  %v7051_v43 = vadd.f32 1.1283791, %v7050_v63  ;;  %v14243_v10 = vld [vmem:[#allocation96_spill] sm:$0xff] }
 0xee4   : > { %v7099_v57 = vmul.f32 %v7098_v41, %v13853_v59  ;;  %v7088_v12 = vmul.f32 %v7087_v13, %v13853_v59 }
 0xee5   : > { %v7227_v40 = vadd.f32 1.0, %v8122_v32  ;;  %8799 = vrcp.f32 %v7062_v60  ;;  %v7074_v5 = vand.u32 2147483648, %v7062_v60  ;;  %v7072_v2 = vand.u32 2147483647, %v7062_v60 }
 0xee6   : > { %v7404_v42 = vpop.f32.mrf.mxu1  ;;  %v7100_v31 = vadd.f32 0.4994258, %v7099_v57  ;;  %v7089_v25 = vadd.f32 0.18741608, %v7088_v12  ;;  %vm7068_vm12 = vweird.f32 %v7062_v60  ;;  %v7052_v4 = vmul.f32 %v7051_v43, %v13832_v38 }
 0xee7   : > { %v7405_v58 = vadd.f32 %v13858_v37, %v7404_v42  ;;  %v7259_v46 = vmul.f32 %v7227_v40, %v5883_v61  ;;  %v7075_v39 = vor.u32 1.1754944e-38, %v7074_v5  ;;  %vm7073_vm14 = vcmp.eq.f32.partialorder %v7072_v2, 8.507059e+37 }
 0xee8   : > { %v7101_v50 = vmul.f32 %v7100_v31, %v13853_v59  ;;  %v7090_v44 = vmul.f32 %v7089_v25, %v13853_v59 }
 0xee9   : > { %v7456_v14 = vadd.f32 %v7405_v58, %v12188_v8  ;;  %v7277_v35 = vpack.c.bf16 %v7259_v46, %v7258_v49 }
 0xeea   : > { %v7102_v20 = vadd.f32 1.0, %v7101_v50  ;;  %v7091_v17 = vadd.f32 1.1283791, %v7090_v44 }
 0xeeb   : > { %7488 = vst.msk [vmem:[%s13097_s16 + $0x98] sm:$0xff] %vm1515_vm10, %v7456_v14  ;;  %8148 = vmatmul.msk.bf16.gmra.mxu1 %vm1403_vm0, %v7277_v35  ;;  %v8800_v7 = vpop.eup %8799  ;;  %v5884_v35 = vmul.f32 0.5, %v13827_v55 }
 0xeec   : > { %v7064_v8 = vmul.f32 %v8800_v7, %v7062_v60  ;;  %8801 = vrcp.f32 %v7102_v20  ;;  %vm7069_vm1 = vweird.f32 %v8800_v7  ;;  %v7114_v24 = vand.u32 2147483648, %v7102_v20 }
 0xeed   : > { %vm7070_vm13 = vmor %vm7068_vm12, %vm7069_vm1  ;;  %v7112_v42 = vand.u32 2147483647, %v7102_v20  ;;  %vm7108_vm3 = vweird.f32 %v7102_v20  ;;  %v7092_v38 = vmul.f32 %v7091_v17, %v13846_v22 }
 0xeee   : > { %v7065_v0 = vsub.f32 1.0, %v7064_v8  ;;  %v7115_v1 = vor.u32 1.1754944e-38, %v7114_v24 }
 0xeef   : > { %vm7113_vm5 = vcmp.eq.f32.partialorder %v7112_v42, 8.507059e+37 }
 0xef0   : > { %v7066_v53 = vmul.f32 %v8800_v7, %v7065_v0 }
 0xef2   : > { %v7407_v15 = vpop.f32.mrf.mxu1  ;;  %v7067_v19 = vadd.f32 %v8800_v7, %v7066_v53  ;;  %v8802_v28 = vpop.eup %8801 }
 0xef3   : > { %v7408_v30 = vadd.f32 %v13858_v37, %v7407_v15  ;;  %v7104_v33 = vmul.f32 %v8802_v28, %v7102_v20  ;;  %vm7109_vm15 = vweird.f32 %v8802_v28 }
 0xef4   : > { %v7071_v26 = vsel %vm7070_vm13, %v8800_v7, %v7067_v19  ;;  %vm7110_vm4 = vmor %vm7108_vm3, %vm7109_vm15 }
 0xef5   : > { %v7457_v23 = vadd.f32 %v7408_v30, %v14243_v10  ;;  %v7076_v52 = vsel %vm7073_vm14, %v7075_v39, %v7071_v26  ;;  %v7105_v32 = vsub.f32 1.0, %v7104_v33 }
 0xef6   : > { %v7077_v48 = vmul.f32 %v7076_v52, %v7052_v4 }
 0xef7   : > { %7489 = vst.msk [vmem:[%s13097_s16 + $0xa0] sm:$0xff] %vm1515_vm10, %v7457_v23  ;;  %v7106_v45 = vmul.f32 %v8802_v28, %v7105_v32 }
 0xef8   : > { %v8123_v49 = vclamps-f32 %v7077_v48, 1.0 }
 0xef9   : > { %v7107_v40 = vadd.f32 %v8802_v28, %v7106_v45 }
 0xefa   : > { %v7409_v61 = vpop.f32.mrf.mxu1  ;;  %v7228_v60 = vadd.f32 1.0, %v8123_v49 }
 0xefb   : > { %v7410_v59 = vadd.f32 %v13858_v37, %v7409_v61  ;;  %v7111_v9 = vsel %vm7110_vm4, %v8802_v28, %v7107_v40 }
 0xefc   : > { %v7116_v41 = vsel %vm7113_vm5, %v7115_v1, %v7111_v9  ;;  %v7260_v22 = vmul.f32 %v7228_v60, %v5884_v35 }
 0xefd   : > { %v7458_v58 = vadd.f32 %v7410_v59, %v12222_v56  ;;  %v7117_v46 = vmul.f32 %v7116_v41, %v7092_v38 }
 0xeff   : > { %7490 = vst.msk [vmem:[%s13097_s16 + $0xa8] sm:$0xff] %vm1515_vm10, %v7458_v58  ;;  %v8124_v3 = vclamps-f32 %v7117_v46, 1.0 }
 0xf01   : > { %v7229_v56 = vadd.f32 1.0, %v8124_v3 }
 0xf03   : > { %v7261_v31 = vmul.f32 %v7229_v56, %v5885_v62 }
 0xf05   : > { %v7278_v11 = vpack.c.bf16 %v7261_v31, %v7260_v22 }
 0xf06   : > { %v5851_v14 = vpop.f32.mrf.mxu2 }
 0xf07   : > { %v13895_v57 = vadd.f32 %v13656_v18, %v5851_v14  ;;  %8149 = vmatmul.msk.bf16.vlgmr.msra.gmra.mxu3 %vm1403_vm0, %v7278_v11 }
 0xf09   : > { %v13900_v13 = vmul.f32 0.70710677, %v13895_v57 }
 0xf0b   : > { %v7120_v50 = vmul.f32 %v13900_v13, %v13900_v13 }
 0xf0d   : > { %v7121_v7 = vmin.f32 %v7120_v50, 16.0 }
 0xf0e   : > { %v5853_v12 = vpop.f32.mrf.mxu2 }
 0xf0f   : > { %v7122_v20 = vmul.f32 2.1237322e-06, %v7121_v7  ;;  %v7133_v8 = vmul.f32 3.8918573e-05, %v7121_v7  ;;  %v13906_v55 = vadd.f32 %v13656_v18, %v5853_v12 }
 0xf11   : > { %v7123_v34 = vadd.f32 0.00028619796, %v7122_v20  ;;  %v7134_v63 = vadd.f32 0.001143296, %v7133_v8  ;;  %v13909_v0 = vmul.f32 0.70710677, %v13906_v55 }
 0xf13   : > { %v7135_v5 = vmul.f32 %v7134_v63, %v7121_v7  ;;  %v7160_v25 = vmul.f32 %v13909_v0, %v13909_v0  ;;  %v7124_v53 = vmul.f32 %v7123_v34, %v7121_v7 }
 0xf15   : > { %v7136_v2 = vadd.f32 0.014752088, %v7135_v5  ;;  %v7161_v15 = vmin.f32 %v7160_v25, 16.0  ;;  %v7125_v28 = vadd.f32 0.0036580483, %v7124_v53 }
 0xf17   : > { %v7137_v30 = vmul.f32 %v7136_v2, %v7121_v7  ;;  %v7162_v43 = vmul.f32 2.1237322e-06, %v7161_v15  ;;  %v7173_v19 = vmul.f32 3.8918573e-05, %v7161_v15  ;;  %v7126_v33 = vmul.f32 %v7125_v28, %v7121_v7 }
 0xf19   : > { %v7138_v39 = vadd.f32 0.112945676, %v7137_v30  ;;  %v7163_v44 = vadd.f32 0.00028619796, %v7162_v43  ;;  %v7174_v18 = vadd.f32 0.001143296, %v7173_v19 }
 0xf1a   : > { %v7127_v48 = vadd.f32 0.05243302, %v7126_v33 }
 0xf1b   : > { %v7139_v10 = vmul.f32 %v7138_v39, %v7121_v7  ;;  %v7164_v23 = vmul.f32 %v7163_v44, %v7161_v15  ;;  %v7175_v26 = vmul.f32 %v7174_v18, %v7161_v15 }
 0xf1c   : > { %v7128_v40 = vmul.f32 %v7127_v48, %v7121_v7 }
 0xf1d   : > { %v7140_v52 = vadd.f32 0.4994258, %v7139_v10  ;;  %v7165_v4 = vadd.f32 0.0036580483, %v7164_v23  ;;  %v7176_v32 = vadd.f32 0.014752088, %v7175_v26 }
 0xf1e   : > { %v7129_v9 = vadd.f32 0.18741608, %v7128_v40  ;;  %v14244_v23 = vld [vmem:[#allocation97_spill] sm:$0xff] }
 0xf1f   : > { %v7141_v17 = vmul.f32 %v7140_v52, %v7121_v7  ;;  %v7177_v24 = vmul.f32 %v7176_v32, %v7161_v15  ;;  %v7166_v42 = vmul.f32 %v7165_v4, %v7161_v15  ;;  %v5886_v32 = vmul.f32 0.5, %v13895_v57 }
 0xf20   : > { %v7130_v14 = vmul.f32 %v7129_v9, %v7121_v7 }
 0xf21   : > { %v7142_v45 = vadd.f32 1.0, %v7141_v17  ;;  %v7178_v61 = vadd.f32 0.112945676, %v7177_v24  ;;  %v7167_v1 = vadd.f32 0.05243302, %v7166_v42  ;;  %v5887_v17 = vmul.f32 0.5, %v13906_v55 }
 0xf22   : > { %v7131_v50 = vadd.f32 1.1283791, %v7130_v14 }
 0xf23   : > { %8803 = vrcp.f32 %v7142_v45  ;;  %v7179_v59 = vmul.f32 %v7178_v61, %v7161_v15  ;;  %v7168_v46 = vmul.f32 %v7167_v1, %v7161_v15  ;;  %v7154_v62 = vand.u32 2147483648, %v7142_v45 }
 0xf24   : > { %v7152_v22 = vand.u32 2147483647, %v7142_v45  ;;  %vm7148_vm7 = vweird.f32 %v7142_v45  ;;  %v7132_v5 = vmul.f32 %v7131_v50, %v13900_v13 }
 0xf25   : > { %v7180_v58 = vadd.f32 0.4994258, %v7179_v59  ;;  %v7169_v56 = vadd.f32 0.18741608, %v7168_v46  ;;  %v7155_v20 = vor.u32 1.1754944e-38, %v7154_v62 }
 0xf26   : > { %vm7153_vm8 = vcmp.eq.f32.partialorder %v7152_v22, 8.507059e+37 }
 0xf27   : > { %v7181_v49 = vmul.f32 %v7180_v58, %v7161_v15  ;;  %v7170_v8 = vmul.f32 %v7169_v56, %v7161_v15 }
 0xf29   : > { %v8804_v38 = vpop.eup %8803  ;;  %v7182_v60 = vadd.f32 1.0, %v7181_v49  ;;  %v7171_v7 = vadd.f32 1.1283791, %v7170_v8 }
 0xf2a   : > { %v7144_v41 = vmul.f32 %v8804_v38, %v7142_v45  ;;  %vm7149_vm6 = vweird.f32 %v8804_v38 }
 0xf2b   : > { %8805 = vrcp.f32 %v7182_v60  ;;  %vm7150_vm2 = vmor %vm7148_vm7, %vm7149_vm6  ;;  %v7194_v53 = vand.u32 2147483648, %v7182_v60  ;;  %v7192_v43 = vand.u32 2147483647, %v7182_v60  ;;  %vm7188_vm11 = vweird.f32 %v7182_v60 }
 0xf2c   : > { %v7145_v3 = vsub.f32 1.0, %v7144_v41  ;;  %v7172_v18 = vmul.f32 %v7171_v7, %v13909_v0 }
 0xf2d   : > { %v7195_v39 = vor.u32 1.1754944e-38, %v7194_v53  ;;  %vm7193_vm12 = vcmp.eq.f32.partialorder %v7192_v43, 8.507059e+37 }
 0xf2e   : > { %v7146_v35 = vmul.f32 %v8804_v38, %v7145_v3 }
 0xf30   : > { %v7147_v31 = vadd.f32 %v8804_v38, %v7146_v35 }
 0xf31   : > { %v8806_v11 = vpop.eup %8805 }
 0xf32   : > { %v7151_v12 = vsel %vm7150_vm2, %v8804_v38, %v7147_v31  ;;  %v7184_v34 = vmul.f32 %v8806_v11, %v7182_v60  ;;  %vm7189_vm9 = vweird.f32 %v8806_v11 }
 0xf33   : > { %v7156_v63 = vsel %vm7153_vm8, %v7155_v20, %v7151_v12  ;;  %vm7190_vm1 = vmor %vm7188_vm11, %vm7189_vm9 }
 0xf34   : > { %v7185_v25 = vsub.f32 1.0, %v7184_v34  ;;  %v7157_v2 = vmul.f32 %v7156_v63, %v7132_v5 }
 0xf36   : > { %v7186_v30 = vmul.f32 %v8806_v11, %v7185_v25  ;;  %v8125_v44 = vclamps-f32 %v7157_v2, 1.0 }
 0xf38   : > { %v7187_v19 = vadd.f32 %v8806_v11, %v7186_v30  ;;  %v7230_v52 = vadd.f32 1.0, %v8125_v44 }
 0xf39   : > { %v7412_v28 = vpop.f32.mrf.mxu1 }
 0xf3a   : > { %v7413_v15 = vadd.f32 %v13858_v37, %v7412_v28  ;;  %v7191_v10 = vsel %vm7190_vm1, %v8806_v11, %v7187_v19  ;;  %v7262_v45 = vmul.f32 %v7230_v52, %v5886_v32 }
 0xf3b   : > { %v7196_v13 = vsel %vm7193_vm12, %v7195_v39, %v7191_v10 }
 0xf3c   : > { %v7459_v26 = vadd.f32 %v7413_v15, %v14244_v23  ;;  %v7197_v33 = vmul.f32 %v7196_v13, %v7172_v18 }
 0xf3e   : > { %7491 = vst.msk [vmem:[%s13097_s16 + $0xb0] sm:$0xff] %vm1515_vm10, %v7459_v26  ;;  %v8126_v4 = vclamps-f32 %v7197_v33, 1.0 }
 0xf40   : > { %v7231_v24 = vadd.f32 1.0, %v8126_v4 }
 0xf41   : > { %v7414_v48 = vpop.f32.mrf.mxu1 }
 0xf42   : > { %v7415_v0 = vadd.f32 %v13858_v37, %v7414_v48  ;;  %v7263_v42 = vmul.f32 %v7231_v24, %v5887_v17 }
 0xf44   : > { %v7460_v61 = vadd.f32 %v7415_v0, %v12266_v36  ;;  %v7279_v59 = vpack.c.bf16 %v7263_v42, %v7262_v45 }
 0xf46   : > { %7492 = vst.msk [vmem:[%s13097_s16 + $0xb8] sm:$0xff] %vm1515_vm10, %v7460_v61  ;;  %8150 = vmatmul.msk.bf16.gmra.mxu3 %vm1403_vm0, %v7279_v59 }
 0xf49   : > { %v7417_v57 = vpop.f32.mrf.mxu1 }
 0xf4a   : > { %v7418_v55 = vadd.f32 %v13858_v37, %v7417_v57 }
 0xf4c   : > { %v7461_v40 = vadd.f32 %v7418_v55, %v12304_v6 }
 0xf4e   : > { %7493 = vst.msk [vmem:[%s13097_s16 + $0xc0] sm:$0xff] %vm1515_vm10, %v7461_v40 }
 0xf51   : > { %v7419_v1 = vpop.f32.mrf.mxu1 }
 0xf52   : > { %v7420_v58 = vadd.f32 %v13858_v37, %v7419_v1 }
 0xf54   : > { %v7462_v36 = vadd.f32 %v7420_v58, %v12336_v51 }
 0xf56   : > { %7494 = vst.msk [vmem:[%s13097_s16 + $0xc8] sm:$0xff] %vm1515_vm10, %v7462_v36 }
 0xf57   : > { %9453 = shalt.err (!%p9450_p7)
}
 0xf58   : > { %s9647_s2 = smov 128   ;;  %s14247_s13 = smov 8  }
 0xf59   : > { %8258 = dma.vmem_to_hbm [thread:$0]  (%p14246_p4), %s7522_s23, 256, %s7524_s17, %s7502_s5, %s9647_s2, %s9647_s2, %s14247_s13  }
 0xf5a   : > { %s14248_s8 = sld [smem:[#allocation72_spill]]  ;;  %s8181_s5 = sshll.u32 %s14131_s15, 8 }
 0xf5b   : > { %s7540_s9 = sshll.u32 %s13097_s16, 4  ;;  %s7507_s15 = scalar_lea.sflag [#allocation34], %s10132_s6  ;;  %s7541_s9 = int_to_ptr.vmem [resolvable:$true] %s7540_s9 }
 0xf60   : > { %s7539_s17 = scalar_lea.hbm %s14248_s8, %s8181_s5  ;;  %s9474_s5 = scalar_lea.hbm %s14248_s8, 512 }
 0xf61   : > { %s7542_s11 = sshll.u32 %s7539_s17, 4  ;;  %s7543_s11 = int_to_ptr.hbm [resolvable:$true] %s7542_s11 }
 0xf62   : > { %s9468_s22 = sshra.s32 %s7543_s11, 4  ;;  %s9469_s22 = int_to_ptr.hbm [resolvable:$true] %s9468_s22 }
 0xf63   : > { %s9470_s23 = scalar_lea.hbm %s9469_s22, 256  ;;  %p9475_p12 = scmp.lt.s32.totalorder %s9469_s22, %s14248_s8 }
 0xf64   : > { %p9471_p9 = scmp.ne.s32.totalorder %s9469_s22, %s9470_s23  ;;  %p9476_p2 = scmp.lt.s32.totalorder %s9474_s5, %s9470_s23 }
 0xf66   : > { %p9472_p11 = pnand %p9471_p9, %p14246_p4  ;;  %p9477_p3 = por %p9476_p2, %p9475_p12 }
 0xf68   : > { %v7422_v6 = vpop.f32.mrf.mxu1  ;;  %p9473_p6 = pneg %p9472_p11 }
 0xf69   : > { %v7423_v51 = vadd.f32 %v13858_v37, %v7422_v6 }
 0xf6a   : > { %p9478_p1 = pnand %p9477_p3, %p9473_p6 }
 0xf6b   : > { %v7463_v49 = vadd.f32 %v7423_v51, %v12370_v21 }
 0xf6d   : > { %7495 = vst.msk [vmem:[%s13097_s16 + $0xd0] sm:$0xff] %vm1515_vm10, %v7463_v49 }
 0xf70   : > { %v7424_v38 = vpop.f32.mrf.mxu1 }
 0xf71   : > { %v7425_v9 = vadd.f32 %v13858_v37, %v7424_v38 }
 0xf73   : > { %v7464_v41 = vadd.f32 %v7425_v9, %v14210_v47 }
 0xf75   : > { %7496 = vst.msk [vmem:[%s13097_s16 + $0xd8] sm:$0xff] %vm1515_vm10, %v7464_v41 }
 0xf8a   : > { %v7427_v46 = vpop.f32.mrf.mxu3 }
 0xf8b   : > { %v7428_v60 = vadd.f32 %v13858_v37, %v7427_v46 }
 0xf8d   : > { %v7465_v3 = vadd.f32 %v7428_v60, %v12394_v29 }
 0xf8f   : > { %7497 = vst.msk [vmem:[%s13097_s16 + $0xe0] sm:$0xff] %vm1515_vm10, %v7465_v3 }
 0xf92   : > { %v7429_v21 = vpop.f32.mrf.mxu3 }
 0xf93   : > { %v7430_v14 = vadd.f32 %v13858_v37, %v7429_v21 }
 0xf95   : > { %v7466_v35 = vadd.f32 %v7430_v14, %v12397_v27 }
 0xf97   : > { %7498 = vst.msk [vmem:[%s13097_s16 + $0xe8] sm:$0xff] %vm1515_vm10, %v7466_v35 }
 0xfc9   : > { %v7432_v47 = vpop.f32.mrf.mxu3 }
 0xfca   : > { %v7433_v62 = vadd.f32 %v13858_v37, %v7432_v47 }
 0xfcc   : > { %v7467_v56 = vadd.f32 %v7433_v62, %v12400_v54 }
 0xfce   : > { %7499 = vst.msk [vmem:[%s13097_s16 + $0xf0] sm:$0xff] %vm1515_vm10, %v7467_v56 }
 0xfd1   : > { %v7434_v29 = vpop.f32.mrf.mxu3 }
 0xfd2   : > { %v7435_v27 = vadd.f32 %v13858_v37, %v7434_v29 }
 0xfd4   : > { %v7468_v22 = vadd.f32 %v7435_v27, %v12969_v16 }
 0xfd6   : > { %7500 = vst.msk [vmem:[%s13097_s16 + $0xf8] sm:$0xff] %vm1515_vm10, %v7468_v22 }
 0xfd7   : > { %9481 = shalt.err (!%p9478_p1)
}
 0xfd8   : > { %8259 = dma.vmem_to_hbm [thread:$0]  (%p14246_p4), %s7541_s9, 4096, %s7543_s11, %s7507_s15, %s9647_s2, %s9647_s2, %s14247_s13  }
 0xfd9 PF: > { %s14249_s6 = sld [smem:[#allocation73_spill]]  ;;  %p14250_p10 = scmp.ne.s32.totalorder %s14127_s3, 0 }
 0xfda   : > { %p14251_p13 = scmp.ge.s32.totalorder %s9576_s10, 2 }
 0xfdc   : > { %p8322_p0 = pnand %p14251_p13, %p14250_p10 }
 0xfde   : > { %p8323_p5 = pneg %p8322_p0 }
 0xfdf   : > { %s7557_s16 = sand.u32 1, %s14249_s6  }
 0xfe0   : > { %s7558_s17 = scalar_lea.sflag [#allocation4], %s7557_s16 }
 0xfe1   : > { %9547 = dma.done.wait (%p8323_p5), %s7558_s17, 256  }
 0xfe2   : > { %9549 = vsyncadd (%p8323_p5), %s7558_s17, 4294967040  ;;  %s7568_s22 = scalar_lea.sflag [#allocation34], %s7557_s16 }
 0xfe3   : > { %9551 = dma.done.wait (%p8323_p5), %s7568_s22, 4096  }
 0xfe4   : > { %9553 = vsyncadd (%p8323_p5), %s7568_s22, 4294963200  ;;  %s94_s10 = sadd.s32 1, %s9576_s10   ;;  %s14252_s4 = smov %s14259_s28 }
 0xfe5   : > { %p91_p8 = scmp.ge.s32.totalorder %s94_s10, 4   ;;  %s14253_s28 = smov %s9560_s1 }
 0xfe6   : > { %s14254_s1 = smov %s9564_s0  ;;  %s14255_s0 = smov %s10107_s14 }
 0xfe7   : > { %s14256_s2 = smov %s9572_s7  ;;  %s14257_s7 = smov %s14252_s4 }
 0xfe8   :  { %93 = sbr.rel (!%p91_p8) target bundleno = 82 (0x52), region = 316 }
 0xfed   :  { %7574 = vsyncpa [#allocation3], 1 }
 0xfee   :  { %7576 = vsyncpa [#allocation3 + $0x1], 1 }
 0xfef   :  { %7577 = vsyncpa [#allocation6], 1 }
 0xff0   :  { %7578 = vsyncpa [#allocation9], 1 }
 0xff1   :  { %7579 = vsyncpa [#allocation12], 1 }
 0xff2   :  { %7580 = vsyncpa [#allocation15], 1 }
 0xff3   :  { %7581 = vsyncpa [#allocation18], 1 }
 0xff4   :  { %7582 = vsyncpa [#allocation21], 1 }
 0xff5   :  { %7583 = vsyncpa [#allocation24], 1 }
 0xff6   :  { %7584 = vsyncpa [#allocation27], 1 }
 0xff7   :  { %7585 = vsyncpa [#allocation30], 1 }
 0xff8   :  { %7586 = vsyncpa [#allocation4], 1 }
 0xff9   :  { %7588 = vsyncpa [#allocation4 + $0x1], 1 }
 0xffa   :  { %7589 = vsyncpa [#allocation34], 1 }
 0xffb   :  { %7591 = vsyncpa [#allocation34 + $0x1], 1 }

</bundles_post_ra>
